<compile_context>
chip_gen: v5e
topology: v5e:2x2
jax: 0.10.0
libtpu: 0.0.40
codegen_flags: <defaults>
</compile_context>

<pallas_src>
import functools

import jax
import jax.numpy as jnp
from jax import lax
from jax.experimental import pallas as pl
from jax.experimental.pallas import tpu as pltpu

C = 64            # hidden channel width
CIN_PAD = 8       # real in/out channels (2) padded to one sublane group only
ACT_DTYPE = jnp.bfloat16


def _round_up(x, m):
    return ((x + m - 1) // m) * m


# ---------------------------------------------------------------------------
# Fused kernel: one grid step = the whole network for one image.
# ---------------------------------------------------------------------------
def _fused_denoiser_kernel(x_ref, mask_ref, wf_ref, bf_ref, wm_ref, bm_ref,
                           wl_ref, bl_ref, o_ref, act0_ref, act1_ref,
                           *, H, W, G, n_blocks):
    # x_ref:    (1, 8, Lt)        f32   padded+flattened+guard-banded input
    # mask_ref: (1, Lp)           f32   1.0 on real pixels, 0.0 on padding ring
    # wf_ref:   (9, 64, 8)        bf16  first conv, per-tap (Cout, Cin)
    # bf_ref:   (64, 1)           f32
    # wm_ref:   (n_mid*9, 64, 64) bf16  middle convs (ScaleLayer pre-folded)
    # bm_ref:   (n_mid, 64, 1)    f32
    # wl_ref:   (9, 8, 64)        bf16  last conv (Cout padded 2->8)
    # bl_ref:   (8, 1)            f32
    # o_ref:    (1, 2, Lp)        f32   conv output + identity (padding ring is
    #                                   junk; sliced away by the wrapper)
    # act0/1:   (64, Lt)          bf16  ping-pong activations (flat padded)
    Wp = W + 2
    Lp = (H + 2) * Wp
    Lt = act0_ref.shape[1]
    tail = ((G + Lp) // 128) * 128          # aligned start of the right guard

    # Guard bands are read (as halo zeros) but never written -> zero them once
    # per image with aligned, lane-dense stores.  The interior [G, G+Lp) is
    # fully rewritten by every layer, so no full-buffer zeroing is needed.
    act0_ref[:, :G] = jnp.zeros((C, G), ACT_DTYPE)
    act1_ref[:, :G] = jnp.zeros((C, G), ACT_DTYPE)
    act0_ref[:, tail:] = jnp.zeros((C, Lt - tail), ACT_DTYPE)
    act1_ref[:, tail:] = jnp.zeros((C, Lt - tail), ACT_DTYPE)

    mask = mask_ref[...]                    # (1, Lp) f32, hoisted once
    offs = tuple(dy * Wp + dx for dy in (-1, 0, 1) for dx in (-1, 0, 1))

    def conv(tap, wtap, bias, relu, masked):
        # tap(t) -> (Cin, Lp) bf16 view ; wtap(t) -> (Cout, Cin) bf16
        acc = jnp.dot(wtap(0), tap(0), preferred_element_type=jnp.float32)
        for t in range(1, 9):
            acc = acc + jnp.dot(wtap(t), tap(t),
                                preferred_element_type=jnp.float32)
        acc = acc + bias                    # f32 epilogue
        if relu:
            acc = jnp.maximum(acc, 0.0)
        if masked:
            acc = acc * mask                # keep the padding ring at zero
        return acc

    def act_tap(src_ref):
        # Read shifted windows directly from the ref (small live ranges).
        return lambda t: src_ref[:, G + offs[t]:G + offs[t] + Lp]

    # ---- first conv: 2(->8 sublanes) -> 64, straight from the f32 x block ---
    def x_tap(t):
        s = G + offs[t]
        return x_ref[0, :, s:s + Lp].astype(ACT_DTYPE)

    h0 = conv(x_tap, lambda t: wf_ref[t], bf_ref[...], relu=False, masked=True)
    act0_ref[:, G:G + Lp] = h0.astype(ACT_DTYPE)

    # ---- residual blocks: Conv64 -> ReLU -> Conv64 (ScaleLayer folded) ------
    def block(b, carry):
        l1 = 2 * b                           # first conv of the block (ReLU)
        l2 = 2 * b + 1                       # second conv (scale folded)
        h1 = conv(act_tap(act0_ref), lambda t: wm_ref[l1 * 9 + t], bm_ref[l1],
                  relu=True, masked=True)
        act1_ref[:, G:G + Lp] = h1.astype(ACT_DTYPE)
        h2 = conv(act_tap(act1_ref), lambda t: wm_ref[l2 * 9 + t], bm_ref[l2],
                  relu=False, masked=True)
        act0_ref[:, G:G + Lp] = h2.astype(ACT_DTYPE)
        return carry

    lax.fori_loop(0, n_blocks, block, 0)

    # ---- last conv: 64 -> 2 (padded to 8) fused with the outer identity add -
    hl = conv(act_tap(act0_ref), lambda t: wl_ref[t], bl_ref[...],
              relu=False, masked=False)
    o_ref[0] = hl[:2] + x_ref[0, :2, G:G + Lp]


# ---------------------------------------------------------------------------
# Parameter packing (per-tap transposed weights, ScaleLayer folded in).
# ---------------------------------------------------------------------------
def _pack_params(params, n_layers, scale_value, dtype=ACT_DTYPE):
    n_convs = 2 + 2 * (n_layers - 2)
    assert len(params) == n_convs

    def taps(w):                             # HWIO (3,3,Cin,Cout) -> (9,Cout,Cin)
        cin, cout = w.shape[2], w.shape[3]
        return jnp.transpose(w, (0, 1, 3, 2)).reshape(9, cout, cin)

    w0, b0 = params[0]                       # (3,3,2,64), (64,)
    w_first = (jnp.zeros((9, C, CIN_PAD), jnp.float32)
               .at[:, :, :w0.shape[2]].set(taps(w0)).astype(dtype))
    b_first = b0.reshape(C, 1).astype(jnp.float32)

    n_mid = n_convs - 2
    wm, bm = [], []
    for m in range(n_mid):
        w, b = params[1 + m]
        wt, bt = taps(w), b.astype(jnp.float32)
        if m % 2 == 1:                       # 2nd conv of a block: fold ScaleLayer
            wt, bt = wt * scale_value, bt * scale_value
        wm.append(wt)
        bm.append(bt.reshape(C, 1))
    if n_mid:
        w_mid = jnp.concatenate(wm, axis=0).astype(dtype)      # (n_mid*9,64,64)
        b_mid = jnp.stack(bm)                                   # (n_mid,64,1)
    else:                                    # n_layers == 2: dummies (never read)
        w_mid = jnp.zeros((9, C, C), dtype)
        b_mid = jnp.zeros((1, C, 1), jnp.float32)

    wl, bl = params[-1]                      # (3,3,64,2), (2,)
    w_last = (jnp.zeros((9, CIN_PAD, C), jnp.float32)
              .at[:, :wl.shape[3], :].set(taps(wl)).astype(dtype))
    b_last = jnp.zeros((CIN_PAD, 1), jnp.float32).at[:bl.shape[0], 0].set(bl)
    return w_first, b_first, w_mid, b_mid, w_last, b_last


def _vmem_limit_bytes():
    # Explicit scoped-VMEM budget (defaults: 16 MiB v5e, 32 MiB v6e/v7x).
    try:
        cap = int(pltpu.get_tpu_info().vmem_capacity_bytes)
    except Exception:
        cap = 64 * 1024 * 1024
    return int(min(cap * 3 // 4, 100 * 1024 * 1024))


# ---------------------------------------------------------------------------
# Wrapper: layout prep + pallas_call.
# ---------------------------------------------------------------------------
def resnet_denoiser_forward(x_nchw, params, *, n_layers, scale_value=0.1):
    N, cin, H, W = x_nchw.shape
    assert cin == 2 and n_layers >= 2
    Hp, Wp = H + 2, W + 2
    Lp = Hp * Wp
    G = _round_up(Wp + 1, 128)               # guard band >= largest tap shift
    Lt = _round_up(2 * G + Lp, 128)
    n_blocks = n_layers - 2
    # TODO(synk): for very large images (whole-image activations approaching the
    # VMEM budget, especially v7x's 64 MiB) tile H into row strips with a 1-row
    # halo and expose the strip index as an extra "parallel" grid axis; batch
    # blocking (>1 image per step) would further amortize overhead at tiny H*W.

    w_first, b_first, w_mid, b_mid, w_last, b_last = _pack_params(
        params, n_layers, scale_value)

    # NCHW -> channel-pad 2->8, spatial zero-pad by 1, flatten, guard-pad flat.
    xp = jnp.pad(x_nchw.astype(jnp.float32),
                 ((0, 0), (0, CIN_PAD - cin), (1, 1), (1, 1)))
    xp = jnp.pad(xp.reshape(N, CIN_PAD, Lp), ((0, 0), (0, 0), (G, Lt - G - Lp)))

    # Interior mask: 1.0 on real pixels, 0.0 on the 1-pixel padding ring.
    mask = jnp.zeros((Hp, Wp), jnp.float32).at[1:H + 1, 1:W + 1].set(1.0)
    mask = mask.reshape(1, Lp)

    kernel = functools.partial(_fused_denoiser_kernel, H=H, W=W, G=G,
                               n_blocks=n_blocks)
    full = lambda shape: pl.BlockSpec(shape, lambda n, _s=shape: (0,) * len(_s))

    out = pl.pallas_call(
        kernel,
        out_shape=jax.ShapeDtypeStruct((N, 2, Lp), jnp.float32),
        grid=(N,),
        in_specs=[
            pl.BlockSpec((1, CIN_PAD, Lt), lambda n: (n, 0, 0)),   # x (per image)
            full(mask.shape),                                       # interior mask
            full(w_first.shape), full(b_first.shape),               # resident params
            full(w_mid.shape), full(b_mid.shape),
            full(w_last.shape), full(b_last.shape),
        ],
        out_specs=pl.BlockSpec((1, 2, Lp), lambda n: (n, 0, 0)),
        scratch_shapes=[
            pltpu.VMEM((C, Lt), ACT_DTYPE),     # ping activation (flat, padded)
            pltpu.VMEM((C, Lt), ACT_DTYPE),     # pong activation
        ],
        compiler_params=pltpu.CompilerParams(
            dimension_semantics=("parallel",),
            vmem_limit_bytes=_vmem_limit_bytes()),
    )(xp, mask, w_first, b_first, w_mid, b_mid, w_last, b_last)

    out = out.reshape(N, 2, Hp, Wp)[:, :, 1:H + 1, 1:W + 1]
    return out                                  # NCHW (N, 2, H, W) f32


# ---------------------------------------------------------------------------
# Parameter init (deterministic, synthetic) and pure-JAX f32 reference.
# ---------------------------------------------------------------------------
def init_params(key, n_layers):
    """Weights in HWIO layout: (3,3,Cin,Cout); bias (Cout,)."""
    def conv_init(k, cin, cout):
        kw, kb = jax.random.split(k)
        w = jax.random.normal(kw, (3, 3, cin, cout), jnp.float32) * 0.05
        b = jax.random.normal(kb, (cout,), jnp.float32) * 0.01
        return w, b

    n_blocks = n_layers - 2
    keys = jax.random.split(key, 2 + 2 * n_blocks)
    params = [conv_init(keys[0], 2, 64)]
    for i in range(n_blocks):
        params.append(conv_init(keys[1 + 2 * i], 64, 64))
        params.append(conv_init(keys[2 + 2 * i], 64, 64))
    params.append(conv_init(keys[-1], 64, 2))
    return params


def _ref_conv(x, w, b):
    y = jax.lax.conv_general_dilated(
        x, w, window_strides=(1, 1), padding="SAME",
        dimension_numbers=("NHWC", "HWIO", "NHWC"))
    return y + b


def reference_forward(x_nchw, params, *, n_layers, scale_value=0.1):
    x = jnp.transpose(x_nchw, (0, 2, 3, 1))
    idt = x
    w, b = params[0]
    h = _ref_conv(x, w, b)
    p = 1
    for _ in range(n_layers - 2):
        w, b = params[p]; p += 1
        h = jnp.maximum(_ref_conv(h, w, b), 0.0)
        w, b = params[p]; p += 1
        h = _ref_conv(h, w, b) * scale_value
    w, b = params[p]
    out = _ref_conv(h, w, b) + idt
    return jnp.transpose(out, (0, 3, 1, 2))


if __name__ == "__main__":
    n_layers = 4                        # first conv + 2 residual blocks + last conv
    N, C_in, H, W = 2, 2, 16, 16        # PyTorch NCHW input shape

    key = jax.random.PRNGKey(0)
    kx, kp = jax.random.split(key)
    x = jax.random.normal(kx, (N, C_in, H, W), jnp.float32)
    params = init_params(kp, n_layers)
    scale_value = 0.1                   # ScaleLayer init value

    fwd = jax.jit(functools.partial(resnet_denoiser_forward,
                                    n_layers=n_layers, scale_value=scale_value))
    out = jax.block_until_ready(fwd(x, params))
    assert out.shape == (N, C_in, H, W) and out.dtype == jnp.float32

    ref = reference_forward(x, params, n_layers=n_layers,
                            scale_value=scale_value)
    # bf16 MXU inputs / inter-layer activations vs a pure-f32 XLA reference
    # -> relaxed tolerance (validated at this depth; re-validate for deep nets).
    assert jnp.allclose(out, ref, atol=2e-2, rtol=2e-2), (
        float(jnp.max(jnp.abs(out - ref))))

    print("KERNEL_OK")
</pallas_src>

<mosaic_0001>
module attributes {stable_mosaic.version = 11 : i64} {
  func.func @_fused_denoiser_kernel(%arg0: i32, %arg1: memref<1x8x640xf32, #tpu.memory_space<vmem>>, %arg2: memref<1x324xf32, #tpu.memory_space<vmem>>, %arg3: memref<9x64x8xbf16, #tpu.memory_space<vmem>>, %arg4: memref<64x1xf32, #tpu.memory_space<vmem>>, %arg5: memref<36x64x64xbf16, #tpu.memory_space<vmem>>, %arg6: memref<4x64x1xf32, #tpu.memory_space<vmem>>, %arg7: memref<9x8x64xbf16, #tpu.memory_space<vmem>>, %arg8: memref<8x1xf32, #tpu.memory_space<vmem>>, %arg9: memref<1x2x324xf32, #tpu.memory_space<vmem>>, %arg10: memref<64x640xbf16, #tpu.memory_space<vmem>>, %arg11: memref<64x640xbf16, #tpu.memory_space<vmem>>) attributes {dimension_semantics = [#tpu.dimension_semantics<parallel>], iteration_bounds = array<i64: 2>, scalar_prefetch = 0 : i64, scratch_operands = 2 : i64, tpu.core_type = #tpu.core_type<tc>, window_params = [{transform_indices = @transform_0, window_bounds = array<i64: 1, 8, 640>}, {pipeline_mode = #tpu.pipeline_mode<synchronous>, transform_indices = @transform_1, window_bounds = array<i64: 1, 324>}, {pipeline_mode = #tpu.pipeline_mode<synchronous>, transform_indices = @transform_2, window_bounds = array<i64: 9, 64, 8>}, {pipeline_mode = #tpu.pipeline_mode<synchronous>, transform_indices = @transform_3, window_bounds = array<i64: 64, 1>}, {pipeline_mode = #tpu.pipeline_mode<synchronous>, transform_indices = @transform_4, window_bounds = array<i64: 36, 64, 64>}, {pipeline_mode = #tpu.pipeline_mode<synchronous>, transform_indices = @transform_5, window_bounds = array<i64: 4, 64, 1>}, {pipeline_mode = #tpu.pipeline_mode<synchronous>, transform_indices = @transform_6, window_bounds = array<i64: 9, 8, 64>}, {pipeline_mode = #tpu.pipeline_mode<synchronous>, transform_indices = @transform_7, window_bounds = array<i64: 8, 1>}, {transform_indices = @transform_8, window_bounds = array<i64: 1, 2, 324>}]} {
    %cst = arith.constant 0.000000e+00 : bf16
    %0 = vector.broadcast %cst : bf16 to vector<64x128xbf16>
    %c0 = arith.constant 0 : index
    %c0_0 = arith.constant 0 : index
    %1 = vector.load %arg10[%c0, %c0_0] : memref<64x640xbf16, #tpu.memory_space<vmem>>, vector<64x128xbf16>
    tpu.vector_store %arg10[%c0, %c0_0], %0 {strides = array<i32>} : memref<64x640xbf16, #tpu.memory_space<vmem>>, vector<64x128xbf16>,
    %cst_1 = arith.constant 0.000000e+00 : bf16
    %2 = vector.broadcast %cst_1 : bf16 to vector<64x128xbf16>
    %c0_2 = arith.constant 0 : index
    %c0_3 = arith.constant 0 : index
    %3 = vector.load %arg11[%c0_2, %c0_3] : memref<64x640xbf16, #tpu.memory_space<vmem>>, vector<64x128xbf16>
    tpu.vector_store %arg11[%c0_2, %c0_3], %2 {strides = array<i32>} : memref<64x640xbf16, #tpu.memory_space<vmem>>, vector<64x128xbf16>,
    %cst_4 = arith.constant 0.000000e+00 : bf16
    %4 = vector.broadcast %cst_4 : bf16 to vector<64x256xbf16>
    %c0_5 = arith.constant 0 : index
    %c384 = arith.constant 384 : index
    %5 = vector.load %arg10[%c0_5, %c384] : memref<64x640xbf16, #tpu.memory_space<vmem>>, vector<64x256xbf16>
    tpu.vector_store %arg10[%c0_5, %c384], %4 {strides = array<i32>} : memref<64x640xbf16, #tpu.memory_space<vmem>>, vector<64x256xbf16>,
    %cst_6 = arith.constant 0.000000e+00 : bf16
    %6 = vector.broadcast %cst_6 : bf16 to vector<64x256xbf16>
    %c0_7 = arith.constant 0 : index
    %c384_8 = arith.constant 384 : index
    %7 = vector.load %arg11[%c0_7, %c384_8] : memref<64x640xbf16, #tpu.memory_space<vmem>>, vector<64x256xbf16>
    tpu.vector_store %arg11[%c0_7, %c384_8], %6 {strides = array<i32>} : memref<64x640xbf16, #tpu.memory_space<vmem>>, vector<64x256xbf16>,
    %c0_9 = arith.constant 0 : index
    %c0_10 = arith.constant 0 : index
    %8 = vector.load %arg2[%c0_9, %c0_10] : memref<1x324xf32, #tpu.memory_space<vmem>>, vector<1x324xf32>
    %c0_11 = arith.constant 0 : index
    %c0_12 = arith.constant 0 : index
    %9 = vector.load %arg4[%c0_11, %c0_12] : memref<64x1xf32, #tpu.memory_space<vmem>>, vector<64x1xf32>
    %c0_13 = arith.constant 0 : index
    %c0_14 = arith.constant 0 : index
    %c0_15 = arith.constant 0 : index
    %10 = vector.load %arg3[%c0_13, %c0_14, %c0_15] : memref<9x64x8xbf16, #tpu.memory_space<vmem>>, vector<1x64x8xbf16>
    %11 = vector.shape_cast %10 : vector<1x64x8xbf16> to vector<64x8xbf16>
    %c0_16 = arith.constant 0 : index
    %c0_17 = arith.constant 0 : index
    %c109 = arith.constant 109 : index
    %12 = vector.load %arg1[%c0_16, %c0_17, %c109] : memref<1x8x640xf32, #tpu.memory_space<vmem>>, vector<1x8x324xf32>
    %13 = vector.shape_cast %12 : vector<1x8x324xf32> to vector<8x324xf32>
    %14 = arith.truncf %13 : vector<8x324xf32> to vector<8x324xbf16>
    %cst_18 = arith.constant dense<0.000000e+00> : vector<64x324xf32>
    %15 = tpu.matmul %11, %14, %cst_18 {dimension_numbers = #tpu.dot_dimension_numbers<[1], [0], [0], [1], [0, 0, 1, 1], [], []>} : vector<64x8xbf16>, vector<8x324xbf16>, vector<64x324xf32> -> vector<64x324xf32>
    %c1 = arith.constant 1 : index
    %c0_19 = arith.constant 0 : index
    %c0_20 = arith.constant 0 : index
    %16 = vector.load %arg3[%c1, %c0_19, %c0_20] : memref<9x64x8xbf16, #tpu.memory_space<vmem>>, vector<1x64x8xbf16>
    %17 = vector.shape_cast %16 : vector<1x64x8xbf16> to vector<64x8xbf16>
    %c0_21 = arith.constant 0 : index
    %c0_22 = arith.constant 0 : index
    %c110 = arith.constant 110 : index
    %18 = vector.load %arg1[%c0_21, %c0_22, %c110] : memref<1x8x640xf32, #tpu.memory_space<vmem>>, vector<1x8x324xf32>
    %19 = vector.shape_cast %18 : vector<1x8x324xf32> to vector<8x324xf32>
    %20 = arith.truncf %19 : vector<8x324xf32> to vector<8x324xbf16>
    %cst_23 = arith.constant dense<0.000000e+00> : vector<64x324xf32>
    %21 = tpu.matmul %17, %20, %cst_23 {dimension_numbers = #tpu.dot_dimension_numbers<[1], [0], [0], [1], [0, 0, 1, 1], [], []>} : vector<64x8xbf16>, vector<8x324xbf16>, vector<64x324xf32> -> vector<64x324xf32>
    %22 = arith.addf %15, %21 : vector<64x324xf32>
    %c2 = arith.constant 2 : index
    %c0_24 = arith.constant 0 : index
    %c0_25 = arith.constant 0 : index
    %23 = vector.load %arg3[%c2, %c0_24, %c0_25] : memref<9x64x8xbf16, #tpu.memory_space<vmem>>, vector<1x64x8xbf16>
    %24 = vector.shape_cast %23 : vector<1x64x8xbf16> to vector<64x8xbf16>
    %c0_26 = arith.constant 0 : index
    %c0_27 = arith.constant 0 : index
    %c111 = arith.constant 111 : index
    %25 = vector.load %arg1[%c0_26, %c0_27, %c111] : memref<1x8x640xf32, #tpu.memory_space<vmem>>, vector<1x8x324xf32>
    %26 = vector.shape_cast %25 : vector<1x8x324xf32> to vector<8x324xf32>
    %27 = arith.truncf %26 : vector<8x324xf32> to vector<8x324xbf16>
    %cst_28 = arith.constant dense<0.000000e+00> : vector<64x324xf32>
    %28 = tpu.matmul %24, %27, %cst_28 {dimension_numbers = #tpu.dot_dimension_numbers<[1], [0], [0], [1], [0, 0, 1, 1], [], []>} : vector<64x8xbf16>, vector<8x324xbf16>, vector<64x324xf32> -> vector<64x324xf32>
    %29 = arith.addf %22, %28 : vector<64x324xf32>
    %c3 = arith.constant 3 : index
    %c0_29 = arith.constant 0 : index
    %c0_30 = arith.constant 0 : index
    %30 = vector.load %arg3[%c3, %c0_29, %c0_30] : memref<9x64x8xbf16, #tpu.memory_space<vmem>>, vector<1x64x8xbf16>
    %31 = vector.shape_cast %30 : vector<1x64x8xbf16> to vector<64x8xbf16>
    %c0_31 = arith.constant 0 : index
    %c0_32 = arith.constant 0 : index
    %c127 = arith.constant 127 : index
    %32 = vector.load %arg1[%c0_31, %c0_32, %c127] : memref<1x8x640xf32, #tpu.memory_space<vmem>>, vector<1x8x324xf32>
    %33 = vector.shape_cast %32 : vector<1x8x324xf32> to vector<8x324xf32>
    %34 = arith.truncf %33 : vector<8x324xf32> to vector<8x324xbf16>
    %cst_33 = arith.constant dense<0.000000e+00> : vector<64x324xf32>
    %35 = tpu.matmul %31, %34, %cst_33 {dimension_numbers = #tpu.dot_dimension_numbers<[1], [0], [0], [1], [0, 0, 1, 1], [], []>} : vector<64x8xbf16>, vector<8x324xbf16>, vector<64x324xf32> -> vector<64x324xf32>
    %36 = arith.addf %29, %35 : vector<64x324xf32>
    %c4 = arith.constant 4 : index
    %c0_34 = arith.constant 0 : index
    %c0_35 = arith.constant 0 : index
    %37 = vector.load %arg3[%c4, %c0_34, %c0_35] : memref<9x64x8xbf16, #tpu.memory_space<vmem>>, vector<1x64x8xbf16>
    %38 = vector.shape_cast %37 : vector<1x64x8xbf16> to vector<64x8xbf16>
    %c0_36 = arith.constant 0 : index
    %c0_37 = arith.constant 0 : index
    %c128 = arith.constant 128 : index
    %39 = vector.load %arg1[%c0_36, %c0_37, %c128] : memref<1x8x640xf32, #tpu.memory_space<vmem>>, vector<1x8x324xf32>
    %40 = vector.shape_cast %39 : vector<1x8x324xf32> to vector<8x324xf32>
    %41 = arith.truncf %40 : vector<8x324xf32> to vector<8x324xbf16>
    %cst_38 = arith.constant dense<0.000000e+00> : vector<64x324xf32>
    %42 = tpu.matmul %38, %41, %cst_38 {dimension_numbers = #tpu.dot_dimension_numbers<[1], [0], [0], [1], [0, 0, 1, 1], [], []>} : vector<64x8xbf16>, vector<8x324xbf16>, vector<64x324xf32> -> vector<64x324xf32>
    %43 = arith.addf %36, %42 : vector<64x324xf32>
    %c5 = arith.constant 5 : index
    %c0_39 = arith.constant 0 : index
    %c0_40 = arith.constant 0 : index
    %44 = vector.load %arg3[%c5, %c0_39, %c0_40] : memref<9x64x8xbf16, #tpu.memory_space<vmem>>, vector<1x64x8xbf16>
    %45 = vector.shape_cast %44 : vector<1x64x8xbf16> to vector<64x8xbf16>
    %c0_41 = arith.constant 0 : index
    %c0_42 = arith.constant 0 : index
    %c129 = arith.constant 129 : index
    %46 = vector.load %arg1[%c0_41, %c0_42, %c129] : memref<1x8x640xf32, #tpu.memory_space<vmem>>, vector<1x8x324xf32>
    %47 = vector.shape_cast %46 : vector<1x8x324xf32> to vector<8x324xf32>
    %48 = arith.truncf %47 : vector<8x324xf32> to vector<8x324xbf16>
    %cst_43 = arith.constant dense<0.000000e+00> : vector<64x324xf32>
    %49 = tpu.matmul %45, %48, %cst_43 {dimension_numbers = #tpu.dot_dimension_numbers<[1], [0], [0], [1], [0, 0, 1, 1], [], []>} : vector<64x8xbf16>, vector<8x324xbf16>, vector<64x324xf32> -> vector<64x324xf32>
    %50 = arith.addf %43, %49 : vector<64x324xf32>
    %c6 = arith.constant 6 : index
    %c0_44 = arith.constant 0 : index
    %c0_45 = arith.constant 0 : index
    %51 = vector.load %arg3[%c6, %c0_44, %c0_45] : memref<9x64x8xbf16, #tpu.memory_space<vmem>>, vector<1x64x8xbf16>
    %52 = vector.shape_cast %51 : vector<1x64x8xbf16> to vector<64x8xbf16>
    %c0_46 = arith.constant 0 : index
    %c0_47 = arith.constant 0 : index
    %c145 = arith.constant 145 : index
    %53 = vector.load %arg1[%c0_46, %c0_47, %c145] : memref<1x8x640xf32, #tpu.memory_space<vmem>>, vector<1x8x324xf32>
    %54 = vector.shape_cast %53 : vector<1x8x324xf32> to vector<8x324xf32>
    %55 = arith.truncf %54 : vector<8x324xf32> to vector<8x324xbf16>
    %cst_48 = arith.constant dense<0.000000e+00> : vector<64x324xf32>
    %56 = tpu.matmul %52, %55, %cst_48 {dimension_numbers = #tpu.dot_dimension_numbers<[1], [0], [0], [1], [0, 0, 1, 1], [], []>} : vector<64x8xbf16>, vector<8x324xbf16>, vector<64x324xf32> -> vector<64x324xf32>
    %57 = arith.addf %50, %56 : vector<64x324xf32>
    %c7 = arith.constant 7 : index
    %c0_49 = arith.constant 0 : index
    %c0_50 = arith.constant 0 : index
    %58 = vector.load %arg3[%c7, %c0_49, %c0_50] : memref<9x64x8xbf16, #tpu.memory_space<vmem>>, vector<1x64x8xbf16>
    %59 = vector.shape_cast %58 : vector<1x64x8xbf16> to vector<64x8xbf16>
    %c0_51 = arith.constant 0 : index
    %c0_52 = arith.constant 0 : index
    %c146 = arith.constant 146 : index
    %60 = vector.load %arg1[%c0_51, %c0_52, %c146] : memref<1x8x640xf32, #tpu.memory_space<vmem>>, vector<1x8x324xf32>
    %61 = vector.shape_cast %60 : vector<1x8x324xf32> to vector<8x324xf32>
    %62 = arith.truncf %61 : vector<8x324xf32> to vector<8x324xbf16>
    %cst_53 = arith.constant dense<0.000000e+00> : vector<64x324xf32>
    %63 = tpu.matmul %59, %62, %cst_53 {dimension_numbers = #tpu.dot_dimension_numbers<[1], [0], [0], [1], [0, 0, 1, 1], [], []>} : vector<64x8xbf16>, vector<8x324xbf16>, vector<64x324xf32> -> vector<64x324xf32>
    %64 = arith.addf %57, %63 : vector<64x324xf32>
    %c8 = arith.constant 8 : index
    %c0_54 = arith.constant 0 : index
    %c0_55 = arith.constant 0 : index
    %65 = vector.load %arg3[%c8, %c0_54, %c0_55] : memref<9x64x8xbf16, #tpu.memory_space<vmem>>, vector<1x64x8xbf16>
    %66 = vector.shape_cast %65 : vector<1x64x8xbf16> to vector<64x8xbf16>
    %c0_56 = arith.constant 0 : index
    %c0_57 = arith.constant 0 : index
    %c147 = arith.constant 147 : index
    %67 = vector.load %arg1[%c0_56, %c0_57, %c147] : memref<1x8x640xf32, #tpu.memory_space<vmem>>, vector<1x8x324xf32>
    %68 = vector.shape_cast %67 : vector<1x8x324xf32> to vector<8x324xf32>
    %69 = arith.truncf %68 : vector<8x324xf32> to vector<8x324xbf16>
    %cst_58 = arith.constant dense<0.000000e+00> : vector<64x324xf32>
    %70 = tpu.matmul %66, %69, %cst_58 {dimension_numbers = #tpu.dot_dimension_numbers<[1], [0], [0], [1], [0, 0, 1, 1], [], []>} : vector<64x8xbf16>, vector<8x324xbf16>, vector<64x324xf32> -> vector<64x324xf32>
    %71 = arith.addf %64, %70 : vector<64x324xf32>
    %72 = vector.broadcast %9 : vector<64x1xf32> to vector<64x324xf32>
    %73 = arith.addf %71, %72 : vector<64x324xf32>
    %74 = vector.broadcast %8 : vector<1x324xf32> to vector<64x324xf32>
    %75 = arith.mulf %73, %74 : vector<64x324xf32>
    %76 = arith.truncf %75 : vector<64x324xf32> to vector<64x324xbf16>
    %c0_59 = arith.constant 0 : index
    %c128_60 = arith.constant 128 : index
    %77 = vector.load %arg10[%c0_59, %c128_60] : memref<64x640xbf16, #tpu.memory_space<vmem>>, vector<64x324xbf16>
    tpu.vector_store %arg10[%c0_59, %c128_60], %76 {strides = array<i32>} : memref<64x640xbf16, #tpu.memory_space<vmem>>, vector<64x324xbf16>,
    %c0_i32 = arith.constant 0 : i32
    %c2_i32 = arith.constant 2 : i32
    %78 = arith.addi %c0_i32, %c2_i32 : i32
    %c1_i32 = arith.constant 1 : i32
    scf.for %arg12 = %c0_i32 to %78 step %c1_i32  : i32 {
      %c2_i32_124 = arith.constant 2 : i32
      %133 = arith.muli %c2_i32_124, %arg12 : i32
      %c2_i32_125 = arith.constant 2 : i32
      %134 = arith.muli %c2_i32_125, %arg12 : i32
      %c1_i32_126 = arith.constant 1 : i32
      %135 = arith.addi %134, %c1_i32_126 : i32
      %136 = arith.index_cast %133 : i32 to index
      %c0_127 = arith.constant 0 : index
      %c0_128 = arith.constant 0 : index
      %137 = vector.load %arg6[%136, %c0_127, %c0_128] : memref<4x64x1xf32, #tpu.memory_space<vmem>>, vector<1x64x1xf32>
      %138 = vector.shape_cast %137 : vector<1x64x1xf32> to vector<64x1xf32>
      %c9_i32 = arith.constant 9 : i32
      %139 = arith.muli %133, %c9_i32 : i32
      %c0_i32_129 = arith.constant 0 : i32
      %140 = arith.addi %139, %c0_i32_129 : i32
      %141 = arith.index_cast %140 : i32 to index
      %c0_130 = arith.constant 0 : index
      %c0_131 = arith.constant 0 : index
      %142 = vector.load %arg5[%141, %c0_130, %c0_131] : memref<36x64x64xbf16, #tpu.memory_space<vmem>>, vector<1x64x64xbf16>
      %143 = vector.shape_cast %142 : vector<1x64x64xbf16> to vector<64x64xbf16>
      %c0_132 = arith.constant 0 : index
      %c109_133 = arith.constant 109 : index
      %144 = vector.load %arg10[%c0_132, %c109_133] : memref<64x640xbf16, #tpu.memory_space<vmem>>, vector<64x324xbf16>
      %cst_134 = arith.constant dense<0.000000e+00> : vector<64x324xf32>
      %145 = tpu.matmul %143, %144, %cst_134 {dimension_numbers = #tpu.dot_dimension_numbers<[1], [0], [0], [1], [0, 0, 1, 1], [], []>} : vector<64x64xbf16>, vector<64x324xbf16>, vector<64x324xf32> -> vector<64x324xf32>
      %c9_i32_135 = arith.constant 9 : i32
      %146 = arith.muli %133, %c9_i32_135 : i32
      %c1_i32_136 = arith.constant 1 : i32
      %147 = arith.addi %146, %c1_i32_136 : i32
      %148 = arith.index_cast %147 : i32 to index
      %c0_137 = arith.constant 0 : index
      %c0_138 = arith.constant 0 : index
      %149 = vector.load %arg5[%148, %c0_137, %c0_138] : memref<36x64x64xbf16, #tpu.memory_space<vmem>>, vector<1x64x64xbf16>
      %150 = vector.shape_cast %149 : vector<1x64x64xbf16> to vector<64x64xbf16>
      %c0_139 = arith.constant 0 : index
      %c110_140 = arith.constant 110 : index
      %151 = vector.load %arg10[%c0_139, %c110_140] : memref<64x640xbf16, #tpu.memory_space<vmem>>, vector<64x324xbf16>
      %cst_141 = arith.constant dense<0.000000e+00> : vector<64x324xf32>
      %152 = tpu.matmul %150, %151, %cst_141 {dimension_numbers = #tpu.dot_dimension_numbers<[1], [0], [0], [1], [0, 0, 1, 1], [], []>} : vector<64x64xbf16>, vector<64x324xbf16>, vector<64x324xf32> -> vector<64x324xf32>
      %153 = arith.addf %145, %152 : vector<64x324xf32>
      %c9_i32_142 = arith.constant 9 : i32
      %154 = arith.muli %133, %c9_i32_142 : i32
      %c2_i32_143 = arith.constant 2 : i32
      %155 = arith.addi %154, %c2_i32_143 : i32
      %156 = arith.index_cast %155 : i32 to index
      %c0_144 = arith.constant 0 : index
      %c0_145 = arith.constant 0 : index
      %157 = vector.load %arg5[%156, %c0_144, %c0_145] : memref<36x64x64xbf16, #tpu.memory_space<vmem>>, vector<1x64x64xbf16>
      %158 = vector.shape_cast %157 : vector<1x64x64xbf16> to vector<64x64xbf16>
      %c0_146 = arith.constant 0 : index
      %c111_147 = arith.constant 111 : index
      %159 = vector.load %arg10[%c0_146, %c111_147] : memref<64x640xbf16, #tpu.memory_space<vmem>>, vector<64x324xbf16>
      %cst_148 = arith.constant dense<0.000000e+00> : vector<64x324xf32>
      %160 = tpu.matmul %158, %159, %cst_148 {dimension_numbers = #tpu.dot_dimension_numbers<[1], [0], [0], [1], [0, 0, 1, 1], [], []>} : vector<64x64xbf16>, vector<64x324xbf16>, vector<64x324xf32> -> vector<64x324xf32>
      %161 = arith.addf %153, %160 : vector<64x324xf32>
      %c9_i32_149 = arith.constant 9 : i32
      %162 = arith.muli %133, %c9_i32_149 : i32
      %c3_i32 = arith.constant 3 : i32
      %163 = arith.addi %162, %c3_i32 : i32
      %164 = arith.index_cast %163 : i32 to index
      %c0_150 = arith.constant 0 : index
      %c0_151 = arith.constant 0 : index
      %165 = vector.load %arg5[%164, %c0_150, %c0_151] : memref<36x64x64xbf16, #tpu.memory_space<vmem>>, vector<1x64x64xbf16>
      %166 = vector.shape_cast %165 : vector<1x64x64xbf16> to vector<64x64xbf16>
      %c0_152 = arith.constant 0 : index
      %c127_153 = arith.constant 127 : index
      %167 = vector.load %arg10[%c0_152, %c127_153] : memref<64x640xbf16, #tpu.memory_space<vmem>>, vector<64x324xbf16>
      %cst_154 = arith.constant dense<0.000000e+00> : vector<64x324xf32>
      %168 = tpu.matmul %166, %167, %cst_154 {dimension_numbers = #tpu.dot_dimension_numbers<[1], [0], [0], [1], [0, 0, 1, 1], [], []>} : vector<64x64xbf16>, vector<64x324xbf16>, vector<64x324xf32> -> vector<64x324xf32>
      %169 = arith.addf %161, %168 : vector<64x324xf32>
      %c9_i32_155 = arith.constant 9 : i32
      %170 = arith.muli %133, %c9_i32_155 : i32
      %c4_i32 = arith.constant 4 : i32
      %171 = arith.addi %170, %c4_i32 : i32
      %172 = arith.index_cast %171 : i32 to index
      %c0_156 = arith.constant 0 : index
      %c0_157 = arith.constant 0 : index
      %173 = vector.load %arg5[%172, %c0_156, %c0_157] : memref<36x64x64xbf16, #tpu.memory_space<vmem>>, vector<1x64x64xbf16>
      %174 = vector.shape_cast %173 : vector<1x64x64xbf16> to vector<64x64xbf16>
      %c0_158 = arith.constant 0 : index
      %c128_159 = arith.constant 128 : index
      %175 = vector.load %arg10[%c0_158, %c128_159] : memref<64x640xbf16, #tpu.memory_space<vmem>>, vector<64x324xbf16>
      %cst_160 = arith.constant dense<0.000000e+00> : vector<64x324xf32>
      %176 = tpu.matmul %174, %175, %cst_160 {dimension_numbers = #tpu.dot_dimension_numbers<[1], [0], [0], [1], [0, 0, 1, 1], [], []>} : vector<64x64xbf16>, vector<64x324xbf16>, vector<64x324xf32> -> vector<64x324xf32>
      %177 = arith.addf %169, %176 : vector<64x324xf32>
      %c9_i32_161 = arith.constant 9 : i32
      %178 = arith.muli %133, %c9_i32_161 : i32
      %c5_i32 = arith.constant 5 : i32
      %179 = arith.addi %178, %c5_i32 : i32
      %180 = arith.index_cast %179 : i32 to index
      %c0_162 = arith.constant 0 : index
      %c0_163 = arith.constant 0 : index
      %181 = vector.load %arg5[%180, %c0_162, %c0_163] : memref<36x64x64xbf16, #tpu.memory_space<vmem>>, vector<1x64x64xbf16>
      %182 = vector.shape_cast %181 : vector<1x64x64xbf16> to vector<64x64xbf16>
      %c0_164 = arith.constant 0 : index
      %c129_165 = arith.constant 129 : index
      %183 = vector.load %arg10[%c0_164, %c129_165] : memref<64x640xbf16, #tpu.memory_space<vmem>>, vector<64x324xbf16>
      %cst_166 = arith.constant dense<0.000000e+00> : vector<64x324xf32>
      %184 = tpu.matmul %182, %183, %cst_166 {dimension_numbers = #tpu.dot_dimension_numbers<[1], [0], [0], [1], [0, 0, 1, 1], [], []>} : vector<64x64xbf16>, vector<64x324xbf16>, vector<64x324xf32> -> vector<64x324xf32>
      %185 = arith.addf %177, %184 : vector<64x324xf32>
      %c9_i32_167 = arith.constant 9 : i32
      %186 = arith.muli %133, %c9_i32_167 : i32
      %c6_i32 = arith.constant 6 : i32
      %187 = arith.addi %186, %c6_i32 : i32
      %188 = arith.index_cast %187 : i32 to index
      %c0_168 = arith.constant 0 : index
      %c0_169 = arith.constant 0 : index
      %189 = vector.load %arg5[%188, %c0_168, %c0_169] : memref<36x64x64xbf16, #tpu.memory_space<vmem>>, vector<1x64x64xbf16>
      %190 = vector.shape_cast %189 : vector<1x64x64xbf16> to vector<64x64xbf16>
      %c0_170 = arith.constant 0 : index
      %c145_171 = arith.constant 145 : index
      %191 = vector.load %arg10[%c0_170, %c145_171] : memref<64x640xbf16, #tpu.memory_space<vmem>>, vector<64x324xbf16>
      %cst_172 = arith.constant dense<0.000000e+00> : vector<64x324xf32>
      %192 = tpu.matmul %190, %191, %cst_172 {dimension_numbers = #tpu.dot_dimension_numbers<[1], [0], [0], [1], [0, 0, 1, 1], [], []>} : vector<64x64xbf16>, vector<64x324xbf16>, vector<64x324xf32> -> vector<64x324xf32>
      %193 = arith.addf %185, %192 : vector<64x324xf32>
      %c9_i32_173 = arith.constant 9 : i32
      %194 = arith.muli %133, %c9_i32_173 : i32
      %c7_i32 = arith.constant 7 : i32
      %195 = arith.addi %194, %c7_i32 : i32
      %196 = arith.index_cast %195 : i32 to index
      %c0_174 = arith.constant 0 : index
      %c0_175 = arith.constant 0 : index
      %197 = vector.load %arg5[%196, %c0_174, %c0_175] : memref<36x64x64xbf16, #tpu.memory_space<vmem>>, vector<1x64x64xbf16>
      %198 = vector.shape_cast %197 : vector<1x64x64xbf16> to vector<64x64xbf16>
      %c0_176 = arith.constant 0 : index
      %c146_177 = arith.constant 146 : index
      %199 = vector.load %arg10[%c0_176, %c146_177] : memref<64x640xbf16, #tpu.memory_space<vmem>>, vector<64x324xbf16>
      %cst_178 = arith.constant dense<0.000000e+00> : vector<64x324xf32>
      %200 = tpu.matmul %198, %199, %cst_178 {dimension_numbers = #tpu.dot_dimension_numbers<[1], [0], [0], [1], [0, 0, 1, 1], [], []>} : vector<64x64xbf16>, vector<64x324xbf16>, vector<64x324xf32> -> vector<64x324xf32>
      %201 = arith.addf %193, %200 : vector<64x324xf32>
      %c9_i32_179 = arith.constant 9 : i32
      %202 = arith.muli %133, %c9_i32_179 : i32
      %c8_i32 = arith.constant 8 : i32
      %203 = arith.addi %202, %c8_i32 : i32
      %204 = arith.index_cast %203 : i32 to index
      %c0_180 = arith.constant 0 : index
      %c0_181 = arith.constant 0 : index
      %205 = vector.load %arg5[%204, %c0_180, %c0_181] : memref<36x64x64xbf16, #tpu.memory_space<vmem>>, vector<1x64x64xbf16>
      %206 = vector.shape_cast %205 : vector<1x64x64xbf16> to vector<64x64xbf16>
      %c0_182 = arith.constant 0 : index
      %c147_183 = arith.constant 147 : index
      %207 = vector.load %arg10[%c0_182, %c147_183] : memref<64x640xbf16, #tpu.memory_space<vmem>>, vector<64x324xbf16>
      %cst_184 = arith.constant dense<0.000000e+00> : vector<64x324xf32>
      %208 = tpu.matmul %206, %207, %cst_184 {dimension_numbers = #tpu.dot_dimension_numbers<[1], [0], [0], [1], [0, 0, 1, 1], [], []>} : vector<64x64xbf16>, vector<64x324xbf16>, vector<64x324xf32> -> vector<64x324xf32>
      %209 = arith.addf %201, %208 : vector<64x324xf32>
      %210 = vector.broadcast %138 : vector<64x1xf32> to vector<64x324xf32>
      %211 = arith.addf %209, %210 : vector<64x324xf32>
      %cst_185 = arith.constant 0.000000e+00 : f32
      %212 = vector.broadcast %cst_185 : f32 to vector<64x324xf32>
      %213 = arith.maximumf %211, %212 : vector<64x324xf32>
      %214 = vector.broadcast %8 : vector<1x324xf32> to vector<64x324xf32>
      %215 = arith.mulf %213, %214 : vector<64x324xf32>
      %216 = arith.truncf %215 : vector<64x324xf32> to vector<64x324xbf16>
      %c0_186 = arith.constant 0 : index
      %c128_187 = arith.constant 128 : index
      %217 = vector.load %arg11[%c0_186, %c128_187] : memref<64x640xbf16, #tpu.memory_space<vmem>>, vector<64x324xbf16>
      tpu.vector_store %arg11[%c0_186, %c128_187], %216 {strides = array<i32>} : memref<64x640xbf16, #tpu.memory_space<vmem>>, vector<64x324xbf16>,
      %218 = arith.index_cast %135 : i32 to index
      %c0_188 = arith.constant 0 : index
      %c0_189 = arith.constant 0 : index
      %219 = vector.load %arg6[%218, %c0_188, %c0_189] : memref<4x64x1xf32, #tpu.memory_space<vmem>>, vector<1x64x1xf32>
      %220 = vector.shape_cast %219 : vector<1x64x1xf32> to vector<64x1xf32>
      %c9_i32_190 = arith.constant 9 : i32
      %221 = arith.muli %135, %c9_i32_190 : i32
      %c0_i32_191 = arith.constant 0 : i32
      %222 = arith.addi %221, %c0_i32_191 : i32
      %223 = arith.index_cast %222 : i32 to index
      %c0_192 = arith.constant 0 : index
      %c0_193 = arith.constant 0 : index
      %224 = vector.load %arg5[%223, %c0_192, %c0_193] : memref<36x64x64xbf16, #tpu.memory_space<vmem>>, vector<1x64x64xbf16>
      %225 = vector.shape_cast %224 : vector<1x64x64xbf16> to vector<64x64xbf16>
      %c0_194 = arith.constant 0 : index
      %c109_195 = arith.constant 109 : index
      %226 = vector.load %arg11[%c0_194, %c109_195] : memref<64x640xbf16, #tpu.memory_space<vmem>>, vector<64x324xbf16>
      %cst_196 = arith.constant dense<0.000000e+00> : vector<64x324xf32>
      %227 = tpu.matmul %225, %226, %cst_196 {dimension_numbers = #tpu.dot_dimension_numbers<[1], [0], [0], [1], [0, 0, 1, 1], [], []>} : vector<64x64xbf16>, vector<64x324xbf16>, vector<64x324xf32> -> vector<64x324xf32>
      %c9_i32_197 = arith.constant 9 : i32
      %228 = arith.muli %135, %c9_i32_197 : i32
      %c1_i32_198 = arith.constant 1 : i32
      %229 = arith.addi %228, %c1_i32_198 : i32
      %230 = arith.index_cast %229 : i32 to index
      %c0_199 = arith.constant 0 : index
      %c0_200 = arith.constant 0 : index
      %231 = vector.load %arg5[%230, %c0_199, %c0_200] : memref<36x64x64xbf16, #tpu.memory_space<vmem>>, vector<1x64x64xbf16>
      %232 = vector.shape_cast %231 : vector<1x64x64xbf16> to vector<64x64xbf16>
      %c0_201 = arith.constant 0 : index
      %c110_202 = arith.constant 110 : index
      %233 = vector.load %arg11[%c0_201, %c110_202] : memref<64x640xbf16, #tpu.memory_space<vmem>>, vector<64x324xbf16>
      %cst_203 = arith.constant dense<0.000000e+00> : vector<64x324xf32>
      %234 = tpu.matmul %232, %233, %cst_203 {dimension_numbers = #tpu.dot_dimension_numbers<[1], [0], [0], [1], [0, 0, 1, 1], [], []>} : vector<64x64xbf16>, vector<64x324xbf16>, vector<64x324xf32> -> vector<64x324xf32>
      %235 = arith.addf %227, %234 : vector<64x324xf32>
      %c9_i32_204 = arith.constant 9 : i32
      %236 = arith.muli %135, %c9_i32_204 : i32
      %c2_i32_205 = arith.constant 2 : i32
      %237 = arith.addi %236, %c2_i32_205 : i32
      %238 = arith.index_cast %237 : i32 to index
      %c0_206 = arith.constant 0 : index
      %c0_207 = arith.constant 0 : index
      %239 = vector.load %arg5[%238, %c0_206, %c0_207] : memref<36x64x64xbf16, #tpu.memory_space<vmem>>, vector<1x64x64xbf16>
      %240 = vector.shape_cast %239 : vector<1x64x64xbf16> to vector<64x64xbf16>
      %c0_208 = arith.constant 0 : index
      %c111_209 = arith.constant 111 : index
      %241 = vector.load %arg11[%c0_208, %c111_209] : memref<64x640xbf16, #tpu.memory_space<vmem>>, vector<64x324xbf16>
      %cst_210 = arith.constant dense<0.000000e+00> : vector<64x324xf32>
      %242 = tpu.matmul %240, %241, %cst_210 {dimension_numbers = #tpu.dot_dimension_numbers<[1], [0], [0], [1], [0, 0, 1, 1], [], []>} : vector<64x64xbf16>, vector<64x324xbf16>, vector<64x324xf32> -> vector<64x324xf32>
      %243 = arith.addf %235, %242 : vector<64x324xf32>
      %c9_i32_211 = arith.constant 9 : i32
      %244 = arith.muli %135, %c9_i32_211 : i32
      %c3_i32_212 = arith.constant 3 : i32
      %245 = arith.addi %244, %c3_i32_212 : i32
      %246 = arith.index_cast %245 : i32 to index
      %c0_213 = arith.constant 0 : index
      %c0_214 = arith.constant 0 : index
      %247 = vector.load %arg5[%246, %c0_213, %c0_214] : memref<36x64x64xbf16, #tpu.memory_space<vmem>>, vector<1x64x64xbf16>
      %248 = vector.shape_cast %247 : vector<1x64x64xbf16> to vector<64x64xbf16>
      %c0_215 = arith.constant 0 : index
      %c127_216 = arith.constant 127 : index
      %249 = vector.load %arg11[%c0_215, %c127_216] : memref<64x640xbf16, #tpu.memory_space<vmem>>, vector<64x324xbf16>
      %cst_217 = arith.constant dense<0.000000e+00> : vector<64x324xf32>
      %250 = tpu.matmul %248, %249, %cst_217 {dimension_numbers = #tpu.dot_dimension_numbers<[1], [0], [0], [1], [0, 0, 1, 1], [], []>} : vector<64x64xbf16>, vector<64x324xbf16>, vector<64x324xf32> -> vector<64x324xf32>
      %251 = arith.addf %243, %250 : vector<64x324xf32>
      %c9_i32_218 = arith.constant 9 : i32
      %252 = arith.muli %135, %c9_i32_218 : i32
      %c4_i32_219 = arith.constant 4 : i32
      %253 = arith.addi %252, %c4_i32_219 : i32
      %254 = arith.index_cast %253 : i32 to index
      %c0_220 = arith.constant 0 : index
      %c0_221 = arith.constant 0 : index
      %255 = vector.load %arg5[%254, %c0_220, %c0_221] : memref<36x64x64xbf16, #tpu.memory_space<vmem>>, vector<1x64x64xbf16>
      %256 = vector.shape_cast %255 : vector<1x64x64xbf16> to vector<64x64xbf16>
      %c0_222 = arith.constant 0 : index
      %c128_223 = arith.constant 128 : index
      %257 = vector.load %arg11[%c0_222, %c128_223] : memref<64x640xbf16, #tpu.memory_space<vmem>>, vector<64x324xbf16>
      %cst_224 = arith.constant dense<0.000000e+00> : vector<64x324xf32>
      %258 = tpu.matmul %256, %257, %cst_224 {dimension_numbers = #tpu.dot_dimension_numbers<[1], [0], [0], [1], [0, 0, 1, 1], [], []>} : vector<64x64xbf16>, vector<64x324xbf16>, vector<64x324xf32> -> vector<64x324xf32>
      %259 = arith.addf %251, %258 : vector<64x324xf32>
      %c9_i32_225 = arith.constant 9 : i32
      %260 = arith.muli %135, %c9_i32_225 : i32
      %c5_i32_226 = arith.constant 5 : i32
      %261 = arith.addi %260, %c5_i32_226 : i32
      %262 = arith.index_cast %261 : i32 to index
      %c0_227 = arith.constant 0 : index
      %c0_228 = arith.constant 0 : index
      %263 = vector.load %arg5[%262, %c0_227, %c0_228] : memref<36x64x64xbf16, #tpu.memory_space<vmem>>, vector<1x64x64xbf16>
      %264 = vector.shape_cast %263 : vector<1x64x64xbf16> to vector<64x64xbf16>
      %c0_229 = arith.constant 0 : index
      %c129_230 = arith.constant 129 : index
      %265 = vector.load %arg11[%c0_229, %c129_230] : memref<64x640xbf16, #tpu.memory_space<vmem>>, vector<64x324xbf16>
      %cst_231 = arith.constant dense<0.000000e+00> : vector<64x324xf32>
      %266 = tpu.matmul %264, %265, %cst_231 {dimension_numbers = #tpu.dot_dimension_numbers<[1], [0], [0], [1], [0, 0, 1, 1], [], []>} : vector<64x64xbf16>, vector<64x324xbf16>, vector<64x324xf32> -> vector<64x324xf32>
      %267 = arith.addf %259, %266 : vector<64x324xf32>
      %c9_i32_232 = arith.constant 9 : i32
      %268 = arith.muli %135, %c9_i32_232 : i32
      %c6_i32_233 = arith.constant 6 : i32
      %269 = arith.addi %268, %c6_i32_233 : i32
      %270 = arith.index_cast %269 : i32 to index
      %c0_234 = arith.constant 0 : index
      %c0_235 = arith.constant 0 : index
      %271 = vector.load %arg5[%270, %c0_234, %c0_235] : memref<36x64x64xbf16, #tpu.memory_space<vmem>>, vector<1x64x64xbf16>
      %272 = vector.shape_cast %271 : vector<1x64x64xbf16> to vector<64x64xbf16>
      %c0_236 = arith.constant 0 : index
      %c145_237 = arith.constant 145 : index
      %273 = vector.load %arg11[%c0_236, %c145_237] : memref<64x640xbf16, #tpu.memory_space<vmem>>, vector<64x324xbf16>
      %cst_238 = arith.constant dense<0.000000e+00> : vector<64x324xf32>
      %274 = tpu.matmul %272, %273, %cst_238 {dimension_numbers = #tpu.dot_dimension_numbers<[1], [0], [0], [1], [0, 0, 1, 1], [], []>} : vector<64x64xbf16>, vector<64x324xbf16>, vector<64x324xf32> -> vector<64x324xf32>
      %275 = arith.addf %267, %274 : vector<64x324xf32>
      %c9_i32_239 = arith.constant 9 : i32
      %276 = arith.muli %135, %c9_i32_239 : i32
      %c7_i32_240 = arith.constant 7 : i32
      %277 = arith.addi %276, %c7_i32_240 : i32
      %278 = arith.index_cast %277 : i32 to index
      %c0_241 = arith.constant 0 : index
      %c0_242 = arith.constant 0 : index
      %279 = vector.load %arg5[%278, %c0_241, %c0_242] : memref<36x64x64xbf16, #tpu.memory_space<vmem>>, vector<1x64x64xbf16>
      %280 = vector.shape_cast %279 : vector<1x64x64xbf16> to vector<64x64xbf16>
      %c0_243 = arith.constant 0 : index
      %c146_244 = arith.constant 146 : index
      %281 = vector.load %arg11[%c0_243, %c146_244] : memref<64x640xbf16, #tpu.memory_space<vmem>>, vector<64x324xbf16>
      %cst_245 = arith.constant dense<0.000000e+00> : vector<64x324xf32>
      %282 = tpu.matmul %280, %281, %cst_245 {dimension_numbers = #tpu.dot_dimension_numbers<[1], [0], [0], [1], [0, 0, 1, 1], [], []>} : vector<64x64xbf16>, vector<64x324xbf16>, vector<64x324xf32> -> vector<64x324xf32>
      %283 = arith.addf %275, %282 : vector<64x324xf32>
      %c9_i32_246 = arith.constant 9 : i32
      %284 = arith.muli %135, %c9_i32_246 : i32
      %c8_i32_247 = arith.constant 8 : i32
      %285 = arith.addi %284, %c8_i32_247 : i32
      %286 = arith.index_cast %285 : i32 to index
      %c0_248 = arith.constant 0 : index
      %c0_249 = arith.constant 0 : index
      %287 = vector.load %arg5[%286, %c0_248, %c0_249] : memref<36x64x64xbf16, #tpu.memory_space<vmem>>, vector<1x64x64xbf16>
      %288 = vector.shape_cast %287 : vector<1x64x64xbf16> to vector<64x64xbf16>
      %c0_250 = arith.constant 0 : index
      %c147_251 = arith.constant 147 : index
      %289 = vector.load %arg11[%c0_250, %c147_251] : memref<64x640xbf16, #tpu.memory_space<vmem>>, vector<64x324xbf16>
      %cst_252 = arith.constant dense<0.000000e+00> : vector<64x324xf32>
      %290 = tpu.matmul %288, %289, %cst_252 {dimension_numbers = #tpu.dot_dimension_numbers<[1], [0], [0], [1], [0, 0, 1, 1], [], []>} : vector<64x64xbf16>, vector<64x324xbf16>, vector<64x324xf32> -> vector<64x324xf32>
      %291 = arith.addf %283, %290 : vector<64x324xf32>
      %292 = vector.broadcast %220 : vector<64x1xf32> to vector<64x324xf32>
      %293 = arith.addf %291, %292 : vector<64x324xf32>
      %294 = vector.broadcast %8 : vector<1x324xf32> to vector<64x324xf32>
      %295 = arith.mulf %293, %294 : vector<64x324xf32>
      %296 = arith.truncf %295 : vector<64x324xf32> to vector<64x324xbf16>
      %c0_253 = arith.constant 0 : index
      %c128_254 = arith.constant 128 : index
      %297 = vector.load %arg10[%c0_253, %c128_254] : memref<64x640xbf16, #tpu.memory_space<vmem>>, vector<64x324xbf16>
      tpu.vector_store %arg10[%c0_253, %c128_254], %296 {strides = array<i32>} : memref<64x640xbf16, #tpu.memory_space<vmem>>, vector<64x324xbf16>,
    }
    %c2_i32_61 = arith.constant 2 : i32
    %c0_62 = arith.constant 0 : index
    %c0_63 = arith.constant 0 : index
    %79 = vector.load %arg8[%c0_62, %c0_63] : memref<8x1xf32, #tpu.memory_space<vmem>>, vector<8x1xf32>
    %c0_64 = arith.constant 0 : index
    %c0_65 = arith.constant 0 : index
    %c0_66 = arith.constant 0 : index
    %80 = vector.load %arg7[%c0_64, %c0_65, %c0_66] : memref<9x8x64xbf16, #tpu.memory_space<vmem>>, vector<1x8x64xbf16>
    %81 = vector.shape_cast %80 : vector<1x8x64xbf16> to vector<8x64xbf16>
    %c0_67 = arith.constant 0 : index
    %c109_68 = arith.constant 109 : index
    %82 = vector.load %arg10[%c0_67, %c109_68] : memref<64x640xbf16, #tpu.memory_space<vmem>>, vector<64x324xbf16>
    %cst_69 = arith.constant dense<0.000000e+00> : vector<8x324xf32>
    %83 = tpu.matmul %81, %82, %cst_69 {dimension_numbers = #tpu.dot_dimension_numbers<[1], [0], [0], [1], [0, 0, 1, 1], [], []>} : vector<8x64xbf16>, vector<64x324xbf16>, vector<8x324xf32> -> vector<8x324xf32>
    %c1_70 = arith.constant 1 : index
    %c0_71 = arith.constant 0 : index
    %c0_72 = arith.constant 0 : index
    %84 = vector.load %arg7[%c1_70, %c0_71, %c0_72] : memref<9x8x64xbf16, #tpu.memory_space<vmem>>, vector<1x8x64xbf16>
    %85 = vector.shape_cast %84 : vector<1x8x64xbf16> to vector<8x64xbf16>
    %c0_73 = arith.constant 0 : index
    %c110_74 = arith.constant 110 : index
    %86 = vector.load %arg10[%c0_73, %c110_74] : memref<64x640xbf16, #tpu.memory_space<vmem>>, vector<64x324xbf16>
    %cst_75 = arith.constant dense<0.000000e+00> : vector<8x324xf32>
    %87 = tpu.matmul %85, %86, %cst_75 {dimension_numbers = #tpu.dot_dimension_numbers<[1], [0], [0], [1], [0, 0, 1, 1], [], []>} : vector<8x64xbf16>, vector<64x324xbf16>, vector<8x324xf32> -> vector<8x324xf32>
    %88 = arith.addf %83, %87 : vector<8x324xf32>
    %c2_76 = arith.constant 2 : index
    %c0_77 = arith.constant 0 : index
    %c0_78 = arith.constant 0 : index
    %89 = vector.load %arg7[%c2_76, %c0_77, %c0_78] : memref<9x8x64xbf16, #tpu.memory_space<vmem>>, vector<1x8x64xbf16>
    %90 = vector.shape_cast %89 : vector<1x8x64xbf16> to vector<8x64xbf16>
    %c0_79 = arith.constant 0 : index
    %c111_80 = arith.constant 111 : index
    %91 = vector.load %arg10[%c0_79, %c111_80] : memref<64x640xbf16, #tpu.memory_space<vmem>>, vector<64x324xbf16>
    %cst_81 = arith.constant dense<0.000000e+00> : vector<8x324xf32>
    %92 = tpu.matmul %90, %91, %cst_81 {dimension_numbers = #tpu.dot_dimension_numbers<[1], [0], [0], [1], [0, 0, 1, 1], [], []>} : vector<8x64xbf16>, vector<64x324xbf16>, vector<8x324xf32> -> vector<8x324xf32>
    %93 = arith.addf %88, %92 : vector<8x324xf32>
    %c3_82 = arith.constant 3 : index
    %c0_83 = arith.constant 0 : index
    %c0_84 = arith.constant 0 : index
    %94 = vector.load %arg7[%c3_82, %c0_83, %c0_84] : memref<9x8x64xbf16, #tpu.memory_space<vmem>>, vector<1x8x64xbf16>
    %95 = vector.shape_cast %94 : vector<1x8x64xbf16> to vector<8x64xbf16>
    %c0_85 = arith.constant 0 : index
    %c127_86 = arith.constant 127 : index
    %96 = vector.load %arg10[%c0_85, %c127_86] : memref<64x640xbf16, #tpu.memory_space<vmem>>, vector<64x324xbf16>
    %cst_87 = arith.constant dense<0.000000e+00> : vector<8x324xf32>
    %97 = tpu.matmul %95, %96, %cst_87 {dimension_numbers = #tpu.dot_dimension_numbers<[1], [0], [0], [1], [0, 0, 1, 1], [], []>} : vector<8x64xbf16>, vector<64x324xbf16>, vector<8x324xf32> -> vector<8x324xf32>
    %98 = arith.addf %93, %97 : vector<8x324xf32>
    %c4_88 = arith.constant 4 : index
    %c0_89 = arith.constant 0 : index
    %c0_90 = arith.constant 0 : index
    %99 = vector.load %arg7[%c4_88, %c0_89, %c0_90] : memref<9x8x64xbf16, #tpu.memory_space<vmem>>, vector<1x8x64xbf16>
    %100 = vector.shape_cast %99 : vector<1x8x64xbf16> to vector<8x64xbf16>
    %c0_91 = arith.constant 0 : index
    %c128_92 = arith.constant 128 : index
    %101 = vector.load %arg10[%c0_91, %c128_92] : memref<64x640xbf16, #tpu.memory_space<vmem>>, vector<64x324xbf16>
    %cst_93 = arith.constant dense<0.000000e+00> : vector<8x324xf32>
    %102 = tpu.matmul %100, %101, %cst_93 {dimension_numbers = #tpu.dot_dimension_numbers<[1], [0], [0], [1], [0, 0, 1, 1], [], []>} : vector<8x64xbf16>, vector<64x324xbf16>, vector<8x324xf32> -> vector<8x324xf32>
    %103 = arith.addf %98, %102 : vector<8x324xf32>
    %c5_94 = arith.constant 5 : index
    %c0_95 = arith.constant 0 : index
    %c0_96 = arith.constant 0 : index
    %104 = vector.load %arg7[%c5_94, %c0_95, %c0_96] : memref<9x8x64xbf16, #tpu.memory_space<vmem>>, vector<1x8x64xbf16>
    %105 = vector.shape_cast %104 : vector<1x8x64xbf16> to vector<8x64xbf16>
    %c0_97 = arith.constant 0 : index
    %c129_98 = arith.constant 129 : index
    %106 = vector.load %arg10[%c0_97, %c129_98] : memref<64x640xbf16, #tpu.memory_space<vmem>>, vector<64x324xbf16>
    %cst_99 = arith.constant dense<0.000000e+00> : vector<8x324xf32>
    %107 = tpu.matmul %105, %106, %cst_99 {dimension_numbers = #tpu.dot_dimension_numbers<[1], [0], [0], [1], [0, 0, 1, 1], [], []>} : vector<8x64xbf16>, vector<64x324xbf16>, vector<8x324xf32> -> vector<8x324xf32>
    %108 = arith.addf %103, %107 : vector<8x324xf32>
    %c6_100 = arith.constant 6 : index
    %c0_101 = arith.constant 0 : index
    %c0_102 = arith.constant 0 : index
    %109 = vector.load %arg7[%c6_100, %c0_101, %c0_102] : memref<9x8x64xbf16, #tpu.memory_space<vmem>>, vector<1x8x64xbf16>
    %110 = vector.shape_cast %109 : vector<1x8x64xbf16> to vector<8x64xbf16>
    %c0_103 = arith.constant 0 : index
    %c145_104 = arith.constant 145 : index
    %111 = vector.load %arg10[%c0_103, %c145_104] : memref<64x640xbf16, #tpu.memory_space<vmem>>, vector<64x324xbf16>
    %cst_105 = arith.constant dense<0.000000e+00> : vector<8x324xf32>
    %112 = tpu.matmul %110, %111, %cst_105 {dimension_numbers = #tpu.dot_dimension_numbers<[1], [0], [0], [1], [0, 0, 1, 1], [], []>} : vector<8x64xbf16>, vector<64x324xbf16>, vector<8x324xf32> -> vector<8x324xf32>
    %113 = arith.addf %108, %112 : vector<8x324xf32>
    %c7_106 = arith.constant 7 : index
    %c0_107 = arith.constant 0 : index
    %c0_108 = arith.constant 0 : index
    %114 = vector.load %arg7[%c7_106, %c0_107, %c0_108] : memref<9x8x64xbf16, #tpu.memory_space<vmem>>, vector<1x8x64xbf16>
    %115 = vector.shape_cast %114 : vector<1x8x64xbf16> to vector<8x64xbf16>
    %c0_109 = arith.constant 0 : index
    %c146_110 = arith.constant 146 : index
    %116 = vector.load %arg10[%c0_109, %c146_110] : memref<64x640xbf16, #tpu.memory_space<vmem>>, vector<64x324xbf16>
    %cst_111 = arith.constant dense<0.000000e+00> : vector<8x324xf32>
    %117 = tpu.matmul %115, %116, %cst_111 {dimension_numbers = #tpu.dot_dimension_numbers<[1], [0], [0], [1], [0, 0, 1, 1], [], []>} : vector<8x64xbf16>, vector<64x324xbf16>, vector<8x324xf32> -> vector<8x324xf32>
    %118 = arith.addf %113, %117 : vector<8x324xf32>
    %c8_112 = arith.constant 8 : index
    %c0_113 = arith.constant 0 : index
    %c0_114 = arith.constant 0 : index
    %119 = vector.load %arg7[%c8_112, %c0_113, %c0_114] : memref<9x8x64xbf16, #tpu.memory_space<vmem>>, vector<1x8x64xbf16>
    %120 = vector.shape_cast %119 : vector<1x8x64xbf16> to vector<8x64xbf16>
    %c0_115 = arith.constant 0 : index
    %c147_116 = arith.constant 147 : index
    %121 = vector.load %arg10[%c0_115, %c147_116] : memref<64x640xbf16, #tpu.memory_space<vmem>>, vector<64x324xbf16>
    %cst_117 = arith.constant dense<0.000000e+00> : vector<8x324xf32>
    %122 = tpu.matmul %120, %121, %cst_117 {dimension_numbers = #tpu.dot_dimension_numbers<[1], [0], [0], [1], [0, 0, 1, 1], [], []>} : vector<8x64xbf16>, vector<64x324xbf16>, vector<8x324xf32> -> vector<8x324xf32>
    %123 = arith.addf %118, %122 : vector<8x324xf32>
    %124 = vector.broadcast %79 : vector<8x1xf32> to vector<8x324xf32>
    %125 = arith.addf %123, %124 : vector<8x324xf32>
    %126 = vector.extract_strided_slice %125 {offsets = [0, 0], sizes = [2, 324], strides = [1, 1]} : vector<8x324xf32> to vector<2x324xf32>
    %c0_118 = arith.constant 0 : index
    %c0_119 = arith.constant 0 : index
    %c128_120 = arith.constant 128 : index
    %127 = vector.load %arg1[%c0_118, %c0_119, %c128_120] : memref<1x8x640xf32, #tpu.memory_space<vmem>>, vector<1x2x324xf32>
    %128 = vector.shape_cast %127 : vector<1x2x324xf32> to vector<2x324xf32>
    %129 = arith.addf %126, %128 : vector<2x324xf32>
    %c0_121 = arith.constant 0 : index
    %c0_122 = arith.constant 0 : index
    %c0_123 = arith.constant 0 : index
    %130 = vector.load %arg9[%c0_121, %c0_122, %c0_123] : memref<1x2x324xf32, #tpu.memory_space<vmem>>, vector<1x2x324xf32>
    %131 = vector.shape_cast %130 : vector<1x2x324xf32> to vector<2x324xf32>
    %132 = vector.shape_cast %129 : vector<2x324xf32> to vector<1x2x324xf32>
    tpu.vector_store %arg9[%c0_121, %c0_122, %c0_123], %132 {strides = array<i32>} : memref<1x2x324xf32, #tpu.memory_space<vmem>>, vector<1x2x324xf32>,
    return
  }
  func.func @transform_0(%arg0: i32) -> (i32, i32, i32) {
    %c0_i32 = arith.constant 0 : i32
    %c0_i32_0 = arith.constant 0 : i32
    %c0_i32_1 = arith.constant 0 : i32
    return %arg0, %c0_i32, %c0_i32_0 : i32, i32, i32
  }
  func.func @transform_1(%arg0: i32) -> (i32, i32) {
    %c0_i32 = arith.constant 0 : i32
    %c0_i32_0 = arith.constant 0 : i32
    %c0_i32_1 = arith.constant 0 : i32
    return %c0_i32, %c0_i32_0 : i32, i32
  }
  func.func @transform_2(%arg0: i32) -> (i32, i32, i32) {
    %c0_i32 = arith.constant 0 : i32
    %c0_i32_0 = arith.constant 0 : i32
    %c0_i32_1 = arith.constant 0 : i32
    %c0_i32_2 = arith.constant 0 : i32
    return %c0_i32, %c0_i32_0, %c0_i32_1 : i32, i32, i32
  }
  func.func @transform_3(%arg0: i32) -> (i32, i32) {
    %c0_i32 = arith.constant 0 : i32
    %c0_i32_0 = arith.constant 0 : i32
    %c0_i32_1 = arith.constant 0 : i32
    return %c0_i32, %c0_i32_0 : i32, i32
  }
  func.func @transform_4(%arg0: i32) -> (i32, i32, i32) {
    %c0_i32 = arith.constant 0 : i32
    %c0_i32_0 = arith.constant 0 : i32
    %c0_i32_1 = arith.constant 0 : i32
    %c0_i32_2 = arith.constant 0 : i32
    return %c0_i32, %c0_i32_0, %c0_i32_1 : i32, i32, i32
  }
  func.func @transform_5(%arg0: i32) -> (i32, i32, i32) {
    %c0_i32 = arith.constant 0 : i32
    %c0_i32_0 = arith.constant 0 : i32
    %c0_i32_1 = arith.constant 0 : i32
    %c0_i32_2 = arith.constant 0 : i32
    return %c0_i32, %c0_i32_0, %c0_i32_1 : i32, i32, i32
  }
  func.func @transform_6(%arg0: i32) -> (i32, i32, i32) {
    %c0_i32 = arith.constant 0 : i32
    %c0_i32_0 = arith.constant 0 : i32
    %c0_i32_1 = arith.constant 0 : i32
    %c0_i32_2 = arith.constant 0 : i32
    return %c0_i32, %c0_i32_0, %c0_i32_1 : i32, i32, i32
  }
  func.func @transform_7(%arg0: i32) -> (i32, i32) {
    %c0_i32 = arith.constant 0 : i32
    %c0_i32_0 = arith.constant 0 : i32
    %c0_i32_1 = arith.constant 0 : i32
    return %c0_i32, %c0_i32_0 : i32, i32
  }
  func.func @transform_8(%arg0: i32) -> (i32, i32, i32) {
    %c0_i32 = arith.constant 0 : i32
    %c0_i32_0 = arith.constant 0 : i32
    %c0_i32_1 = arith.constant 0 : i32
    return %arg0, %c0_i32, %c0_i32_0 : i32, i32, i32
  }
}

</mosaic_0001>

<bundles_post_ra>
// kernel: resnet_denoiser_forward.1
= control target key start
LH: loop header
LB: loop body
LE: loop exit
PB: predicated region body
PF: predicated region fallthrough
CT: control target
= control target key end

     0   :  { %s8944_s27 = smov 0   ;;  %s12737_s0 = inlined_call_operand.vmem [shape: f32[2,8,640], index: 0, kind: input, shape index: {}]   ;;  %s12738_s1 = inlined_call_operand.vmem [shape: f32[1,324], index: 1, kind: input, shape index: {}]   ;;  %s12739_s2 = inlined_call_operand.vmem [shape: bf16[9,64,8], index: 2, kind: input, shape index: {}]   ;;  %s12740_s3 = inlined_call_operand.vmem [shape: f32[64,1], index: 3, kind: input, shape index: {}]   ;;  %s12741_s4 = inlined_call_operand.vmem [shape: bf16[36,64,64], index: 4, kind: input, shape index: {}]   ;;  %s12742_s5 = inlined_call_operand.vmem [shape: f32[4,64,1], index: 5, kind: input, shape index: {}]   ;;  %s12743_s6 = inlined_call_operand.vmem [shape: bf16[9,8,64], index: 6, kind: input, shape index: {}]   ;;  %s12744_s7 = inlined_call_operand.vmem [shape: f32[8,1], index: 7, kind: input, shape index: {}]   ;;  %s12745_s8 = inlined_call_operand.vmem [shape: f32[2,2,324], index: 8, kind: output, shape index: {}]  }
   0x1 LB: > { %s7231_s28 = sadd.s32 4294967295, %s8875_s27   ;;  %p7235_p0 = scmp.ge.s32.totalorder %s8875_s27, 1  ;;  %s8875_s27 = sphi %s8944_s27, %s18_s27  }
   0x2   : > { %p262_p1 = scmp.lt.s32.totalorder %s8875_s27, 3 }
   0x4   : > { %p263_p2 = pnand %p7235_p0, %p262_p1 }
   0x6   : > { %266 = sbr.rel (%p263_p2) target bundleno = 2730 (0xaaa), region = 52 }
   0xb   : > { %p296_p3 = scmp.lt.s32.totalorder %s7231_s28, 1  ;;  %s8881_s15 = smov 18   ;;  %vm547_vm0 = vcmask 154624   ;;  %vm405_vm1 = vcmask 146432   ;;  %vm422_vm2 = vcmask 1043456   ;;  %v8619_v22 = vld [vmem:[%s12739_s2 + $0x20] sm:$0xff] }
   0xc   : > { %s8882_s16 = smov 19   ;;  %s8883_s17 = smov 17   ;;  %v8620_v23 = vld [vmem:[%s12739_s2 + $0x28] sm:$0xff]  ;;  %vm409_vm3 = vcmask 64512   ;;  %vm696_vm4 = vcmask 138240   ;;  %v8621_v37 = vld [vmem:[%s12739_s2 + $0x30] sm:$0xff] }
   0xd   : > { %s12836_s28 = smov (!%p296_p3, %s7231_s28), 1  ;;  %s8884_s18 = smov 1   ;;  %vm869_vm5 = vcmask 7168   ;;  %v8622_v46 = vld [vmem:[%s12739_s2 + $0x38] sm:$0xff]  ;;  %v8615_v50 = vld [vmem:[%s12739_s2] sm:$0xff]  ;;  %v8616_v54 = vld [vmem:[%s12739_s2 + $0x8] sm:$0xff] }
   0xe   : > { %s8821_s29 = smul.u32 40, %s12836_s28  ;;  %s8885_s19 = smov 127   ;;  %v8623_v52 = vld [vmem:[%s12739_s2 + $0x40] sm:$0xff]  ;;  %v8624_v55 = vld [vmem:[%s12739_s2 + $0x48] sm:$0xff]  ;;  %v8617_v56 = vld [vmem:[%s12739_s2 + $0x10] sm:$0xff]  ;;  %vm1201_vm6 = vcmask 1039360  }
   0xf   : > { %s8822_s30 = smul.u32 6, %s12836_s28  ;;  %s12752_s20 = smov 111   ;;  %v8625_v57 = vld [vmem:[%s12739_s2 + $0x50] sm:$0xff]  ;;  %v8618_v59 = vld [vmem:[%s12739_s2 + $0x18] sm:$0xff]  ;;  %v9121_v63 = vld [vmem:[%s12739_s2 + $0x60] sm:$0xff]  ;;  %vm1371_vm7 = vcmask 908288  }
  0x10   : > { %s8955_s11 = scalar_lea.vmem %s12737_s0, %s8821_s29  ;;  %s12750_s25 = smov 110   ;;  %v8626_v60 = vld [vmem:[%s12739_s2 + $0x58] sm:$0xff]  ;;  %vm1541_vm8 = vcmask 900096   ;;  %vm1711_vm9 = vcmask 891904   ;;  %vm1958_vm10 = vcmask 551936  }
  0x11   : > { %s8960_s14 = scalar_lea.vmem %s12745_s8, %s8822_s30  ;;  %v358_v0 = vld [vmem:[%s8955_s11 + $0x10] sm:$0xff]  ;;  %v356_v1 = vld [vmem:[%s8955_s11] sm:$0xff]  ;;  %v359_v4 = vld [vmem:[%s8955_s11 + $0x18] sm:$0xff]  ;;  %s12748_s26 = smov 109  }
  0x12   : > { %v8964_v2 = vpack.c.bf16 %v358_v0, %v358_v0  ;;  %v360_v3 = vpack.c.bf16 %v356_v1, %v356_v1  ;;  %v357_v5 = vld [vmem:[%s8955_s11 + $0x8] sm:$0xff]  ;;  %v8972_v6 = vpack.c.bf16 %v359_v4, %v359_v4  ;;  %s9861_s22 = smov 0  }
  0x13   : > { %v8974_v7 = vpack.c.bf16 %v357_v5, %v357_v5  ;;  %v9134_v1 = vld [vmem:[%s12739_s2 + $0x68] sm:$0xff] }
  0x14   : > { %401 = vrot.lane.b32.xlu1 %v8964_v2, %s8881_s15  ;;  %397 = vrot.lane.b32.xlu0 %v360_v3, %s8881_s15  ;;  %v1053_v58 = vsel %vm422_vm2, %v8972_v6, 0  ;;  %v1050_v62 = vsel %vm422_vm2, %v8964_v2, 0 }
  0x15   : > { %539 = vrot.lane.b32.xlu2 %v360_v3, %s8882_s16  ;;  %v1047_v61 = vsel %vm422_vm2, %v8974_v7, 0 }
  0x1c   : > { %403 = vrot.lane.b32.xlu1 %v8972_v6, %s8881_s15  ;;  %399 = vrot.lane.b32.xlu0 %v8974_v7, %s8881_s15 }
  0x1d   : > { %541 = vrot.lane.b32.xlu2 %v8974_v7, %s8882_s16 }
  0x24   : > { %690 = vrot.lane.b32.xlu1 %v8974_v7, %s8883_s17  ;;  %688 = vrot.lane.b32.xlu0 %v360_v3, %s8883_s17 }
  0x25   : > { %543 = vrot.lane.b32.xlu2 %v8964_v2, %s8882_s16 }
  0x2c   : > { %692 = vrot.lane.b32.xlu1 %v8964_v2, %s8883_s17  ;;  %545 = vrot.lane.b32.xlu0 %v8972_v6, %s8882_s16 }
  0x2d   : > { %863 = vrot.lane.b32.xlu2 %v8974_v7, %s8884_s18 }
  0x34   : > { %865 = vrot.lane.b32.xlu0 %v8964_v2, %s8884_s18  ;;  %694 = vrot.lane.b32.xlu1 %v8972_v6, %s8883_s17 }
  0x35   : > { %861 = vrot.lane.b32.xlu2 %v360_v3, %s8884_s18 }
  0x3c   : > { %867 = vrot.lane.b32.xlu0 %v8972_v6, %s8884_s18  ;;  %1195 = vrot.lane.b32.xlu1 %v8974_v7, %s8885_s19 }
  0x3d   : > { %1197 = vrot.lane.b32.xlu2 %v8964_v2, %s8885_s19 }
  0x44   : > { %1365 = vrot.lane.b32.xlu0 %v8974_v7, %s12752_s20  ;;  %1367 = vrot.lane.b32.xlu1 %v8964_v2, %s12752_s20 }
  0x45   : > { %1199 = vrot.lane.b32.xlu2 %v8972_v6, %s8885_s19 }
  0x4c   : > { %1369 = vrot.lane.b32.xlu0 %v8972_v6, %s12752_s20  ;;  %1537 = vrot.lane.b32.xlu1 %v8964_v2, %s12750_s25 }
  0x4d   : > { %1539 = vrot.lane.b32.xlu2 %v8972_v6, %s12750_s25 }
  0x54   : > { %1535 = vrot.lane.b32.xlu0 %v8974_v7, %s12750_s25  ;;  %1709 = vrot.lane.b32.xlu1 %v8972_v6, %s12748_s26 }
  0x55   : > { %1705 = vrot.lane.b32.xlu2 %v8974_v7, %s12748_s26 }
  0x5c   : > { %1707 = vrot.lane.b32.xlu0 %v8964_v2, %s12748_s26 }
  0x6f   : > { %v540_v8 = vpop.permute.xlu2 %539 }
  0x77   : > { %v542_v11 = vpop.permute.xlu2 %541 }
  0x78   : > { %v548_v12 = vsel %vm547_vm0, %v540_v8, %v542_v11 }
  0x79   : > { %v564_v21 = vsel %vm422_vm2, %v548_v12, 0  ;;  %v9159_v12 = vld [vmem:[%s12739_s2 + $0x70] sm:$0xff] }
  0x7f   : > { %v544_v24 = vpop.permute.xlu2 %543 }
  0x80   : > { %v549_v34 = vsel %vm547_vm0, %v542_v11, %v544_v24 }
  0x81   : > { %v567_v38 = vsel %vm422_vm2, %v549_v34, 0 }
  0x86   : > { %v402_v9 = vpop.permute.xlu1 %401  ;;  %v398_v10 = vpop.permute.xlu0 %397 }
  0x87   : > { %v864_v29 = vpop.permute.xlu2 %863 }
  0x8e   : > { %v404_v13 = vpop.permute.xlu1 %403  ;;  %v400_v14 = vpop.permute.xlu0 %399 }
  0x8f   : > { %v406_v15 = vsel %vm405_vm1, %v398_v10, %v400_v14  ;;  %v407_v16 = vsel %vm405_vm1, %v400_v14, %v402_v9  ;;  %v408_v17 = vsel %vm405_vm1, %v402_v9, %v404_v13  ;;  %v862_v39 = vpop.permute.xlu2 %861 }
  0x90   : > { %v424_v18 = vsel %vm422_vm2, %v406_v15, 0  ;;  %v427_v19 = vsel %vm422_vm2, %v407_v16, 0  ;;  %v430_v20 = vsel %vm422_vm2, %v408_v17, 0  ;;  %v870_v41 = vsel %vm869_vm5, %v862_v39, %v864_v29 }
  0x91   : > { %439 = vmatpush.bf16.msra.mxu0 %v424_v18  ;;  %8810 = vmatpush.bf16.msra.mxu3 %v424_v18  ;;  %v886_v43 = vsel %vm422_vm2, %v870_v41, 0 }
  0x92   : > { %8811 = vmatpush.bf16.msra.mxu1 %v427_v19  ;;  %8812 = vmatpush.bf16.msra.mxu2 %v430_v20 }
  0x94   : > { %7262 = vmatmul.msk.bf16.vlgmr.msra.gmra.mxu0 %vm409_vm3, %v8619_v22  ;;  %7263 = vmatmul.msk.bf16.vlgmr.msra.gmra.mxu3 %vm409_vm3, %v8620_v23 }
  0x95   : > { %468 = vmatpush.bf16.msrb.mxu0 %v427_v19  ;;  %579 = vmatpush.bf16.msrb.mxu3 %v564_v21 }
  0x96   : > { %7267 = vmatmul.msk.bf16.vlgmr.msra.gmra.mxu1 %vm409_vm3, %v8620_v23  ;;  %7271 = vmatmul.msk.bf16.vlgmr.msra.gmra.mxu2 %vm409_vm3, %v8620_v23  ;;  %v691_v25 = vpop.permute.xlu1 %690  ;;  %v689_v26 = vpop.permute.xlu0 %688 }
  0x97   : > { %v697_v27 = vsel %vm696_vm4, %v689_v26, %v691_v25  ;;  %v1198_v7 = vpop.permute.xlu2 %1197 }
  0x98   : > { %v713_v28 = vsel %vm422_vm2, %v697_v27, 0 }
  0x99   : > { %497 = vmatpush.bf16.msra.mxu0 %v430_v20  ;;  %728 = vmatpush.bf16.msrb.mxu2 %v713_v28 }
  0x9e   : > { %v693_v30 = vpop.permute.xlu1 %692  ;;  %v546_v31 = vpop.permute.xlu0 %545 }
  0x9f   : > { %v698_v32 = vsel %vm696_vm4, %v691_v25, %v693_v30  ;;  %v550_v33 = vsel %vm547_vm0, %v544_v24, %v546_v31  ;;  %v1200_v16 = vpop.permute.xlu2 %1199  ;;  %v9189_v31 = vld [vmem:[%s12739_s2 + $0x78] sm:$0xff] }
  0xa0   : > { %v716_v35 = vsel %vm422_vm2, %v698_v32, 0  ;;  %v570_v36 = vsel %vm422_vm2, %v550_v33, 0  ;;  %v1203_v17 = vsel %vm1201_vm6, %v1198_v7, %v1200_v16  ;;  %v1223_v18 = vsel %vm422_vm2, %v1200_v16, 0 }
  0xa1   : > { %637 = vmatpush.bf16.msrb.mxu1 %v570_v36  ;;  %757 = vmatpush.bf16.msra.mxu3 %v716_v35  ;;  %v1220_v20 = vsel %vm422_vm2, %v1203_v17, 0 }
  0xa4   : > { %7264 = vmatmul.msk.bf16.gmra.mxu3 %vm409_vm3, %v8621_v37  ;;  %7266 = vmatmul.msk.bf16.vlgmr.msrb.gmra.mxu0 %vm409_vm3, %v8619_v22 }
  0xa5   : > { %608 = vmatpush.bf16.msrb.mxu0 %v567_v38  ;;  %901 = vmatpush.bf16.msra.mxu1 %v886_v43 }
  0xa6   : > { %7268 = vmatmul.msk.bf16.gmra.mxu1 %vm409_vm3, %v8621_v37  ;;  %7272 = vmatmul.msk.bf16.gmra.mxu2 %vm409_vm3, %v8621_v37  ;;  %v866_v40 = vpop.permute.xlu0 %865  ;;  %v695_v45 = vpop.permute.xlu1 %694 }
  0xa7   : > { %v871_v42 = vsel %vm869_vm5, %v864_v29, %v866_v40  ;;  %v699_v47 = vsel %vm696_vm4, %v693_v30, %v695_v45 }
  0xa8   : > { %v889_v44 = vsel %vm422_vm2, %v871_v42, 0  ;;  %v719_v48 = vsel %vm422_vm2, %v699_v47, 0 }
  0xa9   : > { %930 = vmatpush.bf16.msra.mxu2 %v889_v44 }
  0xae   : > { %v868_v49 = vpop.permute.xlu0 %867  ;;  %v1196_v10 = vpop.permute.xlu1 %1195 }
  0xaf   : > { %v872_v51 = vsel %vm869_vm5, %v866_v40, %v868_v49  ;;  %v1202_v13 = vsel %vm1201_vm6, %v1196_v10, %v1198_v7  ;;  %v8631_v40 = vld [vmem:[%s12739_s2 + $0x80] sm:$0xff] }
  0xb0   : > { %v892_v53 = vsel %vm422_vm2, %v872_v51, 0  ;;  %v1217_v15 = vsel %vm422_vm2, %v1202_v13, 0 }
  0xb4   : > { %7265 = vmatmul.msk.bf16.gmra.mxu3 %vm409_vm3, %v8622_v46  ;;  %7270 = vmatmul.msk.bf16.vlgmr.msra.gmra.mxu0 %vm409_vm3, %v8619_v22 }
  0xb5   : > { %786 = vmatpush.bf16.msra.mxu0 %v719_v48 }
  0xb6   : > { %7269 = vmatmul.msk.bf16.gmra.mxu1 %vm409_vm3, %v8622_v46  ;;  %7273 = vmatmul.msk.bf16.gmra.mxu2 %vm409_vm3, %v8622_v46  ;;  %v1366_v23 = vpop.permute.xlu0 %1365  ;;  %v1368_v25 = vpop.permute.xlu1 %1367 }
  0xb7   : > { %v1372_v26 = vsel %vm1371_vm7, %v1366_v23, %v1368_v25 }
  0xb8   : > { %v1387_v27 = vsel %vm422_vm2, %v1372_v26, 0 }
  0xbe   : > { %v1370_v37 = vpop.permute.xlu0 %1369 }
  0xbf   : > { %v1373_v41 = vsel %vm1371_vm7, %v1368_v25, %v1370_v37  ;;  %v1393_v47 = vsel %vm422_vm2, %v1370_v37, 0 }
  0xc0   : > { %v1390_v46 = vsel %vm422_vm2, %v1373_v41, 0 }
  0xc4   : > { %7290 = vmatmul.msk.bf16.vlgmr.msrb.gmra.mxu3 %vm409_vm3, %v8615_v50  ;;  %7294 = vmatmul.msk.bf16.vlgmr.msrb.gmra.mxu0 %vm409_vm3, %v8615_v50 }
  0xc5   : > { %959 = vmatpush.bf16.msrb.mxu3 %v892_v53  ;;  %1062 = vmatpush.bf16.msrb.mxu0 %v1047_v61 }
  0xc6   : > { %7298 = vmatmul.msk.bf16.vlgmr.msrb.gmra.mxu1 %vm409_vm3, %v8615_v50  ;;  %7326 = vmatmul.msk.bf16.vlgmr.msrb.gmra.mxu2 %vm409_vm3, %v8623_v52  ;;  %v1536_v37 = vpop.permute.xlu0 %1535 }
  0xc7   : > { %1120 = vmatpush.bf16.msrb.mxu2 %v1053_v58  ;;  %1091 = vmatpush.bf16.msrb.mxu1 %v1050_v62 }
  0xd4   : > { %7291 = vmatmul.msk.bf16.gmra.mxu3 %vm409_vm3, %v8616_v54  ;;  %7295 = vmatmul.msk.bf16.gmra.mxu0 %vm409_vm3, %v8616_v54 }
  0xd6   : > { %7299 = vmatmul.msk.bf16.gmra.mxu1 %vm409_vm3, %v8616_v54  ;;  %7327 = vmatmul.msk.bf16.gmra.mxu2 %vm409_vm3, %v8624_v55 }
  0xe4   : > { %7292 = vmatmul.msk.bf16.gmra.mxu3 %vm409_vm3, %v8617_v56  ;;  %7296 = vmatmul.msk.bf16.gmra.mxu0 %vm409_vm3, %v8617_v56 }
  0xe6   : > { %7300 = vmatmul.msk.bf16.gmra.mxu1 %vm409_vm3, %v8617_v56  ;;  %7328 = vmatmul.msk.bf16.gmra.mxu2 %vm409_vm3, %v8625_v57 }
  0xf4   : > { %7293 = vmatmul.msk.bf16.gmra.mxu3 %vm409_vm3, %v8618_v59  ;;  %7297 = vmatmul.msk.bf16.gmra.mxu0 %vm409_vm3, %v8618_v59 }
  0xf6   : > { %7301 = vmatmul.msk.bf16.gmra.mxu1 %vm409_vm3, %v8618_v59  ;;  %7329 = vmatmul.msk.bf16.gmra.mxu2 %vm409_vm3, %v8626_v60  ;;  %v8632_v59 = vld [vmem:[%s12739_s2 + $0x88] sm:$0xff] }
 0x104   : > { %7330 = vmatmul.msk.bf16.vlgmr.msra.gmra.mxu3 %vm409_vm3, %v8623_v52  ;;  %7334 = vmatmul.msk.bf16.vlgmr.msra.gmra.mxu0 %vm409_vm3, %v8623_v52 }
 0x105   : > { %1232 = vmatpush.bf16.msra.mxu3 %v1217_v15  ;;  %1261 = vmatpush.bf16.msra.mxu0 %v1220_v20 }
 0x106   : > { %7362 = vmatmul.msk.bf16.vlgmr.msra.gmra.mxu1 %vm409_vm3, %v9121_v63  ;;  %7366 = vmatmul.msk.bf16.vlgmr.msra.gmra.mxu2 %vm409_vm3, %v9121_v63 }
 0x107   : > { %1290 = vmatpush.bf16.msra.mxu1 %v1223_v18  ;;  %1402 = vmatpush.bf16.msra.mxu2 %v1387_v27  ;;  %v8633_v18 = vld [vmem:[%s12739_s2 + $0x90] sm:$0xff] }
 0x111   : > { %v9129_v0 = vpop.f32.mrf.mxu0 }
 0x113   : > { %v9136_v2 = vpop.f32.mrf.mxu1 }
 0x114   : > { %7331 = vmatmul.msk.bf16.gmra.mxu3 %vm409_vm3, %v8624_v55  ;;  %7335 = vmatmul.msk.bf16.gmra.mxu0 %vm409_vm3, %v8624_v55 }
 0x116   : > { %7363 = vmatmul.msk.bf16.gmra.mxu1 %vm409_vm3, %v9134_v1  ;;  %7367 = vmatmul.msk.bf16.gmra.mxu2 %vm409_vm3, %v9134_v1 }
 0x117   : > { %v9144_v3 = vpop.f32.mrf.mxu3 }
 0x119   : > { %v9146_v4 = vpop.f32.mrf.mxu2  ;;  %v9148_v5 = vpop.f32.mrf.mxu0 }
 0x11b   : > { %v9150_v6 = vpop.f32.mrf.mxu1 }
 0x11f   : > { %v9152_v8 = vpop.f32.mrf.mxu3 }
 0x121   : > { %v9154_v9 = vpop.f32.mrf.mxu2  ;;  %v470_v11 = vpop.f32.mrf.mxu0 }
 0x123   : > { %v9162_v14 = vpop.f32.mrf.mxu1 }
 0x124   : > { %7332 = vmatmul.msk.bf16.gmra.mxu3 %vm409_vm3, %v8625_v57  ;;  %7336 = vmatmul.msk.bf16.gmra.mxu0 %vm409_vm3, %v8625_v57 }
 0x126   : > { %7364 = vmatmul.msk.bf16.gmra.mxu1 %vm409_vm3, %v9159_v12  ;;  %7368 = vmatmul.msk.bf16.gmra.mxu2 %vm409_vm3, %v9159_v12 }
 0x127   : > { %v9173_v19 = vpop.f32.mrf.mxu3 }
 0x129   : > { %v9176_v21 = vpop.f32.mrf.mxu2  ;;  %v472_v22 = vpop.f32.mrf.mxu0 }
 0x12b   : > { %v9178_v24 = vpop.f32.mrf.mxu1 }
 0x12f   : > { %v9182_v28 = vpop.f32.mrf.mxu3 }
 0x131   : > { %v9184_v29 = vpop.f32.mrf.mxu2  ;;  %v499_v30 = vpop.f32.mrf.mxu0 }
 0x133   : > { %v9191_v32 = vpop.f32.mrf.mxu1 }
 0x134   : > { %7333 = vmatmul.msk.bf16.gmra.mxu3 %vm409_vm3, %v8626_v60  ;;  %7337 = vmatmul.msk.bf16.gmra.mxu0 %vm409_vm3, %v8626_v60 }
 0x136   : > { %7365 = vmatmul.msk.bf16.gmra.mxu1 %vm409_vm3, %v9189_v31  ;;  %7369 = vmatmul.msk.bf16.gmra.mxu2 %vm409_vm3, %v9189_v31 }
 0x137   : > { %v9199_v33 = vpop.f32.mrf.mxu3 }
 0x139   : > { %v9201_v34 = vpop.f32.mrf.mxu2  ;;  %v501_v35 = vpop.f32.mrf.mxu0 }
 0x13b   : > { %v9203_v36 = vpop.f32.mrf.mxu1 }
 0x13f   : > { %v9205_v38 = vpop.f32.mrf.mxu3 }
 0x141   : > { %v9207_v39 = vpop.f32.mrf.mxu2  ;;  %v610_v42 = vpop.f32.mrf.mxu0 }
 0x142   : > { %v9213_v43 = vadd.f32 %v610_v42, %v470_v11 }
 0x143   : > { %v639_v44 = vpop.f32.mrf.mxu1 }
 0x144   : > { %v9215_v45 = vadd.f32 %v639_v44, %v499_v30  ;;  %7370 = vmatmul.msk.bf16.vlgmr.msrb.gmra.mxu3 %vm409_vm3, %v9121_v63  ;;  %7398 = vmatmul.msk.bf16.vlgmr.msrb.gmra.mxu0 %vm409_vm3, %v8631_v40  ;;  %v1538_v30 = vpop.permute.xlu1 %1537 }
 0x145   : > { %1431 = vmatpush.bf16.msrb.mxu3 %v1390_v46  ;;  %1460 = vmatpush.bf16.msrb.mxu0 %v1393_v47  ;;  %v1542_v41 = vsel %vm1541_vm8, %v1536_v37, %v1538_v30 }
 0x146   : > { %7402 = vmatmul.msk.bf16.vlgmr.msrb.gmra.mxu1 %vm409_vm3, %v8631_v40  ;;  %7406 = vmatmul.msk.bf16.vlgmr.msrb.gmra.mxu2 %vm409_vm3, %v8631_v40  ;;  %v1557_v42 = vsel %vm422_vm2, %v1542_v41, 0 }
 0x147   : > { %v581_v48 = vpop.f32.mrf.mxu3  ;;  %1572 = vmatpush.bf16.msrb.mxu1 %v1557_v42 }
 0x148   : > { %v582_v49 = vadd.f32 %v581_v48, %v9129_v0 }
 0x149   : > { %v730_v50 = vpop.f32.mrf.mxu2  ;;  %v612_v51 = vpop.f32.mrf.mxu0 }
 0x14a   : > { %v9225_v52 = vadd.f32 %v730_v50, %v582_v49  ;;  %v9227_v53 = vadd.f32 %v612_v51, %v472_v22 }
 0x14b   : > { %v641_v54 = vpop.f32.mrf.mxu1 }
 0x14c   : > { %v9229_v55 = vadd.f32 %v641_v54, %v501_v35  ;;  %v1540_v35 = vpop.permute.xlu2 %1539 }
 0x14d   : > { %v1543_v40 = vsel %vm1541_vm8, %v1538_v30, %v1540_v35 }
 0x14f   : > { %v583_v56 = vpop.f32.mrf.mxu3 }
 0x150   : > { %v584_v57 = vadd.f32 %v583_v56, %v9148_v5 }
 0x151   : > { %v732_v58 = vpop.f32.mrf.mxu2  ;;  %v615_v60 = vpop.f32.mrf.mxu0 }
 0x152   : > { %v9235_v61 = vadd.f32 %v732_v58, %v584_v57  ;;  %v9238_v62 = vadd.f32 %v615_v60, %v9136_v2 }
 0x153   : > { %v644_v63 = vpop.f32.mrf.mxu1 }
 0x154   : > { %v9241_v0 = vadd.f32 %v644_v63, %v9146_v4  ;;  %7371 = vmatmul.msk.bf16.gmra.mxu3 %vm409_vm3, %v9134_v1  ;;  %7399 = vmatmul.msk.bf16.gmra.mxu0 %vm409_vm3, %v8632_v59 }
 0x156   : > { %7403 = vmatmul.msk.bf16.gmra.mxu1 %vm409_vm3, %v8632_v59  ;;  %7407 = vmatmul.msk.bf16.gmra.mxu2 %vm409_vm3, %v8632_v59 }
 0x157   : > { %v586_v5 = vpop.f32.mrf.mxu3 }
 0x158   : > { %v587_v7 = vadd.f32 %v586_v5, %v9144_v3  ;;  %v8635_v5 = vld [vmem:[%s12739_s2 + $0xa0] sm:$0xff] }
 0x159   : > { %v735_v10 = vpop.f32.mrf.mxu2  ;;  %v617_v11 = vpop.f32.mrf.mxu0 }
 0x15a   : > { %v9249_v2 = vadd.f32 %v735_v10, %v587_v7  ;;  %v9252_v13 = vadd.f32 %v617_v11, %v9150_v6  ;;  %v9320_v7 = vld [vmem:[%s12739_s2 + $0xc0] sm:$0xff] }
 0x15b   : > { %v646_v4 = vpop.f32.mrf.mxu1 }
 0x15c   : > { %v9255_v15 = vadd.f32 %v646_v4, %v9154_v9 }
 0x15f   : > { %v588_v1 = vpop.f32.mrf.mxu3 }
 0x160   : > { %v589_v16 = vadd.f32 %v588_v1, %v9152_v8 }
 0x161   : > { %v737_v17 = vpop.f32.mrf.mxu2  ;;  %v620_v3 = vpop.f32.mrf.mxu0 }
 0x162   : > { %v9261_v20 = vadd.f32 %v737_v17, %v589_v16  ;;  %v9264_v22 = vadd.f32 %v620_v3, %v9162_v14 }
 0x163   : > { %v649_v6 = vpop.f32.mrf.mxu1 }
 0x164   : > { %v9267_v23 = vadd.f32 %v649_v6, %v9176_v21  ;;  %7372 = vmatmul.msk.bf16.gmra.mxu3 %vm409_vm3, %v9159_v12  ;;  %7400 = vmatmul.msk.bf16.gmra.mxu0 %vm409_vm3, %v8633_v18 }
 0x166   : > { %7404 = vmatmul.msk.bf16.gmra.mxu1 %vm409_vm3, %v8633_v18  ;;  %7408 = vmatmul.msk.bf16.gmra.mxu2 %vm409_vm3, %v8633_v18 }
 0x167   : > { %v591_v8 = vpop.f32.mrf.mxu3 }
 0x168   : > { %v592_v9 = vadd.f32 %v591_v8, %v9173_v19  ;;  %v1560_v19 = vsel %vm422_vm2, %v1543_v40, 0 }
 0x169   : > { %v740_v25 = vpop.f32.mrf.mxu2  ;;  %v622_v26 = vpop.f32.mrf.mxu0  ;;  %1601 = vmatpush.bf16.msrb.mxu2 %v1560_v19 }
 0x16a   : > { %v9275_v14 = vadd.f32 %v740_v25, %v592_v9  ;;  %v9278_v27 = vadd.f32 %v622_v26, %v9178_v24  ;;  %v8636_v25 = vld [vmem:[%s12739_s2 + $0xa8] sm:$0xff] }
 0x16b   : > { %v651_v21 = vpop.f32.mrf.mxu1  ;;  %v9352_v26 = vld [vmem:[%s12739_s2 + $0xc8] sm:$0xff] }
 0x16c   : > { %v9281_v12 = vadd.f32 %v651_v21, %v9184_v29  ;;  %v8634_v29 = vld [vmem:[%s12739_s2 + $0x98] sm:$0xff] }
 0x16f   : > { %v593_v24 = vpop.f32.mrf.mxu3 }
 0x170   : > { %v594_v44 = vadd.f32 %v593_v24, %v9182_v28 }
 0x171   : > { %v742_v46 = vpop.f32.mrf.mxu2  ;;  %v625_v47 = vpop.f32.mrf.mxu0 }
 0x172   : > { %v9291_v48 = vadd.f32 %v742_v46, %v594_v44  ;;  %v9294_v49 = vadd.f32 %v625_v47, %v9191_v32  ;;  %v8637_v46 = vld [vmem:[%s12739_s2 + $0xb0] sm:$0xff] }
 0x173   : > { %v654_v50 = vpop.f32.mrf.mxu1 }
 0x174   : > { %v9297_v51 = vadd.f32 %v654_v50, %v9201_v34  ;;  %7373 = vmatmul.msk.bf16.gmra.mxu3 %vm409_vm3, %v9189_v31  ;;  %7401 = vmatmul.msk.bf16.gmra.mxu0 %vm409_vm3, %v8634_v29 }
 0x176   : > { %7405 = vmatmul.msk.bf16.gmra.mxu1 %vm409_vm3, %v8634_v29  ;;  %7409 = vmatmul.msk.bf16.gmra.mxu2 %vm409_vm3, %v8634_v29  ;;  %v9383_v29 = vld [vmem:[%s12739_s2 + $0xd0] sm:$0xff] }
 0x177   : > { %v596_v28 = vpop.f32.mrf.mxu3 }
 0x178   : > { %v597_v54 = vadd.f32 %v596_v28, %v9199_v33 }
 0x179   : > { %v745_v56 = vpop.f32.mrf.mxu2  ;;  %v627_v57 = vpop.f32.mrf.mxu0 }
 0x17a   : > { %v9305_v32 = vadd.f32 %v745_v56, %v597_v54  ;;  %v9308_v58 = vadd.f32 %v627_v57, %v9203_v36 }
 0x17b   : > { %v656_v34 = vpop.f32.mrf.mxu1 }
 0x17c   : > { %v9311_v59 = vadd.f32 %v656_v34, %v9207_v39  ;;  %v1710_v34 = vpop.permute.xlu1 %1709 }
 0x17f   : > { %v598_v31 = vpop.f32.mrf.mxu3 }
 0x180   : > { %v599_v60 = vadd.f32 %v598_v31, %v9205_v38  ;;  %v1563_v38 = vsel %vm422_vm2, %v1540_v35, 0 }
 0x181   : > { %v747_v63 = vpop.f32.mrf.mxu2  ;;  %v788_v33 = vpop.f32.mrf.mxu0 }
 0x182   : > { %v9322_v36 = vadd.f32 %v747_v63, %v599_v60  ;;  %v9325_v10 = vadd.f32 %v788_v33, %v9215_v45  ;;  %v1733_v60 = vsel %vm422_vm2, %v1710_v34, 0  ;;  %v1708_v63 = vpop.permute.xlu0 %1707 }
 0x183   : > { %v903_v39 = vpop.f32.mrf.mxu1  ;;  %v1713_v33 = vsel %vm1711_vm9, %v1708_v63, %v1710_v34 }
 0x184   : > { %v9328_v11 = vadd.f32 %v903_v39, %v9225_v52  ;;  %7434 = vmatmul.msk.bf16.vlgmr.msra.gmra.mxu3 %vm409_vm3, %v8635_v5  ;;  %7438 = vmatmul.msk.bf16.vlgmr.msra.gmra.mxu0 %vm409_vm3, %v8635_v5  ;;  %v1730_v39 = vsel %vm422_vm2, %v1713_v33, 0 }
 0x185   : > { %1630 = vmatpush.bf16.msra.mxu3 %v1563_v38 }
 0x186   : > { %7442 = vmatmul.msk.bf16.vlgmr.msra.gmra.mxu1 %vm409_vm3, %v8635_v5  ;;  %7470 = vmatmul.msk.bf16.vlgmr.msra.gmra.mxu2 %vm409_vm3, %v9320_v7  ;;  %v1706_v5 = vpop.permute.xlu2 %1705 }
 0x187   : > { %v759_v4 = vpop.f32.mrf.mxu3  ;;  %1800 = vmatpush.bf16.msra.mxu2 %v1733_v60  ;;  %1771 = vmatpush.bf16.msra.mxu1 %v1730_v39 }
 0x188   : > { %v809_v45 = vadd.f32 %v759_v4, %v9213_v43 }
 0x189   : > { %v932_v1 = vpop.f32.mrf.mxu2  ;;  %v790_v16 = vpop.f32.mrf.mxu0 }
 0x18a   : > { %v9337_v17 = vadd.f32 %v932_v1, %v809_v45  ;;  %v9340_v52 = vadd.f32 %v790_v16, %v9229_v55  ;;  %v8638_v45 = vld [vmem:[%s12739_s2 + $0xb8] sm:$0xff] }
 0x18b   : > { %v905_v18 = vpop.f32.mrf.mxu1  ;;  %v9419_v16 = vld [vmem:[%s12739_s2 + $0xd8] sm:$0xff] }
 0x18c   : > { %v9343_v3 = vadd.f32 %v905_v18, %v9235_v61 }
 0x18f   : > { %v761_v6 = vpop.f32.mrf.mxu3 }
 0x190   : > { %v812_v8 = vadd.f32 %v761_v6, %v9227_v53 }
 0x191   : > { %v934_v9 = vpop.f32.mrf.mxu2  ;;  %v793_v43 = vpop.f32.mrf.mxu0 }
 0x192   : > { %v9354_v55 = vadd.f32 %v934_v9, %v812_v8  ;;  %v9357_v21 = vadd.f32 %v793_v43, %v9241_v0 }
 0x193   : > { %v908_v61 = vpop.f32.mrf.mxu1 }
 0x194   : > { %v9360_v30 = vadd.f32 %v908_v61, %v9249_v2  ;;  %7435 = vmatmul.msk.bf16.gmra.mxu3 %vm409_vm3, %v8636_v25  ;;  %7439 = vmatmul.msk.bf16.gmra.mxu0 %vm409_vm3, %v8636_v25 }
 0x196   : > { %7443 = vmatmul.msk.bf16.gmra.mxu1 %vm409_vm3, %v8636_v25  ;;  %7471 = vmatmul.msk.bf16.gmra.mxu2 %vm409_vm3, %v9352_v26 }
 0x197   : > { %v764_v53 = vpop.f32.mrf.mxu3 }
 0x198   : > { %v815_v35 = vadd.f32 %v764_v53, %v9238_v62 }
 0x199   : > { %v937_v37 = vpop.f32.mrf.mxu2  ;;  %v795_v40 = vpop.f32.mrf.mxu0 }
 0x19a   : > { %v9368_v0 = vadd.f32 %v937_v37, %v815_v35  ;;  %v9371_v41 = vadd.f32 %v795_v40, %v9255_v15 }
 0x19b   : > { %v910_v2 = vpop.f32.mrf.mxu1 }
 0x19c   : > { %v9374_v19 = vadd.f32 %v910_v2, %v9261_v20 }
 0x19f   : > { %v766_v42 = vpop.f32.mrf.mxu3 }
 0x1a0   : > { %v818_v24 = vadd.f32 %v766_v42, %v9252_v13 }
 0x1a1   : > { %v939_v44 = vpop.f32.mrf.mxu2  ;;  %v798_v62 = vpop.f32.mrf.mxu0 }
 0x1a2   : > { %v9385_v15 = vadd.f32 %v939_v44, %v818_v24  ;;  %v9388_v47 = vadd.f32 %v798_v62, %v9267_v23 }
 0x1a3   : > { %v913_v20 = vpop.f32.mrf.mxu1 }
 0x1a4   : > { %v9391_v50 = vadd.f32 %v913_v20, %v9275_v14  ;;  %7436 = vmatmul.msk.bf16.gmra.mxu3 %vm409_vm3, %v8637_v46  ;;  %7440 = vmatmul.msk.bf16.gmra.mxu0 %vm409_vm3, %v8637_v46 }
 0x1a6   : > { %7444 = vmatmul.msk.bf16.gmra.mxu1 %vm409_vm3, %v8637_v46  ;;  %7472 = vmatmul.msk.bf16.gmra.mxu2 %vm409_vm3, %v9383_v29 }
 0x1a7   : > { %v769_v13 = vpop.f32.mrf.mxu3 }
 0x1a8   : > { %v821_v28 = vadd.f32 %v769_v13, %v9264_v22  ;;  %v1712_v22 = vsel %vm1711_vm9, %v1706_v5, %v1708_v63 }
 0x1a9   : > { %v942_v54 = vpop.f32.mrf.mxu2  ;;  %v800_v56 = vpop.f32.mrf.mxu0 }
 0x1aa   : > { %v9399_v23 = vadd.f32 %v942_v54, %v821_v28  ;;  %v9402_v57 = vadd.f32 %v800_v56, %v9281_v12  ;;  %v1727_v12 = vsel %vm422_vm2, %v1712_v22, 0 }
 0x1ab   : > { %v915_v14 = vpop.f32.mrf.mxu1  ;;  %1742 = vmatpush.bf16.msra.mxu0 %v1727_v12 }
 0x1ac   : > { %v9405_v31 = vadd.f32 %v915_v14, %v9291_v48 }
 0x1af   : > { %v771_v38 = vpop.f32.mrf.mxu3 }
 0x1b0   : > { %v824_v48 = vadd.f32 %v771_v38, %v9278_v27 }
 0x1b1   : > { %v944_v4 = vpop.f32.mrf.mxu2  ;;  %v803_v1 = vpop.f32.mrf.mxu0 }
 0x1b2   : > { %v9421_v18 = vadd.f32 %v944_v4, %v824_v48  ;;  %v9424_v6 = vadd.f32 %v803_v1, %v9297_v51 }
 0x1b3   : > { %v918_v8 = vpop.f32.mrf.mxu1 }
 0x1b4   : > { %v9427_v9 = vadd.f32 %v918_v8, %v9305_v32  ;;  %7437 = vmatmul.msk.bf16.gmra.mxu3 %vm409_vm3, %v8638_v45  ;;  %7441 = vmatmul.msk.bf16.gmra.mxu0 %vm409_vm3, %v8638_v45 }
 0x1b6   : > { %7445 = vmatmul.msk.bf16.gmra.mxu1 %vm409_vm3, %v8638_v45  ;;  %7473 = vmatmul.msk.bf16.gmra.mxu2 %vm409_vm3, %v9419_v16 }
 0x1b7   : > { %v774_v27 = vpop.f32.mrf.mxu3 }
 0x1b8   : > { %v827_v25 = vadd.f32 %v774_v27, %v9294_v49  ;;  %v9447_v49 = vld [vmem:[%s12739_s2 + $0xe0] sm:$0xff] }
 0x1b9   : > { %v947_v43 = vpop.f32.mrf.mxu2  ;;  %v805_v61 = vpop.f32.mrf.mxu0 }
 0x1ba   : > { %v9435_v51 = vadd.f32 %v947_v43, %v827_v25  ;;  %v9438_v53 = vadd.f32 %v805_v61, %v9311_v59 }
 0x1bb   : > { %v920_v32 = vpop.f32.mrf.mxu1 }
 0x1bc   : > { %v9441_v35 = vadd.f32 %v920_v32, %v9322_v36 }
 0x1bf   : > { %v776_v37 = vpop.f32.mrf.mxu3 }
 0x1c0   : > { %v830_v40 = vadd.f32 %v776_v37, %v9308_v58 }
 0x1c1   : > { %v949_v2 = vpop.f32.mrf.mxu2  ;;  %v1064_v42 = vpop.f32.mrf.mxu0 }
 0x1c2   : > { %v9449_v24 = vadd.f32 %v949_v2, %v830_v40  ;;  %v9452_v44 = vadd.f32 %v1064_v42, %v9328_v11  ;;  %v12746_v40 = vmov 0  }
 0x1c3   : > { %v1093_v59 = vpop.f32.mrf.mxu1  ;;  %8857 = vset.pattern.permute.xlu1 %v12746_v40  ;;  %307 = vst [vmem:[#allocation2] sm:$0xf] %v12746_v40  ;;  %8859 = vset.pattern.permute.xlu0 %v12746_v40 }
 0x1c4   : > { %v9455_v46 = vadd.f32 %v1093_v59, %v9337_v17  ;;  %7474 = vmatmul.msk.bf16.vlgmr.msrb.gmra.mxu3 %vm409_vm3, %v9320_v7  ;;  %7478 = vmatmul.msk.bf16.vlgmr.msrb.gmra.mxu0 %vm409_vm3, %v9320_v7  ;;  %308 = vst [vmem:[#allocation2 + $0x14] sm:$0xf] %v12746_v40 }
 0x1c5   : > { %8858 = vset.pattern.permute.xlu2 %v12746_v40  ;;  %309 = vst [vmem:[#allocation2 + $0x28] sm:$0xf] %v12746_v40 }
 0x1c6   : > { %7506 = vmatmul.msk.bf16.vlgmr.msrb.gmra.mxu1 %vm409_vm3, %v9447_v49  ;;  %7510 = vmatmul.msk.bf16.vlgmr.msrb.gmra.mxu2 %vm409_vm3, %v9447_v49  ;;  %310 = vst [vmem:[#allocation2 + $0x3c] sm:$0xf] %v12746_v40 }
 0x1c7   : > { %v961_v58 = vpop.f32.mrf.mxu3  ;;  %311 = vst [vmem:[#allocation2 + $0x50] sm:$0xf] %v12746_v40 }
 0x1c8   : > { %v983_v36 = vadd.f32 %v961_v58, %v9325_v10  ;;  %v9478_v10 = vld [vmem:[%s12739_s2 + $0xe8] sm:$0xff]  ;;  %312 = vst [vmem:[#allocation2 + $0x64] sm:$0xf] %v12746_v40 }
 0x1c9   : > { %v1122_v11 = vpop.f32.mrf.mxu2  ;;  %v1066_v62 = vpop.f32.mrf.mxu0  ;;  %313 = vst [vmem:[#allocation2 + $0x78] sm:$0xf] %v12746_v40 }
 0x1ca   : > { %v9466_v20 = vadd.f32 %v1122_v11, %v983_v36  ;;  %v9469_v17 = vadd.f32 %v1066_v62, %v9343_v3  ;;  %314 = vst [vmem:[#allocation2 + $0x8c] sm:$0xf] %v12746_v40 }
 0x1cb   : > { %v1095_v13 = vpop.f32.mrf.mxu1  ;;  %315 = vst [vmem:[#allocation3] sm:$0xf] %v12746_v40 }
 0x1cc   : > { %v9472_v28 = vadd.f32 %v1095_v13, %v9354_v55  ;;  %316 = vst [vmem:[#allocation3 + $0x14] sm:$0xf] %v12746_v40 }
 0x1cd   : > { %317 = vst [vmem:[#allocation3 + $0x28] sm:$0xf] %v12746_v40 }
 0x1ce   : > { %318 = vst [vmem:[#allocation3 + $0x3c] sm:$0xf] %v12746_v40 }
 0x1cf   : > { %v963_v7 = vpop.f32.mrf.mxu3  ;;  %319 = vst [vmem:[#allocation3 + $0x50] sm:$0xf] %v12746_v40 }
 0x1d0   : > { %v986_v54 = vadd.f32 %v963_v7, %v9340_v52  ;;  %320 = vst [vmem:[#allocation3 + $0x64] sm:$0xf] %v12746_v40  ;;  %v8647_v7 = vld [vmem:[%s12739_s2 + $0x100] sm:$0xff] }
 0x1d1   : > { %v1124_v56 = vpop.f32.mrf.mxu2  ;;  %v1069_v14 = vpop.f32.mrf.mxu0  ;;  %321 = vst [vmem:[#allocation3 + $0x78] sm:$0xf] %v12746_v40 }
 0x1d2   : > { %v9480_v34 = vadd.f32 %v1124_v56, %v986_v54  ;;  %v9483_v60 = vadd.f32 %v1069_v14, %v9360_v30  ;;  %322 = vst [vmem:[#allocation3 + $0x8c] sm:$0xf] %v12746_v40  ;;  %v342_v54 = vld [vmem:[%s12740_s3 + $0x10] sm:$0xff] }
 0x1d3   : > { %v1098_v3 = vpop.f32.mrf.mxu1  ;;  %331 = vst [vmem:[#allocation3 + $0xc] sm:$0xff] %v12746_v40  ;;  %1858 = vperm.xlu0 %8859, %v342_v54  }
 0x1d4   : > { %v9486_v63 = vadd.f32 %v1098_v3, %v9368_v0  ;;  %7475 = vmatmul.msk.bf16.gmra.mxu3 %vm409_vm3, %v9352_v26  ;;  %7479 = vmatmul.msk.bf16.gmra.mxu0 %vm409_vm3, %v9352_v26  ;;  %332 = vst [vmem:[#allocation3 + $0x20] sm:$0xff] %v12746_v40 }
 0x1d5   : > { %333 = vst [vmem:[#allocation3 + $0x34] sm:$0xff] %v12746_v40 }
 0x1d6   : > { %7507 = vmatmul.msk.bf16.gmra.mxu1 %vm409_vm3, %v9478_v10  ;;  %7511 = vmatmul.msk.bf16.gmra.mxu2 %vm409_vm3, %v9478_v10  ;;  %334 = vst [vmem:[#allocation3 + $0x48] sm:$0xff] %v12746_v40 }
 0x1d7   : > { %v966_v52 = vpop.f32.mrf.mxu3  ;;  %335 = vst [vmem:[#allocation3 + $0x5c] sm:$0xff] %v12746_v40 }
 0x1d8   : > { %v989_v55 = vadd.f32 %v966_v52, %v9357_v21  ;;  %v9509_v21 = vld [vmem:[%s12739_s2 + $0xf0] sm:$0xff]  ;;  %336 = vst [vmem:[#allocation3 + $0x70] sm:$0xff] %v12746_v40 }
 0x1d9   : > { %v1127_v30 = vpop.f32.mrf.mxu2  ;;  %v1071_v5 = vpop.f32.mrf.mxu0  ;;  %337 = vst [vmem:[#allocation3 + $0x84] sm:$0xff] %v12746_v40 }
 0x1da   : > { %v9497_v33 = vadd.f32 %v1127_v30, %v989_v55  ;;  %v9500_v0 = vadd.f32 %v1071_v5, %v9374_v19  ;;  %338 = vst [vmem:[#allocation3 + $0x98] sm:$0xff] %v12746_v40  ;;  %v343_v55 = vld [vmem:[%s12740_s3 + $0x18] sm:$0xff] }
 0x1db   : > { %v1100_v22 = vpop.f32.mrf.mxu1  ;;  %323 = vst [vmem:[#allocation2 + $0xc] sm:$0xff] %v12746_v40 }
 0x1dc   : > { %v9503_v39 = vadd.f32 %v1100_v22, %v9385_v15  ;;  %324 = vst [vmem:[#allocation2 + $0x20] sm:$0xff] %v12746_v40 }
 0x1dd   : > { %325 = vst [vmem:[#allocation2 + $0x34] sm:$0xff] %v12746_v40 }
 0x1de   : > { %326 = vst [vmem:[#allocation2 + $0x48] sm:$0xff] %v12746_v40 }
 0x1df   : > { %v968_v26 = vpop.f32.mrf.mxu3  ;;  %327 = vst [vmem:[#allocation2 + $0x5c] sm:$0xff] %v12746_v40 }
 0x1e0   : > { %v992_v12 = vadd.f32 %v968_v26, %v9371_v41  ;;  %328 = vst [vmem:[#allocation2 + $0x70] sm:$0xff] %v12746_v40 }
 0x1e1   : > { %v1129_v38 = vpop.f32.mrf.mxu2  ;;  %v1074_v48 = vpop.f32.mrf.mxu0  ;;  %329 = vst [vmem:[#allocation2 + $0x84] sm:$0xff] %v12746_v40 }
 0x1e2   : > { %v9511_v4 = vadd.f32 %v1129_v38, %v992_v12  ;;  %v9514_v45 = vadd.f32 %v1074_v48, %v9391_v50  ;;  %330 = vst [vmem:[#allocation2 + $0x98] sm:$0xff] %v12746_v40  ;;  %v341_v48 = vld [vmem:[%s12740_s3 + $0x8] sm:$0xff] }
 0x1e3   : > { %v1103_v19 = vpop.f32.mrf.mxu1  ;;  %1853 = vperm.xlu2 %8858, %v341_v48  }
 0x1e4   : > { %v9517_v1 = vadd.f32 %v1103_v19, %v9399_v23  ;;  %7476 = vmatmul.msk.bf16.gmra.mxu3 %vm409_vm3, %v9383_v29  ;;  %7480 = vmatmul.msk.bf16.gmra.mxu0 %vm409_vm3, %v9383_v29 }
 0x1e6   : > { %7508 = vmatmul.msk.bf16.gmra.mxu1 %vm409_vm3, %v9509_v21  ;;  %7512 = vmatmul.msk.bf16.gmra.mxu2 %vm409_vm3, %v9509_v21 }
 0x1e7   : > { %v971_v41 = vpop.f32.mrf.mxu3 }
 0x1e8   : > { %v995_v15 = vadd.f32 %v971_v41, %v9388_v47  ;;  %v9540_v47 = vld [vmem:[%s12739_s2 + $0xf8] sm:$0xff] }
 0x1e9   : > { %v1132_v50 = vpop.f32.mrf.mxu2  ;;  %v1076_v8 = vpop.f32.mrf.mxu0 }
 0x1ea   : > { %v9528_v27 = vadd.f32 %v1132_v50, %v995_v15  ;;  %v9531_v23 = vadd.f32 %v1076_v8, %v9405_v31  ;;  %v340_v31 = vld [vmem:[%s12740_s3] sm:$0xff] }
 0x1eb   : > { %v1105_v25 = vpop.f32.mrf.mxu1  ;;  %1848 = vperm.xlu1 %8857, %v340_v31  }
 0x1ec   : > { %v9534_v43 = vadd.f32 %v1105_v25, %v9421_v18 }
 0x1ef   : > { %v973_v29 = vpop.f32.mrf.mxu3 }
 0x1f0   : > { %v998_v61 = vadd.f32 %v973_v29, %v9402_v57  ;;  %v345_v29 = vld [vmem:[%s12740_s3 + $0x28] sm:$0xff] }
 0x1f1   : > { %v1134_v32 = vpop.f32.mrf.mxu2  ;;  %v1079_v37 = vpop.f32.mrf.mxu0 }
 0x1f2   : > { %v9548_v18 = vadd.f32 %v1134_v32, %v998_v61  ;;  %v9551_v57 = vadd.f32 %v1079_v37, %v9427_v9 }
 0x1f3   : > { %v1108_v2 = vpop.f32.mrf.mxu1  ;;  %1863 = vperm.xlu1 %8857, %v343_v55  }
 0x1f4   : > { %v9556_v42 = vadd.f32 %v1108_v2, %v9435_v51  ;;  %7477 = vmatmul.msk.bf16.gmra.mxu3 %vm409_vm3, %v9419_v16  ;;  %7481 = vmatmul.msk.bf16.gmra.mxu0 %vm409_vm3, %v9419_v16  ;;  %v8649_v2 = vld [vmem:[%s12739_s2 + $0x110] sm:$0xff] }
 0x1f6   : > { %7509 = vmatmul.msk.bf16.gmra.mxu1 %vm409_vm3, %v9540_v47  ;;  %7513 = vmatmul.msk.bf16.gmra.mxu2 %vm409_vm3, %v9540_v47 }
 0x1f7   : > { %v976_v9 = vpop.f32.mrf.mxu3 }
 0x1f8   : > { %v1001_v51 = vadd.f32 %v976_v9, %v9424_v6 }
 0x1f9   : > { %v1137_v59 = vpop.f32.mrf.mxu2  ;;  %v1081_v16 = vpop.f32.mrf.mxu0 }
 0x1fa   : > { %v9574_v58 = vadd.f32 %v1137_v59, %v1001_v51  ;;  %v9577_v36 = vadd.f32 %v1081_v16, %v9441_v35 }
 0x1fb   : > { %v1110_v11 = vpop.f32.mrf.mxu1  ;;  %1873 = vperm.xlu1 %8857, %v345_v29  }
 0x1fc   : > { %v9581_v62 = vadd.f32 %v1110_v11, %v9449_v24 }
 0x1ff   : > { %v978_v6 = vpop.f32.mrf.mxu3 }
 0x200   : > { %v1004_v35 = vadd.f32 %v978_v6, %v9438_v53 }
 0x201   : > { %v1139_v13 = vpop.f32.mrf.mxu2  ;;  %v1263_v24 = vpop.f32.mrf.mxu0 }
 0x202   : > { %v9597_v56 = vadd.f32 %v1139_v13, %v1004_v35  ;;  %v9600_v14 = vadd.f32 %v1263_v24, %v9455_v46 }
 0x203   : > { %v1292_v53 = vpop.f32.mrf.mxu1 }
 0x204   : > { %v9604_v3 = vadd.f32 %v1292_v53, %v9466_v20  ;;  %7514 = vmatmul.msk.bf16.vlgmr.msra.gmra.mxu3 %vm409_vm3, %v9447_v49  ;;  %7542 = vmatmul.msk.bf16.vlgmr.msra.gmra.mxu0 %vm409_vm3, %v8647_v7  ;;  %v8650_v53 = vld [vmem:[%s12739_s2 + $0x118] sm:$0xff] }
 0x206   : > { %7546 = vmatmul.msk.bf16.vlgmr.msra.gmra.mxu1 %vm409_vm3, %v8647_v7  ;;  %7550 = vmatmul.msk.bf16.vlgmr.msra.gmra.mxu2 %vm409_vm3, %v8647_v7 }
 0x207   : > { %v1234_v46 = vpop.f32.mrf.mxu3 }
 0x208   : > { %v1312_v20 = vadd.f32 %v1234_v46, %v9452_v44 }
 0x209   : > { %v1404_v52 = vpop.f32.mrf.mxu2  ;;  %v1265_v49 = vpop.f32.mrf.mxu0 }
 0x20a   : > { %v9622_v30 = vadd.f32 %v1404_v52, %v1312_v20  ;;  %v9625_v5 = vadd.f32 %v1265_v49, %v9472_v28 }
 0x20b   : > { %v1294_v22 = vpop.f32.mrf.mxu1 }
 0x20c   : > { %v9629_v44 = vadd.f32 %v1294_v22, %v9480_v34  ;;  %v8648_v34 = vld [vmem:[%s12739_s2 + $0x108] sm:$0xff] }
 0x20f   : > { %v1236_v26 = vpop.f32.mrf.mxu3 }
 0x210   : > { %v1315_v28 = vadd.f32 %v1236_v26, %v9469_v17 }
 0x211   : > { %v1406_v12 = vpop.f32.mrf.mxu2  ;;  %v1268_v38 = vpop.f32.mrf.mxu0 }
 0x212   : > { %v9644_v19 = vadd.f32 %v1406_v12, %v1315_v28  ;;  %v9647_v41 = vadd.f32 %v1268_v38, %v9486_v63 }
 0x213   : > { %v1297_v15 = vpop.f32.mrf.mxu1 }
 0x214   : > { %v9650_v17 = vadd.f32 %v1297_v15, %v9497_v33  ;;  %7515 = vmatmul.msk.bf16.gmra.mxu3 %vm409_vm3, %v9478_v10  ;;  %7543 = vmatmul.msk.bf16.gmra.mxu0 %vm409_vm3, %v8648_v34 }
 0x216   : > { %7547 = vmatmul.msk.bf16.gmra.mxu1 %vm409_vm3, %v8648_v34  ;;  %7551 = vmatmul.msk.bf16.gmra.mxu2 %vm409_vm3, %v8648_v34 }
 0x217   : > { %v1239_v50 = vpop.f32.mrf.mxu3 }
 0x218   : > { %v1318_v8 = vadd.f32 %v1239_v50, %v9483_v60 }
 0x219   : > { %v1409_v25 = vpop.f32.mrf.mxu2  ;;  %v1270_v63 = vpop.f32.mrf.mxu0 }
 0x21a   : > { %v9661_v33 = vadd.f32 %v1409_v25, %v1318_v8  ;;  %v9664_v61 = vadd.f32 %v1270_v63, %v9503_v39 }
 0x21b   : > { %v1299_v10 = vpop.f32.mrf.mxu1 }
 0x21c   : > { %v9667_v32 = vadd.f32 %v1299_v10, %v9511_v4 }
 0x21f   : > { %v1241_v37 = vpop.f32.mrf.mxu3 }
 0x220   : > { %v1321_v31 = vadd.f32 %v1241_v37, %v9500_v0 }
 0x221   : > { %v1411_v60 = vpop.f32.mrf.mxu2  ;;  %v1273_v9 = vpop.f32.mrf.mxu0 }
 0x222   : > { %v9673_v51 = vadd.f32 %v1411_v60, %v1321_v31  ;;  %v9676_v59 = vadd.f32 %v1273_v9, %v9517_v1  ;;  %v344_v1 = vld [vmem:[%s12740_s3 + $0x20] sm:$0xff] }
 0x223   : > { %v1302_v39 = vpop.f32.mrf.mxu1  ;;  %1868 = vperm.xlu2 %8858, %v344_v1  }
 0x224   : > { %v9679_v16 = vadd.f32 %v1302_v39, %v9528_v27  ;;  %7516 = vmatmul.msk.bf16.gmra.mxu3 %vm409_vm3, %v9509_v21  ;;  %7544 = vmatmul.msk.bf16.gmra.mxu0 %vm409_vm3, %v8649_v2  ;;  %v347_v27 = vld [vmem:[%s12740_s3 + $0x38] sm:$0xff] }
 0x225   : > { %1883 = vperm.xlu0 %8859, %v347_v27  }
 0x226   : > { %7548 = vmatmul.msk.bf16.gmra.mxu1 %vm409_vm3, %v8649_v2  ;;  %7552 = vmatmul.msk.bf16.gmra.mxu2 %vm409_vm3, %v8649_v2 }
 0x227   : > { %v1244_v0 = vpop.f32.mrf.mxu3 }
 0x228   : > { %v1324_v4 = vadd.f32 %v1244_v0, %v9514_v45 }
 0x229   : > { %v1414_v11 = vpop.f32.mrf.mxu2  ;;  %v1275_v6 = vpop.f32.mrf.mxu0 }
 0x22a   : > { %v9693_v21 = vadd.f32 %v1414_v11, %v1324_v4  ;;  %v9696_v35 = vadd.f32 %v1275_v6, %v9534_v43 }
 0x22b   : > { %v1304_v13 = vpop.f32.mrf.mxu1 }
 0x22c   : > { %v1329_v45 = vadd.f32 %v1304_v13, %v9548_v18 }
 0x22f   : > { %v1246_v7 = vpop.f32.mrf.mxu3 }
 0x230   : > { %v1327_v24 = vadd.f32 %v1246_v7, %v9531_v23 }
 0x231   : > { %v1416_v54 = vpop.f32.mrf.mxu2  ;;  %v1278_v46 = vpop.f32.mrf.mxu0 }
 0x232   : > { %v9703_v20 = vadd.f32 %v1416_v54, %v1327_v24  ;;  %v9706_v52 = vadd.f32 %v1278_v46, %v9556_v42  ;;  %v346_v42 = vld [vmem:[%s12740_s3 + $0x30] sm:$0xff] }
 0x233   : > { %v1307_v43 = vpop.f32.mrf.mxu1  ;;  %1878 = vperm.xlu2 %8858, %v346_v42  }
 0x234   : > { %v1332_v49 = vadd.f32 %v1307_v43, %v9574_v58  ;;  %7517 = vmatmul.msk.bf16.gmra.mxu3 %vm409_vm3, %v9540_v47  ;;  %7545 = vmatmul.msk.bf16.gmra.mxu0 %vm409_vm3, %v8650_v53 }
 0x236   : > { %7549 = vmatmul.msk.bf16.gmra.mxu1 %vm409_vm3, %v8650_v53  ;;  %7553 = vmatmul.msk.bf16.gmra.mxu2 %vm409_vm3, %v8650_v53 }
 0x237   : > { %v1249_v23 = vpop.f32.mrf.mxu3 }
 0x238   : > { %v1330_v18 = vadd.f32 %v1249_v23, %v9551_v57 }
 0x239   : > { %v1419_v55 = vpop.f32.mrf.mxu2  ;;  %v1280_v22 = vpop.f32.mrf.mxu0 }
 0x23a   : > { %v9718_v26 = vadd.f32 %v1419_v55, %v1330_v18  ;;  %v9721_v58 = vadd.f32 %v1280_v22, %v9581_v62 }
 0x23b   : > { %v1309_v47 = vpop.f32.mrf.mxu1 }
 0x23c   : > { %v1335_v28 = vadd.f32 %v1309_v47, %v9597_v56 }
 0x23d   : > { %v1854_v40 = vpop.permute.xlu2 %1853 }
 0x23f   : > { %v1251_v12 = vpop.f32.mrf.mxu3 }
 0x240   : > { %v1333_v34 = vadd.f32 %v1251_v12, %v9577_v36 }
 0x241   : > { %v1421_v38 = vpop.f32.mrf.mxu2  ;;  %v1462_v57 = vpop.f32.mrf.mxu0 }
 0x242   : > { %v9725_v48 = vadd.f32 %v1421_v38, %v1333_v34  ;;  %v1484_v15 = vadd.f32 %v1462_v57, %v9604_v3 }
 0x243   : > { %v1574_v50 = vpop.f32.mrf.mxu1 }
 0x244   : > { %v1652_v42 = vadd.f32 %v1574_v50, %v9622_v30 }
 0x247   : > { %v1433_v8 = vpop.f32.mrf.mxu3 }
 0x248   : > { %v1483_v55 = vadd.f32 %v1433_v8, %v9600_v14 }
 0x249   : > { %v1603_v25 = vpop.f32.mrf.mxu2  ;;  %v1464_v63 = vpop.f32.mrf.mxu0 }
 0x24a   : > { %v9729_v62 = vadd.f32 %v1464_v63, %v9629_v44  ;;  %v1653_v12 = vadd.f32 %v1603_v25, %v1483_v55 }
 0x24b   : > { %v1576_v29 = vpop.f32.mrf.mxu1 }
 0x24c   : > { %v1655_v25 = vadd.f32 %v1576_v29, %v9644_v19 }
 0x24f   : > { %v1435_v10 = vpop.f32.mrf.mxu3 }
 0x250   : > { %v1486_v8 = vadd.f32 %v1435_v10, %v9625_v5 }
 0x251   : > { %v1605_v37 = vpop.f32.mrf.mxu2  ;;  %v1467_v56 = vpop.f32.mrf.mxu0 }
 0x252   : > { %v9732_v31 = vadd.f32 %v1467_v56, %v9650_v17  ;;  %v1656_v55 = vadd.f32 %v1605_v37, %v1486_v8 }
 0x253   : > { %v9734_v36 = vpop.f32.mrf.mxu1 }
 0x257   : > { %v1438_v60 = vpop.f32.mrf.mxu3 }
 0x259   : > { %v9736_v2 = vpop.f32.mrf.mxu2  ;;  %v1469_v3 = vpop.f32.mrf.mxu0 }
 0x25a   : > { %v9739_v9 = vadd.f32 %v1469_v3, %v9667_v32 }
 0x25b   : > { %v9741_v39 = vpop.f32.mrf.mxu1 }
 0x25d   : > { %v1849_v38 = vpop.permute.xlu1 %1848 }
 0x25f   : > { %v9743_v44 = vpop.f32.mrf.mxu3 }
 0x261   : > { %v9745_v0 = vpop.f32.mrf.mxu2  ;;  %v1472_v4 = vpop.f32.mrf.mxu0 }
 0x262   : > { %v9748_v11 = vadd.f32 %v1472_v4, %v9679_v16 }
 0x263   : > { %v9750_v17 = vpop.f32.mrf.mxu1 }
 0x267   : > { %v9752_v6 = vpop.f32.mrf.mxu3 }
 0x269   : > { %v9754_v1 = vpop.f32.mrf.mxu2  ;;  %v1474_v27 = vpop.f32.mrf.mxu0 }
 0x26a   : > { %v9756_v13 = vadd.f32 %v1474_v27, %v1329_v45 }
 0x26b   : > { %v9758_v32 = vpop.f32.mrf.mxu1 }
 0x26f   : > { %v9760_v7 = vpop.f32.mrf.mxu3 }
 0x271   : > { %v9762_v24 = vpop.f32.mrf.mxu2  ;;  %v1477_v54 = vpop.f32.mrf.mxu0 }
 0x272   : > { %v9764_v53 = vadd.f32 %v1477_v54, %v1332_v49  ;;  %v339_v49 = vld [vmem:[%s12738_s1] sm:$0x7] }
 0x273   : > { %v9766_v16 = vpop.f32.mrf.mxu1  ;;  %v9785_v63 = vperm.slane %v339_v49, 0  ;;  %v9787_v3 = vperm.slane %v339_v49, 1 }
 0x277   : > { %v9768_v46 = vpop.f32.mrf.mxu3 }
 0x279   : > { %v9770_v43 = vpop.f32.mrf.mxu2  ;;  %v1479_v23 = vpop.f32.mrf.mxu0 }
 0x27a   : > { %v9772_v18 = vadd.f32 %v1479_v23, %v1335_v28 }
 0x27b   : > { %v9774_v45 = vpop.f32.mrf.mxu1 }
 0x27c   : > { %12759 = vst [vmem:[#allocation4_spill] sm:$0xff] %v9772_v18 }
 0x27f   : > { %v9777_v22 = vpop.f32.mrf.mxu3 }
 0x281   : > { %v9783_v47 = vpop.f32.mrf.mxu2  ;;  %v1744_v34 = vpop.f32.mrf.mxu0 }
 0x282   : > { %v1822_v57 = vadd.f32 %v1744_v34, %v1652_v42 }
 0x283   : > { %v1773_v28 = vpop.f32.mrf.mxu1 }
 0x284   : > { %v1823_v56 = vadd.f32 %v1773_v28, %v1653_v12  ;;  %v1886_v14 = vadd.f32 %v1849_v38, %v1822_v57  ;;  %v9793_v28 = vperm.slane %v339_v49, 2  ;;  %v1658_v49 = vadd.f32 %v9734_v36, %v9661_v33 }
 0x285   : > { %v1492_v33 = vadd.f32 %v9743_v44, %v9664_v61  ;;  %v1864_v61 = vpop.permute.xlu1 %1863 }
 0x286   : > { %v1887_v4 = vadd.f32 %v1849_v38, %v1823_v56  ;;  %v1917_v27 = vmul.f32 %v9785_v63, %v1886_v14  ;;  %v1489_v14 = vadd.f32 %v1438_v60, %v9647_v41  ;;  %v1859_v60 = vpop.permute.xlu0 %1858 }
 0x287   : > { %v1632_v50 = vpop.f32.mrf.mxu3 }
 0x288   : > { %v1918_v30 = vmul.f32 %v9787_v3, %v1887_v4  ;;  %v1654_v54 = vadd.f32 %v1632_v50, %v1484_v15 }
 0x289   : > { %v1802_v23 = vpop.f32.mrf.mxu2  ;;  %v1746_v34 = vpop.f32.mrf.mxu0 }
 0x28a   : > { %v1941_v42 = vpack.c.bf16 %v1918_v30, %v1917_v27  ;;  %v1824_v12 = vadd.f32 %v1802_v23, %v1654_v54  ;;  %v1825_v57 = vadd.f32 %v1746_v34, %v1655_v25 }
 0x28b   : > { %v1775_v18 = vpop.f32.mrf.mxu1 }
 0x28c   : > { %1957 = vst [vmem:[#allocation2 + $0x4] sm:$0xff] %v1941_v42  ;;  %v1826_v5 = vadd.f32 %v1775_v18, %v1656_v55  ;;  %v1888_v10 = vadd.f32 %v1849_v38, %v1824_v12  ;;  %v1889_v56 = vadd.f32 %v1854_v40, %v1825_v57  ;;  %v1659_v38 = vadd.f32 %v9736_v2, %v1489_v14 }
 0x28d   : > { %v1661_v57 = vadd.f32 %v9741_v39, %v9673_v51  ;;  %v1495_v51 = vadd.f32 %v9752_v6, %v9676_v59  ;;  %v1869_v59 = vpop.permute.xlu2 %1868 }
 0x28e   : > { %v1890_v4 = vadd.f32 %v1854_v40, %v1826_v5  ;;  %v1919_v19 = vmul.f32 %v9793_v28, %v1888_v10  ;;  %v1920_v15 = vmul.f32 %v9785_v63, %v1889_v56 }
 0x28f   : > { %v1634_v37 = vpop.f32.mrf.mxu3 }
 0x290   : > { %v1921_v29 = vmul.f32 %v9787_v3, %v1890_v4  ;;  %v1942_v8 = vpack.c.bf16 %v1919_v19, %v1919_v19  ;;  %v1657_v27 = vadd.f32 %v1634_v37, %v9729_v62 }
 0x291   : > { %v1804_v18 = vpop.f32.mrf.mxu2  ;;  %v1749_v41 = vpop.f32.mrf.mxu0 }
 0x292   : > { %v1943_v30 = vpack.c.bf16 %v1921_v29, %v1920_v15  ;;  %1959 = vst.msk [vmem:[#allocation2 + $0xc] sm:$0xf] %vm1958_vm10, %v1942_v8  ;;  %v1827_v50 = vadd.f32 %v1804_v18, %v1657_v27  ;;  %v1828_v25 = vadd.f32 %v1749_v41, %v1658_v49  ;;  %v1664_v18 = vadd.f32 %v9750_v17, %v9693_v21 }
 0x293   : > { %v1778_v54 = vpop.f32.mrf.mxu1  ;;  %v1498_v21 = vadd.f32 %v9760_v7, %v9696_v35  ;;  %v1874_v35 = vpop.permute.xlu1 %1873 }
 0x294   : > { %1960 = vst [vmem:[#allocation2 + $0x18] sm:$0xff] %v1943_v30  ;;  %v1829_v23 = vadd.f32 %v1778_v54, %v1659_v38  ;;  %v1891_v55 = vadd.f32 %v1854_v40, %v1827_v50  ;;  %v1892_v42 = vadd.f32 %v1859_v60, %v1828_v25  ;;  %v1662_v40 = vadd.f32 %v9745_v0, %v1492_v33 }
 0x296   : > { %v1893_v36 = vadd.f32 %v1859_v60, %v1829_v23  ;;  %v1922_v62 = vmul.f32 %v9793_v28, %v1891_v55  ;;  %v1923_v2 = vmul.f32 %v9785_v63, %v1892_v42 }
 0x297   : > { %v1637_v12 = vpop.f32.mrf.mxu3 }
 0x298   : > { %v1924_v34 = vmul.f32 %v9787_v3, %v1893_v36  ;;  %v1944_v5 = vpack.c.bf16 %v1922_v62, %v1922_v62  ;;  %v1660_v10 = vadd.f32 %v1637_v12, %v9732_v31 }
 0x299   : > { %v1807_v56 = vpop.f32.mrf.mxu2  ;;  %v1751_v4 = vpop.f32.mrf.mxu0 }
 0x29a   : > { %v1945_v14 = vpack.c.bf16 %v1924_v34, %v1923_v2  ;;  %1961 = vst.msk [vmem:[#allocation2 + $0x20] sm:$0xf] %vm1958_vm10, %v1944_v5  ;;  %v1830_v44 = vadd.f32 %v1807_v56, %v1660_v10  ;;  %v1831_v19 = vadd.f32 %v1751_v4, %v1661_v57  ;;  %v1667_v2 = vadd.f32 %v9758_v32, %v9703_v20 }
 0x29b   : > { %v1780_v15 = vpop.f32.mrf.mxu1  ;;  %v1668_v5 = vadd.f32 %v9762_v24, %v1498_v21  ;;  %v1501_v20 = vadd.f32 %v9768_v46, %v9706_v52  ;;  %v1879_v52 = vpop.permute.xlu2 %1878 }
 0x29c   : > { %1962 = vst [vmem:[#allocation2 + $0x2c] sm:$0xff] %v1945_v14  ;;  %v1832_v29 = vadd.f32 %v1780_v15, %v1662_v40  ;;  %v1894_v37 = vadd.f32 %v1859_v60, %v1830_v44  ;;  %v1895_v49 = vadd.f32 %v1864_v61, %v1831_v19  ;;  %v1665_v60 = vadd.f32 %v9754_v1, %v1495_v51 }
 0x29e   : > { %v1896_v39 = vadd.f32 %v1864_v61, %v1832_v29  ;;  %v1925_v31 = vmul.f32 %v9793_v28, %v1894_v37  ;;  %v1926_v0 = vmul.f32 %v9785_v63, %v1895_v49  ;;  %v1670_v29 = vadd.f32 %v9766_v16, %v9718_v26 }
 0x29f   : > { %v1639_v27 = vpop.f32.mrf.mxu3  ;;  %v1504_v26 = vadd.f32 %v9777_v22, %v9721_v58  ;;  %v1884_v58 = vpop.permute.xlu0 %1883 }
 0x2a0   : > { %v1927_v8 = vmul.f32 %v9787_v3, %v1896_v39  ;;  %v1946_v38 = vpack.c.bf16 %v1925_v31, %v1925_v31  ;;  %v1663_v30 = vadd.f32 %v1639_v27, %v9739_v9  ;;  %v1671_v39 = vadd.f32 %v9770_v43, %v1501_v20 }
 0x2a1   : > { %v1809_v41 = vpop.f32.mrf.mxu2  ;;  %v1754_v25 = vpop.f32.mrf.mxu0 }
 0x2a2   : > { %v1947_v50 = vpack.c.bf16 %v1927_v8, %v1926_v0  ;;  %1963 = vst.msk [vmem:[#allocation2 + $0x34] sm:$0xf] %vm1958_vm10, %v1946_v38  ;;  %v1833_v6 = vadd.f32 %v1809_v41, %v1663_v30  ;;  %v1834_v54 = vadd.f32 %v1754_v25, %v1664_v18 }
 0x2a3   : > { %v1783_v23 = vpop.f32.mrf.mxu1 }
 0x2a4   : > { %1964 = vst [vmem:[#allocation2 + $0x40] sm:$0xff] %v1947_v50  ;;  %v1835_v55 = vadd.f32 %v1783_v23, %v1665_v60  ;;  %v1897_v42 = vadd.f32 %v1864_v61, %v1833_v6  ;;  %v1898_v33 = vadd.f32 %v1869_v59, %v1834_v54  ;;  %v1673_v50 = vadd.f32 %v9774_v45, %v9725_v48 }
 0x2a5   : > { %v1674_v54 = vadd.f32 %v9783_v47, %v1504_v26 }
 0x2a6   : > { %v1899_v17 = vadd.f32 %v1869_v59, %v1835_v55  ;;  %v1928_v9 = vmul.f32 %v9793_v28, %v1897_v42  ;;  %v1929_v1 = vmul.f32 %v9785_v63, %v1898_v33 }
 0x2a7   : > { %v1642_v62 = vpop.f32.mrf.mxu3 }
 0x2a8   : > { %v1930_v36 = vmul.f32 %v9787_v3, %v1899_v17  ;;  %v1948_v34 = vpack.c.bf16 %v1928_v9, %v1928_v9  ;;  %v1666_v12 = vadd.f32 %v1642_v62, %v9748_v11  ;;  %v12760_v62 = vld [vmem:[#allocation4_spill] sm:$0xff] }
 0x2a9   : > { %v1812_v57 = vpop.f32.mrf.mxu2  ;;  %v1756_v56 = vpop.f32.mrf.mxu0 }
 0x2aa   : > { %v1949_v10 = vpack.c.bf16 %v1930_v36, %v1929_v1  ;;  %1965 = vst.msk [vmem:[#allocation2 + $0x48] sm:$0xf] %vm1958_vm10, %v1948_v34  ;;  %v1836_v7 = vadd.f32 %v1812_v57, %v1666_v12  ;;  %v1837_v40 = vadd.f32 %v1756_v56, %v1667_v2 }
 0x2ab   : > { %v1785_v14 = vpop.f32.mrf.mxu1 }
 0x2ac   : > { %1966 = vst [vmem:[#allocation2 + $0x54] sm:$0xff] %v1949_v10  ;;  %v1838_v4 = vadd.f32 %v1785_v14, %v1668_v5  ;;  %v1900_v61 = vadd.f32 %v1869_v59, %v1836_v7  ;;  %v1901_v44 = vadd.f32 %v1874_v35, %v1837_v40 }
 0x2ae   : > { %v1902_v32 = vadd.f32 %v1874_v35, %v1838_v4  ;;  %v1931_v11 = vmul.f32 %v9793_v28, %v1900_v61  ;;  %v1932_v24 = vmul.f32 %v9785_v63, %v1901_v44 }
 0x2af   : > { %v1644_v15 = vpop.f32.mrf.mxu3 }
 0x2b0   : > { %v1933_v19 = vmul.f32 %v9787_v3, %v1902_v32  ;;  %v1950_v37 = vpack.c.bf16 %v1931_v11, %v1931_v11  ;;  %v1669_v49 = vadd.f32 %v1644_v15, %v9756_v13 }
 0x2b1   : > { %v1814_v51 = vpop.f32.mrf.mxu2  ;;  %v1759_v0 = vpop.f32.mrf.mxu0 }
 0x2b2   : > { %v1951_v31 = vpack.c.bf16 %v1933_v19, %v1932_v24  ;;  %1967 = vst.msk [vmem:[#allocation2 + $0x5c] sm:$0xf] %vm1958_vm10, %v1950_v37  ;;  %v1839_v46 = vadd.f32 %v1814_v51, %v1669_v49  ;;  %v1840_v8 = vadd.f32 %v1759_v0, %v1670_v29 }
 0x2b3   : > { %v1788_v27 = vpop.f32.mrf.mxu1 }
 0x2b4   : > { %1968 = vst [vmem:[#allocation2 + $0x68] sm:$0xff] %v1951_v31  ;;  %v1841_v18 = vadd.f32 %v1788_v27, %v1671_v39  ;;  %v1903_v38 = vadd.f32 %v1874_v35, %v1839_v46  ;;  %v1904_v30 = vadd.f32 %v1879_v52, %v1840_v8 }
 0x2b6   : > { %v1905_v16 = vadd.f32 %v1879_v52, %v1841_v18  ;;  %v1934_v13 = vmul.f32 %v9793_v28, %v1903_v38  ;;  %v1935_v43 = vmul.f32 %v9785_v63, %v1904_v30 }
 0x2b7   : > { %v1647_v60 = vpop.f32.mrf.mxu3 }
 0x2b8   : > { %v1936_v41 = vmul.f32 %v9787_v3, %v1905_v16  ;;  %v1952_v25 = vpack.c.bf16 %v1934_v13, %v1934_v13  ;;  %v1672_v59 = vadd.f32 %v1647_v60, %v9764_v53 }
 0x2b9   : > { %v1817_v6 = vpop.f32.mrf.mxu2  ;;  %v1761_v55 = vpop.f32.mrf.mxu0 }
 0x2ba   : > { %v1953_v23 = vpack.c.bf16 %v1936_v41, %v1935_v43  ;;  %1969 = vst.msk [vmem:[#allocation2 + $0x70] sm:$0xf] %vm1958_vm10, %v1952_v25  ;;  %v1842_v22 = vadd.f32 %v1817_v6, %v1672_v59  ;;  %v1843_v42 = vadd.f32 %v1761_v55, %v1673_v50 }
 0x2bb   : > { %v1790_v33 = vpop.f32.mrf.mxu1 }
 0x2bc   : > { %1970 = vst [vmem:[#allocation2 + $0x7c] sm:$0xff] %v1953_v23  ;;  %v1844_v21 = vadd.f32 %v1790_v33, %v1674_v54  ;;  %v1906_v17 = vadd.f32 %v1879_v52, %v1842_v22  ;;  %v1907_v9 = vadd.f32 %v1884_v58, %v1843_v42 }
 0x2be   : > { %v1908_v1 = vadd.f32 %v1884_v58, %v1844_v21  ;;  %v1937_v48 = vmul.f32 %v9793_v28, %v1906_v17  ;;  %v1938_v53 = vmul.f32 %v9785_v63, %v1907_v9 }
 0x2bf   : > { %v1649_v47 = vpop.f32.mrf.mxu3 }
 0x2c0   : > { %v1939_v45 = vmul.f32 %v9787_v3, %v1908_v1  ;;  %v1954_v36 = vpack.c.bf16 %v1937_v48, %v1937_v48  ;;  %v1675_v2 = vadd.f32 %v1649_v47, %v12760_v62 }
 0x2c1   : > { %v1819_v12 = vpop.f32.mrf.mxu2 }
 0x2c2   : > { %v1955_v34 = vpack.c.bf16 %v1939_v45, %v1938_v53  ;;  %1971 = vst.msk [vmem:[#allocation2 + $0x84] sm:$0xf] %vm1958_vm10, %v1954_v36  ;;  %v1845_v57 = vadd.f32 %v1819_v12, %v1675_v2 }
 0x2c4   : > { %1972 = vst [vmem:[#allocation2 + $0x90] sm:$0xff] %v1955_v34  ;;  %v1909_v5 = vadd.f32 %v1884_v58, %v1845_v57 }
 0x2c6   : > { %v1940_v10 = vmul.f32 %v9793_v28, %v1909_v5 }
 0x2c8   : > { %v1956_v56 = vpack.c.bf16 %v1940_v10, %v1940_v10 }
 0x2ca   : > { %1973 = vst.msk [vmem:[#allocation2 + $0x98] sm:$0xf] %vm1958_vm10, %v1956_v56 }
 0x2cb LB: >> { %v7633_v35 = vld [vmem:[#allocation2 + $0x78] sm:$0xf]  ;;  %v8671_v7 = vld [vmem:[#allocation2 + $0x88] sm:$0xf0]  ;;  %v7617_v14 = vld [vmem:[#allocation2 + $0x50] sm:$0xf]  ;;  %s8879_s22 = sphi %s9861_s22, %s1979_s22  }
 0x2cc   : >> { %v9866_v40 = vor.u32 %v8671_v7, %v7633_v35  ;;  %v8667_v4 = vld [vmem:[#allocation2 + $0x60] sm:$0xf0]  ;;  %v7601_v61 = vld [vmem:[#allocation2 + $0x28] sm:$0xf]  ;;  %v8663_v20 = vld [vmem:[#allocation2 + $0x38] sm:$0xf0] }
 0x2cd   : >> { %v9868_v44 = vor.u32 %v8667_v4, %v7617_v14  ;;  %s8890_s23 = smov 18   ;;  %v9872_v32 = vor.u32 %v8663_v20, %v7601_v61  ;;  %v8669_v11 = vld [vmem:[#allocation2 + $0x7c] sm:$0xf]  ;;  %v7635_v24 = vld [vmem:[#allocation2 + $0x8c] sm:$0xf0]  ;;  %s8891_s24 = smov 19  }
 0x2ce   : >> { %2140 = vrot.lane.b32.xlu0 %v9866_v40, %s8890_s23  ;;  %v8665_v19 = vld [vmem:[#allocation2 + $0x54] sm:$0xf]  ;;  %v7619_v15 = vld [vmem:[#allocation2 + $0x64] sm:$0xf0]  ;;  %v8661_v29 = vld [vmem:[#allocation2 + $0x2c] sm:$0xf]  ;;  %v9878_v49 = vor.u32 %v8669_v11, %v7635_v24 }
 0x2cf   : >> { %2132 = vrot.lane.b32.xlu1 %v9868_v44, %s8890_s23  ;;  %2124 = vrot.lane.b32.xlu2 %v9872_v32, %s8890_s23  ;;  %v7603_v37 = vld [vmem:[#allocation2 + $0x3c] sm:$0xf0]  ;;  %v9880_v51 = vor.u32 %v8665_v19, %v7619_v15  ;;  %v8659_v0 = vld [vmem:[#allocation2 + $0x10] sm:$0xf0]  ;;  %v8657_v52 = vld [vmem:[#allocation2 + $0x4] sm:$0xf] }
 0x2d0   : >> { %v9882_v39 = vor.u32 %v8661_v29, %v7603_v37  ;;  %v7585_v31 = vld [vmem:[#allocation2] sm:$0xf]  ;;  %v7587_v46 = vld [vmem:[#allocation2 + $0x14] sm:$0xf0]  ;;  %v8672_v27 = vld [vmem:[#allocation2 + $0x90] sm:$0xf0] }
 0x2d1   : >> { %v7641_v8 = vld [vmem:[#allocation2 + $0x80] sm:$0xf]  ;;  %v9890_v18 = vor.u32 %v8659_v0, %v7585_v31  ;;  %v9892_v38 = vor.u32 %v8657_v52, %v7587_v46  ;;  %v8670_v26 = vld [vmem:[#allocation2 + $0x84] sm:$0xf]  ;;  %v7643_v16 = vld [vmem:[#allocation2 + $0x94] sm:$0xf0] }
 0x2d2   : >> { %v9894_v30 = vor.u32 %v8672_v27, %v7641_v8  ;;  %v7625_v13 = vld [vmem:[#allocation2 + $0x58] sm:$0xf]  ;;  %v8668_v43 = vld [vmem:[#allocation2 + $0x68] sm:$0xf0]  ;;  %v8666_v41 = vld [vmem:[#allocation2 + $0x5c] sm:$0xf]  ;;  %v9902_v50 = vor.u32 %v8670_v26, %v7643_v16 }
 0x2d3   : >> { %v7627_v60 = vld [vmem:[#allocation2 + $0x6c] sm:$0xf0]  ;;  %v9904_v25 = vor.u32 %v8668_v43, %v7625_v13  ;;  %v8664_v54 = vld [vmem:[#allocation2 + $0x40] sm:$0xf0]  ;;  %v8662_v23 = vld [vmem:[#allocation2 + $0x34] sm:$0xf] }
 0x2d4   : >> { %v9906_v59 = vor.u32 %v8666_v41, %v7627_v60  ;;  %v7609_v6 = vld [vmem:[#allocation2 + $0x30] sm:$0xf]  ;;  %v7611_v55 = vld [vmem:[#allocation2 + $0x44] sm:$0xf0]  ;;  %v8660_v22 = vld [vmem:[#allocation2 + $0x18] sm:$0xf0] }
 0x2d5   : >> { %v7593_v58 = vld [vmem:[#allocation2 + $0x8] sm:$0xf]  ;;  %v9914_v42 = vor.u32 %v8664_v54, %v7609_v6  ;;  %v9916_v33 = vor.u32 %v8662_v23, %v7611_v55  ;;  %v8658_v17 = vld [vmem:[#allocation2 + $0xc] sm:$0xf]  ;;  %v7595_v9 = vld [vmem:[#allocation2 + $0x1c] sm:$0xf0] }
 0x2d6   : >> { %2142 = vrot.lane.b32.xlu0 %v9878_v49, %s8890_s23  ;;  %v9918_v21 = vor.u32 %v8660_v22, %v7593_v58  ;;  %v9926_v1 = vor.u32 %v8658_v17, %v7595_v9  ;;  %s8892_s28 = smov 17   ;;  %s8893_s29 = smov 1   ;;  %vm2172_vm11 = vcmask 523264   ;;  %v7824_v17 = vld [vmem:[#allocation2 + $0x7c] sm:$0xf] }
 0x2d7   : >> { %2134 = vrot.lane.b32.xlu1 %v9880_v51, %s8890_s23  ;;  %2126 = vrot.lane.b32.xlu2 %v9882_v39, %s8890_s23  ;;  %s8652_s30 = smul.u32 576, %s8879_s22  ;;  %s8894_s13 = smov 127  }
 0x2d8   : >> { %s8895_s21 = smov 111   ;;  %s8897_s9 = smov 109  }
 0x2d9   : >> { %s10011_s12 = scalar_lea.vmem %s12741_s4, %s8652_s30  ;;  %s8896_s30 = smov 110  }
 0x2da   : >> { %v10015_v4 = vld [vmem:[%s10011_s12 + $0x30] sm:$0xff]  ;;  %v8673_v19 = vld [vmem:[%s10011_s12 + $0x20] sm:$0xff]  ;;  %v10041_v31 = vld [vmem:[%s10011_s12 + $0x38] sm:$0xff]  ;;  %s8651_s10 = sshll.u32 %s8879_s22, 7  ;;  %s1979_s22 = sadd.s32 1, %s8879_s22  }
 0x2db   : >> { %v8674_v27 = vld [vmem:[%s10011_s12 + $0x28] sm:$0xff]  ;;  %s10775_s20 = scalar_lea.vmem %s12742_s5, %s8651_s10  ;;  %p1976_p4 = scmp.ge.s32.totalorder %s1979_s22, 2  }
 0x2dc   : > { %vm7078_vm12 = vcmask (%p1976_p4), 1041408   ;;  %vm7082_vm13 = vcmask (%p1976_p4), 1043458   ;;  %vm7084_vm15 = vcmask (%p1976_p4), 553988  }
 0x2dd   : > { %vm7083_vm14 = vmor (%p1976_p4), %vm7082_vm13, %vm7078_vm12 }
 0x2de   : >> { %2116 = vrot.lane.b32.xlu0 %v9890_v18, %s8890_s23 }
 0x2df   : >> { %2118 = vrot.lane.b32.xlu1 %v9892_v38, %s8890_s23  ;;  %2144 = vrot.lane.b32.xlu2 %v9894_v30, %s8890_s23 }
 0x2e6   : >> { %2146 = vrot.lane.b32.xlu0 %v9902_v50, %s8890_s23 }
 0x2e7   : >> { %2136 = vrot.lane.b32.xlu1 %v9904_v25, %s8890_s23  ;;  %2138 = vrot.lane.b32.xlu2 %v9906_v59, %s8890_s23 }
 0x2ee   : >> { %2128 = vrot.lane.b32.xlu0 %v9914_v42, %s8890_s23 }
 0x2ef   : >> { %2130 = vrot.lane.b32.xlu1 %v9916_v33, %s8890_s23  ;;  %2120 = vrot.lane.b32.xlu2 %v9918_v21, %s8890_s23 }
 0x2f6   : >> { %2122 = vrot.lane.b32.xlu0 %v9926_v1, %s8890_s23 }
 0x2f7   : >> { %2316 = vrot.lane.b32.xlu1 %v9866_v40, %s8891_s24  ;;  %2318 = vrot.lane.b32.xlu2 %v9878_v49, %s8891_s24 }
 0x2fe   : >> { %2320 = vrot.lane.b32.xlu0 %v9894_v30, %s8891_s24 }
 0x2ff   : >> { %2322 = vrot.lane.b32.xlu1 %v9902_v50, %s8891_s24  ;;  %2503 = vrot.lane.b32.xlu2 %v9866_v40, %s8892_s28 }
 0x306   : >> { %2505 = vrot.lane.b32.xlu0 %v9878_v49, %s8892_s28 }
 0x307   : >> { %2308 = vrot.lane.b32.xlu1 %v9868_v44, %s8891_s24  ;;  %2310 = vrot.lane.b32.xlu2 %v9880_v51, %s8891_s24 }
 0x30e   : >> { %2312 = vrot.lane.b32.xlu0 %v9904_v25, %s8891_s24 }
 0x30f   : >> { %2314 = vrot.lane.b32.xlu1 %v9906_v59, %s8891_s24  ;;  %2495 = vrot.lane.b32.xlu2 %v9868_v44, %s8892_s28 }
 0x316   : >> { %2497 = vrot.lane.b32.xlu0 %v9880_v51, %s8892_s28 }
 0x317   : >> { %2300 = vrot.lane.b32.xlu1 %v9872_v32, %s8891_s24  ;;  %2302 = vrot.lane.b32.xlu2 %v9882_v39, %s8891_s24 }
 0x31e   : >> { %2304 = vrot.lane.b32.xlu0 %v9914_v42, %s8891_s24 }
 0x31f   : >> { %2306 = vrot.lane.b32.xlu1 %v9916_v33, %s8891_s24  ;;  %2487 = vrot.lane.b32.xlu2 %v9872_v32, %s8892_s28 }
 0x326   : >> { %2489 = vrot.lane.b32.xlu0 %v9882_v39, %s8892_s28 }
 0x327   : >> { %2292 = vrot.lane.b32.xlu1 %v9890_v18, %s8891_s24  ;;  %2294 = vrot.lane.b32.xlu2 %v9892_v38, %s8891_s24 }
 0x329   : >> { %v2125_v48 = vpop.permute.xlu2 %2124 }
 0x32e   : >> { %2296 = vrot.lane.b32.xlu0 %v9918_v21, %s8891_s24 }
 0x32f   : >> { %2298 = vrot.lane.b32.xlu1 %v9926_v1, %s8891_s24  ;;  %2479 = vrot.lane.b32.xlu2 %v9890_v18, %s8892_s28 }
 0x331   : >> { %v9976_v53 = vpop.permute.xlu2 %2126 }
 0x332   : >> { %v2151_v7 = vsel %vm405_vm1, %v2125_v48, %v9976_v53  ;;  %v8699_v48 = vld [vmem:[#allocation2 + $0x8c] sm:$0xf0] }
 0x336   : >> { %2481 = vrot.lane.b32.xlu0 %v9892_v38, %s8892_s28 }
 0x337   : >> { %2507 = vrot.lane.b32.xlu1 %v9894_v30, %s8892_s28  ;;  %2509 = vrot.lane.b32.xlu2 %v9902_v50, %s8892_s28 }
 0x339   : >> { %v2145_v45 = vpop.permute.xlu2 %2144 }
 0x33e   : >> { %2714 = vrot.lane.b32.xlu0 %v9866_v40, %s8893_s29 }
 0x33f   : >> { %2716 = vrot.lane.b32.xlu1 %v9878_v49, %s8893_s29  ;;  %2718 = vrot.lane.b32.xlu2 %v9894_v30, %s8893_s29 }
 0x340   : >> { %v2141_v47 = vpop.permute.xlu0 %2140 }
 0x341   : >> { %v2133_v36 = vpop.permute.xlu1 %2132  ;;  %v2139_v62 = vpop.permute.xlu2 %2138 }
 0x346   : >> { %2499 = vrot.lane.b32.xlu0 %v9904_v25, %s8892_s28 }
 0x347   : >> { %2501 = vrot.lane.b32.xlu1 %v9906_v59, %s8892_s28  ;;  %2706 = vrot.lane.b32.xlu2 %v9868_v44, %s8893_s29 }
 0x348   : >> { %v2143_v2 = vpop.permute.xlu0 %2142 }
 0x349   : >> { %v2135_v34 = vpop.permute.xlu1 %2134  ;;  %v2157_v12 = vsel %vm405_vm1, %v2141_v47, %v2143_v2  ;;  %v2158_v57 = vsel %vm405_vm1, %v2143_v2, %v2145_v45  ;;  %v2121_v5 = vpop.permute.xlu2 %2120  ;;  %v8696_v2 = vld [vmem:[#allocation2 + $0x64] sm:$0xf0] }
 0x34a   : >> { %2189 = vmatpush.bf16.msra.mxu0 %v2157_v12  ;;  %8813 = vmatpush.bf16.msra.mxu2 %v2157_v12  ;;  %v2154_v10 = vsel %vm405_vm1, %v2133_v36, %v2135_v34 }
 0x34b   : >> { %2218 = vmatpush.bf16.msra.mxu1 %v2158_v57  ;;  %8817 = vmatpush.bf16.msra.mxu3 %v2158_v57 }
 0x34e   : >> { %2190 = vmatpush.bf16.msra.mxu0 %v2154_v10  ;;  %8814 = vmatpush.bf16.msra.mxu2 %v2154_v10 }
 0x34f   : >> { %2708 = vrot.lane.b32.xlu0 %v9880_v51, %s8893_s29  ;;  %2710 = vrot.lane.b32.xlu1 %v9904_v25, %s8893_s29 }
 0x350   : >> { %2491 = vrot.lane.b32.xlu2 %v9914_v42, %s8892_s28  ;;  %v2117_v56 = vpop.permute.xlu0 %2116 }
 0x351   : >> { %v2119_v35 = vpop.permute.xlu1 %2118  ;;  %v2319_v40 = vpop.permute.xlu2 %2318 }
 0x352   : >> { %2191 = vmatpush.bf16.msra.mxu0 %v2151_v7  ;;  %8815 = vmatpush.bf16.msra.mxu2 %v2151_v7  ;;  %v2148_v14 = vsel %vm405_vm1, %v2117_v56, %v2119_v35  ;;  %v7814_v7 = vld [vmem:[#allocation2 + $0x68] sm:$0xf0] }
 0x356   : >> { %2192 = vmatpush.bf16.msra.mxu0 %v2148_v14  ;;  %8816 = vmatpush.bf16.msra.mxu2 %v2148_v14  ;;  %v8653_v14 = vld [vmem:[%s10011_s12] sm:$0xff] }
 0x357   : >> { %2493 = vrot.lane.b32.xlu0 %v9916_v33, %s8892_s28  ;;  %2698 = vrot.lane.b32.xlu1 %v9872_v32, %s8893_s29 }
 0x358   : >> { %v2147_v61 = vpop.permute.xlu0 %2146  ;;  %2700 = vrot.lane.b32.xlu2 %v9882_v39, %s8893_s29  ;;  %v2149_v39 = vsel %vm405_vm1, %v2119_v35, %v2121_v5  ;;  %v8695_v35 = vld [vmem:[#allocation2 + $0x58] sm:$0xf] }
 0x359   : >> { %v2137_v44 = vpop.permute.xlu1 %2136  ;;  %7649 = vmatmul.msk.bf16.vlgmr.msra.gmra.mxu2 %vm2172_vm11, %v10015_v4  ;;  %v2159_v20 = vsel %vm405_vm1, %v2145_v45, %v2147_v61  ;;  %v2504_v11 = vpop.permute.xlu2 %2503  ;;  %7647 = vmatmul.msk.bf16.vlgmr.msra.gmra.mxu0 %vm2172_vm11, %v8673_v19  ;;  %v10109_v61 = vor.u32 %v8695_v35, %v7814_v7  ;;  %v8656_v7 = vld [vmem:[%s10011_s12 + $0x18] sm:$0xff] }
 0x35a   : >> { %v2155_v24 = vsel %vm405_vm1, %v2135_v34, %v2137_v44  ;;  %2247 = vmatpush.bf16.msrb.mxu2 %v2159_v20  ;;  %v2156_v32 = vsel %vm405_vm1, %v2137_v44, %v2139_v62  ;;  %v7812_v62 = vld [vmem:[#allocation2 + $0x54] sm:$0xf] }
 0x35b   : >> { %2219 = vmatpush.bf16.msra.mxu1 %v2155_v24  ;;  %8818 = vmatpush.bf16.msra.mxu3 %v2155_v24  ;;  %v10095_v12 = vor.u32 %v8696_v2, %v7812_v62  ;;  %v8692_v24 = vld [vmem:[#allocation2 + $0x30] sm:$0xf] }
 0x35e   : >> { %2248 = vmatpush.bf16.msrb.mxu2 %v2156_v32 }
 0x35f   : >> { %2702 = vrot.lane.b32.xlu0 %v9914_v42, %s8893_s29  ;;  %2483 = vrot.lane.b32.xlu1 %v9918_v21, %s8892_s28 }
 0x360   : >> { %v2129_v15 = vpop.permute.xlu0 %2128  ;;  %2485 = vrot.lane.b32.xlu2 %v9926_v1, %s8892_s28 }
 0x361   : >> { %v2131_v29 = vpop.permute.xlu1 %2130  ;;  %v2152_v37 = vsel %vm405_vm1, %v9976_v53, %v2129_v15  ;;  %v2311_v49 = vpop.permute.xlu2 %2310  ;;  %v10087_v53 = vor.u32 %v8699_v48, %v7824_v17  ;;  %v8655_v17 = vld [vmem:[%s10011_s12 + $0x10] sm:$0xff] }
 0x362   : >> { %2220 = vmatpush.bf16.msra.mxu1 %v2152_v37  ;;  %8819 = vmatpush.bf16.msra.mxu3 %v2152_v37  ;;  %v2153_v51 = vsel %vm405_vm1, %v2129_v15, %v2131_v29 }
 0x363   : >> { %2249 = vmatpush.bf16.msrb.mxu2 %v2153_v51  ;;  %v7826_v51 = vld [vmem:[#allocation2 + $0x90] sm:$0xf0] }
 0x366   : >> { %2221 = vmatpush.bf16.msra.mxu1 %v2149_v39  ;;  %8820 = vmatpush.bf16.msra.mxu3 %v2149_v39 }
 0x367   : >> { %2690 = vrot.lane.b32.xlu0 %v9890_v18, %s8893_s29  ;;  %2692 = vrot.lane.b32.xlu1 %v9892_v38, %s8893_s29 }
 0x368   : >> { %v2123_v0 = vpop.permute.xlu0 %2122  ;;  %2694 = vrot.lane.b32.xlu2 %v9918_v21, %s8893_s29  ;;  %v8700_v21 = vld [vmem:[#allocation2 + $0x94] sm:$0xf0] }
 0x369   : >> { %v2317_v52 = vpop.permute.xlu1 %2316  ;;  %7650 = vmatmul.msk.bf16.gmra.mxu2 %vm2172_vm11, %v10041_v31  ;;  %v2150_v46 = vsel %vm405_vm1, %v2121_v5, %v2123_v0  ;;  %7653 = vmatmul.msk.bf16.vlgmr.msra.gmra.mxu3 %vm2172_vm11, %v10015_v4  ;;  %v2496_v18 = vpop.permute.xlu2 %2495 }
 0x36a   : >> { %2250 = vmatpush.bf16.msrb.mxu2 %v2150_v46  ;;  %v2333_v8 = vsel %vm547_vm0, %v2317_v52, %v2319_v40  ;;  %7651 = vmatmul.msk.bf16.vlgmr.msra.gmra.mxu1 %vm2172_vm11, %v8673_v19  ;;  %v7808_v46 = vld [vmem:[#allocation2 + $0x34] sm:$0xf] }
 0x36b   : >> { %2364 = vmatpush.bf16.msrb.mxu3 %v2333_v8  ;;  %7648 = vmatmul.msk.bf16.gmra.mxu0 %vm2172_vm11, %v8674_v27  ;;  %v8694_v8 = vld [vmem:[#allocation2 + $0x44] sm:$0xf0] }
 0x36f   : >> { %2720 = vrot.lane.b32.xlu0 %v9902_v50, %s8893_s29  ;;  %2712 = vrot.lane.b32.xlu1 %v9906_v59, %s8893_s29 }
 0x370   : >> { %v2321_v38 = vpop.permute.xlu0 %2320  ;;  %2704 = vrot.lane.b32.xlu2 %v9916_v33, %s8893_s29  ;;  %v7832_v33 = vld [vmem:[#allocation2 + $0x84] sm:$0xf] }
 0x371   : >> { %v2323_v30 = vpop.permute.xlu1 %2322  ;;  %v2334_v26 = vsel %vm547_vm0, %v2319_v40, %v2321_v38  ;;  %v2303_v13 = vpop.permute.xlu2 %2302 }
 0x372   : >> { %2393 = vmatpush.bf16.msrb.mxu0 %v2334_v26  ;;  %v2335_v16 = vsel %vm547_vm0, %v2321_v38, %v2323_v30  ;;  %v10140_v30 = vor.u32 %v8694_v8, %v7808_v46 }
 0x373   : >> { %2422 = vmatpush.bf16.msrb.mxu1 %v2335_v16 }
 0x377   : >> { %2696 = vrot.lane.b32.xlu0 %v9926_v1, %s8893_s29  ;;  %v10085_v1 = vor.u32 %v8700_v21, %v7832_v33  ;;  %3154 = vrot.lane.b32.xlu1 %v10087_v53, %s8894_s13 }
 0x378   : >> { %v10068_v43 = vpop.permute.xlu0 %2505 }
 0x379   : >> { %v2309_v41 = vpop.permute.xlu1 %2308  ;;  %7655 = vmatmul.msk.bf16.vlgmr.msrb.gmra.mxu2 %vm2172_vm11, %v8673_v19  ;;  %v2520_v60 = vsel %vm696_vm4, %v2504_v11, %v10068_v43  ;;  %7654 = vmatmul.msk.bf16.gmra.mxu3 %vm2172_vm11, %v10041_v31  ;;  %v2488_v25 = vpop.permute.xlu2 %2487  ;;  %v7802_v19 = vld [vmem:[#allocation2 + $0x40] sm:$0xf0] }
 0x37a   : >> { %2551 = vmatpush.bf16.msra.mxu2 %v2520_v60  ;;  %v2330_v50 = vsel %vm547_vm0, %v2309_v41, %v2311_v49  ;;  %7652 = vmatmul.msk.bf16.gmra.mxu1 %vm2172_vm11, %v8674_v27  ;;  %v10118_v15 = vor.u32 %v8692_v24, %v7802_v19  ;;  %v7788_v41 = vld [vmem:[#allocation2 + $0x4] sm:$0xf] }
 0x37b   : >> { %2365 = vmatpush.bf16.msrb.mxu3 %v2330_v50 }
 0x37f   : >> { %3158 = vrot.lane.b32.xlu0 %v10085_v1, %s8894_s13  ;;  %3353 = vrot.lane.b32.xlu1 %v10087_v53, %s8895_s21 }
 0x380   : >> { %v2313_v59 = vpop.permute.xlu0 %2312 }
 0x381   : >> { %v2315_v6 = vpop.permute.xlu1 %2314  ;;  %v2331_v54 = vsel %vm547_vm0, %v2311_v49, %v2313_v59  ;;  %v2295_v58 = vpop.permute.xlu2 %2294  ;;  %v8698_v49 = vld [vmem:[#allocation2 + $0x80] sm:$0xf] }
 0x382   : >> { %2394 = vmatpush.bf16.msrb.mxu0 %v2331_v54  ;;  %v2332_v23 = vsel %vm547_vm0, %v2313_v59, %v2315_v6  ;;  %v10134_v52 = vor.u32 %v8698_v49, %v7826_v51  ;;  %v8690_v59 = vld [vmem:[#allocation2 + $0x14] sm:$0xf0]  ;;  %v10162_v54 = vld [vmem:[%s10011_s12 + $0x40] sm:$0xff] }
 0x383   : >> { %2423 = vmatpush.bf16.msrb.mxu1 %v2332_v23  ;;  %v10154_v6 = vor.u32 %v8690_v59, %v7788_v41 }
 0x384   : >> { %3156 = vrot.lane.b32.xlu2 %v10134_v52, %s8894_s13 }
 0x387   : >> { %3148 = vrot.lane.b32.xlu0 %v10095_v12, %s8894_s13  ;;  %3150 = vrot.lane.b32.xlu1 %v10109_v61, %s8894_s13 }
 0x388   : >> { %v10079_v55 = vpop.permute.xlu0 %2497 }
 0x389   : >> { %v2301_v22 = vpop.permute.xlu1 %2300  ;;  %7656 = vmatmul.msk.bf16.gmra.mxu2 %vm2172_vm11, %v8674_v27  ;;  %v2517_v42 = vsel %vm696_vm4, %v2496_v18, %v10079_v55  ;;  %v2480_v57 = vpop.permute.xlu2 %2479  ;;  %v8654_v18 = vld [vmem:[%s10011_s12 + $0x8] sm:$0xff] }
 0x38a   : >> { %v2327_v9 = vsel %vm547_vm0, %v2301_v22, %v2303_v13  ;;  %2552 = vmatpush.bf16.msra.mxu2 %v2517_v42  ;;  %v8697_v22 = vld [vmem:[#allocation2 + $0x6c] sm:$0xf0] }
 0x38b   : >> { %2366 = vmatpush.bf16.msrb.mxu3 %v2327_v9 }
 0x38c   : >> { %3355 = vrot.lane.b32.xlu2 %v10134_v52, %s8895_s21 }
 0x38f   : >> { %3347 = vrot.lane.b32.xlu0 %v10095_v12, %s8895_s21  ;;  %3349 = vrot.lane.b32.xlu1 %v10109_v61, %s8895_s21 }
 0x390   : >> { %v2305_v45 = vpop.permute.xlu0 %2304 }
 0x391   : >> { %v2307_v47 = vpop.permute.xlu1 %2306  ;;  %v2328_v36 = vsel %vm547_vm0, %v2303_v13, %v2305_v45  ;;  %v2510_v44 = vpop.permute.xlu2 %2509  ;;  %v7796_v13 = vld [vmem:[#allocation2 + $0xc] sm:$0xf] }
 0x392   : >> { %2395 = vmatpush.bf16.msrb.mxu0 %v2328_v36  ;;  %v2329_v34 = vsel %vm547_vm0, %v2305_v45, %v2307_v47  ;;  %v7800_v45 = vld [vmem:[#allocation2 + $0x2c] sm:$0xf]  ;;  %v8693_v47 = vld [vmem:[#allocation2 + $0x3c] sm:$0xf0] }
 0x393   : >> { %2424 = vmatpush.bf16.msrb.mxu1 %v2329_v34  ;;  %v10186_v2 = vor.u32 %v8693_v47, %v7800_v45 }
 0x397   : >> { %3144 = vrot.lane.b32.xlu0 %v10118_v15, %s8894_s13  ;;  %3146 = vrot.lane.b32.xlu1 %v10140_v30, %s8894_s13 }
 0x398   : >> { %v10101_v5 = vpop.permute.xlu0 %2489 }
 0x399   : >> { %v2293_v10 = vpop.permute.xlu1 %2292  ;;  %7657 = vmatmul.msk.bf16.gmra.mxu2 %vm2172_vm11, %v10015_v4  ;;  %v2514_v56 = vsel %vm696_vm4, %v2488_v25, %v10101_v5  ;;  %v10126_v29 = vpop.permute.xlu2 %2718 }
 0x39a   : >> { %v2324_v40 = vsel %vm547_vm0, %v2293_v10, %v2295_v58  ;;  %2553 = vmatpush.bf16.msra.mxu2 %v2514_v56 }
 0x39b   : >> { %2367 = vmatpush.bf16.msrb.mxu3 %v2324_v40 }
 0x39e   : >> { %7675 = vmatmul.msk.bf16.vlgmr.msrb.gmra.mxu3 %vm2172_vm11, %v8653_v14 }
 0x39f   : >> { %3343 = vrot.lane.b32.xlu0 %v10118_v15, %s8895_s21  ;;  %3136 = vrot.lane.b32.xlu1 %v10154_v6, %s8894_s13 }
 0x3a0   : >> { %v2297_v4 = vpop.permute.xlu0 %2296 }
 0x3a1   : >> { %v2299_v20 = vpop.permute.xlu1 %2298  ;;  %v2325_v11 = vsel %vm547_vm0, %v2295_v58, %v2297_v4  ;;  %v2707_v26 = vpop.permute.xlu2 %2706  ;;  %v7820_v58 = vld [vmem:[#allocation2 + $0x5c] sm:$0xf] }
 0x3a2   : >> { %2396 = vmatpush.bf16.msrb.mxu0 %v2325_v11  ;;  %v2326_v32 = vsel %vm547_vm0, %v2297_v4, %v2299_v20  ;;  %v10171_v21 = vor.u32 %v8697_v22, %v7820_v58  ;;  %v8689_v4 = vld [vmem:[#allocation2 + $0x8] sm:$0xf]  ;;  %v7790_v20 = vld [vmem:[#allocation2 + $0x18] sm:$0xf0] }
 0x3a3   : >> { %2425 = vmatpush.bf16.msrb.mxu1 %v2326_v32  ;;  %v10214_v11 = vor.u32 %v8689_v4, %v7790_v20 }
 0x3a4   : >> { %3152 = vrot.lane.b32.xlu2 %v10171_v21, %s8894_s13 }
 0x3a5   : >> { %7679 = vmatmul.msk.bf16.vlgmr.msrb.gmra.mxu0 %vm2172_vm11, %v8653_v14 }
 0x3a6   : >> { %7683 = vmatmul.msk.bf16.vlgmr.msrb.gmra.mxu1 %vm2172_vm11, %v8653_v14 }
 0x3a7   : >> { %3335 = vrot.lane.b32.xlu1 %v10154_v6, %s8895_s21 }
 0x3a8   : >> { %v10128_v37 = vpop.permute.xlu0 %2481 }
 0x3a9   : >> { %v2508_v39 = vpop.permute.xlu1 %2507  ;;  %7658 = vmatmul.msk.bf16.gmra.mxu2 %vm2172_vm11, %v10041_v31  ;;  %v2511_v0 = vsel %vm696_vm4, %v2480_v57, %v10128_v37 }
 0x3aa   : >> { %v2521_v27 = vsel %vm696_vm4, %v10068_v43, %v2508_v39  ;;  %2554 = vmatpush.bf16.msra.mxu2 %v2511_v0  ;;  %v2522_v38 = vsel %vm696_vm4, %v2508_v39, %v2510_v44  ;;  %v8691_v43 = vld [vmem:[#allocation2 + $0x1c] sm:$0xf0]  ;;  %v2492_v48 = vpop.permute.xlu2 %2491  ;;  %v10224_v39 = vld [vmem:[%s10011_s12 + $0x50] sm:$0xff] }
 0x3ab   : >> { %2580 = vmatpush.bf16.msra.mxu3 %v2521_v27  ;;  %2609 = vmatpush.bf16.msra.mxu0 %v2522_v38  ;;  %v10152_v25 = vor.u32 %v8691_v43, %v7796_v13  ;;  %v10266_v43 = vld [vmem:[%s10011_s12 + $0x58] sm:$0xff] }
 0x3ac   : >> { %3142 = vrot.lane.b32.xlu2 %v10186_v2, %s8894_s13 }
 0x3ad   : >> { %3140 = vrot.lane.b32.xlu0 %v10152_v25, %s8894_s13 }
 0x3ae   : >> { %7676 = vmatmul.msk.bf16.gmra.mxu3 %vm2172_vm11, %v8654_v18 }
 0x3af   : >> { %3552 = vrot.lane.b32.xlu1 %v10087_v53, %s8896_s30 }
 0x3b0   : >> { %v2715_v31 = vpop.permute.xlu0 %2714 }
 0x3b1   : >> { %v2717_v16 = vpop.permute.xlu1 %2716 }
 0x3b2   : >> { %v2731_v60 = vsel %vm869_vm5, %v2715_v31, %v2717_v16  ;;  %v2732_v50 = vsel %vm869_vm5, %v2717_v16, %v10126_v29  ;;  %v2701_v10 = vpop.permute.xlu2 %2700 }
 0x3b3   : >> { %2762 = vmatpush.bf16.msra.mxu1 %v2731_v60  ;;  %2791 = vmatpush.bf16.msrb.mxu2 %v2732_v50 }
 0x3b4   : >> { %3341 = vrot.lane.b32.xlu2 %v10186_v2, %s8895_s21 }
 0x3b5   : >> { %7680 = vmatmul.msk.bf16.gmra.mxu0 %vm2172_vm11, %v8654_v18  ;;  %3357 = vrot.lane.b32.xlu0 %v10085_v1, %s8895_s21 }
 0x3b6   : >> { %7684 = vmatmul.msk.bf16.gmra.mxu1 %vm2172_vm11, %v8654_v18 }
 0x3b7   : >> { %3351 = vrot.lane.b32.xlu1 %v10171_v21, %s8895_s21 }
 0x3b8   : >> { %v2500_v23 = vpop.permute.xlu0 %2499 }
 0x3b9   : >> { %v2502_v42 = vpop.permute.xlu1 %2501  ;;  %7712 = vmatmul.msk.bf16.vlgmr.msra.gmra.mxu2 %vm2172_vm11, %v10162_v54  ;;  %v2518_v33 = vsel %vm696_vm4, %v10079_v55, %v2500_v23  ;;  %v2515_v55 = vsel %vm696_vm4, %v10101_v5, %v2492_v48  ;;  %v10197_v5 = vld [vmem:[%s10011_s12 + $0x48] sm:$0xff] }
 0x3ba   : >> { %2581 = vmatpush.bf16.msra.mxu3 %v2518_v33  ;;  %v2519_v9 = vsel %vm696_vm4, %v2500_v23, %v2502_v42  ;;  %v2486_v44 = vpop.permute.xlu2 %2485  ;;  %v10294_v23 = vld [vmem:[%s10011_s12 + $0x68] sm:$0xff] }
 0x3bb   : >> { %2610 = vmatpush.bf16.msra.mxu0 %v2519_v9 }
 0x3bc   : >> { %3138 = vrot.lane.b32.xlu2 %v10214_v11, %s8894_s13 }
 0x3bd   : >> { %3556 = vrot.lane.b32.xlu0 %v10085_v1, %s8896_s30 }
 0x3be   : >> { %7677 = vmatmul.msk.bf16.gmra.mxu3 %vm2172_vm11, %v8655_v17 }
 0x3bf   : >> { %2582 = vmatpush.bf16.msra.mxu3 %v2515_v55  ;;  %3550 = vrot.lane.b32.xlu1 %v10171_v21, %s8896_s30 }
 0x3c1   : >> { %v2709_v36 = vpop.permute.xlu0 %2708  ;;  %v10184_v62 = vpop.permute.xlu1 %2710 }
 0x3c2   : >> { %v2728_v34 = vsel %vm869_vm5, %v2707_v26, %v2709_v36  ;;  %v2729_v57 = vsel %vm869_vm5, %v2709_v36, %v10184_v62  ;;  %v10255_v26 = vld [vmem:[%s10011_s12 + $0x60] sm:$0xff] }
 0x3c3   : >> { %2763 = vmatpush.bf16.msra.mxu1 %v2728_v34  ;;  %2792 = vmatpush.bf16.msrb.mxu2 %v2729_v57 }
 0x3c4   : >> { %3337 = vrot.lane.b32.xlu2 %v10214_v11, %s8895_s21 }
 0x3c5   : >> { %7681 = vmatmul.msk.bf16.gmra.mxu0 %vm2172_vm11, %v8655_v17  ;;  %3548 = vrot.lane.b32.xlu0 %v10109_v61, %s8896_s30 }
 0x3c6   : >> { %7685 = vmatmul.msk.bf16.gmra.mxu1 %vm2172_vm11, %v8655_v17 }
 0x3c7   : >> { %3542 = vrot.lane.b32.xlu1 %v10118_v15, %s8896_s30 }
 0x3c9   : >> { %v2494_v56 = vpop.permute.xlu0 %2493  ;;  %v2699_v35 = vpop.permute.xlu1 %2698  ;;  %7713 = vmatmul.msk.bf16.gmra.mxu2 %vm2172_vm11, %v10197_v5 }
 0x3ca   : >> { %v2516_v40 = vsel %vm696_vm4, %v2492_v48, %v2494_v56  ;;  %v2725_v14 = vsel %vm869_vm5, %v2699_v35, %v2701_v10 }
 0x3cb   : >> { %2611 = vmatpush.bf16.msra.mxu0 %v2516_v40  ;;  %2764 = vmatpush.bf16.msra.mxu1 %v2725_v14 }
 0x3cc   : >> { %3554 = vrot.lane.b32.xlu2 %v10134_v52, %s8896_s30 }
 0x3cd   : >> { %3540 = vrot.lane.b32.xlu0 %v10186_v2, %s8896_s30 }
 0x3ce   : >> { %7678 = vmatmul.msk.bf16.gmra.mxu3 %vm2172_vm11, %v8656_v7 }
 0x3cf   : >> { %3534 = vrot.lane.b32.xlu1 %v10154_v6, %s8896_s30 }
 0x3d1   : >> { %v2703_v24 = vpop.permute.xlu0 %2702  ;;  %v2484_v19 = vpop.permute.xlu1 %2483 }
 0x3d2   : >> { %v2512_v32 = vsel %vm696_vm4, %v10128_v37, %v2484_v19  ;;  %v2513_v49 = vsel %vm696_vm4, %v2484_v19, %v2486_v44  ;;  %v2726_v51 = vsel %vm869_vm5, %v2701_v10, %v2703_v24  ;;  %v2695_v37 = vpop.permute.xlu2 %2694  ;;  %v10365_v10 = vld [vmem:[%s10011_s12 + $0x78] sm:$0xff]  ;;  %v8685_v19 = vld [vmem:[%s10011_s12 + $0x80] sm:$0xff] }
 0x3d3   : >> { %2583 = vmatpush.bf16.msra.mxu3 %v2512_v32  ;;  %2612 = vmatpush.bf16.msra.mxu0 %v2513_v49 }
 0x3d4   : >> { %2793 = vmatpush.bf16.msrb.mxu2 %v2726_v51  ;;  %3546 = vrot.lane.b32.xlu2 %v10095_v12, %s8896_s30 }
 0x3d5   : >> { %7682 = vmatmul.msk.bf16.gmra.mxu0 %vm2172_vm11, %v8656_v7  ;;  %3339 = vrot.lane.b32.xlu0 %v10152_v25, %s8895_s21 }
 0x3d6   : >> { %7686 = vmatmul.msk.bf16.gmra.mxu1 %vm2172_vm11, %v8656_v7 }
 0x3d7   : >> { %2997 = vmatpush.bf16.msrb.mxu0 %v10087_v53  ;;  %3751 = vrot.lane.b32.xlu1 %v10087_v53, %s8897_s9  ;;  %v2194_v53 = vpop.f32.mrf.mxu0 }
 0x3d9   : >> { %v2691_v0 = vpop.permute.xlu0 %2690  ;;  %v2693_v46 = vpop.permute.xlu1 %2692  ;;  %7714 = vmatmul.msk.bf16.gmra.mxu2 %vm2172_vm11, %v10224_v39 }
 0x3da   : >> { %v2722_v8 = vsel %vm869_vm5, %v2691_v0, %v2693_v46  ;;  %v2723_v27 = vsel %vm869_vm5, %v2693_v46, %v2695_v37  ;;  %v2705_v41 = vpop.permute.xlu2 %2704 }
 0x3db   : >> { %2998 = vmatpush.bf16.msrb.mxu0 %v10095_v12  ;;  %2765 = vmatpush.bf16.msra.mxu1 %v2722_v8  ;;  %v2727_v60 = vsel %vm869_vm5, %v2703_v24, %v2705_v41 }
 0x3dc   : >> { %2794 = vmatpush.bf16.msrb.mxu2 %v2723_v27  ;;  %v10237_v18 = vpop.f32.mrf.mxu2  ;;  %3345 = vrot.lane.b32.xlu2 %v10140_v30, %s8895_s21 }
 0x3dd   : >> { %3538 = vrot.lane.b32.xlu0 %v10152_v25, %s8896_s30 }
 0x3de   : >> { %7716 = vmatmul.msk.bf16.vlgmr.msra.gmra.mxu3 %vm2172_vm11, %v10162_v54 }
 0x3df   : >> { %3026 = vmatpush.bf16.msrb.mxu1 %v10134_v52  ;;  %2999 = vmatpush.bf16.msrb.mxu0 %v10186_v2  ;;  %v10328_v9 = vpop.f32.mrf.mxu0 }
 0x3e0   : >> { %3055 = vmatpush.bf16.msra.mxu2 %v10085_v1  ;;  %3745 = vrot.lane.b32.xlu1 %v10095_v12, %s8897_s9 }
 0x3e1   : >> { %v2721_v38 = vpop.permute.xlu0 %2720  ;;  %v2713_v16 = vpop.permute.xlu1 %2712 }
 0x3e2   : >> { %v2733_v31 = vsel %vm869_vm5, %v10126_v29, %v2721_v38  ;;  %v2730_v29 = vsel %vm869_vm5, %v10184_v62, %v2713_v16  ;;  %v3157_v55 = vpop.permute.xlu2 %3156 }
 0x3e3   : >> { %3027 = vmatpush.bf16.msrb.mxu1 %v10109_v61  ;;  %3000 = vmatpush.bf16.msrb.mxu0 %v10154_v6 }
 0x3e4   : >> { %3056 = vmatpush.bf16.msra.mxu2 %v10171_v21  ;;  %2820 = vmatpush.bf16.msrb.mxu3 %v2733_v31  ;;  %v10258_v13 = vpop.f32.mrf.mxu2 }
 0x3e5   : >> { %7720 = vmatmul.msk.bf16.vlgmr.msra.gmra.mxu0 %vm2172_vm11, %v10162_v54  ;;  %3755 = vrot.lane.b32.xlu0 %v10085_v1, %s8897_s9 }
 0x3e6   : >> { %7749 = vmatmul.msk.bf16.vlgmr.msra.gmra.mxu1 %vm2172_vm11, %v10255_v26  ;;  %3544 = vrot.lane.b32.xlu2 %v10140_v30, %s8896_s30 }
 0x3e7   : >> { %3028 = vmatpush.bf16.msrb.mxu1 %v10118_v15  ;;  %v2223_v22 = vpop.f32.mrf.mxu1 }
 0x3e8   : >> { %3057 = vmatpush.bf16.msra.mxu2 %v10140_v30  ;;  %2821 = vmatpush.bf16.msrb.mxu3 %v2730_v29 }
 0x3e9   : >> { %7715 = vmatmul.msk.bf16.gmra.mxu2 %vm2172_vm11, %v10266_v43  ;;  %v2697_v50 = vpop.permute.xlu0 %2696  ;;  %v3155_v12 = vpop.permute.xlu1 %3154  ;;  %3739 = vrot.lane.b32.xlu1 %v10186_v2, %s8897_s9 }
 0x3ea   : >> { %v2724_v54 = vsel %vm869_vm5, %v2695_v37, %v2697_v50  ;;  %v10354_v2 = vpop.f32.mrf.mxu0  ;;  %v3166_v51 = vsel %vm1201_vm6, %v3155_v12, %v3157_v55  ;;  %v8686_v12 = vld [vmem:[%s10011_s12 + $0x88] sm:$0xff] }
 0x3eb   : >> { %3029 = vmatpush.bf16.msrb.mxu1 %v10214_v11 }
 0x3ec   : >> { %3058 = vmatpush.bf16.msra.mxu2 %v10152_v25  ;;  %2822 = vmatpush.bf16.msrb.mxu3 %v2727_v60  ;;  %v10282_v59 = vpop.f32.mrf.mxu2  ;;  %v10310_v1 = vpop.f32.mrf.mxu3 }
 0x3ed   : >> { %3749 = vrot.lane.b32.xlu0 %v10171_v21, %s8897_s9  ;;  %v10324_v21 = vld [vmem:[%s10011_s12 + $0x70] sm:$0xff] }
 0x3ee   : >> { %7717 = vmatmul.msk.bf16.gmra.mxu3 %vm2172_vm11, %v10197_v5  ;;  %3536 = vrot.lane.b32.xlu2 %v10214_v11, %s8896_s30 }
 0x3f0   : >> { %2823 = vmatpush.bf16.msrb.mxu3 %v2724_v54 }
 0x3f1   : >> { %v10316_v33 = vpop.permute.xlu0 %3158  ;;  %v10342_v47 = vpop.permute.xlu1 %3353  ;;  %3733 = vrot.lane.b32.xlu1 %v10154_v6, %s8897_s9 }
 0x3f2   : >> { %3254 = vmatpush.bf16.msra.mxu1 %v10316_v33  ;;  %v10384_v40 = vpop.f32.mrf.mxu0  ;;  %v3167_v38 = vsel %vm1201_vm6, %v3157_v55, %v10316_v33 }
 0x3f3   : >> { %3225 = vmatpush.bf16.msra.mxu0 %v3167_v38 }
 0x3f4   : >> { %v10296_v58 = vpop.f32.mrf.mxu2  ;;  %v10326_v17 = vpop.f32.mrf.mxu3  ;;  %3196 = vmatpush.bf16.msra.mxu3 %v3166_v51 }
 0x3f5   : >> { %7721 = vmatmul.msk.bf16.gmra.mxu0 %vm2172_vm11, %v10197_v5  ;;  %3743 = vrot.lane.b32.xlu0 %v10140_v30, %s8897_s9  ;;  %v10336_v30 = vpop.f32.mrf.mxu1 }
 0x3f6   : >> { %7750 = vmatmul.msk.bf16.gmra.mxu1 %vm2172_vm11, %v10294_v23  ;;  %3753 = vrot.lane.b32.xlu2 %v10134_v52, %s8897_s9 }
 0x3f9   : >> { %7753 = vmatmul.msk.bf16.vlgmr.msrb.gmra.mxu2 %vm2172_vm11, %v10255_v26  ;;  %v3149_v45 = vpop.permute.xlu0 %3148  ;;  %v10362_v6 = vpop.permute.xlu1 %3150 }
 0x3fa   : >> { %v3164_v27 = vsel %vm1201_vm6, %v3149_v45, %v10362_v6 }
 0x3fb   : >> { %3197 = vmatpush.bf16.msra.mxu3 %v3164_v27 }
 0x3fc   : >> { %v2252_v42 = vpop.f32.mrf.mxu2  ;;  %v10352_v62 = vpop.f32.mrf.mxu3 }
 0x3fd   : >> { %3737 = vrot.lane.b32.xlu0 %v10152_v25, %s8897_s9  ;;  %v3356_v25 = vpop.permute.xlu2 %3355  ;;  %v10360_v57 = vpop.f32.mrf.mxu1 }
 0x3fe   : >> { %7718 = vmatmul.msk.bf16.gmra.mxu3 %vm2172_vm11, %v10224_v39  ;;  %3747 = vrot.lane.b32.xlu2 %v10109_v61, %s8897_s9  ;;  %v3365_v54 = vsel %vm1371_vm7, %v10342_v47, %v3356_v25 }
 0x3ff   : >> { %3395 = vmatpush.bf16.msrb.mxu2 %v3365_v54 }
 0x401   : >> { %v10358_v34 = vpop.permute.xlu0 %3347  ;;  %v10381_v7 = vpop.permute.xlu1 %3349 }
 0x404   : >> { %v10330_v48 = vpop.f32.mrf.mxu2  ;;  %v10379_v35 = vpop.f32.mrf.mxu3 }
 0x405   : >> { %7722 = vmatmul.msk.bf16.gmra.mxu0 %vm2172_vm11, %v10224_v39  ;;  %v10375_v52 = vpop.permute.xlu2 %3152  ;;  %v10388_v61 = vpop.f32.mrf.mxu1 }
 0x406   : >> { %7751 = vmatmul.msk.bf16.gmra.mxu1 %vm2172_vm11, %v10324_v21  ;;  %3741 = vrot.lane.b32.xlu2 %v10118_v15, %s8897_s9 }
 0x407   : >> { %3255 = vmatpush.bf16.msra.mxu1 %v10375_v52 }
 0x409   : >> { %7754 = vmatmul.msk.bf16.gmra.mxu2 %vm2172_vm11, %v10294_v23  ;;  %v10377_v56 = vpop.permute.xlu0 %3144  ;;  %v10398_v20 = vpop.permute.xlu1 %3146 }
 0x40b   : >> { %3256 = vmatpush.bf16.msra.mxu1 %v10398_v20 }
 0x40c   : >> { %v10348_v36 = vpop.f32.mrf.mxu2 }
 0x40d   : >> { %v3143_v44 = vpop.permute.xlu2 %3142 }
 0x40e   : >> { %7719 = vmatmul.msk.bf16.gmra.mxu3 %vm2172_vm11, %v10266_v43  ;;  %3735 = vrot.lane.b32.xlu2 %v10214_v11, %s8897_s9  ;;  %v3162_v16 = vsel %vm1201_vm6, %v3143_v44, %v10377_v56 }
 0x40f   : >> { %3198 = vmatpush.bf16.msra.mxu3 %v3162_v16  ;;  %v8687_v16 = vld [vmem:[%s10011_s12 + $0x90] sm:$0xff] }
 0x411   : >> { %v10396_v4 = vpop.permute.xlu0 %3343  ;;  %v3137_v31 = vpop.permute.xlu1 %3136 }
 0x414   : >> { %v10367_v5 = vpop.f32.mrf.mxu2 }
 0x415   : >> { %7723 = vmatmul.msk.bf16.gmra.mxu0 %vm2172_vm11, %v10266_v43  ;;  %v10413_v46 = vpop.permute.xlu2 %3341 }
 0x416   : >> { %7752 = vmatmul.msk.bf16.gmra.mxu1 %vm2172_vm11, %v10365_v10 }
 0x419   : >> { %7755 = vmatmul.msk.bf16.gmra.mxu2 %vm2172_vm11, %v10324_v21 }
 0x41c   : >> { %v10390_v14 = vpop.f32.mrf.mxu2 }
 0x41d   : >> { %v3139_v60 = vpop.permute.xlu2 %3138 }
 0x41e   : >> { %7757 = vmatmul.msk.bf16.vlgmr.msrb.gmra.mxu3 %vm2172_vm11, %v10255_v26 }
 0x41f   : >> { %v10415_v8 = vpop.permute.xlu0 %3140 }
 0x420   : >> { %3257 = vmatpush.bf16.msra.mxu1 %v10415_v8 }
 0x421   : >> { %v2369_v24 = vpop.f32.mrf.mxu3 }
 0x422   : >> { %v2370_v32 = vadd.f32 %v2369_v24, %v2194_v53  ;;  %v2398_v49 = vpop.f32.mrf.mxu0  ;;  %v10437_v53 = vpop.permute.xlu1 %3335 }
 0x423   : >> { %v10403_v39 = vadd.f32 %v2398_v49, %v2223_v22  ;;  %v2427_v37 = vpop.f32.mrf.mxu1  ;;  %v3160_v22 = vsel %vm1201_vm6, %v3137_v31, %v3139_v60 }
 0x424   : >> { %v10405_v15 = vadd.f32 %v2427_v37, %v2252_v42  ;;  %v10407_v0 = vpop.f32.mrf.mxu2  ;;  %3199 = vmatpush.bf16.msra.mxu3 %v3160_v22 }
 0x425   : >> { %7834 = vmatmul.msk.bf16.vlgmr.msrb.gmra.mxu0 %vm2172_vm11, %v8685_v19  ;;  %v10456_v24 = vpop.permute.xlu2 %3337 }
 0x426   : >> { %7838 = vmatmul.msk.bf16.vlgmr.msrb.gmra.mxu1 %vm2172_vm11, %v8685_v19 }
 0x427   : >> { %v3358_v50 = vpop.permute.xlu0 %3357 }
 0x428   : >> { %v3366_v42 = vsel %vm1371_vm7, %v3356_v25, %v3358_v50  ;;  %v3165_v25 = vsel %vm1201_vm6, %v10362_v6, %v10375_v52 }
 0x429   : >> { %v2371_v11 = vpop.f32.mrf.mxu3  ;;  %7756 = vmatmul.msk.bf16.gmra.mxu2 %vm2172_vm11, %v10365_v10  ;;  %3424 = vmatpush.bf16.msrb.mxu3 %v3366_v42 }
 0x42a   : >> { %v10424_v26 = vpop.f32.mrf.mxu0  ;;  %3226 = vmatpush.bf16.msra.mxu0 %v3165_v25  ;;  %v8688_v25 = vld [vmem:[%s10011_s12 + $0x98] sm:$0xff] }
 0x42b   : >> { %v2429_v43 = vpop.f32.mrf.mxu1 }
 0x42c   : >> { %v10429_v41 = vadd.f32 %v2429_v43, %v10330_v48  ;;  %v10431_v29 = vpop.f32.mrf.mxu2  ;;  %v2372_v43 = vadd.f32 %v2371_v11, %v10328_v9  ;;  %v3361_v9 = vsel %vm1371_vm7, %v10413_v46, %v10396_v4 }
 0x42e   : >> { %7758 = vmatmul.msk.bf16.gmra.mxu3 %vm2172_vm11, %v10294_v23 }
 0x42f   : >> { %v10468_v52 = vpop.permute.xlu0 %3556 }
 0x431   : >> { %v2374_v33 = vpop.f32.mrf.mxu3 }
 0x432   : >> { %v2375_v48 = vadd.f32 %v2374_v33, %v10354_v2  ;;  %v2403_v55 = vpop.f32.mrf.mxu0  ;;  %v10458_v2 = vpop.permute.xlu1 %3552 }
 0x433   : >> { %v10444_v23 = vadd.f32 %v2403_v55, %v10360_v57  ;;  %v2432_v45 = vpop.f32.mrf.mxu1 }
 0x434   : >> { %v10447_v47 = vadd.f32 %v2432_v45, %v10348_v36  ;;  %v10449_v44 = vpop.f32.mrf.mxu2 }
 0x435   : >> { %7835 = vmatmul.msk.bf16.gmra.mxu0 %vm2172_vm11, %v8686_v12 }
 0x436   : >> { %7839 = vmatmul.msk.bf16.gmra.mxu1 %vm2172_vm11, %v8686_v12 }
 0x437   : >> { %v10493_v22 = vpop.permute.xlu0 %3548 }
 0x439   : >> { %v2376_v57 = vpop.f32.mrf.mxu3  ;;  %7842 = vmatmul.msk.bf16.vlgmr.msra.gmra.mxu2 %vm2172_vm11, %v8685_v19  ;;  %v10480_v19 = vpop.permute.xlu2 %3554 }
 0x43a   : >> { %v2377_v36 = vadd.f32 %v2376_v57, %v10384_v40  ;;  %v2405_v49 = vpop.f32.mrf.mxu0  ;;  %v3163_v40 = vsel %vm1201_vm6, %v10377_v56, %v10398_v20  ;;  %v3161_v20 = vsel %vm1201_vm6, %v3139_v60, %v10415_v8 }
 0x43b   : >> { %v10463_v51 = vadd.f32 %v2405_v49, %v10388_v61  ;;  %v2434_v37 = vpop.f32.mrf.mxu1  ;;  %v3363_v61 = vsel %vm1371_vm7, %v10358_v34, %v10381_v7  ;;  %3227 = vmatpush.bf16.msra.mxu0 %v3163_v40 }
 0x43c   : >> { %v10466_v27 = vadd.f32 %v2434_v37, %v10367_v5  ;;  %v2556_v6 = vpop.f32.mrf.mxu2  ;;  %v3352_v5 = vpop.permute.xlu1 %3351  ;;  %3396 = vmatpush.bf16.msrb.mxu2 %v3363_v61 }
 0x43d   : >> { %v10470_v38 = vadd.f32 %v2556_v6, %v2370_v32  ;;  %v3364_v32 = vsel %vm1371_vm7, %v10381_v7, %v3352_v5 }
 0x43e   : >> { %7759 = vmatmul.msk.bf16.gmra.mxu3 %vm2172_vm11, %v10324_v21 }
 0x43f   : >> { %3425 = vmatpush.bf16.msrb.mxu3 %v3364_v32  ;;  %3228 = vmatpush.bf16.msra.mxu0 %v3161_v20  ;;  %v10510_v55 = vpop.permute.xlu0 %3540 }
 0x440   : >> { %3397 = vmatpush.bf16.msrb.mxu2 %v3361_v9 }
 0x441   : >> { %v2379_v31 = vpop.f32.mrf.mxu3  ;;  %v10502_v7 = vpop.permute.xlu2 %3546 }
 0x442   : >> { %v10485_v21 = vpop.f32.mrf.mxu0  ;;  %v2380_v61 = vadd.f32 %v2379_v31, %v10237_v18 }
 0x443   : >> { %v2437_v56 = vpop.f32.mrf.mxu1  ;;  %3453 = vmatpush.bf16.msrb.mxu0 %v3358_v50 }
 0x444   : >> { %v10491_v34 = vadd.f32 %v2437_v56, %v10390_v14  ;;  %v2558_v54 = vpop.f32.mrf.mxu2 }
 0x445   : >> { %v10495_v42 = vadd.f32 %v2558_v54, %v2372_v43  ;;  %7836 = vmatmul.msk.bf16.gmra.mxu0 %vm2172_vm11, %v8687_v16 }
 0x446   : >> { %7840 = vmatmul.msk.bf16.gmra.mxu1 %vm2172_vm11, %v8687_v16 }
 0x447   : >> { %3454 = vmatpush.bf16.msrb.mxu0 %v3352_v5 }
 0x449   : >> { %v2381_v14 = vpop.f32.mrf.mxu3  ;;  %7843 = vmatmul.msk.bf16.gmra.mxu2 %vm2172_vm11, %v8686_v12  ;;  %v3346_v46 = vpop.permute.xlu2 %3345 }
 0x44a   : >> { %v10505_v8 = vpop.f32.mrf.mxu0  ;;  %v3362_v49 = vsel %vm1371_vm7, %v10396_v4, %v3346_v46  ;;  %v2382_v18 = vadd.f32 %v2381_v14, %v10258_v13  ;;  %v8702_v14 = vld [vmem:[%s10011_s12 + $0xa8] sm:$0xff] }
 0x44b   : >> { %v2439_v11 = vpop.f32.mrf.mxu1  ;;  %3455 = vmatpush.bf16.msrb.mxu0 %v3346_v46  ;;  %3426 = vmatpush.bf16.msrb.mxu3 %v3362_v49 }
 0x44c   : >> { %v10508_v60 = vadd.f32 %v2439_v11, %v10407_v0  ;;  %v2561_v33 = vpop.f32.mrf.mxu2 }
 0x44d   : >> { %v10512_v45 = vadd.f32 %v2561_v33, %v2375_v48  ;;  %v3340_v48 = vpop.permute.xlu0 %3339 }
 0x44e   : >> { %7760 = vmatmul.msk.bf16.gmra.mxu3 %vm2172_vm11, %v10365_v10  ;;  %v3359_v10 = vsel %vm1371_vm7, %v10437_v53, %v10456_v24  ;;  %v3360_v4 = vsel %vm1371_vm7, %v10456_v24, %v3340_v48 }
 0x44f   : >> { %3456 = vmatpush.bf16.msrb.mxu0 %v3340_v48  ;;  %3398 = vmatpush.bf16.msrb.mxu2 %v3359_v10 }
 0x450   : >> { %3427 = vmatpush.bf16.msrb.mxu3 %v3360_v4 }
 0x451   : >> { %v2384_v50 = vpop.f32.mrf.mxu3 }
 0x452   : >> { %v10517_v12 = vpop.f32.mrf.mxu0  ;;  %v2385_v33 = vadd.f32 %v2384_v50, %v10282_v59 }
 0x453   : >> { %v2442_v57 = vpop.f32.mrf.mxu1 }
 0x454   : >> { %v10522_v0 = vadd.f32 %v2442_v57, %v10431_v29  ;;  %v2563_v37 = vpop.f32.mrf.mxu2 }
 0x455   : >> { %v10524_v6 = vadd.f32 %v2563_v37, %v2377_v36  ;;  %7837 = vmatmul.msk.bf16.gmra.mxu0 %vm2172_vm11, %v8688_v25  ;;  %v8701_v36 = vld [vmem:[%s10011_s12 + $0xa0] sm:$0xff] }
 0x456   : >> { %7841 = vmatmul.msk.bf16.gmra.mxu1 %vm2172_vm11, %v8688_v25 }
 0x459   : >> { %v2386_v29 = vpop.f32.mrf.mxu3  ;;  %7844 = vmatmul.msk.bf16.gmra.mxu2 %vm2172_vm11, %v8687_v16 }
 0x45a   : >> { %v2415_v40 = vpop.f32.mrf.mxu0  ;;  %v2387_v59 = vadd.f32 %v2386_v29, %v10296_v58  ;;  %v3564_v58 = vsel %vm1541_vm8, %v10458_v2, %v10480_v19 }
 0x45b   : >> { %v10537_v5 = vadd.f32 %v2415_v40, %v10379_v35  ;;  %v2444_v32 = vpop.f32.mrf.mxu1  ;;  %v10584_v40 = vld [vmem:[%s10011_s12 + $0xc0] sm:$0xff]  ;;  %3594 = vmatpush.bf16.msrb.mxu1 %v3564_v58 }
 0x45c   : >> { %v10540_v43 = vadd.f32 %v2444_v32, %v10449_v44  ;;  %v2566_v53 = vpop.f32.mrf.mxu2  ;;  %v8703_v32 = vld [vmem:[%s10011_s12 + $0xb0] sm:$0xff] }
 0x45d   : >> { %v10542_v56 = vadd.f32 %v2566_v53, %v2380_v61 }
 0x45e   : >> { %7871 = vmatmul.msk.bf16.vlgmr.msra.gmra.mxu3 %vm2172_vm11, %v8701_v36 }
 0x45f   : >> { %3652 = vmatpush.bf16.msra.mxu3 %v10468_v52 }
 0x461   : >> { %v2585_v24 = vpop.f32.mrf.mxu3 }
 0x462   : >> { %v2635_v16 = vadd.f32 %v2585_v24, %v10403_v39  ;;  %v2614_v20 = vpop.f32.mrf.mxu0  ;;  %v2401_v39 = vadd.f32 %v10424_v26, %v10336_v30  ;;  %v3551_v30 = vpop.permute.xlu1 %3550 }
 0x463   : >> { %v10549_v35 = vadd.f32 %v2614_v20, %v10405_v15  ;;  %v2767_v31 = vpop.f32.mrf.mxu1  ;;  %3653 = vmatpush.bf16.msra.mxu3 %v3551_v30 }
 0x464   : >> { %v10552_v44 = vadd.f32 %v2767_v31, %v10470_v38  ;;  %v2568_v54 = vpop.f32.mrf.mxu2 }
 0x465   : >> { %v10554_v9 = vadd.f32 %v2568_v54, %v2382_v18  ;;  %7875 = vmatmul.msk.bf16.vlgmr.msra.gmra.mxu0 %vm2172_vm11, %v8701_v36 }
 0x466   : >> { %7879 = vmatmul.msk.bf16.vlgmr.msra.gmra.mxu1 %vm2172_vm11, %v8701_v36 }
 0x469   : >> { %v2587_v11 = vpop.f32.mrf.mxu3  ;;  %7845 = vmatmul.msk.bf16.gmra.mxu2 %vm2172_vm11, %v8688_v25 }
 0x46a   : >> { %v2638_v13 = vadd.f32 %v2587_v11, %v2401_v39  ;;  %v2616_v15 = vpop.f32.mrf.mxu0 }
 0x46b   : >> { %v10564_v38 = vadd.f32 %v2616_v15, %v10429_v41  ;;  %v2769_v46 = vpop.f32.mrf.mxu1 }
 0x46c   : >> { %v10567_v57 = vadd.f32 %v2769_v46, %v10495_v42  ;;  %v2571_v49 = vpop.f32.mrf.mxu2  ;;  %v8704_v46 = vld [vmem:[%s10011_s12 + $0xb8] sm:$0xff] }
 0x46d   : >> { %v10569_v37 = vadd.f32 %v2571_v49, %v2385_v33 }
 0x46e   : >> { %7872 = vmatmul.msk.bf16.gmra.mxu3 %vm2172_vm11, %v8702_v14 }
 0x471   : >> { %v2590_v26 = vpop.f32.mrf.mxu3 }
 0x472   : >> { %v2641_v25 = vadd.f32 %v2590_v26, %v10444_v23  ;;  %v2619_v48 = vpop.f32.mrf.mxu0  ;;  %v3565_v23 = vsel %vm1541_vm8, %v10480_v19, %v10468_v52  ;;  %v3562_v52 = vsel %vm1541_vm8, %v10502_v7, %v10493_v22  ;;  %v2409_v7 = vadd.f32 %v10485_v21, %v10310_v1  ;;  %v10626_v1 = vld [vmem:[%s10011_s12 + $0xc8] sm:$0xff] }
 0x473   : >> { %v10575_v41 = vadd.f32 %v2619_v48, %v10447_v47  ;;  %v2772_v50 = vpop.f32.mrf.mxu1  ;;  %v3545_v47 = vpop.permute.xlu2 %3544  ;;  %3623 = vmatpush.bf16.msra.mxu2 %v3565_v23  ;;  %3595 = vmatpush.bf16.msrb.mxu1 %v3562_v52  ;;  %v2411_v21 = vadd.f32 %v10505_v8, %v10326_v17  ;;  %v2414_v8 = vadd.f32 %v10517_v12, %v10352_v62 }
 0x474   : >> { %v10578_v42 = vadd.f32 %v2772_v50, %v10512_v45  ;;  %v2573_v10 = vpop.f32.mrf.mxu2  ;;  %v3543_v45 = vpop.permute.xlu1 %3542  ;;  %3654 = vmatpush.bf16.msra.mxu3 %v3545_v47 }
 0x475   : >> { %v10580_v4 = vadd.f32 %v2573_v10, %v2387_v59  ;;  %7876 = vmatmul.msk.bf16.gmra.mxu0 %vm2172_vm11, %v8702_v14  ;;  %v3561_v17 = vsel %vm1541_vm8, %v3543_v45, %v3545_v47  ;;  %v3539_v23 = vpop.permute.xlu0 %3538  ;;  %v10656_v47 = vld [vmem:[%s10011_s12 + $0xd0] sm:$0xff] }
 0x476   : >> { %7880 = vmatmul.msk.bf16.gmra.mxu1 %vm2172_vm11, %v8702_v14 }
 0x478   : >> { %3655 = vmatpush.bf16.msra.mxu3 %v3539_v23 }
 0x479   : >> { %v2592_v29 = vpop.f32.mrf.mxu3  ;;  %7908 = vmatmul.msk.bf16.vlgmr.msrb.gmra.mxu2 %vm2172_vm11, %v10584_v40 }
 0x47a   : >> { %v2644_v36 = vadd.f32 %v2592_v29, %v10463_v51  ;;  %v2621_v61 = vpop.f32.mrf.mxu0  ;;  %v3560_v51 = vsel %vm1541_vm8, %v10510_v55, %v3543_v45 }
 0x47b   : >> { %v10598_v53 = vadd.f32 %v2621_v61, %v10466_v27  ;;  %v2774_v2 = vpop.f32.mrf.mxu1  ;;  %v3563_v27 = vsel %vm1541_vm8, %v10493_v22, %v3551_v30  ;;  %v3537_v18 = vpop.permute.xlu2 %3536  ;;  %3596 = vmatpush.bf16.msrb.mxu1 %v3560_v51 }
 0x47c   : >> { %v10604_v19 = vadd.f32 %v2774_v2, %v10524_v6  ;;  %v2796_v24 = vpop.f32.mrf.mxu2  ;;  %v3535_v31 = vpop.permute.xlu1 %3534  ;;  %3624 = vmatpush.bf16.msra.mxu2 %v3563_v27  ;;  %v3559_v62 = vsel %vm1541_vm8, %v3537_v18, %v3539_v23 }
 0x47d   : >> { %v10606_v20 = vadd.f32 %v2796_v24, %v2635_v16  ;;  %v3558_v16 = vsel %vm1541_vm8, %v3535_v31, %v3537_v18 }
 0x47e   : >> { %7873 = vmatmul.msk.bf16.gmra.mxu3 %vm2172_vm11, %v8703_v32 }
 0x47f   : >> { %3597 = vmatpush.bf16.msrb.mxu1 %v3558_v16 }
 0x480   : >> { %3625 = vmatpush.bf16.msra.mxu2 %v3561_v17 }
 0x481   : >> { %v2595_v6 = vpop.f32.mrf.mxu3 }
 0x482   : >> { %v2647_v54 = vadd.f32 %v2595_v6, %v2409_v7  ;;  %v2624_v39 = vpop.f32.mrf.mxu0  ;;  %v10688_v7 = vld [vmem:[%s10011_s12 + $0xd8] sm:$0xff] }
 0x483   : >> { %v10617_v11 = vadd.f32 %v2624_v39, %v10491_v34  ;;  %v2777_v55 = vpop.f32.mrf.mxu1  ;;  %v3754_v6 = vpop.permute.xlu2 %3753 }
 0x484   : >> { %v10620_v22 = vadd.f32 %v2777_v55, %v10542_v56  ;;  %v2798_v15 = vpop.f32.mrf.mxu2  ;;  %3626 = vmatpush.bf16.msra.mxu2 %v3559_v62  ;;  %v3752_v16 = vpop.permute.xlu1 %3751 }
 0x485   : >> { %v10622_v14 = vadd.f32 %v2798_v15, %v2638_v13  ;;  %7877 = vmatmul.msk.bf16.gmra.mxu0 %vm2172_vm11, %v8703_v32 }
 0x486   : >> { %7881 = vmatmul.msk.bf16.gmra.mxu1 %vm2172_vm11, %v8703_v32 }
 0x489   : >> { %v2597_v33 = vpop.f32.mrf.mxu3  ;;  %7909 = vmatmul.msk.bf16.gmra.mxu2 %vm2172_vm11, %v10626_v1 }
 0x48a   : >> { %v2650_v34 = vadd.f32 %v2597_v33, %v2411_v21  ;;  %v2626_v56 = vpop.f32.mrf.mxu0 }
 0x48b   : >> { %v10635_v49 = vadd.f32 %v2626_v56, %v10508_v60  ;;  %v2779_v13 = vpop.f32.mrf.mxu1 }
 0x48c   : >> { %v10638_v30 = vadd.f32 %v2779_v13, %v10554_v9  ;;  %v2801_v26 = vpop.f32.mrf.mxu2  ;;  %v3746_v13 = vpop.permute.xlu1 %3745 }
 0x48d   : >> { %v10640_v48 = vadd.f32 %v2801_v26, %v2641_v25 }
 0x48e   : >> { %7874 = vmatmul.msk.bf16.gmra.mxu3 %vm2172_vm11, %v8704_v46 }
 0x491   : >> { %v2600_v59 = vpop.f32.mrf.mxu3 }
 0x492   : >> { %v2653_v50 = vadd.f32 %v2600_v59, %v2414_v8  ;;  %v2629_v60 = vpop.f32.mrf.mxu0  ;;  %v10710_v8 = vld [vmem:[%s10011_s12 + $0xe8] sm:$0xff] }
 0x493   : >> { %v10647_v10 = vadd.f32 %v2629_v60, %v10522_v0  ;;  %v2782_v9 = vpop.f32.mrf.mxu1 }
 0x494   : >> { %v10650_v58 = vadd.f32 %v2782_v9, %v10569_v37  ;;  %v2803_v25 = vpop.f32.mrf.mxu2  ;;  %v3740_v23 = vpop.permute.xlu1 %3739 }
 0x495   : >> { %v10652_v29 = vadd.f32 %v2803_v25, %v2644_v36  ;;  %7878 = vmatmul.msk.bf16.gmra.mxu0 %vm2172_vm11, %v8704_v46 }
 0x496   : >> { %7882 = vmatmul.msk.bf16.gmra.mxu1 %vm2172_vm11, %v8704_v46  ;;  %v3748_v46 = vpop.permute.xlu2 %3747 }
 0x499   : >> { %v2602_v12 = vpop.f32.mrf.mxu3  ;;  %7910 = vmatmul.msk.bf16.gmra.mxu2 %vm2172_vm11, %v10656_v47 }
 0x49a   : >> { %v2656_v0 = vadd.f32 %v2602_v12, %v10537_v5  ;;  %v2631_v37 = vpop.f32.mrf.mxu0  ;;  %v10675_v5 = vld [vmem:[%s10011_s12 + $0xe0] sm:$0xff] }
 0x49b   : >> { %v10664_v45 = vadd.f32 %v2631_v37, %v10540_v43  ;;  %v2784_v36 = vpop.f32.mrf.mxu1 }
 0x49c   : >> { %v10667_v61 = vadd.f32 %v2784_v36, %v10580_v4  ;;  %v2806_v32 = vpop.f32.mrf.mxu2 }
 0x49d   : >> { %v10669_v2 = vadd.f32 %v2806_v32, %v2647_v54 }
 0x49e   : >> { %7912 = vmatmul.msk.bf16.vlgmr.msrb.gmra.mxu3 %vm2172_vm11, %v10584_v40  ;;  %v3742_v25 = vpop.permute.xlu2 %3741 }
 0x4a1   : >> { %v2825_v52 = vpop.f32.mrf.mxu3 }
 0x4a2   : >> { %v2847_v24 = vadd.f32 %v2825_v52, %v10549_v35  ;;  %v3002_v51 = vpop.f32.mrf.mxu0  ;;  %v3756_v35 = vpop.permute.xlu0 %3755 }
 0x4a3   : >> { %v10678_v43 = vadd.f32 %v3002_v51, %v10552_v44  ;;  %v3031_v27 = vpop.f32.mrf.mxu1  ;;  %v3764_v44 = vsel %vm1711_vm9, %v3754_v6, %v3756_v35  ;;  %3851 = vmatpush.bf16.msrb.mxu2 %v3756_v35 }
 0x4a4   : >> { %v10681_v18 = vadd.f32 %v3031_v27, %v10606_v20  ;;  %v2808_v4 = vpop.f32.mrf.mxu2  ;;  %v3763_v20 = vsel %vm1711_vm9, %v3752_v16, %v3754_v6  ;;  %3822 = vmatpush.bf16.msra.mxu1 %v3764_v44  ;;  %v10743_v44 = vld [vmem:[%s10011_s12 + $0xf0] sm:$0xff] }
 0x4a5   : >> { %v10683_v31 = vadd.f32 %v2808_v4, %v2650_v34  ;;  %7916 = vmatmul.msk.bf16.vlgmr.msrb.gmra.mxu0 %vm2172_vm11, %v10584_v40 }
 0x4a6   : >> { %7945 = vmatmul.msk.bf16.vlgmr.msrb.gmra.mxu1 %vm2172_vm11, %v10675_v5  ;;  %3793 = vmatpush.bf16.msra.mxu0 %v3763_v20  ;;  %v3736_v27 = vpop.permute.xlu2 %3735 }
 0x4a9   : >> { %v2827_v54 = vpop.f32.mrf.mxu3  ;;  %7911 = vmatmul.msk.bf16.gmra.mxu2 %vm2172_vm11, %v10688_v7 }
 0x4aa   : >> { %v2850_v40 = vadd.f32 %v2827_v54, %v10564_v38  ;;  %v3004_v39 = vpop.f32.mrf.mxu0  ;;  %v3750_v56 = vpop.permute.xlu0 %3749  ;;  %v3761_v38 = vsel %vm1711_vm9, %v3746_v13, %v3748_v46 }
 0x4ab   : >> { %v10698_v55 = vadd.f32 %v3004_v39, %v10567_v57  ;;  %v3033_v15 = vpop.f32.mrf.mxu1  ;;  %3852 = vmatpush.bf16.msrb.mxu2 %v3750_v56  ;;  %3794 = vmatpush.bf16.msra.mxu0 %v3761_v38  ;;  %v3762_v37 = vsel %vm1711_vm9, %v3748_v46, %v3750_v56  ;;  %v10779_v38 = vld [vmem:[%s10011_s12 + $0xf8] sm:$0xff] }
 0x4ac   : >> { %v10701_v21 = vadd.f32 %v3033_v15, %v10622_v14  ;;  %v2811_v33 = vpop.f32.mrf.mxu2  ;;  %3823 = vmatpush.bf16.msra.mxu1 %v3762_v37 }
 0x4ad   : >> { %v10703_v34 = vadd.f32 %v2811_v33, %v2653_v50 }
 0x4ae   : >> { %7913 = vmatmul.msk.bf16.gmra.mxu3 %vm2172_vm11, %v10626_v1 }
 0x4b1   : >> { %v2830_v26 = vpop.f32.mrf.mxu3 }
 0x4b2   : >> { %v2853_v57 = vadd.f32 %v2830_v26, %v10575_v41  ;;  %v3007_v17 = vpop.f32.mrf.mxu0  ;;  %v3744_v41 = vpop.permute.xlu0 %3743 }
 0x4b3   : >> { %v10713_v14 = vadd.f32 %v3007_v17, %v10578_v42  ;;  %v3036_v59 = vpop.f32.mrf.mxu1  ;;  %3853 = vmatpush.bf16.msrb.mxu2 %v3744_v41  ;;  %v3759_v42 = vsel %vm1711_vm9, %v3740_v23, %v3742_v25  ;;  %v1988_v17 = vld [vmem:[%s10775_s20 + $0x20] sm:$0xff] }
 0x4b4   : >> { %v10716_v50 = vadd.f32 %v3036_v59, %v10640_v48  ;;  %v2813_v60 = vpop.f32.mrf.mxu2  ;;  %3795 = vmatpush.bf16.msra.mxu0 %v3759_v42  ;;  %v1991_v42 = vld [vmem:[%s10775_s20 + $0x38] sm:$0xff] }
 0x4b5   : >> { %v10718_v9 = vadd.f32 %v2813_v60, %v2656_v0  ;;  %7917 = vmatmul.msk.bf16.gmra.mxu0 %vm2172_vm11, %v10626_v1 }
 0x4b6   : >> { %7946 = vmatmul.msk.bf16.gmra.mxu1 %vm2172_vm11, %v10710_v8 }
 0x4b9   : >> { %v2832_v62 = vpop.f32.mrf.mxu3  ;;  %7949 = vmatmul.msk.bf16.vlgmr.msra.gmra.mxu2 %vm2172_vm11, %v10675_v5 }
 0x4ba   : >> { %v2856_v48 = vadd.f32 %v2832_v62, %v10598_v53  ;;  %v3009_v12 = vpop.f32.mrf.mxu0  ;;  %v3760_v53 = vsel %vm1711_vm9, %v3742_v25, %v3744_v41  ;;  %v3738_v51 = vpop.permute.xlu0 %3737  ;;  %v1990_v62 = vld [vmem:[%s10775_s20 + $0x30] sm:$0xff] }
 0x4bb   : >> { %v10729_v0 = vadd.f32 %v3009_v12, %v10604_v19  ;;  %v3038_v1 = vpop.f32.mrf.mxu1  ;;  %v3734_v19 = vpop.permute.xlu1 %3733  ;;  %3854 = vmatpush.bf16.msrb.mxu2 %v3738_v51  ;;  %3824 = vmatpush.bf16.msra.mxu1 %v3760_v53  ;;  %v3758_v20 = vsel %vm1711_vm9, %v3736_v27, %v3738_v51  ;;  %v1989_v51 = vld [vmem:[%s10775_s20 + $0x28] sm:$0xff] }
 0x4bc   : >> { %v10733_v36 = vadd.f32 %v3038_v1, %v10652_v29  ;;  %v3060_v32 = vpop.f32.mrf.mxu2  ;;  %v3757_v4 = vsel %vm1711_vm9, %v3734_v19, %v3736_v27  ;;  %v1986_v27 = vld [vmem:[%s10775_s20 + $0x10] sm:$0xff] }
 0x4bd   : >> { %v10735_v52 = vadd.f32 %v3060_v32, %v2847_v24  ;;  %3796 = vmatpush.bf16.msra.mxu0 %v3757_v4 }
 0x4be   : >> { %7914 = vmatmul.msk.bf16.gmra.mxu3 %vm2172_vm11, %v10656_v47 }
 0x4bf   : >> { %3825 = vmatpush.bf16.msra.mxu1 %v3758_v20 }
 0x4c1   : >> { %v2835_v35 = vpop.f32.mrf.mxu3 }
 0x4c2   : >> { %v2859_v29 = vadd.f32 %v2835_v35, %v10617_v11  ;;  %v3012_v6 = vpop.f32.mrf.mxu0 }
 0x4c3   : >> { %v10746_v24 = vadd.f32 %v3012_v6, %v10620_v22  ;;  %v3041_v16 = vpop.f32.mrf.mxu1 }
 0x4c4   : >> { %v10750_v54 = vadd.f32 %v3041_v16, %v10669_v2  ;;  %v3062_v39 = vpop.f32.mrf.mxu2 }
 0x4c5   : >> { %v10752_v15 = vadd.f32 %v3062_v39, %v2850_v40  ;;  %7918 = vmatmul.msk.bf16.gmra.mxu0 %vm2172_vm11, %v10656_v47  ;;  %v8714_v39 = vld [vmem:[%s10011_s12 + $0x108] sm:$0xff] }
 0x4c6   : >> { %7947 = vmatmul.msk.bf16.gmra.mxu1 %vm2172_vm11, %v10743_v44 }
 0x4c9   : >> { %v2837_v11 = vpop.f32.mrf.mxu3  ;;  %7950 = vmatmul.msk.bf16.gmra.mxu2 %vm2172_vm11, %v10710_v8 }
 0x4ca   : >> { %v2862_v22 = vadd.f32 %v2837_v11, %v10635_v49  ;;  %v3014_v33 = vpop.f32.mrf.mxu0 }
 0x4cb   : >> { %v10762_v2 = vadd.f32 %v3014_v33, %v10638_v30  ;;  %v3043_v56 = vpop.f32.mrf.mxu1 }
 0x4cc   : >> { %v10765_v40 = vadd.f32 %v3043_v56, %v10683_v31  ;;  %v3065_v46 = vpop.f32.mrf.mxu2 }
 0x4cd   : >> { %v10767_v47 = vadd.f32 %v3065_v46, %v2853_v57  ;;  %v8898_v57 = vmov 0  }
 0x4ce   : >> { %7915 = vmatmul.msk.bf16.gmra.mxu3 %vm2172_vm11, %v10688_v7  ;;  %8862 = vset.pattern.permute.xlu0 %v8898_v57 }
 0x4cf   : >> { %8861 = vset.pattern.permute.xlu2 %v8898_v57  ;;  %3922 = vperm.xlu0 %8862, %v1988_v17  }
 0x4d0   : >> { %8860 = vset.pattern.permute.xlu1 %v8898_v57  ;;  %3937 = vperm.xlu2 %8861, %v1991_v42   ;;  %v8715_v57 = vld [vmem:[%s10011_s12 + $0x110] sm:$0xff] }
 0x4d1   : >> { %v2840_v49 = vpop.f32.mrf.mxu3  ;;  %3932 = vperm.xlu1 %8860, %v1990_v62  }
 0x4d2   : >> { %v2865_v30 = vadd.f32 %v2840_v49, %v10647_v10  ;;  %v3017_v13 = vpop.f32.mrf.mxu0 }
 0x4d3   : >> { %v10782_v31 = vadd.f32 %v3017_v13, %v10650_v58  ;;  %v3046_v26 = vpop.f32.mrf.mxu1 }
 0x4d4   : >> { %v10786_v59 = vadd.f32 %v3046_v26, %v10703_v34  ;;  %v3067_v60 = vpop.f32.mrf.mxu2 }
 0x4d5   : >> { %v10788_v10 = vadd.f32 %v3067_v60, %v2856_v48  ;;  %7919 = vmatmul.msk.bf16.gmra.mxu0 %vm2172_vm11, %v10688_v7  ;;  %v1985_v7 = vld [vmem:[%s10775_s20 + $0x8] sm:$0xff] }
 0x4d6   : >> { %7948 = vmatmul.msk.bf16.gmra.mxu1 %vm2172_vm11, %v10779_v38 }
 0x4d7   : >> { %3907 = vperm.xlu0 %8862, %v1985_v7  }
 0x4d8   : >> { %3912 = vperm.xlu2 %8861, %v1986_v27  }
 0x4d9   : >> { %v2842_v58 = vpop.f32.mrf.mxu3  ;;  %7951 = vmatmul.msk.bf16.gmra.mxu2 %vm2172_vm11, %v10743_v44  ;;  %3927 = vperm.xlu1 %8860, %v1989_v51  }
 0x4da   : >> { %v2868_v41 = vadd.f32 %v2842_v58, %v10664_v45  ;;  %v3019_v34 = vpop.f32.mrf.mxu0 }
 0x4db   : >> { %v10798_v25 = vadd.f32 %v3019_v34, %v10667_v61  ;;  %v3048_v23 = vpop.f32.mrf.mxu1  ;;  %v8713_v61 = vld [vmem:[%s10011_s12 + $0x100] sm:$0xff] }
 0x4dc   : >> { %v10804_v48 = vadd.f32 %v3048_v23, %v10718_v9  ;;  %v3070_v12 = vpop.f32.mrf.mxu2 }
 0x4dd   : >> { %12761 = vst [vmem:[#allocation5_spill] sm:$0xff] %v10798_v25  ;;  %v3094_v1 = vadd.f32 %v3070_v12, %v2859_v29  ;;  %v1984_v29 = vld [vmem:[%s10775_s20] sm:$0xff]  ;;  %v8716_v12 = vld [vmem:[%s10011_s12 + $0x118] sm:$0xff] }
 0x4de   : >> { %12762 = vst [vmem:[#allocation6_spill] sm:$0xff] %v10804_v48  ;;  %7953 = vmatmul.msk.bf16.vlgmr.msra.gmra.mxu3 %vm2172_vm11, %v10675_v5 }
 0x4e0   : >> { %3902 = vperm.xlu2 %8861, %v1984_v29  }
 0x4e1   : >> { %v3201_v45 = vpop.f32.mrf.mxu3 }
 0x4e2   : >> { %v3279_v37 = vadd.f32 %v3201_v45, %v10678_v43  ;;  %v3230_v32 = vpop.f32.mrf.mxu0 }
 0x4e3   : >> { %v10811_v53 = vadd.f32 %v3230_v32, %v10681_v18  ;;  %v3259_v9 = vpop.f32.mrf.mxu1 }
 0x4e4   : >> { %v10816_v19 = vadd.f32 %v3259_v9, %v10735_v52  ;;  %v3072_v4 = vpop.f32.mrf.mxu2  ;;  %v1987_v52 = vld [vmem:[%s10775_s20 + $0x18] sm:$0xff] }
 0x4e5   : >> { %v10818_v5 = vadd.f32 %v3072_v4, %v2862_v22  ;;  %7982 = vmatmul.msk.bf16.vlgmr.msra.gmra.mxu0 %vm2172_vm11, %v8713_v61  ;;  %3917 = vperm.xlu1 %8860, %v1987_v52  }
 0x4e6   : >> { %7986 = vmatmul.msk.bf16.vlgmr.msra.gmra.mxu1 %vm2172_vm11, %v8713_v61 }
 0x4e7   : >> { %12763 = vst [vmem:[#allocation7_spill] sm:$0xff] %v10818_v5 }
 0x4e9   : >> { %v10822_v43 = vpop.f32.mrf.mxu3  ;;  %7952 = vmatmul.msk.bf16.gmra.mxu2 %vm2172_vm11, %v10779_v38 }
 0x4ea   : >> { %v10826_v18 = vpop.f32.mrf.mxu0 }
 0x4eb   : >> { %v10828_v35 = vpop.f32.mrf.mxu1 }
 0x4ec   : >> { %v3075_v6 = vpop.f32.mrf.mxu2 }
 0x4ed   : >> { %v3100_v16 = vadd.f32 %v3075_v6, %v2865_v30 }
 0x4ee   : >> { %7954 = vmatmul.msk.bf16.gmra.mxu3 %vm2172_vm11, %v10710_v8 }
 0x4f1   : >> { %v3206_v20 = vpop.f32.mrf.mxu3 }
 0x4f2   : >> { %v3285_v11 = vadd.f32 %v3206_v20, %v10713_v14  ;;  %v3235_v22 = vpop.f32.mrf.mxu0 }
 0x4f3   : >> { %v10837_v33 = vadd.f32 %v3235_v22, %v10716_v50  ;;  %v3264_v56 = vpop.f32.mrf.mxu1 }
 0x4f4   : >> { %v3287_v46 = vadd.f32 %v3264_v56, %v10767_v47  ;;  %v3077_v49 = vpop.f32.mrf.mxu2 }
 0x4f5   : >> { %v10840_v13 = vadd.f32 %v3077_v49, %v2868_v41  ;;  %7983 = vmatmul.msk.bf16.gmra.mxu0 %vm2172_vm11, %v8714_v39 }
 0x4f6   : >> { %7987 = vmatmul.msk.bf16.gmra.mxu1 %vm2172_vm11, %v8714_v39 }
 0x4f7   : >> { %12764 = vst [vmem:[#allocation8_spill] sm:$0xff] %v10840_v13  ;;  %v8736_v13 = vld [vmem:[#allocation3 + $0x88] sm:$0xf0] }
 0x4f9   : >> { %v10844_v8 = vpop.f32.mrf.mxu3  ;;  %7990 = vmatmul.msk.bf16.vlgmr.msrb.gmra.mxu2 %vm2172_vm11, %v8713_v61 }
 0x4fa   : >> { %v10847_v14 = vpop.f32.mrf.mxu0 }
 0x4fb   : >> { %v10849_v30 = vpop.f32.mrf.mxu1 }
 0x4fc   : >> { %v3400_v50 = vpop.f32.mrf.mxu2 }
 0x4fd   : >> { %v10851_v26 = vadd.f32 %v3400_v50, %v3279_v37 }
 0x4fe   : >> { %7955 = vmatmul.msk.bf16.gmra.mxu3 %vm2172_vm11, %v10743_v44 }
 0x501   : >> { %v3211_v47 = vpop.f32.mrf.mxu3 }
 0x502   : >> { %v3291_v17 = vadd.f32 %v3211_v47, %v10746_v24  ;;  %v3240_v60 = vpop.f32.mrf.mxu0 }
 0x503   : >> { %v10858_v58 = vadd.f32 %v3240_v60, %v10750_v54  ;;  %v3269_v41 = vpop.f32.mrf.mxu1 }
 0x504   : >> { %v3293_v34 = vadd.f32 %v3269_v41, %v3094_v1  ;;  %v10860_v23 = vpop.f32.mrf.mxu2 }
 0x505   : >> { %7984 = vmatmul.msk.bf16.gmra.mxu0 %vm2172_vm11, %v8715_v57 }
 0x506   : >> { %7988 = vmatmul.msk.bf16.gmra.mxu1 %vm2172_vm11, %v8715_v57 }
 0x509   : >> { %v10864_v42 = vpop.f32.mrf.mxu3  ;;  %7991 = vmatmul.msk.bf16.gmra.mxu2 %vm2172_vm11, %v8714_v39 }
 0x50a   : >> { %v10867_v44 = vpop.f32.mrf.mxu0 }
 0x50b   : >> { %v10869_v24 = vpop.f32.mrf.mxu1 }
 0x50c   : >> { %12765 = vst [vmem:[#allocation9_spill] sm:$0xff] %v10869_v24  ;;  %v3405_v62 = vpop.f32.mrf.mxu2 }
 0x50d   : >> { %v10871_v7 = vadd.f32 %v3405_v62, %v3285_v11 }
 0x50e   : >> { %7956 = vmatmul.msk.bf16.gmra.mxu3 %vm2172_vm11, %v10779_v38 }
 0x511   : >> { %v3216_v54 = vpop.f32.mrf.mxu3 }
 0x512   : >> { %v3297_v1 = vadd.f32 %v3216_v54, %v10782_v31  ;;  %v3245_v45 = vpop.f32.mrf.mxu0 }
 0x513   : >> { %v10878_v61 = vadd.f32 %v3245_v45, %v10786_v59  ;;  %v3274_v37 = vpop.f32.mrf.mxu1 }
 0x514   : >> { %v3299_v32 = vadd.f32 %v3274_v37, %v3100_v16  ;;  %v10880_v9 = vpop.f32.mrf.mxu2 }
 0x515   : >> { %7985 = vmatmul.msk.bf16.gmra.mxu0 %vm2172_vm11, %v8716_v12 }
 0x516   : >> { %7989 = vmatmul.msk.bf16.gmra.mxu1 %vm2172_vm11, %v8716_v12 }
 0x519   : >> { %v10884_v51 = vpop.f32.mrf.mxu3  ;;  %7992 = vmatmul.msk.bf16.gmra.mxu2 %vm2172_vm11, %v8715_v57 }
 0x51a   : >> { %12766 = vst [vmem:[#allocation10_spill] sm:$0xff] %v10884_v51  ;;  %v10887_v38 = vpop.f32.mrf.mxu0 }
 0x51b   : >> { %12767 = vst [vmem:[#allocation11_spill] sm:$0xff] %v10887_v38  ;;  %v10889_v27 = vpop.f32.mrf.mxu1  ;;  %v8728_v38 = vld [vmem:[#allocation3 + $0x38] sm:$0xf0] }
 0x51c   : >> { %12768 = vst [vmem:[#allocation12_spill] sm:$0xff] %v10889_v27  ;;  %v3410_v31 = vpop.f32.mrf.mxu2  ;;  %v8091_v27 = vld [vmem:[#allocation3 + $0x78] sm:$0xf] }
 0x51d   : >> { %v10891_v4 = vadd.f32 %v3410_v31, %v3291_v17  ;;  %v10935_v24 = vor.u32 %v8736_v13, %v8091_v27 }
 0x51f   : >> { %12775 = vst [vmem:[#allocation19_spill] sm:$0xff] %v10935_v24  ;;  %4202 = vrot.lane.b32.xlu1 %v10935_v24, %s8890_s23 }
 0x521   : >> { %v3429_v59 = vpop.f32.mrf.mxu3 }
 0x522   : >> { %v3458_v52 = vpop.f32.mrf.mxu0  ;;  %v3479_v24 = vadd.f32 %v3429_v59, %v10811_v53  ;;  %v3283_v53 = vadd.f32 %v10826_v18, %v10701_v21 }
 0x523   : >> { %v10894_v29 = vadd.f32 %v3458_v52, %v10816_v19  ;;  %v3599_v6 = vpop.f32.mrf.mxu1 }
 0x524   : >> { %v10896_v16 = vpop.f32.mrf.mxu2 }
 0x529   : >> { %v10898_v20 = vpop.f32.mrf.mxu3  ;;  %7993 = vmatmul.msk.bf16.gmra.mxu2 %vm2172_vm11, %v8716_v12 }
 0x52a   : >> { %v10901_v39 = vpop.f32.mrf.mxu0 }
 0x52b   : >> { %v3601_v11 = vpop.f32.mrf.mxu1 }
 0x52c   : >> { %v3415_v22 = vpop.f32.mrf.mxu2 }
 0x52d   : >> { %v10903_v56 = vadd.f32 %v3415_v22, %v3297_v1 }
 0x52f   : >> { %12769 = vst [vmem:[#allocation13_spill] sm:$0xff] %v10903_v56 }
 0x531   : >> { %v10905_v49 = vpop.f32.mrf.mxu3 }
 0x532   : >> { %v3463_v50 = vpop.f32.mrf.mxu0 }
 0x533   : >> { %v10907_v47 = vadd.f32 %v3463_v50, %v3287_v46  ;;  %v10909_v19 = vpop.f32.mrf.mxu1  ;;  %v10933_v50 = vpop.permute.xlu2 %3937 }
 0x534   : >> { %v10911_v57 = vpop.f32.mrf.mxu2  ;;  %12774 = vst [vmem:[#allocation18_spill] sm:$0xff] %v10933_v50 }
 0x535   : >> { %12770 = vst [vmem:[#allocation14_spill] sm:$0xff] %v10911_v57  ;;  %v8059_v57 = vld [vmem:[#allocation3 + $0x28] sm:$0xf] }
 0x536   : >> { %v10947_v48 = vor.u32 %v8728_v38, %v8059_v57  ;;  %v3677_v38 = vadd.f32 %v3599_v6, %v10851_v26  ;;  %v8724_v6 = vld [vmem:[#allocation3 + $0x10] sm:$0xf0] }
 0x538   : >> { %12778 = vst [vmem:[#allocation22_spill] sm:$0xff] %v10947_v48  ;;  %4186 = vrot.lane.b32.xlu1 %v10947_v48, %s8890_s23 }
 0x539   : >> { %v10913_v17 = vpop.f32.mrf.mxu3 }
 0x53a   : >> { %v10915_v60 = vpop.f32.mrf.mxu0 }
 0x53b   : >> { %12771 = vst [vmem:[#allocation15_spill] sm:$0xff] %v10915_v60  ;;  %v10917_v41 = vpop.f32.mrf.mxu1  ;;  %v10949_v50 = vpop.permute.xlu2 %3912 }
 0x53c   : >> { %v3628_v62 = vpop.f32.mrf.mxu2 }
 0x53d   : >> { %v3678_v57 = vadd.f32 %v3628_v62, %v3479_v24  ;;  %v8043_v24 = vld [vmem:[#allocation3] sm:$0xf] }
 0x541   : >> { %v10919_v54 = vpop.f32.mrf.mxu3 }
 0x542   : >> { %v3468_v12 = vpop.f32.mrf.mxu0 }
 0x543   : >> { %v10921_v1 = vadd.f32 %v3468_v12, %v3293_v34  ;;  %v10923_v45 = vpop.f32.mrf.mxu1  ;;  %v10965_v25 = vpop.permute.xlu2 %3902 }
 0x544   : >> { %v3630_v46 = vpop.f32.mrf.mxu2  ;;  %v10975_v26 = vpop.permute.xlu1 %3932 }
 0x545   : >> { %12772 = vst [vmem:[#allocation16_spill] sm:$0xff] %v10921_v1 }
 0x549   : >> { %v10929_v52 = vpop.f32.mrf.mxu3 }
 0x54a   : >> { %v10925_v37 = vpop.f32.mrf.mxu0 }
 0x54b   : >> { %12773 = vst [vmem:[#allocation17_spill] sm:$0xff] %v10925_v37  ;;  %v10927_v31 = vpop.f32.mrf.mxu1 }
 0x54c   : >> { %v10931_v22 = vpop.f32.mrf.mxu2 }
 0x551   : >> { %v10945_v1 = vpop.f32.mrf.mxu3 }
 0x552   : >> { %v3473_v34 = vpop.f32.mrf.mxu0 }
 0x553   : >> { %v10939_v12 = vadd.f32 %v3473_v34, %v3299_v32  ;;  %v10941_v5 = vpop.f32.mrf.mxu1  ;;  %v10959_v34 = vpop.permute.xlu0 %3922 }
 0x554   : >> { %12777 = vst [vmem:[#allocation21_spill] sm:$0xff] %v10941_v5  ;;  %v10943_v37 = vpop.f32.mrf.mxu2 }
 0x555   : >> { %12776 = vst [vmem:[#allocation20_spill] sm:$0xff] %v10939_v12 }
 0x559   : >> { %v10962_v12 = vpop.f32.mrf.mxu3 }
 0x55a   : >> { %v10953_v13 = vpop.f32.mrf.mxu0  ;;  %12781 = vst [vmem:[#allocation25_spill] sm:$0xff] %v10962_v12 }
 0x55b   : >> { %12779 = vst [vmem:[#allocation23_spill] sm:$0xff] %v10953_v13  ;;  %v10955_v27 = vpop.f32.mrf.mxu1 }
 0x55c   : >> { %12780 = vst [vmem:[#allocation24_spill] sm:$0xff] %v10955_v27  ;;  %v10957_v32 = vpop.f32.mrf.mxu2  ;;  %v3282_v27 = vadd.f32 %v10822_v43, %v10698_v55  ;;  %v10982_v43 = vpop.permute.xlu0 %3907 }
 0x561   : >> { %v3657_v18 = vpop.f32.mrf.mxu3 }
 0x562   : >> { %v3798_v51 = vpop.f32.mrf.mxu0 }
 0x563   : >> { %v3876_v5 = vadd.f32 %v3798_v51, %v3677_v38  ;;  %v3827_v48 = vpop.f32.mrf.mxu1  ;;  %v3481_v51 = vadd.f32 %v10860_v23, %v3282_v27  ;;  %v3482_v38 = vadd.f32 %v10898_v20, %v3283_v53 }
 0x564   : >> { %v3877_v56 = vadd.f32 %v3827_v48, %v3678_v57  ;;  %v10967_v13 = vpop.f32.mrf.mxu2  ;;  %v10978_v48 = vor.u32 %v8724_v6, %v8043_v24 }
 0x565   : >> { %v3940_v60 = vadd.f32 %v10965_v25, %v3876_v5  ;;  %v3680_v55 = vadd.f32 %v3601_v11, %v3481_v51  ;;  %v3681_v21 = vadd.f32 %v3630_v46, %v3482_v38  ;;  %v10993_v51 = vpop.permute.xlu1 %3927 }
 0x566   : >> { %v3941_v59 = vadd.f32 %v10965_v25, %v3877_v56  ;;  %4178 = vrot.lane.b32.xlu2 %v10978_v48, %s8890_s23 }
 0x567   : >> { %v3964_v62 = vmax.f32 %v3940_v60, 0.0 }
 0x568   : >> { %v3965_v57 = vmax.f32 %v3941_v59, 0.0  ;;  %v3485_v59 = vadd.f32 %v10905_v49, %v10837_v33  ;;  %v3288_v33 = vadd.f32 %v10844_v8, %v10729_v0 }
 0x569   : >> { %v3988_v5 = vmul.f32 %v3964_v62, %v9785_v63 }
 0x56a   : >> { %v3989_v56 = vmul.f32 %v3965_v57, %v9787_v3  ;;  %v3800_v12 = vpop.f32.mrf.mxu0  ;;  %v3684_v38 = vadd.f32 %v10931_v22, %v3485_v59  ;;  %v8075_v22 = vld [vmem:[#allocation3 + $0x50] sm:$0xf] }
 0x56b   : >> { %v3879_v23 = vadd.f32 %v3800_v12, %v3680_v55  ;;  %v3829_v60 = vpop.f32.mrf.mxu1  ;;  %v3683_v12 = vadd.f32 %v10909_v19, %v10871_v7  ;;  %v3289_v7 = vadd.f32 %v10847_v14, %v10733_v36 }
 0x56c   : >> { %v4012_v27 = vpack.c.bf16 %v3989_v56, %v3988_v5  ;;  %v3880_v24 = vadd.f32 %v3829_v60, %v3681_v21  ;;  %v10987_v6 = vpop.f32.mrf.mxu2  ;;  %v3659_v56 = vpop.f32.mrf.mxu3 }
 0x56d   : >> { %v3943_v20 = vadd.f32 %v10982_v43, %v3879_v23  ;;  %v3488_v59 = vadd.f32 %v10913_v17, %v3289_v7 }
 0x56e   : >> { %4028 = vst [vmem:[#allocation3 + $0x4] sm:$0xff] %v4012_v27  ;;  %v3944_v11 = vadd.f32 %v10982_v43, %v3880_v24  ;;  %v8732_v24 = vld [vmem:[#allocation3 + $0x60] sm:$0xf0] }
 0x56f   : >> { %v3967_v53 = vmax.f32 %v3943_v20, 0.0  ;;  %v3487_v20 = vadd.f32 %v10880_v9, %v3288_v33  ;;  %v3687_v36 = vadd.f32 %v10943_v37, %v3488_v59  ;;  %v3679_v9 = vadd.f32 %v3657_v18, %v10894_v29 }
 0x570   : >> { %v3968_v46 = vmax.f32 %v3944_v11, 0.0  ;;  %v3284_v37 = vadd.f32 %v10828_v35, %v10752_v15  ;;  %v3491_v29 = vadd.f32 %v10919_v54, %v10858_v58 }
 0x571   : >> { %v3991_v62 = vmul.f32 %v3967_v53, %v9785_v63  ;;  %v11009_v53 = vor.u32 %v8732_v24, %v8075_v22  ;;  %v3686_v0 = vadd.f32 %v10917_v41, %v3487_v20 }
 0x572   : >> { %v3992_v57 = vmul.f32 %v3968_v46, %v9787_v3  ;;  %v3803_v55 = vpop.f32.mrf.mxu0  ;;  %v3483_v7 = vadd.f32 %v10901_v39, %v3284_v37  ;;  %v3690_v20 = vadd.f32 %v10957_v32, %v3491_v29  ;;  %v3294_v39 = vadd.f32 %v10864_v42, %v10762_v2 }
 0x573   : >> { %v3882_v5 = vadd.f32 %v3803_v55, %v3683_v12  ;;  %v3832_v21 = vpop.f32.mrf.mxu1  ;;  %4194 = vrot.lane.b32.xlu0 %v11009_v53, %s8890_s23  ;;  %v3295_v32 = vadd.f32 %v10867_v44, %v10765_v40 }
 0x574   : >> { %v4014_v23 = vpack.c.bf16 %v3992_v57, %v3991_v62  ;;  %v3883_v60 = vadd.f32 %v3832_v21, %v3684_v38  ;;  %v11000_v27 = vpop.f32.mrf.mxu2  ;;  %v11018_v62 = vpop.permute.xlu1 %3917  ;;  %v3682_v35 = vadd.f32 %v3659_v56, %v3483_v7 }
 0x575   : >> { %v3946_v49 = vadd.f32 %v10949_v50, %v3882_v5 }
 0x576   : >> { %4030 = vst [vmem:[#allocation3 + $0x18] sm:$0xff] %v4014_v23  ;;  %v3947_v19 = vadd.f32 %v10949_v50, %v3883_v60  ;;  %v3662_v23 = vpop.f32.mrf.mxu3 }
 0x577   : >> { %v3970_v11 = vmax.f32 %v3946_v49, 0.0 }
 0x578   : >> { %v3971_v46 = vmax.f32 %v3947_v19, 0.0  ;;  %v3689_v19 = vadd.f32 %v10923_v45, %v10891_v4 }
 0x579   : >> { %v3994_v8 = vmul.f32 %v3970_v11, %v9785_v63 }
 0x57a   : >> { %v3995_v14 = vmul.f32 %v3971_v46, %v9787_v3  ;;  %v3805_v12 = vpop.f32.mrf.mxu0 }
 0x57b   : >> { %v3885_v38 = vadd.f32 %v3805_v12, %v3686_v0  ;;  %v3834_v57 = vpop.f32.mrf.mxu1 }
 0x57c   : >> { %v4016_v17 = vpack.c.bf16 %v3995_v14, %v3994_v8  ;;  %v3886_v55 = vadd.f32 %v3834_v57, %v3687_v36  ;;  %v3856_v5 = vpop.f32.mrf.mxu2  ;;  %v3493_v36 = vadd.f32 %v10896_v16, %v3294_v39  ;;  %v3685_v16 = vadd.f32 %v3662_v23, %v10907_v47 }
 0x57d   : >> { %v3878_v41 = vadd.f32 %v3856_v5, %v3679_v9  ;;  %v3949_v21 = vadd.f32 %v11018_v62, %v3885_v38  ;;  %v3494_v9 = vadd.f32 %v10929_v52, %v3295_v32  ;;  %v3290_v47 = vadd.f32 %v10849_v30, %v10788_v10 }
 0x57e   : >> { %4032 = vst [vmem:[#allocation3 + $0x2c] sm:$0xff] %v4016_v17  ;;  %v3950_v60 = vadd.f32 %v11018_v62, %v3886_v55  ;;  %v3664_v2 = vpop.f32.mrf.mxu3  ;;  %v3692_v38 = vadd.f32 %v10927_v31, %v3493_v36 }
 0x57f   : >> { %v3942_v33 = vadd.f32 %v10965_v25, %v3878_v41  ;;  %v3973_v49 = vmax.f32 %v3949_v21, 0.0  ;;  %v3693_v40 = vadd.f32 %v10967_v13, %v3494_v9 }
 0x580   : >> { %v3974_v18 = vmax.f32 %v3950_v60, 0.0 }
 0x581   : >> { %v3966_v22 = vmax.f32 %v3942_v33, 0.0  ;;  %v3997_v24 = vmul.f32 %v3973_v49, %v9785_v63 }
 0x582   : >> { %v3998_v11 = vmul.f32 %v3974_v18, %v9787_v3  ;;  %v3808_v15 = vpop.f32.mrf.mxu0 }
 0x583   : >> { %v3990_v25 = vmul.f32 %v3966_v22, %v9793_v28  ;;  %v3888_v59 = vadd.f32 %v3808_v15, %v3689_v19  ;;  %v3837_v46 = vpop.f32.mrf.mxu1  ;;  %v3497_v19 = vadd.f32 %v10945_v1, %v10878_v61  ;;  %v12784_v15 = vld [vmem:[#allocation21_spill] sm:$0xff] }
 0x584   : >> { %v4018_v58 = vpack.c.bf16 %v3998_v11, %v3997_v24  ;;  %v3889_v54 = vadd.f32 %v3837_v46, %v3690_v20  ;;  %v3858_v0 = vpop.f32.mrf.mxu2  ;;  %v12782_v24 = vld [vmem:[#allocation15_spill] sm:$0xff]  ;;  %v12783_v11 = vld [vmem:[#allocation13_spill] sm:$0xff] }
 0x585   : >> { %v4013_v4 = vpack.c.bf16 %v3990_v25, %v3990_v25  ;;  %v3952_v45 = vadd.f32 %v10959_v34, %v3888_v59  ;;  %v3881_v8 = vadd.f32 %v3858_v0, %v3682_v35  ;;  %v8726_v49 = vld [vmem:[#allocation3 + $0x2c] sm:$0xf]  ;;  %v3489_v20 = vadd.f32 %v12782_v24, %v3290_v47 }
 0x586   : >> { %4034 = vst [vmem:[#allocation3 + $0x40] sm:$0xff] %v4018_v58  ;;  %v3953_v56 = vadd.f32 %v10959_v34, %v3889_v54  ;;  %v3695_v35 = vadd.f32 %v12784_v15, %v12783_v11  ;;  %v3696_v30 = vadd.f32 %v10987_v6, %v3497_v19  ;;  %v3667_v59 = vpop.f32.mrf.mxu3  ;;  %v12787_v6 = vld [vmem:[#allocation6_spill] sm:$0xff] }
 0x587   : >> { %4029 = vst.msk [vmem:[#allocation3 + $0xc] sm:$0xf] %vm1958_vm10, %v4013_v4  ;;  %v3976_v14 = vmax.f32 %v3952_v45, 0.0  ;;  %v3945_v12 = vadd.f32 %v10982_v43, %v3881_v8  ;;  %v3688_v58 = vadd.f32 %v3664_v2, %v3489_v20  ;;  %v12785_v45 = vld [vmem:[#allocation5_spill] sm:$0xff]  ;;  %v12786_v8 = vld [vmem:[#allocation10_spill] sm:$0xff] }
 0x588   : >> { %v3977_v42 = vmax.f32 %v3953_v56, 0.0  ;;  %v3300_v32 = vadd.f32 %v12786_v8, %v12785_v45 }
 0x589   : >> { %v4000_v57 = vmul.f32 %v3976_v14, %v9785_v63  ;;  %v3969_v17 = vmax.f32 %v3945_v12, 0.0  ;;  %v12788_v12 = vld [vmem:[#allocation11_spill] sm:$0xff] }
 0x58a   : >> { %v4001_v44 = vmul.f32 %v3977_v42, %v9787_v3  ;;  %v3810_v55 = vpop.f32.mrf.mxu0  ;;  %v3301_v9 = vadd.f32 %v12788_v12, %v12787_v6  ;;  %v12789_v42 = vld [vmem:[#allocation14_spill] sm:$0xff] }
 0x58b   : >> { %v3993_v5 = vmul.f32 %v3969_v17, %v9793_v28  ;;  %v3891_v41 = vadd.f32 %v3810_v55, %v3692_v38  ;;  %v3839_v43 = vpop.f32.mrf.mxu1  ;;  %v3499_v38 = vadd.f32 %v12789_v42, %v3300_v32 }
 0x58c   : >> { %v4020_v21 = vpack.c.bf16 %v4001_v44, %v4000_v57  ;;  %v3892_v52 = vadd.f32 %v3839_v43, %v3693_v40  ;;  %v3861_v60 = vpop.f32.mrf.mxu2  ;;  %v12790_v40 = vld [vmem:[#allocation25_spill] sm:$0xff] }
 0x58d   : >> { %v4015_v37 = vpack.c.bf16 %v3993_v5, %v3993_v5  ;;  %v3955_v31 = vadd.f32 %v10993_v51, %v3891_v41  ;;  %v3884_v33 = vadd.f32 %v3861_v60, %v3685_v16  ;;  %v8061_v29 = vld [vmem:[#allocation3 + $0x3c] sm:$0xf0]  ;;  %v3500_v44 = vadd.f32 %v12790_v40, %v3301_v9 }
 0x58e   : >> { %4036 = vst [vmem:[#allocation3 + $0x54] sm:$0xff] %v4020_v21  ;;  %v3956_v13 = vadd.f32 %v10993_v51, %v3892_v52  ;;  %v11053_v18 = vor.u32 %v8726_v49, %v8061_v29  ;;  %v12791_v16 = vld [vmem:[#allocation24_spill] sm:$0xff] }
 0x58f   : >> { %4031 = vst.msk [vmem:[#allocation3 + $0x20] sm:$0xf] %vm1958_vm10, %v4015_v37  ;;  %v3979_v23 = vmax.f32 %v3955_v31, 0.0  ;;  %v3948_v7 = vadd.f32 %v10949_v50, %v3884_v33  ;;  %v3698_v5 = vadd.f32 %v12791_v16, %v3499_v38  ;;  %v3699_v21 = vadd.f32 %v11000_v27, %v3500_v44  ;;  %v12792_v37 = vld [vmem:[#allocation16_spill] sm:$0xff] }
 0x590   : >> { %v3980_v22 = vmax.f32 %v3956_v13, 0.0  ;;  %4188 = vrot.lane.b32.xlu2 %v11053_v18, %s8890_s23  ;;  %v3691_v31 = vadd.f32 %v3667_v59, %v12792_v37  ;;  %v12795_v59 = vld [vmem:[#allocation9_spill] sm:$0xff]  ;;  %v12797_v9 = vld [vmem:[#allocation20_spill] sm:$0xff] }
 0x591   : >> { %v4003_v25 = vmul.f32 %v3979_v23, %v9785_v63  ;;  %v3972_v10 = vmax.f32 %v3948_v7, 0.0  ;;  %v12798_v16 = vld [vmem:[#allocation8_spill] sm:$0xff] }
 0x592   : >> { %v4004_v50 = vmul.f32 %v3980_v22, %v9787_v3  ;;  %v3813_v46 = vpop.f32.mrf.mxu0  ;;  %v12793_v22 = vld [vmem:[#allocation18_spill] sm:$0xff] }
 0x593   : >> { %v3996_v61 = vmul.f32 %v3972_v10, %v9793_v28  ;;  %v3894_v1 = vadd.f32 %v3813_v46, %v3695_v35  ;;  %v3842_v54 = vpop.f32.mrf.mxu1 }
 0x594   : >> { %v4022_v0 = vpack.c.bf16 %v4004_v50, %v4003_v25  ;;  %v3895_v39 = vadd.f32 %v3842_v54, %v3696_v30  ;;  %v3863_v4 = vpop.f32.mrf.mxu2  ;;  %v12794_v30 = vld [vmem:[#allocation7_spill] sm:$0xff] }
 0x595   : >> { %v4017_v56 = vpack.c.bf16 %v3996_v61, %v3996_v61  ;;  %v3958_v36 = vadd.f32 %v10975_v26, %v3894_v1  ;;  %v3887_v14 = vadd.f32 %v3863_v4, %v3688_v58  ;;  %v8730_v7 = vld [vmem:[#allocation3 + $0x54] sm:$0xf]  ;;  %v8083_v27 = vld [vmem:[#allocation3 + $0x58] sm:$0xf]  ;;  %v3296_v50 = vadd.f32 %v12795_v59, %v12794_v30  ;;  %v12796_v1 = vld [vmem:[#allocation17_spill] sm:$0xff] }
 0x596   : >> { %4038 = vst [vmem:[#allocation3 + $0x68] sm:$0xff] %v4022_v0  ;;  %v3959_v2 = vadd.f32 %v10975_v26, %v3895_v39  ;;  %v8067_v59 = vld [vmem:[#allocation3 + $0x30] sm:$0xf] }
 0x597   : >> { %4033 = vst.msk [vmem:[#allocation3 + $0x34] sm:$0xf] %vm1958_vm10, %v4017_v56  ;;  %v3982_v57 = vmax.f32 %v3958_v36, 0.0  ;;  %v3951_v17 = vadd.f32 %v11018_v62, %v3887_v14  ;;  %v3669_v62 = vpop.f32.mrf.mxu3  ;;  %v3495_v54 = vadd.f32 %v12796_v1, %v3296_v50  ;;  %v8053_v50 = vld [vmem:[#allocation3 + $0x1c] sm:$0xf0] }
 0x598   : >> { %v3983_v55 = vmax.f32 %v3959_v2, 0.0 }
 0x599   : >> { %v4006_v41 = vmul.f32 %v3982_v57, %v9785_v63  ;;  %v3975_v43 = vmax.f32 %v3951_v17, 0.0  ;;  %v3694_v45 = vadd.f32 %v3669_v62, %v3495_v54 }
 0x59a   : >> { %v4007_v52 = vmul.f32 %v3983_v55, %v9787_v3  ;;  %v3815_v60 = vpop.f32.mrf.mxu0 }
 0x59b   : >> { %v3999_v33 = vmul.f32 %v3975_v43, %v9793_v28  ;;  %v3897_v49 = vadd.f32 %v3815_v60, %v3698_v5  ;;  %v3844_v29 = vpop.f32.mrf.mxu1  ;;  %v12799_v5 = vld [vmem:[#allocation12_spill] sm:$0xff] }
 0x59c   : >> { %v4024_v13 = vpack.c.bf16 %v4007_v52, %v4006_v41  ;;  %v3898_v47 = vadd.f32 %v3844_v29, %v3699_v21  ;;  %v3866_v23 = vpop.f32.mrf.mxu2  ;;  %v3302_v41 = vadd.f32 %v12799_v5, %v12798_v16  ;;  %v12800_v21 = vld [vmem:[#allocation23_spill] sm:$0xff] }
 0x59d   : >> { %v4019_v19 = vpack.c.bf16 %v3999_v33, %v3999_v33  ;;  %v3961_v24 = vadd.f32 %v12793_v22, %v3897_v49  ;;  %v3890_v20 = vadd.f32 %v3866_v23, %v3691_v31  ;;  %v8077_v11 = vld [vmem:[#allocation3 + $0x64] sm:$0xf0]  ;;  %v8733_v15 = vld [vmem:[#allocation3 + $0x68] sm:$0xf0] }
 0x59e   : >> { %4040 = vst [vmem:[#allocation3 + $0x7c] sm:$0xff] %v4024_v13  ;;  %v3962_v35 = vadd.f32 %v12793_v22, %v3898_v47  ;;  %v11088_v25 = vor.u32 %v8730_v7, %v8077_v11  ;;  %v11090_v10 = vor.u32 %v8733_v15, %v8083_v27  ;;  %v3501_v52 = vadd.f32 %v12800_v21, %v3302_v41  ;;  %v8729_v27 = vld [vmem:[#allocation3 + $0x40] sm:$0xf0] }
 0x59f   : >> { %4035 = vst.msk [vmem:[#allocation3 + $0x48] sm:$0xf] %vm1958_vm10, %v4019_v19  ;;  %v3985_v46 = vmax.f32 %v3961_v24, 0.0  ;;  %v3954_v58 = vadd.f32 %v10959_v34, %v3890_v20  ;;  %v3672_v14 = vpop.f32.mrf.mxu3 }
 0x5a0   : >> { %v3986_v61 = vmax.f32 %v3962_v35, 0.0  ;;  %4196 = vrot.lane.b32.xlu1 %v11088_v25, %s8890_s23  ;;  %4198 = vrot.lane.b32.xlu0 %v11090_v10, %s8890_s23  ;;  %v3697_v2 = vadd.f32 %v3672_v14, %v12797_v9  ;;  %v8727_v35 = vld [vmem:[#allocation3 + $0x34] sm:$0xf]  ;;  %v4203_v14 = vpop.permute.xlu1 %4202 }
 0x5a1   : >> { %v4009_v0 = vmul.f32 %v3985_v46, %v9785_v63  ;;  %v3978_v39 = vmax.f32 %v3954_v58, 0.0 }
 0x5a2   : >> { %v4010_v4 = vmul.f32 %v3986_v61, %v9787_v3  ;;  %v8723_v61 = vld [vmem:[#allocation3 + $0xc] sm:$0xf] }
 0x5a3   : >> { %v4002_v8 = vmul.f32 %v3978_v39, %v9793_v28  ;;  %v11140_v54 = vor.u32 %v8723_v61, %v8053_v50  ;;  %v8045_v39 = vld [vmem:[#allocation3 + $0x14] sm:$0xf0] }
 0x5a4   : >> { %v4026_v32 = vpack.c.bf16 %v4010_v4, %v4009_v0  ;;  %v3868_v56 = vpop.f32.mrf.mxu2  ;;  %v12801_v0 = vld [vmem:[#allocation19_spill] sm:$0xff]  ;;  %v8722_v4 = vld [vmem:[#allocation3 + $0x4] sm:$0xf] }
 0x5a5   : >> { %v4021_v34 = vpack.c.bf16 %v4002_v8, %v4002_v8  ;;  %v3893_v36 = vadd.f32 %v3868_v56, %v3694_v45  ;;  %v8734_v40 = vld [vmem:[#allocation3 + $0x7c] sm:$0xf]  ;;  %v8099_v13 = vld [vmem:[#allocation3 + $0x80] sm:$0xf]  ;;  %v11148_v45 = vor.u32 %v8722_v4, %v8045_v39  ;;  %v8264_v39 = vld [vmem:[#allocation3 + $0x2c] sm:$0xf] }
 0x5a6   : >> { %4042 = vst [vmem:[#allocation3 + $0x90] sm:$0xff] %v4026_v32  ;;  %v8069_v11 = vld [vmem:[#allocation3 + $0x44] sm:$0xf0]  ;;  %v8725_v8 = vld [vmem:[#allocation3 + $0x18] sm:$0xf0] }
 0x5a7   : >> { %4037 = vst.msk [vmem:[#allocation3 + $0x5c] sm:$0xf] %vm1958_vm10, %v4021_v34  ;;  %v3957_v6 = vadd.f32 %v10993_v51, %v3893_v36  ;;  %v3674_v51 = vpop.f32.mrf.mxu3  ;;  %v11129_v30 = vor.u32 %v8727_v35, %v8069_v11  ;;  %v8051_v32 = vld [vmem:[#allocation3 + $0x8] sm:$0xf]  ;;  %v12802_v34 = vld [vmem:[#allocation22_spill] sm:$0xff] }
 0x5a8   : >> { %v3700_v37 = vadd.f32 %v3674_v51, %v3501_v52  ;;  %v11156_v56 = vor.u32 %v8725_v8, %v8051_v32 }
 0x5a9   : >> { %v3981_v12 = vmax.f32 %v3957_v6, 0.0 }
 0x5ab   : >> { %v4005_v42 = vmul.f32 %v3981_v12, %v9793_v28  ;;  %v4187_v12 = vpop.permute.xlu1 %4186 }
 0x5ac   : >> { %v3871_v38 = vpop.f32.mrf.mxu2 }
 0x5ad   : >> { %v4023_v57 = vpack.c.bf16 %v4005_v42, %v4005_v42  ;;  %v3896_v17 = vadd.f32 %v3871_v38, %v3697_v2  ;;  %v8093_v44 = vld [vmem:[#allocation3 + $0x8c] sm:$0xf0]  ;;  %v8737_v33 = vld [vmem:[#allocation3 + $0x90] sm:$0xf0] }
 0x5ae   : >> { %v11108_v55 = vor.u32 %v8734_v40, %v8093_v44  ;;  %v11118_v47 = vor.u32 %v8737_v33, %v8099_v13  ;;  %v8731_v23 = vld [vmem:[#allocation3 + $0x5c] sm:$0xf]  ;;  %v8764_v33 = vld [vmem:[#allocation3 + $0x8c] sm:$0xf0]  ;;  %v8738_v13 = vld [vmem:[%s10011_s12 + $0x140] sm:$0xff] }
 0x5af   : >> { %4039 = vst.msk [vmem:[#allocation3 + $0x70] sm:$0xf] %vm1958_vm10, %v4023_v57  ;;  %v3960_v43 = vadd.f32 %v10975_v26, %v3896_v17  ;;  %v8290_v32 = vld [vmem:[#allocation3 + $0x90] sm:$0xf0] }
 0x5b0   : >> { %4204 = vrot.lane.b32.xlu2 %v11108_v55, %s8890_s23 }
 0x5b1   : >> { %v3984_v60 = vmax.f32 %v3960_v43, 0.0 }
 0x5b3   : >> { %v4008_v31 = vmul.f32 %v3984_v60, %v9793_v28 }
 0x5b4   : >> { %v3873_v49 = vpop.f32.mrf.mxu2 }
 0x5b5   : >> { %v4025_v29 = vpack.c.bf16 %v4008_v31, %v4008_v31  ;;  %v3899_v62 = vadd.f32 %v3873_v49, %v3700_v37 }
 0x5b6   : >> { %v8085_v7 = vld [vmem:[#allocation3 + $0x6c] sm:$0xf0] }
 0x5b7   : >> { %4041 = vst.msk [vmem:[#allocation3 + $0x84] sm:$0xf] %vm1958_vm10, %v4025_v29  ;;  %v3963_v26 = vadd.f32 %v12793_v22, %v3899_v62  ;;  %v11122_v19 = vor.u32 %v8731_v23, %v8085_v7  ;;  %v11132_v22 = vor.u32 %v8729_v27, %v8067_v59  ;;  %v8762_v27 = vld [vmem:[#allocation3 + $0x6c] sm:$0xf0]  ;;  %v8284_v59 = vld [vmem:[#allocation3 + $0x5c] sm:$0xf] }
 0x5b8   : >> { %4206 = vrot.lane.b32.xlu2 %v11118_v47, %s8890_s23  ;;  %v11285_v50 = vor.u32 %v8762_v27, %v8284_v59  ;;  %v8759_v59 = vld [vmem:[#allocation3 + $0x44] sm:$0xf0] }
 0x5b9   : >> { %v3987_v24 = vmax.f32 %v3963_v26, 0.0  ;;  %4200 = vrot.lane.b32.xlu1 %v11122_v19, %s8890_s23 }
 0x5bb   : >> { %v4011_v20 = vmul.f32 %v3987_v24, %v9793_v28 }
 0x5bd   : >> { %v4027_v15 = vpack.c.bf16 %v4011_v20, %v4011_v20 }
 0x5be   : >> { %v8735_v46 = vld [vmem:[#allocation3 + $0x84] sm:$0xf] }
 0x5bf   : >> { %4043 = vst.msk [vmem:[#allocation3 + $0x98] sm:$0xf] %vm1958_vm10, %v4027_v15  ;;  %v8276_v15 = vld [vmem:[#allocation3 + $0x54] sm:$0xf] }
 0x5c0   : >> { %4192 = vrot.lane.b32.xlu2 %v11129_v30, %s8890_s23  ;;  %v11182_v36 = vpop.permute.xlu2 %4178 }
 0x5c1   : >> { %4190 = vrot.lane.b32.xlu1 %v11132_v22, %s8890_s23 }
 0x5c6   : >> { %v8101_v58 = vld [vmem:[#allocation3 + $0x94] sm:$0xf0] }
 0x5c7   : >> { %v11138_v1 = vor.u32 %v8735_v46, %v8101_v58  ;;  %v8758_v58 = vld [vmem:[#allocation3 + $0x3c] sm:$0xf0] }
 0x5c8   : >> { %4377 = vrot.lane.b32.xlu2 %v12801_v0, %s8891_s24  ;;  %v11304_v4 = vor.u32 %v8758_v58, %v8264_v39  ;;  %v8272_v58 = vld [vmem:[#allocation3 + $0x34] sm:$0xf] }
 0x5c9   : >> { %4208 = vrot.lane.b32.xlu0 %v11138_v1, %s8890_s23  ;;  %4184 = vrot.lane.b32.xlu1 %v11140_v54, %s8890_s23 }
 0x5d0   : >> { %4369 = vrot.lane.b32.xlu2 %v11009_v53, %s8891_s24 }
 0x5d1   : >> { %4381 = vrot.lane.b32.xlu1 %v11118_v47, %s8891_s24  ;;  %4180 = vrot.lane.b32.xlu0 %v11148_v45, %s8890_s23 }
 0x5d8   : >> { %4361 = vrot.lane.b32.xlu2 %v12802_v34, %s8891_s24 }
 0x5d9   : >> { %4373 = vrot.lane.b32.xlu1 %v11090_v10, %s8891_s24  ;;  %4182 = vrot.lane.b32.xlu0 %v11156_v56, %s8890_s23 }
 0x5e0   : >> { %4564 = vrot.lane.b32.xlu2 %v12801_v0, %s8892_s28 }
 0x5e1   : >> { %4365 = vrot.lane.b32.xlu1 %v11132_v22, %s8891_s24  ;;  %4379 = vrot.lane.b32.xlu0 %v11108_v55, %s8891_s24 }
 0x5e5   : >> { %v4195_v2 = vpop.permute.xlu0 %4194 }
 0x5e8   : >> { %4353 = vrot.lane.b32.xlu2 %v10978_v48, %s8891_s24 }
 0x5e9   : >> { %4375 = vrot.lane.b32.xlu1 %v11122_v19, %s8891_s24  ;;  %4371 = vrot.lane.b32.xlu0 %v11088_v25, %s8891_s24 }
 0x5ea   : >> { %v4189_v6 = vpop.permute.xlu2 %4188 }
 0x5eb   : >> { %v4213_v16 = vsel %vm405_vm1, %v4187_v12, %v4189_v6 }
 0x5f0   : >> { %4556 = vrot.lane.b32.xlu2 %v11009_v53, %s8892_s28 }
 0x5f1   : >> { %4357 = vrot.lane.b32.xlu1 %v11156_v56, %s8891_s24  ;;  %4363 = vrot.lane.b32.xlu0 %v11053_v18, %s8891_s24 }
 0x5f8   : >> { %4367 = vrot.lane.b32.xlu2 %v11129_v30, %s8891_s24 }
 0x5f9   : >> { %4383 = vrot.lane.b32.xlu1 %v11138_v1, %s8891_s24  ;;  %4566 = vrot.lane.b32.xlu0 %v11108_v55, %s8892_s28 }
 0x600   : >> { %4359 = vrot.lane.b32.xlu2 %v11140_v54, %s8891_s24 }
 0x601   : >> { %4550 = vrot.lane.b32.xlu1 %v11053_v18, %s8892_s28  ;;  %4355 = vrot.lane.b32.xlu0 %v11148_v45, %s8891_s24  ;;  %s12834_s24 = smov (%p1976_p4), 109  }
 0x608   : >> { %4568 = vrot.lane.b32.xlu2 %v11118_v47, %s8892_s28 }
 0x609   : >> { %4542 = vrot.lane.b32.xlu1 %v11148_v45, %s8892_s28  ;;  %4558 = vrot.lane.b32.xlu0 %v11088_v25, %s8892_s28 }
 0x60a   : >> { %v4205_v9 = vpop.permute.xlu2 %4204 }
 0x60b   : >> { %v4219_v42 = vsel %vm405_vm1, %v4203_v14, %v4205_v9  ;;  %v8755_v14 = vld [vmem:[#allocation3 + $0x14] sm:$0xf0] }
 0x60c   : >> { %4250 = vmatpush.bf16.msrb.mxu3 %v4219_v42 }
 0x610   : >> { %4562 = vrot.lane.b32.xlu2 %v11122_v19, %s8892_s28 }
 0x611   : >> { %4560 = vrot.lane.b32.xlu1 %v11090_v10, %s8892_s28  ;;  %4548 = vrot.lane.b32.xlu0 %v12802_v34, %s8892_s28 }
 0x612   : >> { %v4197_v38 = vpop.permute.xlu1 %4196  ;;  %v4207_v57 = vpop.permute.xlu2 %4206 }
 0x613   : >> { %v4216_v17 = vsel %vm405_vm1, %v4195_v2, %v4197_v38  ;;  %v4220_v40 = vsel %vm405_vm1, %v4205_v9, %v4207_v57  ;;  %v4199_v44 = vpop.permute.xlu0 %4198  ;;  %v8252_v9 = vld [vmem:[#allocation3 + $0x4] sm:$0xf] }
 0x614   : >> { %4251 = vmatpush.bf16.msrb.mxu3 %v4216_v17  ;;  %4279 = vmatpush.bf16.msrb.mxu0 %v4220_v40  ;;  %v4217_v5 = vsel %vm405_vm1, %v4197_v38, %v4199_v44  ;;  %v8254_v38 = vld [vmem:[#allocation3 + $0x18] sm:$0xf0] }
 0x618   : >> { %4777 = vrot.lane.b32.xlu2 %v11108_v55, %s8893_s29  ;;  %4252 = vmatpush.bf16.msrb.mxu3 %v4213_v16  ;;  %v8765_v16 = vld [vmem:[#allocation3 + $0x94] sm:$0xf0] }
 0x619   : >> { %4280 = vmatpush.bf16.msrb.mxu0 %v4217_v5  ;;  %4775 = vrot.lane.b32.xlu1 %v12801_v0, %s8893_s29  ;;  %v8739_v0 = vld [vmem:[%s10011_s12 + $0x148] sm:$0xff] }
 0x61a   : >> { %4540 = vrot.lane.b32.xlu0 %v10978_v48, %s8892_s28  ;;  %v4193_v41 = vpop.permute.xlu2 %4192  ;;  %v8754_v5 = vld [vmem:[#allocation3 + $0x8] sm:$0xf] }
 0x620   : >> { %4544 = vrot.lane.b32.xlu2 %v11156_v56, %s8892_s28 }
 0x621   : >> { %4554 = vrot.lane.b32.xlu1 %v11129_v30, %s8892_s28 }
 0x622   : >> { %4552 = vrot.lane.b32.xlu0 %v11132_v22, %s8892_s28  ;;  %v11225_v55 = vpop.permute.xlu2 %4377 }
 0x628   : >> { %4771 = vrot.lane.b32.xlu2 %v11090_v10, %s8893_s29 }
 0x629   : >> { %4769 = vrot.lane.b32.xlu1 %v11088_v25, %s8893_s29 }
 0x62a   : >> { %4779 = vrot.lane.b32.xlu0 %v11118_v47, %s8893_s29  ;;  %v11233_v43 = vpop.permute.xlu2 %4369  ;;  %v8288_v47 = vld [vmem:[#allocation3 + $0x7c] sm:$0xf] }
 0x62b   : >> { %v4201_v51 = vpop.permute.xlu1 %4200  ;;  %v11268_v23 = vor.u32 %v8764_v33, %v8288_v47  ;;  %v8260_v33 = vld [vmem:[#allocation3 + $0xc] sm:$0xf] }
 0x62c   : >> { %v4218_v37 = vsel %vm405_vm1, %v4199_v44, %v4201_v51  ;;  %v8740_v44 = vld [vmem:[%s10011_s12 + $0x150] sm:$0xff] }
 0x630   : >> { %4761 = vrot.lane.b32.xlu2 %v11053_v18, %s8893_s29 }
 0x631   : >> { %4759 = vrot.lane.b32.xlu1 %v12802_v34, %s8893_s29 }
 0x632   : >> { %4767 = vrot.lane.b32.xlu0 %v11009_v53, %s8893_s29  ;;  %v11241_v21 = vpop.permute.xlu2 %4361 }
 0x633   : >> { %v4191_v10 = vpop.permute.xlu1 %4190 }
 0x634   : >> { %v4214_v25 = vsel %vm405_vm1, %v4189_v6, %v4191_v10  ;;  %v4215_v62 = vsel %vm405_vm1, %v4191_v10, %v4193_v41  ;;  %v8763_v6 = vld [vmem:[#allocation3 + $0x80] sm:$0xf]  ;;  %v8278_v41 = vld [vmem:[#allocation3 + $0x68] sm:$0xf0]  ;;  %v8760_v10 = vld [vmem:[#allocation3 + $0x58] sm:$0xf] }
 0x635   : >> { %4281 = vmatpush.bf16.msrb.mxu0 %v4214_v25  ;;  %v11319_v12 = vor.u32 %v8763_v6, %v8290_v32  ;;  %v8719_v32 = vld [vmem:[%s10011_s12 + $0x128] sm:$0xff] }
 0x638   : >> { %4753 = vrot.lane.b32.xlu2 %v11148_v45, %s8893_s29 }
 0x639   : >> { %4751 = vrot.lane.b32.xlu1 %v10978_v48, %s8893_s29 }
 0x63a   : >> { %4570 = vrot.lane.b32.xlu0 %v11138_v1, %s8892_s28  ;;  %v11250_v18 = vpop.permute.xlu2 %4564 }
 0x63b   : >> { %v4209_v52 = vpop.permute.xlu0 %4208  ;;  %v4185_v60 = vpop.permute.xlu1 %4184 }
 0x63c   : >> { %v4221_v53 = vsel %vm405_vm1, %v4207_v57, %v4209_v52  ;;  %v8756_v52 = vld [vmem:[#allocation3 + $0x1c] sm:$0xf0] }
 0x63d   : >> { %4308 = vmatpush.bf16.msrb.mxu1 %v4221_v53 }
 0x640   : >> { %4773 = vrot.lane.b32.xlu2 %v11122_v19, %s8893_s29  ;;  %v8761_v19 = vld [vmem:[#allocation3 + $0x64] sm:$0xf0] }
 0x641   : >> { %4781 = vrot.lane.b32.xlu1 %v11138_v1, %s8893_s29  ;;  %4309 = vmatpush.bf16.msrb.mxu1 %v4218_v37  ;;  %v11283_v35 = vor.u32 %v8761_v19, %v8276_v15  ;;  %v8718_v15 = vld [vmem:[%s10011_s12 + $0x120] sm:$0xff] }
 0x642   : >> { %4546 = vrot.lane.b32.xlu0 %v11140_v54, %s8892_s28  ;;  %v11260_v48 = vpop.permute.xlu2 %4353 }
 0x643   : >> { %v4181_v31 = vpop.permute.xlu0 %4180  ;;  %v11262_v49 = vpop.permute.xlu1 %4381 }
 0x644   : >> { %v4210_v29 = vsel %vm405_vm1, %v11182_v36, %v4181_v31 }
 0x645   : >> { %4253 = vmatpush.bf16.msrb.mxu3 %v4210_v29  ;;  %4310 = vmatpush.bf16.msrb.mxu1 %v4215_v62  ;;  %v8266_v29 = vld [vmem:[#allocation3 + $0x40] sm:$0xf0]  ;;  %v11357_v62 = vor.u32 %v8756_v52, %v8260_v33 }
 0x648   : >> { %5215 = vrot.lane.b32.xlu2 %v11268_v23, %s8894_s13  ;;  %8105 = vmatmul.msk.bf16.vlgmr.msrb.gmra.mxu3 %vm2172_vm11, %v8738_v13 }
 0x649   : >> { %4757 = vrot.lane.b32.xlu1 %v11140_v54, %s8893_s29 }
 0x64a   : >> { %4763 = vrot.lane.b32.xlu0 %v11132_v22, %s8893_s29  ;;  %v11277_v7 = vpop.permute.xlu2 %4556 }
 0x64b   : >> { %v4183_v26 = vpop.permute.xlu0 %4182  ;;  %v11279_v24 = vpop.permute.xlu1 %4373 }
 0x64c   : >> { %v4211_v20 = vsel %vm405_vm1, %v4181_v31, %v4183_v26  ;;  %v4212_v11 = vsel %vm405_vm1, %v4183_v26, %v4185_v60 }
 0x64d   : >> { %4282 = vmatpush.bf16.msrb.mxu0 %v4211_v20  ;;  %4311 = vmatpush.bf16.msrb.mxu1 %v4212_v11  ;;  %v8741_v11 = vld [vmem:[%s10011_s12 + $0x158] sm:$0xff] }
 0x650   : >> { %5209 = vrot.lane.b32.xlu2 %v11283_v35, %s8894_s13  ;;  %8109 = vmatmul.msk.bf16.vlgmr.msrb.gmra.mxu0 %vm2172_vm11, %v8738_v13 }
 0x651   : >> { %8113 = vmatmul.msk.bf16.vlgmr.msrb.gmra.mxu1 %vm2172_vm11, %v8738_v13  ;;  %5213 = vrot.lane.b32.xlu1 %v11285_v50, %s8894_s13  ;;  %v8757_v13 = vld [vmem:[#allocation3 + $0x30] sm:$0xf] }
 0x652   : >> { %4755 = vrot.lane.b32.xlu0 %v11156_v56, %s8893_s29  ;;  %v11295_v22 = vpop.permute.xlu2 %4367 }
 0x653   : >> { %v4380_v46 = vpop.permute.xlu0 %4379  ;;  %v11297_v61 = vpop.permute.xlu1 %4365 }
 0x654   : >> { %v4394_v1 = vsel %vm547_vm0, %v11225_v55, %v4380_v46  ;;  %v4395_v54 = vsel %vm547_vm0, %v4380_v46, %v11262_v49  ;;  %v11338_v55 = vor.u32 %v8754_v5, %v8254_v38  ;;  %v4390_v27 = vsel %vm547_vm0, %v11297_v61, %v11295_v22 }
 0x655   : >> { %4425 = vmatpush.bf16.msra.mxu2 %v4394_v1  ;;  %4454 = vmatpush.bf16.msra.mxu3 %v4395_v54 }
 0x658   : >> { %5203 = vrot.lane.b32.xlu2 %v11304_v4, %s8894_s13  ;;  %8106 = vmatmul.msk.bf16.gmra.mxu3 %vm2172_vm11, %v8739_v0 }
 0x659   : >> { %5414 = vrot.lane.b32.xlu1 %v11268_v23, %s8895_s21 }
 0x65a   : >> { %4765 = vrot.lane.b32.xlu0 %v11129_v30, %s8893_s29  ;;  %v11313_v45 = vpop.permute.xlu2 %4359  ;;  %v11321_v30 = vor.u32 %v8755_v14, %v8252_v9  ;;  %v11424_v9 = vld [vmem:[%s10011_s12 + $0x160] sm:$0xff] }
 0x65b   : >> { %v4372_v8 = vpop.permute.xlu0 %4371  ;;  %v4376_v56 = vpop.permute.xlu1 %4375 }
 0x65c   : >> { %v4391_v34 = vsel %vm547_vm0, %v11233_v43, %v4372_v8  ;;  %v4392_v36 = vsel %vm547_vm0, %v4372_v8, %v11279_v24  ;;  %v8296_v43 = vld [vmem:[#allocation3 + $0x84] sm:$0xf]  ;;  %v4393_v47 = vsel %vm547_vm0, %v11279_v24, %v4376_v56 }
 0x65d   : >> { %4426 = vmatpush.bf16.msra.mxu2 %v4391_v34  ;;  %4455 = vmatpush.bf16.msra.mxu3 %v4392_v36  ;;  %v11340_v51 = vor.u32 %v8765_v16, %v8296_v43  ;;  %v11451_v43 = vld [vmem:[%s10011_s12 + $0x168] sm:$0xff] }
 0x660   : >> { %5416 = vrot.lane.b32.xlu2 %v11319_v12, %s8895_s21  ;;  %8110 = vmatmul.msk.bf16.gmra.mxu0 %vm2172_vm11, %v8739_v0 }
 0x661   : >> { %8114 = vmatmul.msk.bf16.gmra.mxu1 %vm2172_vm11, %v8739_v0  ;;  %5197 = vrot.lane.b32.xlu1 %v11321_v30, %s8894_s13 }
 0x662   : >> { %5217 = vrot.lane.b32.xlu0 %v11319_v12, %s8894_s13  ;;  %v11331_v2 = vpop.permute.xlu2 %4568 }
 0x663   : >> { %v4364_v42 = vpop.permute.xlu0 %4363  ;;  %v4358_v57 = vpop.permute.xlu1 %4357 }
 0x664   : >> { %v4388_v17 = vsel %vm547_vm0, %v11241_v21, %v4364_v42  ;;  %v4389_v40 = vsel %vm547_vm0, %v4364_v42, %v11297_v61  ;;  %v11345_v21 = vor.u32 %v8760_v10, %v8278_v41  ;;  %v4387_v22 = vsel %vm547_vm0, %v4358_v57, %v11313_v45 }
 0x665   : >> { %4427 = vmatpush.bf16.msra.mxu2 %v4388_v17  ;;  %4456 = vmatpush.bf16.msra.mxu3 %v4389_v40  ;;  %v8720_v40 = vld [vmem:[%s10011_s12 + $0x130] sm:$0xff] }
 0x668   : >> { %5199 = vrot.lane.b32.xlu2 %v11338_v55, %s8894_s13  ;;  %8107 = vmatmul.msk.bf16.gmra.mxu3 %vm2172_vm11, %v8740_v44 }
 0x669   : >> { %5219 = vrot.lane.b32.xlu1 %v11340_v51, %s8894_s13 }
 0x66a   : >> { %5211 = vrot.lane.b32.xlu0 %v11345_v21, %s8894_s13  ;;  %v11353_v37 = vpop.permute.xlu2 %4562 }
 0x66b   : >> { %v4567_v25 = vpop.permute.xlu0 %4566  ;;  %v4384_v53 = vpop.permute.xlu1 %4383 }
 0x66c   : >> { %v4581_v60 = vsel %vm696_vm4, %v11250_v18, %v4567_v25  ;;  %v4396_v31 = vsel %vm547_vm0, %v11262_v49, %v4384_v53  ;;  %v11362_v18 = vor.u32 %v8757_v13, %v8266_v29  ;;  %v4582_v24 = vsel %vm696_vm4, %v4567_v25, %v11331_v2 }
 0x66d   : >> { %4612 = vmatpush.bf16.msra.mxu1 %v4581_v60  ;;  %4483 = vmatpush.bf16.msra.mxu0 %v4396_v31  ;;  %v8721_v31 = vld [vmem:[%s10011_s12 + $0x138] sm:$0xff] }
 0x670   : >> { %5201 = vrot.lane.b32.xlu2 %v11357_v62, %s8894_s13  ;;  %8111 = vmatmul.msk.bf16.gmra.mxu0 %vm2172_vm11, %v8740_v44 }
 0x671   : >> { %8115 = vmatmul.msk.bf16.gmra.mxu1 %vm2172_vm11, %v8740_v44  ;;  %5410 = vrot.lane.b32.xlu1 %v11345_v21, %s8895_s21 }
 0x672   : >> { %5205 = vrot.lane.b32.xlu0 %v11362_v18, %s8894_s13  ;;  %4484 = vmatpush.bf16.msra.mxu0 %v4393_v47  ;;  %v4778_v46 = vpop.permute.xlu2 %4777 }
 0x673   : >> { %v4356_v49 = vpop.permute.xlu0 %4355  ;;  %v4551_v26 = vpop.permute.xlu1 %4550 }
 0x674   : >> { %v4385_v19 = vsel %vm547_vm0, %v11260_v48, %v4356_v49  ;;  %v4386_v20 = vsel %vm547_vm0, %v4356_v49, %v4358_v57  ;;  %v11384_v48 = vor.u32 %v8759_v59, %v8272_v58  ;;  %v11522_v58 = vld [vmem:[%s10011_s12 + $0x178] sm:$0xff] }
 0x675   : >> { %4428 = vmatpush.bf16.msra.mxu2 %v4385_v19  ;;  %4457 = vmatpush.bf16.msra.mxu3 %v4386_v20  ;;  %v11483_v19 = vld [vmem:[%s10011_s12 + $0x170] sm:$0xff] }
 0x676   : >> { %4485 = vmatpush.bf16.msra.mxu0 %v4390_v27 }
 0x678   : >> { %5396 = vrot.lane.b32.xlu2 %v11321_v30, %s8895_s21  ;;  %8108 = vmatmul.msk.bf16.gmra.mxu3 %vm2172_vm11, %v8741_v11 }
 0x679   : >> { %4641 = vmatpush.bf16.msrb.mxu2 %v4582_v24  ;;  %5404 = vrot.lane.b32.xlu1 %v11362_v18, %s8895_s21 }
 0x67a   : >> { %8133 = vmatmul.msk.bf16.vlgmr.msra.gmra.mxu2 %vm2172_vm11, %v8718_v15  ;;  %5207 = vrot.lane.b32.xlu0 %v11384_v48, %s8894_s13  ;;  %v11398_v0 = vpop.permute.xlu2 %4544 }
 0x67b   : >> { %4486 = vmatpush.bf16.msra.mxu0 %v4387_v22  ;;  %v4559_v61 = vpop.permute.xlu0 %4558  ;;  %v4543_v1 = vpop.permute.xlu1 %4542 }
 0x67c   : >> { %v4578_v54 = vsel %vm696_vm4, %v11277_v7, %v4559_v61  ;;  %v4573_v44 = vsel %vm696_vm4, %v4543_v1, %v11398_v0 }
 0x67d   : >> { %4613 = vmatpush.bf16.msra.mxu1 %v4578_v54  ;;  %v11558_v54 = vld [vmem:[%s10011_s12 + $0x180] sm:$0xff] }
 0x680   : >> { %5412 = vrot.lane.b32.xlu2 %v11285_v50, %s8895_s21  ;;  %8112 = vmatmul.msk.bf16.gmra.mxu0 %vm2172_vm11, %v8741_v11 }
 0x681   : >> { %8116 = vmatmul.msk.bf16.gmra.mxu1 %vm2172_vm11, %v8741_v11  ;;  %5613 = vrot.lane.b32.xlu1 %v11268_v23, %s8896_s30 }
 0x682   : >> { %5408 = vrot.lane.b32.xlu0 %v11283_v35, %s8895_s21  ;;  %v11419_v56 = vpop.permute.xlu2 %4771 }
 0x683   : >> { %v4549_v39 = vpop.permute.xlu0 %4548  ;;  %v11405_v45 = vpop.permute.xlu1 %4560 }
 0x684   : >> { %v4575_v7 = vsel %vm696_vm4, %v4549_v39, %v4551_v26  ;;  %v4579_v8 = vsel %vm696_vm4, %v4559_v61, %v11405_v45 }
 0x685   : >> { %4614 = vmatpush.bf16.msra.mxu1 %v4575_v7  ;;  %4642 = vmatpush.bf16.msrb.mxu2 %v4579_v8  ;;  %v7998_v8 = vld [vmem:[%s10775_s20 + $0x50] sm:$0xff] }
 0x688   : >> { %5615 = vrot.lane.b32.xlu2 %v11319_v12, %s8896_s30  ;;  %8137 = vmatmul.msk.bf16.vlgmr.msra.gmra.mxu3 %vm2172_vm11, %v8718_v15 }
 0x689   : >> { %5400 = vrot.lane.b32.xlu1 %v11357_v62, %s8895_s21 }
 0x68a   : >> { %8134 = vmatmul.msk.bf16.gmra.mxu2 %vm2172_vm11, %v8719_v32  ;;  %5402 = vrot.lane.b32.xlu0 %v11304_v4, %s8895_s21  ;;  %v11435_v57 = vpop.permute.xlu2 %4761 }
 0x68b   : >> { %v4776_v34 = vpop.permute.xlu1 %4775 }
 0x68c   : >> { %v4541_v36 = vpop.permute.xlu0 %4540  ;;  %v4792_v14 = vsel %vm869_vm5, %v4776_v34, %v4778_v46 }
 0x68d   : >> { %v4572_v6 = vsel %vm696_vm4, %v4541_v36, %v4543_v1  ;;  %4823 = vmatpush.bf16.msrb.mxu0 %v4792_v14 }
 0x68e   : >> { %4615 = vmatpush.bf16.msra.mxu1 %v4572_v6 }
 0x690   : >> { %5607 = vrot.lane.b32.xlu2 %v11283_v35, %s8896_s30  ;;  %8141 = vmatmul.msk.bf16.vlgmr.msra.gmra.mxu0 %vm2172_vm11, %v8718_v15 }
 0x691   : >> { %8172 = vmatmul.msk.bf16.vlgmr.msra.gmra.mxu1 %vm2172_vm11, %v11424_v9  ;;  %5418 = vrot.lane.b32.xlu1 %v11340_v51, %s8895_s21 }
 0x692   : >> { %5398 = vrot.lane.b32.xlu0 %v11338_v55, %s8895_s21  ;;  %v11453_v10 = vpop.permute.xlu2 %4753 }
 0x693   : >> { %v4555_v42 = vpop.permute.xlu1 %4554 }
 0x694   : >> { %v4553_v38 = vpop.permute.xlu0 %4552 }
 0x695   : >> { %v4576_v17 = vsel %vm696_vm4, %v4551_v26, %v4553_v38  ;;  %v4577_v15 = vsel %vm696_vm4, %v4553_v38, %v4555_v42  ;;  %v8002_v42 = vld [vmem:[%s10775_s20 + $0x70] sm:$0xff] }
 0x696   : >> { %4643 = vmatpush.bf16.msrb.mxu2 %v4576_v17 }
 0x698   : >> { %5601 = vrot.lane.b32.xlu2 %v11304_v4, %s8896_s30  ;;  %8138 = vmatmul.msk.bf16.gmra.mxu3 %vm2172_vm11, %v8719_v32 }
 0x699   : >> { %5611 = vrot.lane.b32.xlu1 %v11285_v50, %s8896_s30 }
 0x69a   : >> { %8135 = vmatmul.msk.bf16.gmra.mxu2 %vm2172_vm11, %v8720_v40  ;;  %5406 = vrot.lane.b32.xlu0 %v11384_v48, %s8895_s21  ;;  %v4774_v33 = vpop.permute.xlu2 %4773 }
 0x69b   : >> { %4644 = vmatpush.bf16.msrb.mxu2 %v4573_v44  ;;  %v4770_v16 = vpop.permute.xlu1 %4769 }
 0x69c   : >> { %v4780_v5 = vpop.permute.xlu0 %4779  ;;  %v4790_v25 = vsel %vm869_vm5, %v4770_v16, %v11419_v56 }
 0x69d   : >> { %v4793_v41 = vsel %vm869_vm5, %v4778_v46, %v4780_v5 }
 0x69e   : >> { %4852 = vmatpush.bf16.msrb.mxu1 %v4793_v41 }
 0x6a0   : >> { %5595 = vrot.lane.b32.xlu2 %v11321_v30, %s8896_s30  ;;  %8142 = vmatmul.msk.bf16.gmra.mxu0 %vm2172_vm11, %v8719_v32 }
 0x6a1   : >> { %8173 = vmatmul.msk.bf16.gmra.mxu1 %vm2172_vm11, %v11451_v43  ;;  %5605 = vrot.lane.b32.xlu1 %v11384_v48, %s8896_s30 }
 0x6a2   : >> { %5609 = vrot.lane.b32.xlu0 %v11345_v21, %s8896_s30  ;;  %4853 = vmatpush.bf16.msrb.mxu1 %v4790_v25  ;;  %v11498_v20 = vpop.permute.xlu2 %5215 }
 0x6a3   : >> { %v4760_v52 = vpop.permute.xlu1 %4759 }
 0x6a4   : >> { %v4768_v53 = vpop.permute.xlu0 %4767  ;;  %v4786_v29 = vsel %vm869_vm5, %v4760_v52, %v11435_v57 }
 0x6a5   : >> { %v4789_v60 = vsel %vm869_vm5, %v4768_v53, %v4770_v16 }
 0x6a6   : >> { %4824 = vmatpush.bf16.msrb.mxu0 %v4789_v60 }
 0x6a8   : >> { %5812 = vrot.lane.b32.xlu2 %v11268_v23, %s8897_s9  ;;  %8139 = vmatmul.msk.bf16.gmra.mxu3 %vm2172_vm11, %v8720_v40 }
 0x6a9   : >> { %5599 = vrot.lane.b32.xlu1 %v11357_v62, %s8896_s30 }
 0x6aa   : >> { %8136 = vmatmul.msk.bf16.gmra.mxu2 %vm2172_vm11, %v8721_v31  ;;  %5617 = vrot.lane.b32.xlu0 %v11340_v51, %s8896_s30  ;;  %v11524_v22 = vpop.permute.xlu2 %5209 }
 0x6ab   : >> { %4825 = vmatpush.bf16.msrb.mxu0 %v4786_v29  ;;  %v4752_v13 = vpop.permute.xlu1 %4751  ;;  %v8000_v29 = vld [vmem:[%s10775_s20 + $0x60] sm:$0xff] }
 0x6ac   : >> { %v4571_v47 = vpop.permute.xlu0 %4570  ;;  %v4783_v49 = vsel %vm869_vm5, %v4752_v13, %v11453_v10 }
 0x6ad   : >> { %v4583_v26 = vsel %vm696_vm4, %v11331_v2, %v4571_v47  ;;  %v4580_v2 = vsel %vm696_vm4, %v11405_v45, %v11353_v37  ;;  %v7999_v45 = vld [vmem:[%s10775_s20 + $0x58] sm:$0xff] }
 0x6ae   : >> { %4670 = vmatpush.bf16.msrb.mxu3 %v4583_v26 }
 0x6af   : >> { %4826 = vmatpush.bf16.msrb.mxu0 %v4783_v49 }
 0x6b0   : >> { %5808 = vrot.lane.b32.xlu2 %v11345_v21, %s8897_s9  ;;  %8143 = vmatmul.msk.bf16.gmra.mxu0 %vm2172_vm11, %v8720_v40  ;;  %v11599_v40 = vld [vmem:[%s10011_s12 + $0x188] sm:$0xff] }
 0x6b1   : >> { %8174 = vmatmul.msk.bf16.gmra.mxu1 %vm2172_vm11, %v11483_v19  ;;  %5806 = vrot.lane.b32.xlu1 %v11283_v35, %s8897_s9 }
 0x6b2   : >> { %5603 = vrot.lane.b32.xlu0 %v11362_v18, %s8896_s30  ;;  %4671 = vmatpush.bf16.msrb.mxu3 %v4580_v2  ;;  %v11544_v1 = vpop.permute.xlu2 %5203 }
 0x6b3   : >> { %5087 = vmatpush.bf16.msra.mxu0 %v11319_v12  ;;  %v4782_v11 = vpop.permute.xlu1 %4781 }
 0x6b4   : >> { %v4547_v24 = vpop.permute.xlu0 %4546  ;;  %v4794_v27 = vsel %vm869_vm5, %v4780_v5, %v4782_v11 }
 0x6b5   : >> { %4881 = vmatpush.bf16.msra.mxu2 %v4794_v27  ;;  %v4574_v37 = vsel %vm696_vm4, %v11398_v0, %v4547_v24  ;;  %v8003_v27 = vld [vmem:[%s10775_s20 + $0x78] sm:$0xff] }
 0x6b6   : >> { %4672 = vmatpush.bf16.msrb.mxu3 %v4577_v15 }
 0x6b7   : >> { %5088 = vmatpush.bf16.msra.mxu0 %v11345_v21  ;;  %v4791_v21 = vsel %vm869_vm5, %v11419_v56, %v4774_v33 }
 0x6b8   : >> { %5802 = vrot.lane.b32.xlu2 %v11362_v18, %s8897_s9  ;;  %8140 = vmatmul.msk.bf16.gmra.mxu3 %vm2172_vm11, %v8721_v31 }
 0x6b9   : >> { %5800 = vrot.lane.b32.xlu1 %v11304_v4, %s8897_s9  ;;  %4882 = vmatpush.bf16.msra.mxu2 %v4791_v21 }
 0x6ba   : >> { %8176 = vmatmul.msk.bf16.vlgmr.msrb.gmra.mxu2 %vm2172_vm11, %v11424_v9  ;;  %5597 = vrot.lane.b32.xlu0 %v11338_v55, %s8896_s30  ;;  %v11573_v32 = vpop.permute.xlu2 %5416 }
 0x6bb   : >> { %5089 = vmatpush.bf16.msra.mxu0 %v11362_v18  ;;  %4673 = vmatpush.bf16.msrb.mxu3 %v4574_v37  ;;  %v4758_v18 = vpop.permute.xlu1 %4757 }
 0x6bc   : >> { %v4764_v59 = vpop.permute.xlu0 %4763 }
 0x6bd   : >> { %v4787_v46 = vsel %vm869_vm5, %v11435_v57, %v4764_v59 }
 0x6be   : >> { %4854 = vmatpush.bf16.msrb.mxu1 %v4787_v46 }
 0x6bf   : >> { %5058 = vmatpush.bf16.msra.mxu3 %v11268_v23  ;;  %5090 = vmatpush.bf16.msra.mxu0 %v11338_v55 }
 0x6c0   : >> { %5796 = vrot.lane.b32.xlu2 %v11338_v55, %s8897_s9  ;;  %8144 = vmatmul.msk.bf16.gmra.mxu0 %vm2172_vm11, %v8721_v31  ;;  %v7996_v55 = vld [vmem:[%s10775_s20 + $0x40] sm:$0xff] }
 0x6c1   : >> { %8175 = vmatmul.msk.bf16.gmra.mxu1 %vm2172_vm11, %v11522_v58  ;;  %5794 = vrot.lane.b32.xlu1 %v11321_v30, %s8897_s9 }
 0x6c2   : >> { %5814 = vrot.lane.b32.xlu0 %v11319_v12, %s8897_s9 }
 0x6c3   : >> { %5059 = vmatpush.bf16.msra.mxu3 %v11283_v35  ;;  %v11537_v23 = vpop.permute.xlu1 %5213 }
 0x6c4   : >> { %v4756_v61 = vpop.permute.xlu0 %4755 }
 0x6c5   : >> { %v4784_v35 = vsel %vm869_vm5, %v11453_v10, %v4756_v61 }
 0x6c6   : >> { %4855 = vmatpush.bf16.msrb.mxu1 %v4784_v35 }
 0x6c7   : >> { %5060 = vmatpush.bf16.msra.mxu3 %v11304_v4 }
 0x6c8   : >> { %5963 = vperm.xlu2 %8861, %v7996_v55   ;;  %8180 = vmatmul.msk.bf16.vlgmr.msrb.gmra.mxu3 %vm2172_vm11, %v11424_v9 }
 0x6c9   : >> { %5798 = vrot.lane.b32.xlu1 %v11357_v62, %s8897_s9 }
 0x6ca   : >> { %5116 = vmatpush.bf16.msra.mxu1 %v11340_v51  ;;  %8177 = vmatmul.msk.bf16.gmra.mxu2 %vm2172_vm11, %v11451_v43 }
 0x6cb   : >> { %5061 = vmatpush.bf16.msra.mxu3 %v11321_v30  ;;  %5810 = vrot.lane.b32.xlu0 %v11285_v50, %s8897_s9  ;;  %v11555_v4 = vpop.f32.mrf.mxu3  ;;  %v5415_v12 = vpop.permute.xlu1 %5414 }
 0x6cc   : >> { %v4766_v30 = vpop.permute.xlu0 %4765  ;;  %v5426_v56 = vsel %vm1371_vm7, %v5415_v12, %v11573_v32 }
 0x6cd   : >> { %v4788_v0 = vsel %vm869_vm5, %v4764_v59, %v4766_v30  ;;  %v11561_v39 = vpop.f32.mrf.mxu0 }
 0x6ce   : >> { %5117 = vmatpush.bf16.msra.mxu1 %v11285_v50  ;;  %v11564_v7 = vpop.f32.mrf.mxu1  ;;  %4883 = vmatpush.bf16.msra.mxu2 %v4788_v0  ;;  %v4785_v50 = vsel %vm869_vm5, %v4756_v61, %v4758_v18 }
 0x6d0   : >> { %5978 = vperm.xlu2 %8861, %v7999_v45   ;;  %8211 = vmatmul.msk.bf16.vlgmr.msrb.gmra.mxu0 %vm2172_vm11, %v11558_v54 }
 0x6d1   : >> { %8215 = vmatmul.msk.bf16.vlgmr.msrb.gmra.mxu1 %vm2172_vm11, %v11558_v54  ;;  %5973 = vperm.xlu1 %8860, %v7998_v8  }
 0x6d2   : >> { %5118 = vmatpush.bf16.msra.mxu1 %v11384_v48  ;;  %4884 = vmatpush.bf16.msra.mxu2 %v4785_v50 }
 0x6d3   : >> { %5816 = vrot.lane.b32.xlu0 %v11340_v51, %s8897_s9  ;;  %v11580_v34 = vpop.f32.mrf.mxu3  ;;  %v5198_v36 = vpop.permute.xlu1 %5197  ;;  %v8001_v51 = vld [vmem:[%s10775_s20 + $0x68] sm:$0xff] }
 0x6d4   : >> { %v5218_v14 = vpop.permute.xlu0 %5217 }
 0x6d5   : >> { %v5227_v6 = vsel %vm1201_vm6, %v11498_v20, %v5218_v14  ;;  %v11584_v9 = vpop.f32.mrf.mxu0  ;;  %v11637_v20 = vld [vmem:[%s10011_s12 + $0x190] sm:$0xff] }
 0x6d6   : >> { %5119 = vmatpush.bf16.msra.mxu1 %v11357_v62  ;;  %v11587_v38 = vpop.f32.mrf.mxu1  ;;  %5257 = vmatpush.bf16.msrb.mxu2 %v5227_v6 }
 0x6d8   : >> { %5993 = vperm.xlu2 %8861, %v8002_v42   ;;  %8181 = vmatmul.msk.bf16.gmra.mxu3 %vm2172_vm11, %v11451_v43  ;;  %v5200_v43 = vpop.permute.xlu2 %5199 }
 0x6d9   : >> { %5988 = vperm.xlu1 %8860, %v8001_v51   ;;  %v5221_v13 = vsel %vm1201_vm6, %v5198_v36, %v5200_v43  ;;  %v8750_v36 = vld [vmem:[%s10011_s12 + $0x1a0] sm:$0xff] }
 0x6da   : >> { %5456 = vmatpush.bf16.msrb.mxu1 %v5426_v56  ;;  %8178 = vmatmul.msk.bf16.gmra.mxu2 %vm2172_vm11, %v11483_v19 }
 0x6db   : >> { %5804 = vrot.lane.b32.xlu0 %v11384_v48, %s8897_s9  ;;  %v11596_v62 = vpop.f32.mrf.mxu3  ;;  %v5220_v57 = vpop.permute.xlu1 %5219  ;;  %v7997_v48 = vld [vmem:[%s10775_s20 + $0x48] sm:$0xff] }
 0x6dc   : >> { %v5212_v17 = vpop.permute.xlu0 %5211  ;;  %v5228_v44 = vsel %vm1201_vm6, %v5218_v14, %v5220_v57  ;;  %5315 = vmatpush.bf16.msrb.mxu0 %v5220_v57 }
 0x6dd   : >> { %v11602_v16 = vpop.f32.mrf.mxu0  ;;  %v5225_v5 = vsel %vm1201_vm6, %v11524_v22, %v5212_v17  ;;  %5286 = vmatpush.bf16.msrb.mxu3 %v5228_v44  ;;  %v5226_v10 = vsel %vm1201_vm6, %v5212_v17, %v11537_v23 }
 0x6de   : >> { %v11606_v41 = vpop.f32.mrf.mxu1  ;;  %5258 = vmatpush.bf16.msrb.mxu2 %v5225_v5 }
 0x6e0   : >> { %8212 = vmatmul.msk.bf16.gmra.mxu0 %vm2172_vm11, %v11599_v40  ;;  %v5202_v47 = vpop.permute.xlu2 %5201 }
 0x6e1   : >> { %8216 = vmatmul.msk.bf16.gmra.mxu1 %vm2172_vm11, %v11599_v40  ;;  %5316 = vmatpush.bf16.msrb.mxu0 %v11537_v23  ;;  %v5222_v15 = vsel %vm1201_vm6, %v5200_v43, %v5202_v47 }
 0x6e2   : >> { %5287 = vmatpush.bf16.msrb.mxu3 %v5226_v10 }
 0x6e3   : >> { %5968 = vperm.xlu0 %8862, %v7997_v48   ;;  %v11616_v25 = vpop.f32.mrf.mxu3  ;;  %v11618_v52 = vpop.permute.xlu1 %5410 }
 0x6e4   : >> { %v5206_v53 = vpop.permute.xlu0 %5205 }
 0x6e5   : >> { %v11620_v60 = vpop.f32.mrf.mxu0  ;;  %v5223_v31 = vsel %vm1201_vm6, %v11544_v1, %v5206_v53  ;;  %v11665_v1 = vld [vmem:[%s10011_s12 + $0x198] sm:$0xff] }
 0x6e6   : >> { %v11624_v33 = vpop.f32.mrf.mxu1  ;;  %5259 = vmatpush.bf16.msrb.mxu2 %v5223_v31 }
 0x6e8   : >> { %8182 = vmatmul.msk.bf16.gmra.mxu3 %vm2172_vm11, %v11483_v19  ;;  %v5397_v22 = vpop.permute.xlu2 %5396 }
 0x6ea   : >> { %8179 = vmatmul.msk.bf16.gmra.mxu2 %vm2172_vm11, %v11522_v58 }
 0x6eb   : >> { %5983 = vperm.xlu0 %8862, %v8000_v29   ;;  %5260 = vmatpush.bf16.msrb.mxu2 %v5221_v13  ;;  %v11632_v49 = vpop.f32.mrf.mxu3  ;;  %v11634_v26 = vpop.permute.xlu1 %5404 }
 0x6ec   : >> { %v5208_v2 = vpop.permute.xlu0 %5207 }
 0x6ed   : >> { %5317 = vmatpush.bf16.msrb.mxu0 %v5208_v2  ;;  %v11639_v11 = vpop.f32.mrf.mxu0  ;;  %v5224_v19 = vsel %vm1201_vm6, %v5206_v53, %v5208_v2 }
 0x6ee   : >> { %v11642_v24 = vpop.f32.mrf.mxu1  ;;  %5288 = vmatpush.bf16.msrb.mxu3 %v5224_v19 }
 0x6f0   : >> { %8213 = vmatmul.msk.bf16.gmra.mxu0 %vm2172_vm11, %v11637_v20 }
 0x6f1   : >> { %8217 = vmatmul.msk.bf16.gmra.mxu1 %vm2172_vm11, %v11637_v20  ;;  %5318 = vmatpush.bf16.msrb.mxu0 %v5202_v47 }
 0x6f2   : >> { %5289 = vmatpush.bf16.msrb.mxu3 %v5222_v15 }
 0x6f3   : >> { %5998 = vperm.xlu0 %8862, %v8003_v27   ;;  %v11650_v37 = vpop.f32.mrf.mxu3  ;;  %v5614_v21 = vpop.permute.xlu1 %5613 }
 0x6f4   : >> { %v5409_v18 = vpop.permute.xlu0 %5408 }
 0x6f5   : >> { %v5424_v59 = vsel %vm1371_vm7, %v5409_v18, %v11618_v52  ;;  %v11654_v46 = vpop.f32.mrf.mxu0 }
 0x6f6   : >> { %v11656_v23 = vpop.f32.mrf.mxu1  ;;  %5457 = vmatpush.bf16.msrb.mxu1 %v5424_v59 }
 0x6f8   : >> { %8183 = vmatmul.msk.bf16.gmra.mxu3 %vm2172_vm11, %v11522_v58  ;;  %v5413_v58 = vpop.permute.xlu2 %5412 }
 0x6fa   : >> { %8219 = vmatmul.msk.bf16.vlgmr.msra.gmra.mxu2 %vm2172_vm11, %v11558_v54 }
 0x6fb   : >> { %v11662_v61 = vpop.f32.mrf.mxu3  ;;  %v5401_v35 = vpop.permute.xlu1 %5400 }
 0x6fc   : >> { %v5403_v55 = vpop.permute.xlu0 %5402 }
 0x6fd   : >> { %v5422_v12 = vsel %vm1371_vm7, %v5403_v55, %v11634_v26  ;;  %v4430_v30 = vpop.f32.mrf.mxu2  ;;  %v11669_v0 = vpop.f32.mrf.mxu0 }
 0x6fe   : >> { %v4431_v45 = vadd.f32 %v4430_v30, %v11555_v4  ;;  %v11672_v8 = vpop.f32.mrf.mxu1  ;;  %5458 = vmatpush.bf16.msrb.mxu1 %v5422_v12 }
 0x700   : >> { %8214 = vmatmul.msk.bf16.gmra.mxu0 %vm2172_vm11, %v11665_v1  ;;  %v5616_v17 = vpop.permute.xlu2 %5615 }
 0x701   : >> { %8218 = vmatmul.msk.bf16.gmra.mxu1 %vm2172_vm11, %v11665_v1 }
 0x703   : >> { %v11678_v54 = vpop.f32.mrf.mxu3  ;;  %v5419_v50 = vpop.permute.xlu1 %5418 }
 0x704   : >> { %v5399_v56 = vpop.permute.xlu0 %5398  ;;  %v5427_v14 = vsel %vm1371_vm7, %v11573_v32, %v5419_v50  ;;  %v5425_v32 = vsel %vm1371_vm7, %v11618_v52, %v5413_v58 }
 0x705   : >> { %v4432_v6 = vpop.f32.mrf.mxu2  ;;  %v11683_v4 = vpop.f32.mrf.mxu0  ;;  %v5420_v42 = vsel %vm1371_vm7, %v5397_v22, %v5399_v56  ;;  %5485 = vmatpush.bf16.msra.mxu2 %v5427_v14  ;;  %v5421_v29 = vsel %vm1371_vm7, %v5399_v56, %v5401_v35  ;;  %v8752_v14 = vld [vmem:[%s10011_s12 + $0x1b0] sm:$0xff] }
 0x706   : >> { %v4433_v51 = vadd.f32 %v4432_v6, %v11580_v34  ;;  %v11687_v57 = vpop.f32.mrf.mxu1  ;;  %5459 = vmatpush.bf16.msrb.mxu1 %v5420_v42 }
 0x708   : >> { %8298 = vmatmul.msk.bf16.vlgmr.msra.gmra.mxu3 %vm2172_vm11, %v8750_v36  ;;  %v5608_v13 = vpop.permute.xlu2 %5607 }
 0x709   : >> { %5514 = vmatpush.bf16.msra.mxu3 %v5419_v50  ;;  %5486 = vmatpush.bf16.msra.mxu2 %v5425_v32 }
 0x70a   : >> { %8220 = vmatmul.msk.bf16.gmra.mxu2 %vm2172_vm11, %v11599_v40 }
 0x70b   : >> { %v4459_v44 = vpop.f32.mrf.mxu3  ;;  %v11720_v22 = vpop.permute.xlu1 %5611 }
 0x70c   : >> { %v5407_v5 = vpop.permute.xlu0 %5406  ;;  %v11695_v48 = vadd.f32 %v4459_v44, %v11561_v39  ;;  %v5625_v39 = vsel %vm1541_vm8, %v5614_v21, %v5616_v17 }
 0x70d   : >> { %v4435_v34 = vpop.f32.mrf.mxu2  ;;  %5515 = vmatpush.bf16.msra.mxu3 %v5413_v58  ;;  %v4488_v43 = vpop.f32.mrf.mxu0  ;;  %v5423_v10 = vsel %vm1371_vm7, %v11634_v26, %v5407_v5  ;;  %v8751_v26 = vld [vmem:[%s10011_s12 + $0x1a8] sm:$0xff] }
 0x70e   : >> { %v4436_v53 = vadd.f32 %v4435_v34, %v11596_v62  ;;  %v11701_v40 = vadd.f32 %v4488_v43, %v11564_v7  ;;  %v4617_v52 = vpop.f32.mrf.mxu1  ;;  %5487 = vmatpush.bf16.msra.mxu2 %v5423_v10 }
 0x70f   : >> { %v11703_v31 = vadd.f32 %v4617_v52, %v4431_v45 }
 0x710   : >> { %8302 = vmatmul.msk.bf16.vlgmr.msra.gmra.mxu0 %vm2172_vm11, %v8750_v36  ;;  %v5602_v50 = vpop.permute.xlu2 %5601 }
 0x711   : >> { %8306 = vmatmul.msk.bf16.vlgmr.msra.gmra.mxu1 %vm2172_vm11, %v8750_v36  ;;  %5516 = vmatpush.bf16.msra.mxu3 %v5407_v5 }
 0x712   : >> { %5655 = vmatpush.bf16.msra.mxu0 %v5625_v39  ;;  %5488 = vmatpush.bf16.msra.mxu2 %v5421_v29 }
 0x713   : >> { %v4461_v62 = vpop.f32.mrf.mxu3  ;;  %v11742_v56 = vpop.permute.xlu1 %5605 }
 0x714   : >> { %v5610_v47 = vpop.permute.xlu0 %5609  ;;  %v11710_v7 = vadd.f32 %v4461_v62, %v11584_v9 }
 0x715   : >> { %v4437_v2 = vpop.f32.mrf.mxu2  ;;  %5517 = vmatpush.bf16.msra.mxu3 %v5401_v35  ;;  %v4490_v19 = vpop.f32.mrf.mxu0  ;;  %v5623_v27 = vsel %vm1541_vm8, %v5608_v13, %v5610_v47 }
 0x716   : >> { %v4438_v15 = vadd.f32 %v4437_v2, %v11616_v25  ;;  %v11716_v21 = vadd.f32 %v4490_v19, %v11587_v38  ;;  %v4619_v18 = vpop.f32.mrf.mxu1  ;;  %5656 = vmatpush.bf16.msra.mxu0 %v5623_v27  ;;  %v8753_v19 = vld [vmem:[%s10011_s12 + $0x1b8] sm:$0xff] }
 0x717   : >> { %v11718_v59 = vadd.f32 %v4619_v18, %v4433_v51 }
 0x718   : >> { %8299 = vmatmul.msk.bf16.gmra.mxu3 %vm2172_vm11, %v8751_v26 }
 0x71a   : >> { %8221 = vmatmul.msk.bf16.gmra.mxu2 %vm2172_vm11, %v11637_v20 }
 0x71b   : >> { %v4464_v9 = vpop.f32.mrf.mxu3  ;;  %v5600_v10 = vpop.permute.xlu1 %5599 }
 0x71c   : >> { %v11725_v35 = vpop.permute.xlu0 %5617  ;;  %v11728_v55 = vadd.f32 %v4464_v9, %v11602_v16  ;;  %v5624_v16 = vsel %vm1541_vm8, %v5610_v47, %v11720_v22 }
 0x71d   : >> { %v5626_v38 = vsel %vm1541_vm8, %v5616_v17, %v11725_v35  ;;  %v4440_v25 = vpop.f32.mrf.mxu2  ;;  %v4493_v12 = vpop.f32.mrf.mxu0 }
 0x71e   : >> { %v4441_v30 = vadd.f32 %v4440_v25, %v11632_v49  ;;  %v11734_v45 = vadd.f32 %v4493_v12, %v11606_v41  ;;  %v4622_v58 = vpop.f32.mrf.mxu1  ;;  %5684 = vmatpush.bf16.msra.mxu1 %v5626_v38 }
 0x71f   : >> { %v11736_v20 = vadd.f32 %v4622_v58, %v4436_v53 }
 0x720   : >> { %8303 = vmatmul.msk.bf16.gmra.mxu0 %vm2172_vm11, %v8751_v26 }
 0x721   : >> { %8307 = vmatmul.msk.bf16.gmra.mxu1 %vm2172_vm11, %v8751_v26 }
 0x722   : >> { %5685 = vmatpush.bf16.msra.mxu1 %v5624_v16 }
 0x723   : >> { %v4466_v36 = vpop.f32.mrf.mxu3  ;;  %v5807_v12 = vpop.permute.xlu1 %5806 }
 0x724   : >> { %v5604_v49 = vpop.permute.xlu0 %5603  ;;  %v11745_v41 = vadd.f32 %v4466_v36, %v11620_v60  ;;  %v5596_v60 = vpop.permute.xlu2 %5595 }
 0x725   : >> { %v4442_v6 = vpop.f32.mrf.mxu2  ;;  %v4495_v42 = vpop.f32.mrf.mxu0  ;;  %v5621_v51 = vsel %vm1541_vm8, %v5602_v50, %v5604_v49  ;;  %v5622_v32 = vsel %vm1541_vm8, %v5604_v49, %v11742_v56 }
 0x726   : >> { %v4443_v17 = vadd.f32 %v4442_v6, %v11650_v37  ;;  %v11753_v44 = vadd.f32 %v4495_v42, %v11624_v33  ;;  %v4624_v5 = vpop.f32.mrf.mxu1  ;;  %5657 = vmatpush.bf16.msra.mxu0 %v5621_v51  ;;  %5686 = vmatpush.bf16.msra.mxu1 %v5622_v32  ;;  %v11804_v6 = vld [vmem:[%s10011_s12 + $0x1c8] sm:$0xff] }
 0x727   : >> { %v11755_v34 = vadd.f32 %v4624_v5, %v4438_v15  ;;  %v8766_v15 = vld [vmem:[%s10011_s12 + $0x1c0] sm:$0xff] }
 0x728   : >> { %8300 = vmatmul.msk.bf16.gmra.mxu3 %vm2172_vm11, %v8752_v14 }
 0x72a   : >> { %8222 = vmatmul.msk.bf16.gmra.mxu2 %vm2172_vm11, %v11665_v1 }
 0x72b   : >> { %v4469_v43 = vpop.f32.mrf.mxu3 }
 0x72c   : >> { %v5598_v53 = vpop.permute.xlu0 %5597  ;;  %v11761_v52 = vadd.f32 %v4469_v43, %v11639_v11  ;;  %v5813_v26 = vpop.permute.xlu2 %5812 }
 0x72d   : >> { %v4445_v33 = vpop.f32.mrf.mxu2  ;;  %v4498_v37 = vpop.f32.mrf.mxu0  ;;  %v5619_v39 = vsel %vm1541_vm8, %v5596_v60, %v5598_v53  ;;  %v5620_v29 = vsel %vm1541_vm8, %v5598_v53, %v5600_v10  ;;  %v11821_v53 = vld [vmem:[%s10011_s12 + $0x1e0] sm:$0xff] }
 0x72e   : >> { %v4446_v62 = vadd.f32 %v4445_v33, %v11662_v61  ;;  %v11767_v13 = vadd.f32 %v4498_v37, %v11642_v24  ;;  %v4627_v1 = vpop.f32.mrf.mxu1  ;;  %5658 = vmatpush.bf16.msra.mxu0 %v5619_v39  ;;  %5687 = vmatpush.bf16.msra.mxu1 %v5620_v29 }
 0x72f   : >> { %v11769_v47 = vadd.f32 %v4627_v1, %v4441_v30 }
 0x730   : >> { %8304 = vmatmul.msk.bf16.gmra.mxu0 %vm2172_vm11, %v8752_v14 }
 0x731   : >> { %8308 = vmatmul.msk.bf16.gmra.mxu1 %vm2172_vm11, %v8752_v14 }
 0x733   : >> { %v4471_v11 = vpop.f32.mrf.mxu3 }
 0x734   : >> { %v11774_v2 = vadd.f32 %v4471_v11, %v11654_v46  ;;  %v5815_v25 = vpop.permute.xlu0 %5814  ;;  %v5809_v36 = vpop.permute.xlu2 %5808 }
 0x735   : >> { %v4447_v27 = vpop.f32.mrf.mxu2  ;;  %v4500_v61 = vpop.f32.mrf.mxu0 }
 0x736   : >> { %v4448_v24 = vadd.f32 %v4447_v27, %v11678_v54  ;;  %v11780_v18 = vadd.f32 %v4500_v61, %v11656_v23  ;;  %v4629_v9 = vpop.f32.mrf.mxu1 }
 0x737   : >> { %v11782_v38 = vadd.f32 %v4629_v9, %v4443_v17 }
 0x738   : >> { %8301 = vmatmul.msk.bf16.gmra.mxu3 %vm2172_vm11, %v8753_v19 }
 0x73a   : >> { %8337 = vmatmul.msk.bf16.vlgmr.msrb.gmra.mxu2 %vm2172_vm11, %v8766_v15 }
 0x73b   : >> { %5713 = vmatpush.bf16.msrb.mxu2 %v11725_v35  ;;  %v4474_v46 = vpop.f32.mrf.mxu3 }
 0x73c   : >> { %v11788_v30 = vadd.f32 %v4474_v46, %v11669_v0 }
 0x73d   : >> { %v4646_v58 = vpop.f32.mrf.mxu2  ;;  %v4503_v54 = vpop.f32.mrf.mxu0 }
 0x73e   : >> { %v4696_v23 = vadd.f32 %v4646_v58, %v11695_v48  ;;  %v11793_v50 = vadd.f32 %v4503_v54, %v11672_v8  ;;  %v4632_v16 = vpop.f32.mrf.mxu1  ;;  %v5811_v0 = vpop.permute.xlu0 %5810 }
 0x73f   : >> { %5714 = vmatpush.bf16.msrb.mxu2 %v11720_v22  ;;  %v11795_v49 = vadd.f32 %v4632_v16, %v4446_v62  ;;  %v5801_v8 = vpop.permute.xlu1 %5800  ;;  %v5823_v27 = vsel %vm1711_vm9, %v5809_v36, %v5811_v0 }
 0x740   : >> { %8305 = vmatmul.msk.bf16.gmra.mxu0 %vm2172_vm11, %v8753_v19 }
 0x741   : >> { %8309 = vmatmul.msk.bf16.gmra.mxu1 %vm2172_vm11, %v8753_v19 }
 0x743   : >> { %5715 = vmatpush.bf16.msrb.mxu2 %v11742_v56  ;;  %v4476_v35 = vpop.f32.mrf.mxu3  ;;  %v5824_v56 = vsel %vm1711_vm9, %v5813_v26, %v5815_v25 }
 0x744   : >> { %v11801_v14 = vadd.f32 %v4476_v35, %v11683_v4  ;;  %v5803_v4 = vpop.permute.xlu2 %5802 }
 0x745   : >> { %v4648_v48 = vpop.f32.mrf.mxu2  ;;  %v4505_v22 = vpop.f32.mrf.mxu0  ;;  %v5820_v62 = vsel %vm1711_vm9, %v5801_v8, %v5803_v4 }
 0x746   : >> { %v4699_v42 = vadd.f32 %v4648_v48, %v11710_v7  ;;  %v11808_v51 = vadd.f32 %v4505_v22, %v11687_v57  ;;  %v4634_v32 = vpop.f32.mrf.mxu1  ;;  %v5822_v7 = vsel %vm1711_vm9, %v5807_v12, %v5809_v36  ;;  %v5817_v60 = vpop.permute.xlu0 %5816  ;;  %v11855_v36 = vld [vmem:[%s10011_s12 + $0x1e8] sm:$0xff] }
 0x747   : >> { %5716 = vmatpush.bf16.msrb.mxu2 %v5600_v10  ;;  %v11810_v17 = vadd.f32 %v4634_v32, %v4448_v24  ;;  %v5795_v1 = vpop.permute.xlu1 %5794  ;;  %v8769_v32 = vld [vmem:[%s10011_s12 + $0x1d8] sm:$0xff] }
 0x748   : >> { %8341 = vmatmul.msk.bf16.vlgmr.msrb.gmra.mxu3 %vm2172_vm11, %v8766_v15 }
 0x749   : >> { %5854 = vmatpush.bf16.msrb.mxu3 %v5824_v56 }
 0x74a   : >> { %8338 = vmatmul.msk.bf16.gmra.mxu2 %vm2172_vm11, %v11804_v6 }
 0x74b   : >> { %v4675_v5 = vpop.f32.mrf.mxu3 }
 0x74c   : >> { %v11818_v43 = vadd.f32 %v4675_v5, %v11701_v40  ;;  %v5825_v40 = vsel %vm1711_vm9, %v5815_v25, %v5817_v60 }
 0x74d   : >> { %v4651_v57 = vpop.f32.mrf.mxu2  ;;  %5855 = vmatpush.bf16.msrb.mxu3 %v5822_v7  ;;  %v4828_v10 = vpop.f32.mrf.mxu0 }
 0x74e   : >> { %v4702_v33 = vadd.f32 %v4651_v57, %v11728_v55  ;;  %v11825_v37 = vadd.f32 %v4828_v10, %v11703_v31  ;;  %v4857_v39 = vpop.f32.mrf.mxu1  ;;  %v5797_v55 = vpop.permute.xlu2 %5796  ;;  %v11883_v57 = vld [vmem:[%s10011_s12 + $0x1f0] sm:$0xff] }
 0x74f   : >> { %v11827_v29 = vadd.f32 %v4857_v39, %v4696_v23  ;;  %v5818_v11 = vsel %vm1711_vm9, %v5795_v1, %v5797_v55  ;;  %v5805_v24 = vpop.permute.xlu0 %5804  ;;  %v5799_v58 = vpop.permute.xlu1 %5798 }
 0x750   : >> { %8345 = vmatmul.msk.bf16.vlgmr.msrb.gmra.mxu0 %vm2172_vm11, %v8766_v15  ;;  %v8768_v15 = vld [vmem:[%s10011_s12 + $0x1d0] sm:$0xff] }
 0x751   : >> { %8376 = vmatmul.msk.bf16.vlgmr.msrb.gmra.mxu1 %vm2172_vm11, %v11821_v53  ;;  %5856 = vmatpush.bf16.msrb.mxu3 %v5820_v62 }
 0x752   : >> { %5883 = vmatpush.bf16.msrb.mxu0 %v5825_v40  ;;  %5912 = vmatpush.bf16.msrb.mxu1 %v5817_v60 }
 0x753   : >> { %v4677_v31 = vpop.f32.mrf.mxu3 }
 0x754   : >> { %v11836_v26 = vadd.f32 %v4677_v31, %v11716_v21  ;;  %v5821_v21 = vsel %vm1711_vm9, %v5803_v4, %v5805_v24 }
 0x755   : >> { %v4653_v19 = vpop.f32.mrf.mxu2  ;;  %5857 = vmatpush.bf16.msrb.mxu3 %v5818_v11  ;;  %v4830_v61 = vpop.f32.mrf.mxu0 }
 0x756   : >> { %v4705_v9 = vadd.f32 %v4653_v19, %v11745_v41  ;;  %5884 = vmatpush.bf16.msrb.mxu0 %v5823_v27  ;;  %5913 = vmatpush.bf16.msrb.mxu1 %v5811_v0  ;;  %v11842_v25 = vadd.f32 %v4830_v61, %v11718_v59  ;;  %v4859_v46 = vpop.f32.mrf.mxu1  ;;  %v5819_v59 = vsel %vm1711_vm9, %v5797_v55, %v5799_v58  ;;  %v11910_v27 = vld [vmem:[%s10011_s12 + $0x1f8] sm:$0xff] }
 0x757   : >> { %v11844_v12 = vadd.f32 %v4859_v46, %v4699_v42 }
 0x758   : >> { %8342 = vmatmul.msk.bf16.gmra.mxu3 %vm2172_vm11, %v11804_v6 }
 0x75a   : >> { %8339 = vmatmul.msk.bf16.gmra.mxu2 %vm2172_vm11, %v8768_v15  ;;  %5885 = vmatpush.bf16.msrb.mxu0 %v5821_v21 }
 0x75b   : >> { %5914 = vmatpush.bf16.msrb.mxu1 %v5805_v24  ;;  %v4680_v41 = vpop.f32.mrf.mxu3 }
 0x75c   : >> { %v11851_v54 = vadd.f32 %v4680_v41, %v11734_v45 }
 0x75d   : >> { %v4656_v23 = vpop.f32.mrf.mxu2  ;;  %v4833_v16 = vpop.f32.mrf.mxu0 }
 0x75e   : >> { %v4708_v0 = vadd.f32 %v4656_v23, %v11761_v52  ;;  %5886 = vmatpush.bf16.msrb.mxu0 %v5819_v59  ;;  %v11859_v35 = vadd.f32 %v4833_v16, %v11736_v20  ;;  %v4862_v48 = vpop.f32.mrf.mxu1  ;;  %v8774_v23 = vld [vmem:[%s10011_s12 + $0x200] sm:$0xff] }
 0x75f   : >> { %5915 = vmatpush.bf16.msrb.mxu1 %v5799_v58  ;;  %v11861_v22 = vadd.f32 %v4862_v48, %v4702_v33 }
 0x760   : >> { %8346 = vmatmul.msk.bf16.gmra.mxu0 %vm2172_vm11, %v11804_v6 }
 0x761   : >> { %8377 = vmatmul.msk.bf16.gmra.mxu1 %vm2172_vm11, %v11855_v36 }
 0x763   : >> { %v4682_v45 = vpop.f32.mrf.mxu3 }
 0x764   : >> { %v11868_v8 = vadd.f32 %v4682_v45, %v11753_v44 }
 0x765   : >> { %v4658_v52 = vpop.f32.mrf.mxu2  ;;  %v4835_v42 = vpop.f32.mrf.mxu0 }
 0x766   : >> { %v4711_v20 = vadd.f32 %v4658_v52, %v11774_v2  ;;  %v11873_v56 = vadd.f32 %v4835_v42, %v11755_v34  ;;  %v4864_v4 = vpop.f32.mrf.mxu1 }
 0x767   : >> { %v11875_v5 = vadd.f32 %v4864_v4, %v4705_v9  ;;  %v8775_v4 = vld [vmem:[%s10011_s12 + $0x208] sm:$0xff] }
 0x768   : >> { %8343 = vmatmul.msk.bf16.gmra.mxu3 %vm2172_vm11, %v8768_v15 }
 0x76a   : >> { %8340 = vmatmul.msk.bf16.gmra.mxu2 %vm2172_vm11, %v8769_v32 }
 0x76b   : >> { %v4685_v6 = vpop.f32.mrf.mxu3 }
 0x76c   : >> { %v11880_v7 = vadd.f32 %v4685_v6, %v11767_v13 }
 0x76d   : >> { %v4661_v44 = vpop.f32.mrf.mxu2  ;;  %v4838_v60 = vpop.f32.mrf.mxu0 }
 0x76e   : >> { %v4714_v2 = vadd.f32 %v4661_v44, %v11788_v30  ;;  %v11887_v34 = vadd.f32 %v4838_v60, %v11769_v47  ;;  %v4867_v10 = vpop.f32.mrf.mxu1 }
 0x76f   : >> { %v11889_v33 = vadd.f32 %v4867_v10, %v4708_v0 }
 0x770   : >> { %8347 = vmatmul.msk.bf16.gmra.mxu0 %vm2172_vm11, %v8768_v15 }
 0x771   : >> { %8378 = vmatmul.msk.bf16.gmra.mxu1 %vm2172_vm11, %v11883_v57 }
 0x773   : >> { %v4687_v13 = vpop.f32.mrf.mxu3 }
 0x774   : >> { %v11895_v39 = vadd.f32 %v4687_v13, %v11780_v18 }
 0x775   : >> { %v4663_v62 = vpop.f32.mrf.mxu2  ;;  %v4840_v1 = vpop.f32.mrf.mxu0 }
 0x776   : >> { %v4717_v30 = vadd.f32 %v4663_v62, %v11801_v14  ;;  %v11899_v47 = vadd.f32 %v4840_v1, %v11782_v38  ;;  %v4869_v40 = vpop.f32.mrf.mxu1 }
 0x777   : >> { %v11901_v55 = vadd.f32 %v4869_v40, %v4711_v20  ;;  %v8776_v40 = vld [vmem:[%s10011_s12 + $0x210] sm:$0xff] }
 0x778   : >> { %8344 = vmatmul.msk.bf16.gmra.mxu3 %vm2172_vm11, %v8769_v32 }
 0x77a   : >> { %8380 = vmatmul.msk.bf16.vlgmr.msra.gmra.mxu2 %vm2172_vm11, %v11821_v53 }
 0x77b   : >> { %v4690_v31 = vpop.f32.mrf.mxu3 }
 0x77c   : >> { %v11907_v11 = vadd.f32 %v4690_v31, %v11793_v50 }
 0x77d   : >> { %v4886_v18 = vpop.f32.mrf.mxu2  ;;  %v4843_v19 = vpop.f32.mrf.mxu0 }
 0x77e   : >> { %v4908_v14 = vadd.f32 %v4886_v18, %v11818_v43  ;;  %v11914_v38 = vadd.f32 %v4843_v19, %v11795_v49  ;;  %v4872_v61 = vpop.f32.mrf.mxu1 }
 0x77f   : >> { %v11916_v15 = vadd.f32 %v4872_v61, %v4714_v2 }
 0x780   : >> { %8348 = vmatmul.msk.bf16.gmra.mxu0 %vm2172_vm11, %v8769_v32 }
 0x781   : >> { %8379 = vmatmul.msk.bf16.gmra.mxu1 %vm2172_vm11, %v11910_v27 }
 0x783   : >> { %v4692_v50 = vpop.f32.mrf.mxu3 }
 0x784   : >> { %v11922_v24 = vadd.f32 %v4692_v50, %v11808_v51 }
 0x785   : >> { %v4888_v9 = vpop.f32.mrf.mxu2  ;;  %v4845_v46 = vpop.f32.mrf.mxu0 }
 0x786   : >> { %v4911_v43 = vadd.f32 %v4888_v9, %v11836_v26  ;;  %v11926_v49 = vadd.f32 %v4845_v46, %v11810_v17  ;;  %v4874_v21 = vpop.f32.mrf.mxu1 }
 0x787   : >> { %v11928_v58 = vadd.f32 %v4874_v21, %v4717_v30  ;;  %v8777_v21 = vld [vmem:[%s10011_s12 + $0x218] sm:$0xff] }
 0x788   : >> { %8384 = vmatmul.msk.bf16.vlgmr.msra.gmra.mxu3 %vm2172_vm11, %v11821_v53 }
 0x78a   : >> { %8381 = vmatmul.msk.bf16.gmra.mxu2 %vm2172_vm11, %v11855_v36 }
 0x78b   : >> { %v5063_v41 = vpop.f32.mrf.mxu3 }
 0x78c   : >> { %v11935_v51 = vadd.f32 %v5063_v41, %v11825_v37 }
 0x78d   : >> { %v4891_v59 = vpop.f32.mrf.mxu2  ;;  %v5092_v16 = vpop.f32.mrf.mxu0 }
 0x78e   : >> { %v4914_v26 = vadd.f32 %v4891_v59, %v11851_v54  ;;  %v11940_v17 = vadd.f32 %v5092_v16, %v11827_v29  ;;  %v5121_v0 = vpop.f32.mrf.mxu1 }
 0x78f   : >> { %v11942_v48 = vadd.f32 %v5121_v0, %v4908_v14 }
 0x790   : >> { %8415 = vmatmul.msk.bf16.vlgmr.msra.gmra.mxu0 %vm2172_vm11, %v8774_v23 }
 0x791   : >> { %8419 = vmatmul.msk.bf16.vlgmr.msra.gmra.mxu1 %vm2172_vm11, %v8774_v23 }
 0x793   : >> { %v5065_v53 = vpop.f32.mrf.mxu3 }
 0x794   : >> { %v11947_v37 = vadd.f32 %v5065_v53, %v11842_v25 }
 0x795   : >> { %v4893_v45 = vpop.f32.mrf.mxu2  ;;  %v5094_v52 = vpop.f32.mrf.mxu0 }
 0x796   : >> { %v4917_v42 = vadd.f32 %v4893_v45, %v11868_v8  ;;  %v11951_v54 = vadd.f32 %v5094_v52, %v11844_v12  ;;  %v5123_v29 = vpop.f32.mrf.mxu1 }
 0x797   : >> { %v11953_v32 = vadd.f32 %v5123_v29, %v4911_v43 }
 0x798   : >> { %8385 = vmatmul.msk.bf16.gmra.mxu3 %vm2172_vm11, %v11855_v36 }
 0x79a   : >> { %8382 = vmatmul.msk.bf16.gmra.mxu2 %vm2172_vm11, %v11883_v57 }
 0x79b   : >> { %v5068_v20 = vpop.f32.mrf.mxu3 }
 0x79c   : >> { %v11960_v25 = vadd.f32 %v5068_v20, %v11859_v35 }
 0x79d   : >> { %v4896_v6 = vpop.f32.mrf.mxu2  ;;  %v5097_v44 = vpop.f32.mrf.mxu0 }
 0x79e   : >> { %v4920_v8 = vadd.f32 %v4896_v6, %v11880_v7  ;;  %v11965_v12 = vadd.f32 %v5097_v44, %v11861_v22  ;;  %v5126_v60 = vpop.f32.mrf.mxu1 }
 0x79f   : >> { %v11967_v2 = vadd.f32 %v5126_v60, %v4914_v26 }
 0x7a0   : >> { %8416 = vmatmul.msk.bf16.gmra.mxu0 %vm2172_vm11, %v8775_v4 }
 0x7a1   : >> { %8420 = vmatmul.msk.bf16.gmra.mxu1 %vm2172_vm11, %v8775_v4 }
 0x7a3   : >> { %v5070_v36 = vpop.f32.mrf.mxu3 }
 0x7a4   : >> { %v11972_v35 = vadd.f32 %v5070_v36, %v11873_v56 }
 0x7a5   : >> { %v4898_v10 = vpop.f32.mrf.mxu2  ;;  %v5099_v13 = vpop.f32.mrf.mxu0 }
 0x7a6   : >> { %v4923_v62 = vadd.f32 %v4898_v10, %v11895_v39  ;;  %v11976_v7 = vadd.f32 %v5099_v13, %v11875_v5  ;;  %v5128_v22 = vpop.f32.mrf.mxu1 }
 0x7a7   : >> { %v11978_v1 = vadd.f32 %v5128_v22, %v4917_v42 }
 0x7a8   : >> { %8386 = vmatmul.msk.bf16.gmra.mxu3 %vm2172_vm11, %v11883_v57 }
 0x7aa   : >> { %8383 = vmatmul.msk.bf16.gmra.mxu2 %vm2172_vm11, %v11910_v27 }
 0x7ab   : >> { %v5073_v30 = vpop.f32.mrf.mxu3 }
 0x7ac   : >> { %v11985_v56 = vadd.f32 %v5073_v30, %v11887_v34 }
 0x7ad   : >> { %v4901_v31 = vpop.f32.mrf.mxu2  ;;  %v5102_v18 = vpop.f32.mrf.mxu0 }
 0x7ae   : >> { %v4926_v39 = vadd.f32 %v4901_v31, %v11907_v11  ;;  %v11990_v5 = vadd.f32 %v5102_v18, %v11889_v33  ;;  %v5131_v19 = vpop.f32.mrf.mxu1 }
 0x7af   : >> { %v11992_v14 = vadd.f32 %v5131_v19, %v4920_v8 }
 0x7b0   : >> { %8417 = vmatmul.msk.bf16.gmra.mxu0 %vm2172_vm11, %v8776_v40 }
 0x7b1   : >> { %8421 = vmatmul.msk.bf16.gmra.mxu1 %vm2172_vm11, %v8776_v40 }
 0x7b3   : >> { %v5075_v57 = vpop.f32.mrf.mxu3 }
 0x7b4   : >> { %v11997_v34 = vadd.f32 %v5075_v57, %v11899_v47 }
 0x7b5   : >> { %v4903_v61 = vpop.f32.mrf.mxu2  ;;  %v5104_v50 = vpop.f32.mrf.mxu0 }
 0x7b6   : >> { %v4929_v9 = vadd.f32 %v4903_v61, %v11922_v24  ;;  %v12001_v11 = vadd.f32 %v5104_v50, %v11901_v55  ;;  %v5133_v33 = vpop.f32.mrf.mxu1 }
 0x7b7   : >> { %v12003_v46 = vadd.f32 %v5133_v33, %v4923_v62 }
 0x7b8   : >> { %8387 = vmatmul.msk.bf16.gmra.mxu3 %vm2172_vm11, %v11910_v27 }
 0x7ba   : >> { %8423 = vmatmul.msk.bf16.vlgmr.msrb.gmra.mxu2 %vm2172_vm11, %v8774_v23 }
 0x7bb   : >> { %v5078_v43 = vpop.f32.mrf.mxu3 }
 0x7bc   : >> { %v12009_v47 = vadd.f32 %v5078_v43, %v11914_v38  ;;  %v8778_v38 = vld [vmem:[%s10011_s12 + $0x220] sm:$0xff] }
 0x7bd   : >> { %v5262_v41 = vpop.f32.mrf.mxu2  ;;  %v5107_v59 = vpop.f32.mrf.mxu0 }
 0x7be   : >> { %v5340_v24 = vadd.f32 %v5262_v41, %v11935_v51  ;;  %v12014_v55 = vadd.f32 %v5107_v59, %v11916_v15  ;;  %v5136_v16 = vpop.f32.mrf.mxu1 }
 0x7bf   : >> { %v12016_v26 = vadd.f32 %v5136_v16, %v4926_v39 }
 0x7c0   : >> { %8418 = vmatmul.msk.bf16.gmra.mxu0 %vm2172_vm11, %v8777_v21 }
 0x7c1   : >> { %8422 = vmatmul.msk.bf16.gmra.mxu1 %vm2172_vm11, %v8777_v21 }
 0x7c3   : >> { %v5080_v27 = vpop.f32.mrf.mxu3 }
 0x7c4   : >> { %v12021_v23 = vadd.f32 %v5080_v27, %v11926_v49 }
 0x7c5   : >> { %v5264_v0 = vpop.f32.mrf.mxu2  ;;  %v5109_v53 = vpop.f32.mrf.mxu0 }
 0x7c6   : >> { %v5343_v45 = vadd.f32 %v5264_v0, %v11947_v37  ;;  %v12026_v51 = vadd.f32 %v5109_v53, %v11928_v58  ;;  %v5138_v15 = vpop.f32.mrf.mxu1 }
 0x7c7   : >> { %v12028_v52 = vadd.f32 %v5138_v15, %v4929_v9 }
 0x7c8   : >> { %8454 = vmatmul.msk.bf16.vlgmr.msrb.gmra.mxu3 %vm2172_vm11, %v8778_v38 }
 0x7ca   : >> { %8424 = vmatmul.msk.bf16.gmra.mxu2 %vm2172_vm11, %v8775_v4 }
 0x7cb   : >> { %v5291_v42 = vpop.f32.mrf.mxu3 }
 0x7cc   : >> { %v12033_v49 = vadd.f32 %v5291_v42, %v11940_v17  ;;  %v8779_v17 = vld [vmem:[%s10011_s12 + $0x228] sm:$0xff] }
 0x7cd   : >> { %v5267_v29 = vpop.f32.mrf.mxu2  ;;  %v5320_v20 = vpop.f32.mrf.mxu0 }
 0x7ce   : >> { %v5346_v6 = vadd.f32 %v5267_v29, %v11960_v25  ;;  %v12037_v37 = vadd.f32 %v5320_v20, %v11942_v48  ;;  %v5461_v58 = vpop.f32.mrf.mxu1 }
 0x7cf   : >> { %v12039_v44 = vadd.f32 %v5461_v58, %v5340_v24 }
 0x7d0   : >> { %8458 = vmatmul.msk.bf16.vlgmr.msrb.gmra.mxu0 %vm2172_vm11, %v8778_v38 }
 0x7d1   : >> { %8462 = vmatmul.msk.bf16.vlgmr.msrb.gmra.mxu1 %vm2172_vm11, %v8778_v38 }
 0x7d3   : >> { %v5293_v8 = vpop.f32.mrf.mxu3 }
 0x7d4   : >> { %v12044_v4 = vadd.f32 %v5293_v8, %v11951_v54 }
 0x7d5   : >> { %v5269_v60 = vpop.f32.mrf.mxu2  ;;  %v5322_v36 = vpop.f32.mrf.mxu0 }
 0x7d6   : >> { %v5349_v10 = vadd.f32 %v5269_v60, %v11972_v35  ;;  %v12049_v25 = vadd.f32 %v5322_v36, %v11953_v32  ;;  %v5463_v48 = vpop.f32.mrf.mxu1 }
 0x7d7   : >> { %v12051_v13 = vadd.f32 %v5463_v48, %v5343_v45 }
 0x7d8   : >> { %8455 = vmatmul.msk.bf16.gmra.mxu3 %vm2172_vm11, %v8779_v17 }
 0x7da   : >> { %8425 = vmatmul.msk.bf16.gmra.mxu2 %vm2172_vm11, %v8776_v40 }
 0x7db   : >> { %v5296_v62 = vpop.f32.mrf.mxu3 }
 0x7dc   : >> { %v12056_v54 = vadd.f32 %v5296_v62, %v11965_v12  ;;  %v8780_v12 = vld [vmem:[%s10011_s12 + $0x230] sm:$0xff] }
 0x7dd   : >> { %v5272_v22 = vpop.f32.mrf.mxu2  ;;  %v5325_v30 = vpop.f32.mrf.mxu0 }
 0x7de   : >> { %v5352_v31 = vadd.f32 %v5272_v22, %v11985_v56  ;;  %v12060_v35 = vadd.f32 %v5325_v30, %v11967_v2  ;;  %v5466_v32 = vpop.f32.mrf.mxu1 }
 0x7df   : >> { %v12062_v18 = vadd.f32 %v5466_v32, %v5346_v6 }
 0x7e0   : >> { %8459 = vmatmul.msk.bf16.gmra.mxu0 %vm2172_vm11, %v8779_v17 }
 0x7e1   : >> { %8463 = vmatmul.msk.bf16.gmra.mxu1 %vm2172_vm11, %v8779_v17 }
 0x7e3   : >> { %v5298_v39 = vpop.f32.mrf.mxu3 }
 0x7e4   : >> { %v12067_v40 = vadd.f32 %v5298_v39, %v11976_v7 }
 0x7e5   : >> { %v5274_v19 = vpop.f32.mrf.mxu2  ;;  %v5327_v57 = vpop.f32.mrf.mxu0 }
 0x7e6   : >> { %v5355_v61 = vadd.f32 %v5274_v19, %v11997_v34  ;;  %v12072_v56 = vadd.f32 %v5327_v57, %v11978_v1  ;;  %v5468_v2 = vpop.f32.mrf.mxu1 }
 0x7e7   : >> { %v12074_v50 = vadd.f32 %v5468_v2, %v5349_v10 }
 0x7e8   : >> { %8456 = vmatmul.msk.bf16.gmra.mxu3 %vm2172_vm11, %v8780_v12 }
 0x7ea   : >> { %8426 = vmatmul.msk.bf16.gmra.mxu2 %vm2172_vm11, %v8777_v21 }
 0x7eb   : >> { %v5301_v9 = vpop.f32.mrf.mxu3 }
 0x7ec   : >> { %v12079_v7 = vadd.f32 %v5301_v9, %v11990_v5  ;;  %v8781_v5 = vld [vmem:[%s10011_s12 + $0x238] sm:$0xff] }
 0x7ed   : >> { %v5277_v33 = vpop.f32.mrf.mxu2  ;;  %v5330_v43 = vpop.f32.mrf.mxu0 }
 0x7ee   : >> { %v5358_v41 = vadd.f32 %v5277_v33, %v12009_v47  ;;  %v12083_v34 = vadd.f32 %v5330_v43, %v11992_v14  ;;  %v5471_v1 = vpop.f32.mrf.mxu1 }
 0x7ef   : >> { %v12085_v59 = vadd.f32 %v5471_v1, %v5352_v31 }
 0x7f0   : >> { %8460 = vmatmul.msk.bf16.gmra.mxu0 %vm2172_vm11, %v8780_v12 }
 0x7f1   : >> { %8464 = vmatmul.msk.bf16.gmra.mxu1 %vm2172_vm11, %v8780_v12 }
 0x7f3   : >> { %v5303_v24 = vpop.f32.mrf.mxu3 }
 0x7f4   : >> { %v12090_v21 = vadd.f32 %v5303_v24, %v12001_v11 }
 0x7f5   : >> { %v5279_v16 = vpop.f32.mrf.mxu2  ;;  %v5332_v27 = vpop.f32.mrf.mxu0 }
 0x7f6   : >> { %v5361_v38 = vadd.f32 %v5279_v16, %v12021_v23  ;;  %v12095_v47 = vadd.f32 %v5332_v27, %v12003_v46  ;;  %v5473_v14 = vpop.f32.mrf.mxu1 }
 0x7f7   : >> { %v12097_v0 = vadd.f32 %v5473_v14, %v5355_v61 }
 0x7f8   : >> { %8457 = vmatmul.msk.bf16.gmra.mxu3 %vm2172_vm11, %v8781_v5 }
 0x7fb   : >> { %v5306_v53 = vpop.f32.mrf.mxu3 }
 0x7fc   : >> { %v12101_v45 = vadd.f32 %v5306_v53, %v12014_v55 }
 0x7fd   : >> { %v5490_v15 = vpop.f32.mrf.mxu2  ;;  %v5335_v11 = vpop.f32.mrf.mxu0 }
 0x7fe   : >> { %12803 = vst [vmem:[#allocation15_spill] sm:$0xff] %v12101_v45  ;;  %v12104_v42 = vadd.f32 %v5335_v11, %v12016_v26  ;;  %v5476_v29 = vpop.f32.mrf.mxu1 }
 0x7ff   : >> { %v12106_v20 = vadd.f32 %v5476_v29, %v5358_v41 }
 0x800   : >> { %12804 = vst [vmem:[#allocation13_spill] sm:$0xff] %v12104_v42  ;;  %8461 = vmatmul.msk.bf16.gmra.mxu0 %vm2172_vm11, %v8781_v5 }
 0x801   : >> { %12805 = vst [vmem:[#allocation21_spill] sm:$0xff] %v12106_v20  ;;  %8465 = vmatmul.msk.bf16.gmra.mxu1 %vm2172_vm11, %v8781_v5 }
 0x803   : >> { %v5308_v46 = vpop.f32.mrf.mxu3 }
 0x804   : >> { %v12111_v23 = vadd.f32 %v5308_v46, %v12026_v51  ;;  %v5540_v46 = vadd.f32 %v5490_v15, %v12033_v49 }
 0x805   : >> { %v5492_v6 = vpop.f32.mrf.mxu2  ;;  %v5337_v58 = vpop.f32.mrf.mxu0 }
 0x806   : >> { %12806 = vst [vmem:[#allocation5_spill] sm:$0xff] %v12111_v23  ;;  %v12114_v55 = vadd.f32 %v5337_v58, %v12028_v52  ;;  %v5478_v8 = vpop.f32.mrf.mxu1  ;;  %v5964_v23 = vpop.permute.xlu2 %5963 }
 0x807   : >> { %v12116_v17 = vadd.f32 %v5478_v8, %v5361_v38 }
 0x808   : >> { %12807 = vst [vmem:[#allocation10_spill] sm:$0xff] %v12114_v55 }
 0x809   : >> { %12808 = vst [vmem:[#allocation6_spill] sm:$0xff] %v12116_v17 }
 0x80b   : >> { %v5519_v26 = vpop.f32.mrf.mxu3 }
 0x80c   : >> { %v5541_v8 = vadd.f32 %v5519_v26, %v12037_v37 }
 0x80d   : >> { %v12118_v60 = vpop.f32.mrf.mxu2  ;;  %v5660_v36 = vpop.f32.mrf.mxu0 }
 0x80e   : >> { %v5689_v10 = vpop.f32.mrf.mxu1  ;;  %v5738_v58 = vadd.f32 %v5660_v36, %v12039_v44 }
 0x80f   : >> { %v5739_v17 = vadd.f32 %v5689_v10, %v5540_v46  ;;  %v5969_v10 = vpop.permute.xlu0 %5968 }
 0x813   : >> { %v5521_v48 = vpop.f32.mrf.mxu3 }
 0x814   : >> { %v5544_v15 = vadd.f32 %v5521_v48, %v12049_v25  ;;  %v5546_v25 = vadd.f32 %v12118_v60, %v12056_v54 }
 0x815   : >> { %v12120_v62 = vpop.f32.mrf.mxu2  ;;  %v5662_v22 = vpop.f32.mrf.mxu0 }
 0x816   : >> { %v5691_v30 = vpop.f32.mrf.mxu1  ;;  %v5741_v49 = vadd.f32 %v5662_v22, %v12051_v13 }
 0x81b   : >> { %v12122_v51 = vpop.f32.mrf.mxu3 }
 0x81d   : >> { %v12124_v31 = vpop.f32.mrf.mxu2  ;;  %v5665_v32 = vpop.f32.mrf.mxu0 }
 0x81e   : >> { %v12126_v52 = vpop.f32.mrf.mxu1 }
 0x823   : >> { %v12128_v39 = vpop.f32.mrf.mxu3 }
 0x825   : >> { %v12130_v12 = vpop.f32.mrf.mxu2  ;;  %v12132_v19 = vpop.f32.mrf.mxu0 }
 0x826   : >> { %v12134_v57 = vpop.f32.mrf.mxu1 }
 0x82b   : >> { %v12136_v61 = vpop.f32.mrf.mxu3 }
 0x82d   : >> { %v12138_v2 = vpop.f32.mrf.mxu2  ;;  %v12140_v9 = vpop.f32.mrf.mxu0 }
 0x82e   : >> { %12809 = vst [vmem:[#allocation11_spill] sm:$0xff] %v12138_v2  ;;  %v12142_v33 = vpop.f32.mrf.mxu1 }
 0x833   : >> { %v12144_v43 = vpop.f32.mrf.mxu3 }
 0x835   : >> { %v12146_v41 = vpop.f32.mrf.mxu2  ;;  %v12148_v1 = vpop.f32.mrf.mxu0 }
 0x836   : >> { %12810 = vst [vmem:[#allocation14_spill] sm:$0xff] %v12146_v41  ;;  %v12150_v24 = vpop.f32.mrf.mxu1 }
 0x83b   : >> { %v12152_v5 = vpop.f32.mrf.mxu3 }
 0x83c   : >> { %12811 = vst [vmem:[#allocation25_spill] sm:$0xff] %v12152_v5 }
 0x83d   : >> { %v5718_v16 = vpop.f32.mrf.mxu2  ;;  %v12154_v27 = vpop.f32.mrf.mxu0 }
 0x83e   : >> { %12812 = vst [vmem:[#allocation24_spill] sm:$0xff] %v12154_v27  ;;  %v12156_v38 = vpop.f32.mrf.mxu1  ;;  %v5740_v5 = vadd.f32 %v5718_v16, %v5541_v8 }
 0x83f   : >> { %12813 = vst [vmem:[#allocation16_spill] sm:$0xff] %v12156_v38 }
 0x843   : >> { %v12158_v14 = vpop.f32.mrf.mxu3 }
 0x844   : >> { %12814 = vst [vmem:[#allocation18_spill] sm:$0xff] %v12158_v14 }
 0x845   : >> { %v12160_v53 = vpop.f32.mrf.mxu0  ;;  %v5720_v11 = vpop.f32.mrf.mxu2 }
 0x846   : >> { %12815 = vst [vmem:[#allocation7_spill] sm:$0xff] %v12160_v53  ;;  %v12162_v29 = vpop.f32.mrf.mxu1 }
 0x847   : >> { %12816 = vst [vmem:[#allocation9_spill] sm:$0xff] %v12162_v29  ;;  %v5543_v29 = vadd.f32 %v5492_v6, %v12044_v4 }
 0x849   : >> { %v5742_v36 = vadd.f32 %v5691_v30, %v5543_v29 }
 0x84b   : >> { %v5859_v55 = vpop.f32.mrf.mxu3 }
 0x84c   : >> { %v5937_v41 = vadd.f32 %v5859_v55, %v5738_v58  ;;  %v5974_v58 = vpop.permute.xlu1 %5973 }
 0x84d   : >> { %v5888_v42 = vpop.f32.mrf.mxu0  ;;  %v5723_v53 = vpop.f32.mrf.mxu2 }
 0x84e   : >> { %v6001_v38 = vadd.f32 %v5964_v23, %v5937_v41  ;;  %v5938_v27 = vadd.f32 %v5888_v42, %v5739_v17  ;;  %v5917_v14 = vpop.f32.mrf.mxu1  ;;  %v5743_v41 = vadd.f32 %v5720_v11, %v5544_v15  ;;  %v5745_v11 = vadd.f32 %v12126_v52, %v5546_v25 }
 0x84f   : >> { %v5939_v20 = vadd.f32 %v5917_v14, %v5740_v5  ;;  %v5747_v52 = vadd.f32 %v12132_v19, %v12074_v50 }
 0x850   : >> { %v6002_v2 = vadd.f32 %v5964_v23, %v5938_v27  ;;  %v6025_v44 = vmul.f32 %v6001_v38, %v9785_v63  ;;  %v5547_v27 = vadd.f32 %v12122_v51, %v12060_v35  ;;  %v5549_v51 = vadd.f32 %v12120_v62, %v12067_v40 }
 0x851   : >> { %v6003_v45 = vadd.f32 %v5964_v23, %v5939_v20 }
 0x852   : >> { %v6026_v37 = vmul.f32 %v6002_v2, %v9787_v3  ;;  %v5746_v8 = vadd.f32 %v5723_v53, %v5547_v27  ;;  %v5984_v27 = vpop.permute.xlu0 %5983 }
 0x853   : >> { %v6027_v55 = vmul.f32 %v6003_v45, %v9793_v28  ;;  %v5861_v26 = vpop.f32.mrf.mxu3  ;;  %v5744_v45 = vadd.f32 %v5665_v32, %v12062_v18 }
 0x854   : >> { %v6049_v42 = vpack.c.bf16 %v6026_v37, %v6025_v44  ;;  %v5940_v17 = vadd.f32 %v5861_v26, %v5741_v49 }
 0x855   : >> { %v6050_v5 = vpack.c.bf16 %v6027_v55, %v6027_v55  ;;  %v5890_v20 = vpop.f32.mrf.mxu0  ;;  %v5725_v48 = vpop.f32.mrf.mxu2  ;;  %v5550_v55 = vadd.f32 %v12128_v39, %v12072_v56 }
 0x856   : >> { %6065 = vst [vmem:[#allocation2 + $0x4] sm:$0xff] %v6049_v42  ;;  %v6004_v4 = vadd.f32 %v5969_v10, %v5940_v17  ;;  %v5941_v23 = vadd.f32 %v5890_v20, %v5742_v36  ;;  %v5919_v13 = vpop.f32.mrf.mxu1  ;;  %v5748_v42 = vadd.f32 %v12134_v57, %v5549_v51  ;;  %v5750_v57 = vadd.f32 %v12140_v9, %v12085_v59 }
 0x857   : >> { %6066 = vst.msk [vmem:[#allocation2 + $0xc] sm:$0xf] %vm1958_vm10, %v6050_v5  ;;  %v5942_v6 = vadd.f32 %v5919_v13, %v5743_v41  ;;  %v5979_v5 = vpop.permute.xlu2 %5978  ;;  %v5749_v40 = vadd.f32 %v5725_v48, %v5550_v55  ;;  %v5552_v13 = vadd.f32 %v12124_v31, %v12079_v7  ;;  %v12818_v55 = vld [vmem:[#allocation11_spill] sm:$0xff] }
 0x858   : >> { %v6005_v22 = vadd.f32 %v5969_v10, %v5941_v23  ;;  %v6028_v30 = vmul.f32 %v6004_v4, %v9785_v63 }
 0x859   : >> { %v6006_v2 = vadd.f32 %v5969_v10, %v5942_v6  ;;  %v5751_v48 = vadd.f32 %v12142_v33, %v5552_v13  ;;  %v5753_v33 = vadd.f32 %v12148_v1, %v12097_v0 }
 0x85a   : >> { %v6029_v16 = vmul.f32 %v6005_v22, %v9787_v3 }
 0x85b   : >> { %v6030_v38 = vmul.f32 %v6006_v2, %v9793_v28  ;;  %v5864_v14 = vpop.f32.mrf.mxu3  ;;  %v5553_v2 = vadd.f32 %v12136_v61, %v12083_v34 }
 0x85c   : >> { %v6051_v29 = vpack.c.bf16 %v6029_v16, %v6028_v30  ;;  %v5943_v46 = vadd.f32 %v5864_v14, %v5744_v45 }
 0x85d   : >> { %v6052_v54 = vpack.c.bf16 %v6030_v38, %v6030_v38  ;;  %v5893_v60 = vpop.f32.mrf.mxu0  ;;  %v5728_v17 = vpop.f32.mrf.mxu2 }
 0x85e   : >> { %6067 = vst [vmem:[#allocation2 + $0x18] sm:$0xff] %v6051_v29  ;;  %v6007_v18 = vadd.f32 %v5974_v58, %v5943_v46  ;;  %v5944_v32 = vadd.f32 %v5893_v60, %v5745_v11  ;;  %v5922_v49 = vpop.f32.mrf.mxu1  ;;  %v5752_v38 = vadd.f32 %v5728_v17, %v5553_v2  ;;  %v5555_v46 = vadd.f32 %v12130_v12, %v12090_v21 }
 0x85f   : >> { %6068 = vst.msk [vmem:[#allocation2 + $0x20] sm:$0xf] %vm1958_vm10, %v6052_v54  ;;  %v5945_v44 = vadd.f32 %v5922_v49, %v5746_v8  ;;  %v5556_v54 = vadd.f32 %v12144_v43, %v12095_v47 }
 0x860   : >> { %v6008_v37 = vadd.f32 %v5974_v58, %v5944_v32  ;;  %v6031_v15 = vmul.f32 %v6007_v18, %v9785_v63  ;;  %v5754_v32 = vadd.f32 %v12150_v24, %v5555_v46  ;;  %v12819_v24 = vld [vmem:[#allocation21_spill] sm:$0xff] }
 0x861   : >> { %v6009_v35 = vadd.f32 %v5974_v58, %v5945_v44 }
 0x862   : >> { %v6032_v53 = vmul.f32 %v6008_v37, %v9787_v3  ;;  %v5989_v37 = vpop.permute.xlu1 %5988 }
 0x863   : >> { %v6033_v26 = vmul.f32 %v6009_v35, %v9793_v28  ;;  %v5866_v36 = vpop.f32.mrf.mxu3 }
 0x864   : >> { %v6053_v10 = vpack.c.bf16 %v6032_v53, %v6031_v15  ;;  %v5946_v41 = vadd.f32 %v5866_v36, %v5747_v52  ;;  %v12817_v53 = vld [vmem:[#allocation15_spill] sm:$0xff]  ;;  %v12820_v36 = vld [vmem:[#allocation24_spill] sm:$0xff] }
 0x865   : >> { %v6054_v62 = vpack.c.bf16 %v6033_v26, %v6033_v26  ;;  %v5895_v20 = vpop.f32.mrf.mxu0  ;;  %v5730_v14 = vpop.f32.mrf.mxu2  ;;  %v5558_v26 = vadd.f32 %v12818_v55, %v12817_v53  ;;  %v8788_v53 = vld [vmem:[#allocation2 + $0x38] sm:$0xf0] (%p1976_p4)  ;;  %v8477_v55 = vld [vmem:[#allocation2 + $0x8] sm:$0xf] (%p1976_p4) }
 0x866   : >> { %6069 = vst [vmem:[#allocation2 + $0x2c] sm:$0xff] %v6053_v10  ;;  %v6010_v50 = vadd.f32 %v5979_v5, %v5946_v41  ;;  %v5947_v19 = vadd.f32 %v5895_v20, %v5748_v42  ;;  %v5924_v4 = vpop.f32.mrf.mxu1  ;;  %v5755_v35 = vadd.f32 %v5730_v14, %v5556_v54  ;;  %v5756_v42 = vadd.f32 %v12820_v36, %v12819_v24  ;;  %v12821_v41 = vld [vmem:[#allocation13_spill] sm:$0xff]  ;;  %v8785_v36 = vld [vmem:[#allocation2 + $0x18] sm:$0xf0] (%p1976_p4) }
 0x867   : >> { %6070 = vst.msk [vmem:[#allocation2 + $0x34] sm:$0xf] %vm1958_vm10, %v6054_v62  ;;  %v5948_v23 = vadd.f32 %v5924_v4, %v5749_v40 }
 0x868   : >> { %v6011_v56 = vadd.f32 %v5979_v5, %v5947_v19  ;;  %v6034_v6 = vmul.f32 %v6010_v50, %v9785_v63  ;;  %v12823_v50 = vld [vmem:[#allocation16_spill] sm:$0xff] }
 0x869   : >> { %v6012_v39 = vadd.f32 %v5979_v5, %v5948_v23  ;;  %v12822_v5 = vld [vmem:[#allocation25_spill] sm:$0xff]  ;;  %v5757_v19 = vadd.f32 %v12823_v50, %v5558_v26  ;;  %v12831_v26 = vmov (%p1976_p4), 0  }
 0x86a   : >> { %v6035_v22 = vmul.f32 %v6011_v56, %v9787_v3  ;;  %v5559_v40 = vadd.f32 %v12822_v5, %v12821_v41  ;;  %v5994_v56 = vpop.permute.xlu2 %5993  ;;  %8863 = vset.pattern.permute.xlu1 (%p1976_p4), %v12831_v26  ;;  %8864 = vset.pattern.permute.xlu0 (%p1976_p4), %v12831_v26  ;;  %v8479_v5 = vld [vmem:[#allocation2 + $0x1c] sm:$0xf0] (%p1976_p4) }
 0x86b   : >> { %v6036_v25 = vmul.f32 %v6012_v39, %v9793_v28  ;;  %v5869_v45 = vpop.f32.mrf.mxu3 }
 0x86c   : >> { %v6055_v30 = vpack.c.bf16 %v6035_v22, %v6034_v6  ;;  %v5949_v16 = vadd.f32 %v5869_v45, %v5750_v57 }
 0x86d   : >> { %v6056_v7 = vpack.c.bf16 %v6036_v25, %v6036_v25  ;;  %v5898_v31 = vpop.f32.mrf.mxu0  ;;  %v5733_v15 = vpop.f32.mrf.mxu2 }
 0x86e   : >> { %6071 = vst [vmem:[#allocation2 + $0x40] sm:$0xff] %v6055_v30  ;;  %v6013_v59 = vadd.f32 %v5984_v27, %v5949_v16  ;;  %v5950_v9 = vadd.f32 %v5898_v31, %v5751_v48  ;;  %v5927_v11 = vpop.f32.mrf.mxu1  ;;  %v5758_v39 = vadd.f32 %v5733_v15, %v5559_v40  ;;  %v12824_v30 = vld [vmem:[#allocation5_spill] sm:$0xff]  ;;  %v12825_v16 = vld [vmem:[#allocation14_spill] sm:$0xff]  ;;  %v8782_v40 = vld [vmem:[#allocation2 + $0x4] sm:$0xf] (%p1976_p4) }
 0x86f   : >> { %6072 = vst.msk [vmem:[#allocation2 + $0x48] sm:$0xf] %vm1958_vm10, %v6056_v7  ;;  %v5951_v29 = vadd.f32 %v5927_v11, %v5752_v38  ;;  %v12826_v38 = vld [vmem:[#allocation6_spill] sm:$0xff]  ;;  %v12827_v7 = vld [vmem:[#allocation7_spill] sm:$0xff] }
 0x870   : >> { %v6014_v34 = vadd.f32 %v5984_v27, %v5950_v9  ;;  %v6037_v58 = vmul.f32 %v6013_v59, %v9785_v63  ;;  %v5759_v31 = vadd.f32 %v12827_v7, %v12826_v38  ;;  %v12828_v11 = vld [vmem:[#allocation10_spill] sm:$0xff] }
 0x871   : >> { %v6015_v61 = vadd.f32 %v5984_v27, %v5951_v29  ;;  %v5561_v27 = vadd.f32 %v12825_v16, %v12824_v30  ;;  %v12829_v29 = vld [vmem:[#allocation18_spill] sm:$0xff] }
 0x872   : >> { %v6038_v8 = vmul.f32 %v6014_v34, %v9787_v3  ;;  %v5562_v34 = vadd.f32 %v12829_v29, %v12828_v11  ;;  %v8517_v29 = vld [vmem:[#allocation2 + $0x78] sm:$0xf] (%p1976_p4) }
 0x873   : >> { %v6039_v60 = vmul.f32 %v6015_v61, %v9793_v28  ;;  %v5871_v18 = vpop.f32.mrf.mxu3 }
 0x874   : >> { %v6057_v49 = vpack.c.bf16 %v6038_v8, %v6037_v58  ;;  %v5952_v44 = vadd.f32 %v5871_v18, %v5753_v33  ;;  %v12830_v33 = vld [vmem:[#allocation9_spill] sm:$0xff] }
 0x875   : >> { %v6058_v21 = vpack.c.bf16 %v6039_v60, %v6039_v60  ;;  %v5900_v12 = vpop.f32.mrf.mxu0  ;;  %v5735_v14 = vpop.f32.mrf.mxu2  ;;  %v5760_v58 = vadd.f32 %v12830_v33, %v5561_v27 }
 0x876   : >> { %6073 = vst [vmem:[#allocation2 + $0x54] sm:$0xff] %v6057_v49  ;;  %v6016_v0 = vadd.f32 %v5989_v37, %v5952_v44  ;;  %v5953_v1 = vadd.f32 %v5900_v12, %v5754_v32  ;;  %v5929_v51 = vpop.f32.mrf.mxu1  ;;  %v5999_v60 = vpop.permute.xlu0 %5998  ;;  %v5761_v18 = vadd.f32 %v5735_v14, %v5562_v34  ;;  %v8796_v34 = vld [vmem:[#allocation2 + $0x88] sm:$0xf0] (%p1976_p4) }
 0x877   : >> { %6074 = vst.msk [vmem:[#allocation2 + $0x5c] sm:$0xf] %vm1958_vm10, %v6058_v21  ;;  %v5954_v52 = vadd.f32 %v5929_v51, %v5755_v35  ;;  %v8518_v33 = vor.u32 (%p1976_p4), %v8796_v34, %v8517_v29  ;;  %v8801_v29 = vld [vmem:[#allocation2 + $0x30] sm:$0xf] (%p1976_p4) }
 0x878   : >> { %v6017_v47 = vadd.f32 %v5989_v37, %v5953_v1  ;;  %v6040_v17 = vmul.f32 %v6016_v0, %v9785_v63 }
 0x879   : >> { %v6018_v43 = vadd.f32 %v5989_v37, %v5954_v52 }
 0x87a   : >> { %v6041_v10 = vmul.f32 %v6017_v47, %v9787_v3 }
 0x87b   : >> { %v6042_v62 = vmul.f32 %v6018_v43, %v9793_v28  ;;  %v5874_v20 = vpop.f32.mrf.mxu3  ;;  %v8485_v43 = vld [vmem:[#allocation2 + $0x28] sm:$0xf] (%p1976_p4) }
 0x87c   : >> { %v6059_v4 = vpack.c.bf16 %v6041_v10, %v6040_v17  ;;  %v5955_v23 = vadd.f32 %v5874_v20, %v5756_v42  ;;  %v12248_v24 = vor.u32 (%p1976_p4), %v8788_v53, %v8485_v43  ;;  %v8469_v42 = vld [vmem:[#allocation2] sm:$0xf] (%p1976_p4)  ;;  %v8784_v17 = vld [vmem:[#allocation2 + $0x10] sm:$0xf0] (%p1976_p4)  ;;  %v12250_v10 = vor.u32 (%p1976_p4), %v8785_v36, %v8477_v55 }
 0x87d   : >> { %v6060_v13 = vpack.c.bf16 %v6042_v62, %v6042_v62  ;;  %v5903_v57 = vpop.f32.mrf.mxu0  ;;  %v12252_v41 = vor.u32 (%p1976_p4), %v8784_v17, %v8469_v42  ;;  %v8471_v62 = vld [vmem:[#allocation2 + $0x14] sm:$0xf0] (%p1976_p4)  ;;  %v8790_v16 = vld [vmem:[#allocation2 + $0x54] sm:$0xf] (%p1976_p4) }
 0x87e   : >> { %6075 = vst [vmem:[#allocation2 + $0x68] sm:$0xff] %v6059_v4  ;;  %v6019_v6 = vadd.f32 %v5994_v56, %v5955_v23  ;;  %v5956_v22 = vadd.f32 %v5903_v57, %v5757_v19  ;;  %v5932_v2 = vpop.f32.mrf.mxu1  ;;  %6173 = vrot.lane.b32.xlu2 (%p1976_p4), %v12248_v24, %s8881_s15  ;;  %6169 = vrot.lane.b32.xlu1 (%p1976_p4), %v12250_v10, %s8881_s15  ;;  %v8501_v4 = vld [vmem:[#allocation2 + $0x50] sm:$0xf] (%p1976_p4)  ;;  %v8792_v23 = vld [vmem:[#allocation2 + $0x60] sm:$0xf0] (%p1976_p4) }
 0x87f   : >> { %6076 = vst.msk [vmem:[#allocation2 + $0x70] sm:$0xf] %vm1958_vm10, %v6060_v13  ;;  %v5957_v25 = vadd.f32 %v5932_v2, %v5758_v39  ;;  %6165 = vrot.lane.b32.xlu0 (%p1976_p4), %v12252_v41, %s8881_s15  ;;  %v12264_v19 = vor.u32 (%p1976_p4), %v8782_v40, %v8471_v62  ;;  %v8495_v39 = vld [vmem:[#allocation2 + $0x44] sm:$0xf0] (%p1976_p4)  ;;  %v8493_v13 = vld [vmem:[#allocation2 + $0x30] sm:$0xf] (%p1976_p4) }
 0x880   : >> { %v6020_v45 = vadd.f32 %v5994_v56, %v5956_v22  ;;  %v6043_v59 = vmul.f32 %v6019_v6, %v9785_v63  ;;  %v8789_v57 = vld [vmem:[#allocation2 + $0x40] sm:$0xf0] (%p1976_p4)  ;;  %v12272_v6 = vor.u32 (%p1976_p4), %v8792_v23, %v8501_v4 }
 0x881   : >> { %v6021_v48 = vadd.f32 %v5994_v56, %v5957_v25  ;;  %v8787_v56 = vld [vmem:[#allocation2 + $0x34] sm:$0xf] (%p1976_p4)  ;;  %v12276_v2 = vor.u32 (%p1976_p4), %v8789_v57, %v8493_v13  ;;  %v8791_v25 = vld [vmem:[#allocation2 + $0x5c] sm:$0xf] (%p1976_p4) }
 0x882   : >> { %v6044_v9 = vmul.f32 %v6020_v45, %v9787_v3  ;;  %v12274_v22 = vor.u32 (%p1976_p4), %v8787_v56, %v8495_v39 }
 0x883   : >> { %v6045_v61 = vmul.f32 %v6021_v48, %v9793_v28  ;;  %v5876_v46 = vpop.f32.mrf.mxu3  ;;  %v8509_v48 = vld [vmem:[#allocation2 + $0x58] sm:$0xf] (%p1976_p4) }
 0x884   : >> { %v6061_v8 = vpack.c.bf16 %v6044_v9, %v6043_v59  ;;  %v5958_v54 = vadd.f32 %v5876_v46, %v5759_v31 }
 0x885   : >> { %v6062_v32 = vpack.c.bf16 %v6045_v61, %v6045_v61  ;;  %v5905_v49 = vpop.f32.mrf.mxu0  ;;  %v8793_v30 = vld [vmem:[#allocation2 + $0x68] sm:$0xf0] (%p1976_p4)  ;;  %v8503_v27 = vld [vmem:[#allocation2 + $0x64] sm:$0xf0] (%p1976_p4) }
 0x886   : >> { %6077 = vst [vmem:[#allocation2 + $0x7c] sm:$0xff] %v6061_v8  ;;  %v6022_v44 = vadd.f32 %v5999_v60, %v5958_v54  ;;  %v5959_v37 = vadd.f32 %v5905_v49, %v5760_v58  ;;  %v5934_v35 = vpop.f32.mrf.mxu1  ;;  %v8511_v45 = vld [vmem:[#allocation2 + $0x6c] sm:$0xf0] (%p1976_p4)  ;;  %v8510_v7 = vor.u32 (%p1976_p4), %v8793_v30, %v8509_v48  ;;  %v8506_v31 = vor.u32 (%p1976_p4), %v8790_v16, %v8503_v27 }
 0x887   : >> { %6078 = vst.msk [vmem:[#allocation2 + $0x84] sm:$0xf] %vm1958_vm10, %v6062_v32  ;;  %v5960_v21 = vadd.f32 %v5934_v35, %v5761_v18  ;;  %6167 = vrot.lane.b32.xlu0 (%p1976_p4), %v12264_v19, %s8881_s15  ;;  %v12284_v38 = vor.u32 (%p1976_p4), %v8791_v25, %v8511_v45  ;;  %v8805_v25 = vld [vmem:[#allocation2 + $0x64] sm:$0xf0] (%p1976_p4) }
 0x888   : >> { %v6023_v12 = vadd.f32 %v5999_v60, %v5959_v37  ;;  %v6046_v1 = vmul.f32 %v6022_v44, %v9785_v63  ;;  %v8786_v63 = vld [vmem:[#allocation2 + $0x2c] sm:$0xf] (%p1976_p4) }
 0x889   : >> { %v6024_v0 = vadd.f32 %v5999_v60, %v5960_v21 }
 0x88a   : >> { %v6047_v51 = vmul.f32 %v6023_v12, %v9787_v3  ;;  %v8487_v3 = vld [vmem:[#allocation2 + $0x3c] sm:$0xf0] (%p1976_p4) }
 0x88b   : >> { %v6048_v52 = vmul.f32 %v6024_v0, %v9793_v28  ;;  %1978 = sbr.rel (!%p1976_p4) target bundleno = 715 (0x2cb), region = 125  ;;  %v8783_v28 = vld [vmem:[#allocation2 + $0xc] sm:$0xf] (%p1976_p4)  ;;  %v12260_v20 = vor.u32 (%p1976_p4), %v8786_v63, %v8487_v3 }
 0x88c   : >> { %v6063_v15 = vpack.c.bf16 %v6047_v51, %v6046_v1  ;;  %v12262_v50 = vor.u32 (%p1976_p4), %v8783_v28, %v8479_v5 }
 0x88d   : >> { %v6064_v47 = vpack.c.bf16 %v6048_v52, %v6048_v52  ;;  %6175 = vrot.lane.b32.xlu2 (%p1976_p4), %v12260_v20, %s8881_s15  ;;  %v8525_v14 = vld [vmem:[#allocation2 + $0x80] sm:$0xf] (%p1976_p4)  ;;  %v8794_v9 = vld [vmem:[#allocation2 + $0x7c] sm:$0xf] (%p1976_p4) }
 0x88e   : >> { %6079 = vst [vmem:[#allocation2 + $0x90] sm:$0xff] %v6063_v15  ;;  %6171 = vrot.lane.b32.xlu1 (%p1976_p4), %v12262_v50, %s8881_s15  ;;  %v8795_v58 = vld [vmem:[#allocation2 + $0x84] sm:$0xf] (%p1976_p4)  ;;  %v8807_v62 = vld [vmem:[#allocation2 + $0x80] sm:$0xf] (%p1976_p4) }
 0x88f   : >> { %6080 = vst.msk [vmem:[#allocation2 + $0x98] sm:$0xf] %vm1958_vm10, %v6064_v47  ;;  %6177 = vrot.lane.b32.xlu0 (%p1976_p4), %v12276_v2, %s8881_s15  ;;  %v8584_v23 = vld [vmem:[#allocation2 + $0x7c] sm:$0xf] (%p1976_p4)  ;;  %v8592_v34 = vld [vmem:[#allocation2 + $0x84] sm:$0xf] (%p1976_p4) }
 0x895   : > { %6181 = vrot.lane.b32.xlu2 %v12272_v6, %s8881_s15  ;;  %v8797_v59 = vld [vmem:[#allocation2 + $0x90] sm:$0xf0]  ;;  %v8519_v11 = vld [vmem:[#allocation2 + $0x8c] sm:$0xf0] }
 0x896   : > { %6179 = vrot.lane.b32.xlu1 %v12274_v22, %s8881_s15  ;;  %v8526_v61 = vor.u32 %v8797_v59, %v8525_v14  ;;  %v8522_v46 = vor.u32 %v8794_v9, %v8519_v11  ;;  %v8527_v8 = vld [vmem:[#allocation2 + $0x94] sm:$0xf0]  ;;  %v8808_v56 = vld [vmem:[#allocation2 + $0x8c] sm:$0xf0] }
 0x897   : > { %6183 = vrot.lane.b32.xlu0 %v8506_v31, %s8881_s15  ;;  %v12293_v54 = vor.u32 %v8795_v58, %v8527_v8  ;;  %v8560_v58 = vld [vmem:[#allocation2 + $0x2c] sm:$0xf]  ;;  %v8802_v8 = vld [vmem:[#allocation2 + $0x3c] sm:$0xf0] }
 0x89d   : > { %6187 = vrot.lane.b32.xlu2 %v12284_v38, %s8881_s15 }
 0x89e   : > { %6185 = vrot.lane.b32.xlu1 %v8510_v7, %s8881_s15 }
 0x89f   : > { %6189 = vrot.lane.b32.xlu0 %v8518_v33, %s8881_s15 }
 0x8a5   : > { %6193 = vrot.lane.b32.xlu2 %v8526_v61, %s8881_s15 }
 0x8a6   : > { %6191 = vrot.lane.b32.xlu1 %v8522_v46, %s8881_s15 }
 0x8a7   : > { %6195 = vrot.lane.b32.xlu0 %v12293_v54, %s8881_s15  ;;  %s12832_s15 = smov 111  }
 0x8ad   : > { %6266 = vrot.lane.b32.xlu2 %v12264_v19, %s8882_s16 }
 0x8ae   : > { %6264 = vrot.lane.b32.xlu1 %v12252_v41, %s8882_s16 }
 0x8af   : > { %6268 = vrot.lane.b32.xlu0 %v12250_v10, %s8882_s16 }
 0x8b5   : > { %6272 = vrot.lane.b32.xlu2 %v12248_v24, %s8882_s16 }
 0x8b6   : > { %6270 = vrot.lane.b32.xlu1 %v12262_v50, %s8882_s16 }
 0x8b7   : > { %6274 = vrot.lane.b32.xlu0 %v12260_v20, %s8882_s16 }
 0x8bd   : > { %6290 = vrot.lane.b32.xlu2 %v8522_v46, %s8882_s16 }
 0x8be   : > { %6288 = vrot.lane.b32.xlu1 %v8518_v33, %s8882_s16 }
 0x8bf   : > { %6388 = vrot.lane.b32.xlu0 %v8518_v33, %s8883_s17 }
 0x8c5   : > { %6280 = vrot.lane.b32.xlu2 %v12272_v6, %s8882_s16 }
 0x8c6   : > { %6390 = vrot.lane.b32.xlu1 %v8522_v46, %s8883_s17 }
 0x8c7   : > { %6282 = vrot.lane.b32.xlu0 %v8506_v31, %s8882_s16 }
 0x8cd   : > { %6382 = vrot.lane.b32.xlu2 %v8506_v31, %s8883_s17 }
 0x8ce   : > { %6380 = vrot.lane.b32.xlu1 %v12272_v6, %s8883_s17 }
 0x8cf   : > { %6292 = vrot.lane.b32.xlu0 %v8526_v61, %s8882_s16 }
 0x8d5   : > { %6372 = vrot.lane.b32.xlu2 %v12248_v24, %s8883_s17 }
 0x8d6   : > { %6294 = vrot.lane.b32.xlu1 %v12293_v54, %s8882_s16 }
 0x8d7   : > { %6374 = vrot.lane.b32.xlu0 %v12260_v20, %s8883_s17 }
 0x8d8   : > { %v6174_v60 = vpop.permute.xlu2 %6173 }
 0x8dd   : > { %6286 = vrot.lane.b32.xlu2 %v12284_v38, %s8882_s16 }
 0x8de   : > { %6284 = vrot.lane.b32.xlu1 %v8510_v7, %s8882_s16 }
 0x8df   : > { %6364 = vrot.lane.b32.xlu0 %v12252_v41, %s8883_s17 }
 0x8e5   : > { %6276 = vrot.lane.b32.xlu2 %v12276_v2, %s8882_s16 }
 0x8e6   : > { %6366 = vrot.lane.b32.xlu1 %v12264_v19, %s8883_s17 }
 0x8e7   : > { %v6176_v18 = vpop.permute.xlu2 %6175  ;;  %6278 = vrot.lane.b32.xlu0 %v12274_v22, %s8882_s16 }
 0x8ed   : > { %6493 = vrot.lane.b32.xlu2 %v8522_v46, %s8884_s18 }
 0x8ee   : > { %6392 = vrot.lane.b32.xlu1 %v8526_v61, %s8883_s17 }
 0x8ef   : > { %v6182_v32 = vpop.permute.xlu2 %6181  ;;  %6495 = vrot.lane.b32.xlu0 %v8526_v61, %s8884_s18  ;;  %v8809_v61 = vld [vmem:[#allocation2 + $0x94] sm:$0xf0] }
 0x8f0   : > { %v12342_v44 = vpop.permute.xlu1 %6169 }
 0x8f1   : > { %v6166_v37 = vpop.permute.xlu0 %6165 }
 0x8f5   : > { %6485 = vrot.lane.b32.xlu2 %v8506_v31, %s8884_s18 }
 0x8f6   : > { %6384 = vrot.lane.b32.xlu1 %v8510_v7, %s8883_s17 }
 0x8f7   : > { %v6188_v49 = vpop.permute.xlu2 %6187  ;;  %6487 = vrot.lane.b32.xlu0 %v8510_v7, %s8884_s18  ;;  %v8574_v7 = vld [vmem:[#allocation2 + $0x68] sm:$0xf0] }
 0x8f9   : > { %v6168_v12 = vpop.permute.xlu0 %6167 }
 0x8fa   : > { %v6197_v5 = vsel %vm405_vm1, %v6166_v37, %v6168_v12  ;;  %v6198_v40 = vsel %vm405_vm1, %v6168_v12, %v12342_v44  ;;  %v12457_v37 = vor.u32 %v8802_v8, %v8560_v58  ;;  %v8799_v12 = vld [vmem:[#allocation2 + $0x14] sm:$0xf0]  ;;  %v6082_v8 = vld [vmem:[%s12743_s6] sm:$0xf] }
 0x8fd   : > { %6376 = vrot.lane.b32.xlu2 %v12276_v2, %s8883_s17 }
 0x8fe   : > { %6491 = vrot.lane.b32.xlu1 %v8518_v33, %s8884_s18  ;;  %v8562_v33 = vld [vmem:[#allocation2 + $0x40] sm:$0xf0] }
 0x8ff   : > { %v6194_v35 = vpop.permute.xlu2 %6193  ;;  %6394 = vrot.lane.b32.xlu0 %v12293_v54, %s8883_s17 }
 0x900   : > { %v12348_v21 = vpop.permute.xlu1 %6171 }
 0x901   : > { %v6178_v51 = vpop.permute.xlu0 %6177  ;;  %v6199_v45 = vsel %vm405_vm1, %v12342_v44, %v12348_v21  ;;  %v12455_v44 = vor.u32 %v8801_v29, %v8562_v33  ;;  %v8548_v21 = vld [vmem:[#allocation2 + $0x4] sm:$0xf] }
 0x902   : > { %v6201_v28 = vsel %vm405_vm1, %v6176_v18, %v6178_v51 }
 0x905   : > { %6479 = vrot.lane.b32.xlu2 %v12276_v2, %s8884_s18  ;;  %v8572_v2 = vld [vmem:[#allocation2 + $0x54] sm:$0xf] }
 0x906   : > { %6477 = vrot.lane.b32.xlu1 %v12260_v20, %s8884_s18  ;;  %v8586_v20 = vld [vmem:[#allocation2 + $0x90] sm:$0xf0]  ;;  %v12425_v27 = vor.u32 %v8805_v25, %v8572_v2 }
 0x907   : > { %v12356_v0 = vpop.permute.xlu2 %6266  ;;  %6483 = vrot.lane.b32.xlu0 %v12272_v6, %s8884_s18  ;;  %v12407_v57 = vor.u32 %v8807_v62, %v8586_v20  ;;  %v12409_v6 = vor.u32 %v8808_v56, %v8584_v23  ;;  %v8803_v23 = vld [vmem:[#allocation2 + $0x44] sm:$0xf0] }
 0x908   : > { %v6180_v1 = vpop.permute.xlu1 %6179 }
 0x909   : > { %v6184_v47 = vpop.permute.xlu0 %6183 }
 0x90d   : > { %6386 = vrot.lane.b32.xlu2 %v12284_v38, %s8883_s17 }
 0x90e   : > { %6368 = vrot.lane.b32.xlu1 %v12250_v10, %s8883_s17 }
 0x90f   : > { %v12364_v52 = vpop.permute.xlu2 %6272  ;;  %6469 = vrot.lane.b32.xlu0 %v12264_v19, %s8884_s18 }
 0x910   : > { %v6186_v15 = vpop.permute.xlu1 %6185 }
 0x911   : > { %v6190_v55 = vpop.permute.xlu0 %6189  ;;  %v6204_v42 = vsel %vm405_vm1, %v6184_v47, %v6186_v15  ;;  %v6205_v19 = vsel %vm405_vm1, %v6186_v15, %v6188_v49 }
 0x915   : > { %6475 = vrot.lane.b32.xlu2 %v12248_v24, %s8884_s18  ;;  %v6203_v24 = vsel %vm405_vm1, %v6182_v32, %v6184_v47  ;;  %v12451_v32 = vor.u32 %v8809_v61, %v8592_v34 }
 0x916   : > { %6471 = vrot.lane.b32.xlu1 %v12250_v10, %s8884_s18 }
 0x917   : > { %v12372_v43 = vpop.permute.xlu2 %6290  ;;  %6497 = vrot.lane.b32.xlu0 %v12293_v54, %s8884_s18 }
 0x918   : > { %v6192_v53 = vpop.permute.xlu1 %6191 }
 0x919   : > { %v6206_v26 = vsel %vm405_vm1, %v6190_v55, %v6192_v53  ;;  %v6207_v36 = vsel %vm405_vm1, %v6192_v53, %v6194_v35  ;;  %v6196_v63 = vpop.permute.xlu0 %6195  ;;  %v12473_v55 = vor.u32 %v8799_v12, %v8548_v21  ;;  %v8537_v21 = vld [vmem:[%s12743_s6 + $0x8] sm:$0xf] }
 0x91a   : > { %6229 = vmatpush.bf16.msra.mxu0 %v6206_v26  ;;  %6242 = vmatpush.bf16.msra.mxu1 %v6207_v36  ;;  %v6208_v3 = vsel %vm405_vm1, %v6194_v35, %v6196_v63  ;;  %v8466_v26 = vld [vmem:[%s12743_s6 + $0x4] sm:$0xf] }
 0x91b   : > { %6255 = vmatpush.bf16.msra.mxu2 %v6208_v3 }
 0x91d   : > { %6467 = vrot.lane.b32.xlu2 %v12252_v41, %s8884_s18  ;;  %v6200_v41 = vsel %vm405_vm1, %v6174_v60, %v6176_v18 }
 0x91e   : > { %6378 = vrot.lane.b32.xlu1 %v12274_v22, %s8883_s17  ;;  %6230 = vmatpush.bf16.msra.mxu0 %v6203_v24  ;;  %v8806_v24 = vld [vmem:[#allocation2 + $0x6c] sm:$0xf0] }
 0x91f   : > { %6243 = vmatpush.bf16.msra.mxu1 %v6204_v42  ;;  %v12384_v17 = vpop.permute.xlu2 %6280  ;;  %6489 = vrot.lane.b32.xlu0 %v12284_v38, %s8884_s18  ;;  %v8798_v42 = vld [vmem:[#allocation2 + $0x8] sm:$0xf] }
 0x920   : > { %v12386_v10 = vpop.permute.xlu1 %6264  ;;  %6256 = vmatpush.bf16.msra.mxu2 %v6205_v19  ;;  %v8568_v19 = vld [vmem:[#allocation2 + $0x34] sm:$0xf] }
 0x921   : > { %v12405_v13 = vpop.permute.xlu0 %6268 }
 0x922   : > { %6231 = vmatpush.bf16.msra.mxu0 %v6200_v41  ;;  %v6297_v25 = vsel %vm547_vm0, %v12356_v0, %v12405_v13 }
 0x923   : > { %6244 = vmatpush.bf16.msra.mxu1 %v6201_v28 }
 0x925   : > { %6481 = vrot.lane.b32.xlu2 %v12274_v22, %s8884_s18  ;;  %v6202_v22 = vsel %vm405_vm1, %v6178_v51, %v6180_v1 }
 0x926   : > { %6370 = vrot.lane.b32.xlu1 %v12262_v50, %s8883_s17  ;;  %6232 = vmatpush.bf16.msra.mxu0 %v6197_v5 }
 0x927   : > { %6245 = vmatpush.bf16.msra.mxu1 %v6198_v40  ;;  %v12401_v4 = vpop.permute.xlu2 %6382  ;;  %6257 = vmatpush.bf16.msra.mxu2 %v6202_v22 }
 0x928   : > { %v12403_v39 = vpop.permute.xlu1 %6270  ;;  %6473 = vrot.lane.b32.xlu0 %v12262_v50, %s8884_s18  ;;  %v8804_v50 = vld [vmem:[#allocation2 + $0x58] sm:$0xf]  ;;  %s12833_s18 = smov 110  }
 0x929   : > { %v12423_v16 = vpop.permute.xlu0 %6274  ;;  %v12439_v11 = vor.u32 %v8804_v50, %v8574_v7  ;;  %8531 = vmatmul.msk.bf16.vlgmr.msra.gmra.mxu0 %vm2172_vm11, %v8466_v26 }
 0x92a   : > { %v6299_v35 = vsel %vm547_vm0, %v12364_v52, %v12423_v16  ;;  %v6296_v52 = vsel %vm547_vm0, %v12386_v10, %v12356_v0  ;;  %8532 = vmatmul.msk.bf16.vlgmr.msra.gmra.mxu1 %vm2172_vm11, %v8466_v26 }
 0x92b   : > { %6258 = vmatpush.bf16.msra.mxu2 %v6199_v45  ;;  %v12518_v45 = vor.u32 %v8803_v23, %v8568_v19 }
 0x92d   : > { %6717 = vrot.lane.b32.xlu2 %v12407_v57, %s8885_s19 }
 0x92e   : > { %6715 = vrot.lane.b32.xlu1 %v12409_v6, %s8885_s19  ;;  %8533 = vmatmul.msk.bf16.vlgmr.msra.gmra.mxu2 %vm2172_vm11, %v8466_v26 }
 0x92f   : > { %v12421_v48 = vpop.permute.xlu2 %6372 }
 0x930   : > { %v6289_v30 = vpop.permute.xlu1 %6288  ;;  %6806 = vrot.lane.b32.xlu0 %v12409_v6, %s12832_s15 }
 0x931   : > { %v6305_v38 = vsel %vm547_vm0, %v6289_v30, %v12372_v43  ;;  %v6389_v59 = vpop.permute.xlu0 %6388  ;;  %v8800_v30 = vld [vmem:[#allocation2 + $0x1c] sm:$0xf0] }
 0x932   : > { %6327 = vmatpush.bf16.msra.mxu3 %v6305_v38 }
 0x935   : > { %6709 = vrot.lane.b32.xlu2 %v12425_v27, %s8885_s19 }
 0x936   : > { %6808 = vrot.lane.b32.xlu1 %v12407_v57, %s12832_s15 }
 0x937   : > { %v6287_v31 = vpop.permute.xlu2 %6286 }
 0x938   : > { %v12435_v14 = vpop.permute.xlu1 %6390  ;;  %6711 = vrot.lane.b32.xlu0 %v12439_v11, %s8885_s19 }
 0x939   : > { %v6405_v9 = vsel %vm696_vm4, %v6389_v59, %v12435_v14  ;;  %v6283_v60 = vpop.permute.xlu0 %6282  ;;  %v6298_v59 = vsel %vm547_vm0, %v12405_v13, %v12403_v39 }
 0x93a   : > { %6427 = vmatpush.bf16.msrb.mxu2 %v6405_v9  ;;  %v6302_v18 = vsel %vm547_vm0, %v12384_v17, %v6283_v60  ;;  %v8550_v17 = vld [vmem:[#allocation2 + $0x18] sm:$0xf0] }
 0x93b   : > { %6328 = vmatpush.bf16.msra.mxu3 %v6302_v18  ;;  %v12498_v40 = vor.u32 %v8798_v42, %v8550_v17  ;;  %v8541_v17 = vld [vmem:[%s12743_s6 + $0xc] sm:$0xf] }
 0x93d   : > { %6802 = vrot.lane.b32.xlu2 %v12439_v11, %s12832_s15 }
 0x93e   : > { %6800 = vrot.lane.b32.xlu1 %v12425_v27, %s12832_s15 }
 0x93f   : > { %v12447_v46 = vpop.permute.xlu2 %6276  ;;  %6329 = vmatpush.bf16.msra.mxu3 %v6299_v35 }
 0x940   : > { %v6381_v54 = vpop.permute.xlu1 %6380  ;;  %6703 = vrot.lane.b32.xlu0 %v12457_v37, %s8885_s19  ;;  %v6300_v62 = vsel %vm547_vm0, %v12423_v16, %v12447_v46 }
 0x941   : > { %v6402_v49 = vsel %vm696_vm4, %v6381_v54, %v12401_v4  ;;  %v6293_v15 = vpop.permute.xlu0 %6292 }
 0x942   : > { %6428 = vmatpush.bf16.msrb.mxu2 %v6402_v49  ;;  %v6306_v47 = vsel %vm547_vm0, %v12372_v43, %v6293_v15  ;;  %v8580_v43 = vld [vmem:[#allocation2 + $0x5c] sm:$0xf] }
 0x943   : > { %6340 = vmatpush.bf16.msrb.mxu0 %v6306_v47  ;;  %6330 = vmatpush.bf16.msra.mxu3 %v6296_v52  ;;  %v12496_v5 = vor.u32 %v8806_v24, %v8580_v43 }
 0x945   : > { %6719 = vrot.lane.b32.xlu2 %v12451_v32, %s8885_s19 }
 0x946   : > { %6705 = vrot.lane.b32.xlu1 %v12455_v44, %s8885_s19  ;;  %8534 = vmatmul.msk.bf16.vlgmr.msra.gmra.mxu3 %vm2172_vm11, %v6082_v8 }
 0x947   : > { %v12468_v1 = vpop.permute.xlu2 %6493 }
 0x948   : > { %v6295_v51 = vpop.permute.xlu1 %6294  ;;  %6794 = vrot.lane.b32.xlu0 %v12457_v37, %s12832_s15 }
 0x949   : > { %v6307_v53 = vsel %vm547_vm0, %v6293_v15, %v6295_v51  ;;  %v6375_v63 = vpop.permute.xlu0 %6374 }
 0x94a   : > { %6353 = vmatpush.bf16.msrb.mxu1 %v6307_v53  ;;  %v6399_v41 = vsel %vm696_vm4, %v12421_v48, %v6375_v63  ;;  %v8556_v48 = vld [vmem:[#allocation2 + $0xc] sm:$0xf] }
 0x94b   : > { %6429 = vmatpush.bf16.msrb.mxu2 %v6399_v41 }
 0x94d   : > { %6697 = vrot.lane.b32.xlu2 %v12473_v55, %s8885_s19 }
 0x94e   : > { %6796 = vrot.lane.b32.xlu1 %v12455_v44, %s12832_s15 }
 0x94f   : > { %v12490_v36 = vpop.permute.xlu2 %6485 }
 0x950   : > { %v6285_v10 = vpop.permute.xlu1 %6284  ;;  %6699 = vrot.lane.b32.xlu0 %v12498_v40, %s8885_s19 }
 0x951   : > { %v6303_v3 = vsel %vm547_vm0, %v6283_v60, %v6285_v10  ;;  %v6304_v28 = vsel %vm547_vm0, %v6285_v10, %v6287_v31  ;;  %v6365_v22 = vpop.permute.xlu0 %6364  ;;  %v12532_v31 = vor.u32 %v8800_v30, %v8556_v48 }
 0x952   : > { %6341 = vmatpush.bf16.msrb.mxu0 %v6303_v3  ;;  %6354 = vmatpush.bf16.msrb.mxu1 %v6304_v28 }
 0x955   : > { %6788 = vrot.lane.b32.xlu2 %v12473_v55, %s12832_s15 }
 0x956   : > { %6713 = vrot.lane.b32.xlu1 %v12496_v5, %s8885_s19  ;;  %6342 = vmatpush.bf16.msrb.mxu0 %v6300_v62 }
 0x957   : > { %v12509_v20 = vpop.permute.xlu2 %6376 }
 0x958   : > { %v12511_v56 = vpop.permute.xlu1 %6366  ;;  %6790 = vrot.lane.b32.xlu0 %v12498_v40, %s12832_s15  ;;  %v6400_v39 = vsel %vm696_vm4, %v6375_v63, %v12509_v20 }
 0x959   : > { %v6396_v2 = vsel %vm696_vm4, %v6365_v22, %v12511_v56  ;;  %v6279_v50 = vpop.permute.xlu0 %6278 }
 0x95a   : > { %6430 = vmatpush.bf16.msrb.mxu2 %v6396_v2  ;;  %6343 = vmatpush.bf16.msrb.mxu0 %v6297_v25  ;;  %v6301_v0 = vsel %vm547_vm0, %v12447_v46, %v6279_v50  ;;  %v8545_v25 = vld [vmem:[%s12743_s6 + $0x10] sm:$0xf]  ;;  %vm7085_vm0 = vmor %vm7084_vm15, %vm7083_vm14 }
 0x95b   : > { %6355 = vmatpush.bf16.msrb.mxu1 %v6301_v0 }
 0x95d   : > { %6810 = vrot.lane.b32.xlu2 %v12451_v32, %s12832_s15  ;;  %8535 = vmatmul.msk.bf16.vlgmr.msrb.gmra.mxu0 %vm2172_vm11, %v6082_v8 }
 0x95e   : > { %6707 = vrot.lane.b32.xlu1 %v12518_v45, %s8885_s19  ;;  %8538 = vmatmul.msk.bf16.vlgmr.msrb.gmra.mxu2 %vm2172_vm11, %v8537_v21 }
 0x95f   : > { %v12526_v16 = vpop.permute.xlu2 %6479  ;;  %6356 = vmatpush.bf16.msrb.mxu1 %v6298_v59 }
 0x960   : > { %v6393_v38 = vpop.permute.xlu1 %6392  ;;  %6899 = vrot.lane.b32.xlu0 %v12407_v57, %s12833_s18 }
 0x961   : > { %v6406_v7 = vsel %vm696_vm4, %v12435_v14, %v6393_v38  ;;  %v12543_v29 = vpop.permute.xlu0 %6495 }
 0x962   : > { %6440 = vmatpush.bf16.msrb.mxu3 %v6406_v7  ;;  %v6509_v34 = vsel %vm869_vm5, %v12468_v1, %v12543_v29  ;;  %8536 = vmatmul.msk.bf16.vlgmr.msrb.gmra.mxu1 %vm2172_vm11, %v6082_v8 }
 0x963   : > { %6543 = vmatpush.bf16.msra.mxu2 %v6509_v34 }
 0x965   : > { %6701 = vrot.lane.b32.xlu2 %v12532_v31, %s8885_s19 }
 0x966   : > { %6901 = vrot.lane.b32.xlu1 %v12451_v32, %s12833_s18 }
 0x967   : > { %v6387_v9 = vpop.permute.xlu2 %6386 }
 0x968   : > { %v6385_v14 = vpop.permute.xlu1 %6384  ;;  %6804 = vrot.lane.b32.xlu0 %v12496_v5, %s12832_s15 }
 0x969   : > { %v6403_v61 = vsel %vm696_vm4, %v12401_v4, %v6385_v14  ;;  %v12558_v33 = vpop.permute.xlu0 %6487  ;;  %v6404_v12 = vsel %vm696_vm4, %v6385_v14, %v6387_v9 }
 0x96a   : > { %6441 = vmatpush.bf16.msrb.mxu3 %v6403_v61  ;;  %v6506_v58 = vsel %vm869_vm5, %v12490_v36, %v12558_v33 }
 0x96b   : > { %6544 = vmatpush.bf16.msra.mxu2 %v6506_v58 }
 0x96d   : > { %6895 = vrot.lane.b32.xlu2 %v12496_v5, %s12833_s18 }
 0x96e   : > { %6893 = vrot.lane.b32.xlu1 %v12439_v11, %s12833_s18  ;;  %6442 = vmatpush.bf16.msrb.mxu3 %v6400_v39 }
 0x96f   : > { %v6476_v13 = vpop.permute.xlu2 %6475 }
 0x970   : > { %v6492_v46 = vpop.permute.xlu1 %6491  ;;  %6897 = vrot.lane.b32.xlu0 %v12409_v6, %s12833_s18 }
 0x971   : > { %v6508_v4 = vsel %vm869_vm5, %v6492_v46, %v12468_v1  ;;  %v6395_v18 = vpop.permute.xlu0 %6394  ;;  %v8597_v46 = vld [vmem:[%s12743_s6 + $0x14] sm:$0xf] }
 0x972   : > { %6530 = vmatpush.bf16.msra.mxu1 %v6508_v4  ;;  %v6407_v49 = vsel %vm696_vm4, %v6393_v38, %v6395_v18 }
 0x973   : > { %6453 = vmatpush.bf16.msra.mxu0 %v6407_v49 }
 0x975   : > { %6887 = vrot.lane.b32.xlu2 %v12455_v44, %s12833_s18 }
 0x976   : > { %6798 = vrot.lane.b32.xlu1 %v12518_v45, %s12832_s15 }
 0x977   : > { %v6468_v54 = vpop.permute.xlu2 %6467  ;;  %6454 = vmatpush.bf16.msra.mxu0 %v6404_v12 }
 0x978   : > { %v6478_v60 = vpop.permute.xlu1 %6477  ;;  %6889 = vrot.lane.b32.xlu0 %v12518_v45, %s12833_s18 }
 0x979   : > { %v6503_v35 = vsel %vm869_vm5, %v6478_v60, %v12526_v16  ;;  %v6484_v15 = vpop.permute.xlu0 %6483  ;;  %v6502_v26 = vsel %vm869_vm5, %v6476_v13, %v6478_v60  ;;  %v8601_v60 = vld [vmem:[%s12743_s6 + $0x18] sm:$0xf] }
 0x97a   : > { %6545 = vmatpush.bf16.msra.mxu2 %v6503_v35  ;;  %v6505_v47 = vsel %vm869_vm5, %v6484_v15, %v12490_v36 }
 0x97b   : > { %6531 = vmatpush.bf16.msra.mxu1 %v6505_v47 }
 0x97d   : > { %6792 = vrot.lane.b32.xlu2 %v12532_v31, %s12832_s15 }
 0x97e   : > { %6891 = vrot.lane.b32.xlu1 %v12425_v27, %s12833_s18 }
 0x97f   : > { %v6482_v1 = vpop.permute.xlu2 %6481  ;;  %6532 = vmatpush.bf16.msra.mxu1 %v6502_v26 }
 0x980   : > { %v6369_v51 = vpop.permute.xlu1 %6368  ;;  %6881 = vrot.lane.b32.xlu0 %v12498_v40, %s12833_s18 }
 0x981   : > { %v6397_v53 = vsel %vm696_vm4, %v12511_v56, %v6369_v51  ;;  %v6470_v36 = vpop.permute.xlu0 %6469 }
 0x982   : > { %6443 = vmatpush.bf16.msrb.mxu3 %v6397_v53  ;;  %v6499_v24 = vsel %vm869_vm5, %v6468_v54, %v6470_v36 }
 0x983   : > { %6533 = vmatpush.bf16.msra.mxu1 %v6499_v24 }
 0x985   : > { %6885 = vrot.lane.b32.xlu2 %v12457_v37, %s12833_s18  ;;  %8539 = vmatmul.msk.bf16.vlgmr.msrb.gmra.mxu3 %vm2172_vm11, %v8537_v21 }
 0x986   : > { %6883 = vrot.lane.b32.xlu1 %v12532_v31, %s12833_s18  ;;  %8542 = vmatmul.msk.bf16.vlgmr.msra.gmra.mxu1 %vm2172_vm11, %v8541_v17 }
 0x987   : > { %v6718_v52 = vpop.permute.xlu2 %6717  ;;  %6670 = vmatpush.bf16.msrb.mxu1 %v12407_v57 }
 0x988   : > { %v6472_v43 = vpop.permute.xlu1 %6471  ;;  %6879 = vrot.lane.b32.xlu0 %v12473_v55, %s12833_s18 }
 0x989   : > { %v6500_v42 = vsel %vm869_vm5, %v6470_v36, %v6472_v43  ;;  %v6498_v3 = vpop.permute.xlu0 %6497 }
 0x98a   : > { %6546 = vmatpush.bf16.msra.mxu2 %v6500_v42  ;;  %v6510_v28 = vsel %vm869_vm5, %v12543_v29, %v6498_v3 }
 0x98b   : > { %6671 = vmatpush.bf16.msrb.mxu1 %v12439_v11  ;;  %6556 = vmatpush.bf16.msra.mxu3 %v6510_v28 }
 0x98d   : > { %6986 = vrot.lane.b32.xlu2 %v12496_v5, %s12834_s24  ;;  %8543 = vmatmul.msk.bf16.vlgmr.msra.gmra.mxu2 %vm2172_vm11, %v8541_v17 }
 0x98e   : > { %6683 = vmatpush.bf16.msrb.mxu2 %v12451_v32  ;;  %6992 = vrot.lane.b32.xlu1 %v12451_v32, %s12834_s24 }
 0x98f   : > { %v6710_v10 = vpop.permute.xlu2 %6709  ;;  %6672 = vmatpush.bf16.msrb.mxu1 %v12455_v44 }
 0x990   : > { %v6379_v63 = vpop.permute.xlu1 %6378  ;;  %6990 = vrot.lane.b32.xlu0 %v12407_v57, %s12834_s24  ;;  %v6504_v57 = vsel %vm869_vm5, %v12526_v16, %v6482_v1 }
 0x991   : > { %v6401_v41 = vsel %vm696_vm4, %v12509_v20, %v6379_v63  ;;  %v6490_v62 = vpop.permute.xlu0 %6489 }
 0x992   : > { %6684 = vmatpush.bf16.msrb.mxu2 %v12496_v5  ;;  %6455 = vmatpush.bf16.msra.mxu0 %v6401_v41  ;;  %v6507_v19 = vsel %vm869_vm5, %v12558_v33, %v6490_v62 }
 0x993   : > { %6673 = vmatpush.bf16.msrb.mxu1 %v12498_v40  ;;  %6557 = vmatpush.bf16.msra.mxu3 %v6507_v19 }
 0x995   : > { %6980 = vrot.lane.b32.xlu2 %v12518_v45, %s12834_s24 }
 0x996   : > { %6685 = vmatpush.bf16.msrb.mxu2 %v12518_v45  ;;  %6988 = vrot.lane.b32.xlu1 %v12409_v6, %s12834_s24 }
 0x997   : > { %v12632_v32 = vpop.permute.xlu2 %6802  ;;  %6558 = vmatpush.bf16.msra.mxu3 %v6504_v57  ;;  %8595 = vmatmul.msk.bf16.vlgmr.msrb.gmra.mxu1 %vm2172_vm11, %v8545_v25 }
 0x998   : > { %v6371_v5 = vpop.permute.xlu1 %6370  ;;  %6984 = vrot.lane.b32.xlu0 %v12439_v11, %s12834_s24 }
 0x999   : > { %v6398_v20 = vsel %vm696_vm4, %v6369_v51, %v6371_v5 }
 0x99a   : > { %6686 = vmatpush.bf16.msrb.mxu2 %v12532_v31  ;;  %6456 = vmatpush.bf16.msra.mxu0 %v6398_v20 }
 0x99d   : > { %8540 = vmatmul.msk.bf16.vlgmr.msra.gmra.mxu0 %vm2172_vm11, %v8537_v21  ;;  %6974 = vrot.lane.b32.xlu2 %v12532_v31, %s12834_s24 }
 0x99e   : > { %6657 = vmatpush.bf16.msrb.mxu0 %v12409_v6  ;;  %6982 = vrot.lane.b32.xlu1 %v12425_v27, %s12834_s24  ;;  %v6474_v6 = vpop.permute.xlu0 %6473 }
 0x99f   : > { %v6720_v23 = vpop.permute.xlu2 %6719  ;;  %v6501_v2 = vsel %vm869_vm5, %v6472_v43, %v6474_v6  ;;  %8596 = vmatmul.msk.bf16.vlgmr.msrb.gmra.mxu2 %vm2172_vm11, %v8545_v25 }
 0x9a0   : > { %v6716_v56 = vpop.permute.xlu1 %6715  ;;  %6774 = vmatpush.bf16.msra.mxu1 %v6720_v23  ;;  %6559 = vmatpush.bf16.msra.mxu3 %v6501_v2 }
 0x9a1   : > { %v6727_v22 = vsel %vm1201_vm6, %v6716_v56, %v6718_v52  ;;  %6978 = vrot.lane.b32.xlu0 %v12455_v44, %s12834_s24 }
 0x9a2   : > { %6658 = vmatpush.bf16.msrb.mxu0 %v12425_v27  ;;  %v6728_v27 = vsel %vm1201_vm6, %v6718_v52, %v6720_v23  ;;  %v8605_v23 = vld [vmem:[%s12743_s6 + $0x1c] sm:$0xf] }
 0x9a3   : > { %8544 = vmatmul.msk.bf16.vlgmr.msra.gmra.mxu3 %vm2172_vm11, %v8541_v17 }
 0x9a4   : > { %6748 = vmatpush.bf16.msrb.mxu3 %v6727_v22 }
 0x9a5   : > { %6972 = vrot.lane.b32.xlu2 %v12498_v40, %s12834_s24 }
 0x9a6   : > { %6659 = vmatpush.bf16.msrb.mxu0 %v12457_v37  ;;  %6976 = vrot.lane.b32.xlu1 %v12457_v37, %s12834_s24  ;;  %v6807_v45 = vpop.permute.xlu0 %6806  ;;  %v6234_v28 = vpop.f32.mrf.mxu0 }
 0x9a7   : > { %v6698_v48 = vpop.permute.xlu2 %6697  ;;  %v6247_v41 = vpop.f32.mrf.mxu1 }
 0x9a8   : > { %v6809_v11 = vpop.permute.xlu1 %6808 }
 0x9a9   : > { %v6818_v30 = vsel %vm1371_vm7, %v6807_v45, %v6809_v11  ;;  %6970 = vrot.lane.b32.xlu0 %v12473_v55, %s12834_s24 }
 0x9aa   : > { %6660 = vmatpush.bf16.msrb.mxu0 %v12473_v55  ;;  %6839 = vmatpush.bf16.msra.mxu2 %v6818_v30  ;;  %v6081_v30 = vld [vmem:[%s12744_s7] sm:$0xff] }
 0x9ad   : > { %8594 = vmatmul.msk.bf16.vlgmr.msrb.gmra.mxu0 %vm2172_vm11, %v8545_v25 }
 0x9ae   : > { %6761 = vmatpush.bf16.msra.mxu0 %v6728_v27  ;;  %v6712_v40 = vpop.permute.xlu0 %6711  ;;  %v6236_v6 = vpop.f32.mrf.mxu0  ;;  %7061 = vperm.xlu1 %8863, %v6081_v30  }
 0x9af   : > { %v6725_v16 = vsel %vm1201_vm6, %v6710_v10, %v6712_v40  ;;  %v6789_v38 = vpop.permute.xlu2 %6788  ;;  %v6249_v56 = vpop.f32.mrf.mxu1 }
 0x9b0   : > { %v6801_v37 = vpop.permute.xlu1 %6800  ;;  %6749 = vmatpush.bf16.msrb.mxu3 %v6725_v16 }
 0x9b1   : > { %v6816_v44 = vsel %vm1371_vm7, %v6801_v37, %v12632_v32  ;;  %v6260_v57 = vpop.f32.mrf.mxu2 }
 0x9b2   : > { %6840 = vmatpush.bf16.msra.mxu2 %v6816_v44 }
 0x9b6   : > { %v6704_v0 = vpop.permute.xlu0 %6703 }
 0x9b7   : > { %v6811_v31 = vpop.permute.xlu2 %6810 }
 0x9b8   : > { %v6706_v50 = vpop.permute.xlu1 %6705  ;;  %v6819_v13 = vsel %vm1371_vm7, %v6809_v11, %v6811_v31 }
 0x9b9   : > { %v6723_v7 = vsel %vm1201_vm6, %v6704_v0, %v6706_v50  ;;  %v6262_v11 = vpop.f32.mrf.mxu2 }
 0x9ba   : > { %6750 = vmatpush.bf16.msrb.mxu3 %v6723_v7 }
 0x9be   : > { %v6795_v9 = vpop.permute.xlu0 %6794 }
 0x9bf   : > { %v6702_v14 = vpop.permute.xlu2 %6701 }
 0x9c0   : > { %v6797_v59 = vpop.permute.xlu1 %6796 }
 0x9c1   : > { %v6814_v55 = vsel %vm1371_vm7, %v6795_v9, %v6797_v59 }
 0x9c2   : > { %6841 = vmatpush.bf16.msra.mxu2 %v6814_v55 }
 0x9c6   : > { %v6700_v34 = vpop.permute.xlu0 %6699 }
 0x9c7   : > { %v6721_v61 = vsel %vm1201_vm6, %v6698_v48, %v6700_v34  ;;  %v6896_v58 = vpop.permute.xlu2 %6895  ;;  %v6722_v18 = vsel %vm1201_vm6, %v6700_v34, %v6702_v14 }
 0x9c8   : > { %v6714_v29 = vpop.permute.xlu1 %6713  ;;  %6751 = vmatpush.bf16.msrb.mxu3 %v6721_v61 }
 0x9c9   : > { %v6726_v39 = vsel %vm1201_vm6, %v6712_v40, %v6714_v29  ;;  %6775 = vmatpush.bf16.msra.mxu1 %v6714_v29  ;;  %v6332_v45 = vpop.f32.mrf.mxu3  ;;  %v8609_v29 = vld [vmem:[%s12743_s6 + $0x20] sm:$0xf] }
 0x9ca   : > { %6762 = vmatpush.bf16.msra.mxu0 %v6726_v39  ;;  %v6333_v48 = vadd.f32 %v6332_v45, %v6234_v28 }
 0x9cb   : > { %8598 = vmatmul.msk.bf16.vlgmr.msrb.gmra.mxu3 %vm2172_vm11, %v8597_v46 }
 0x9cc   : > { %6852 = vmatpush.bf16.msra.mxu3 %v6819_v13 }
 0x9ce   : > { %v6791_v4 = vpop.permute.xlu0 %6790 }
 0x9cf   : > { %v6812_v54 = vsel %vm1371_vm7, %v6789_v38, %v6791_v4  ;;  %v6888_v12 = vpop.permute.xlu2 %6887 }
 0x9d0   : > { %v6708_v33 = vpop.permute.xlu1 %6707  ;;  %6842 = vmatpush.bf16.msra.mxu2 %v6812_v54 }
 0x9d1   : > { %6776 = vmatpush.bf16.msra.mxu1 %v6708_v33  ;;  %v6724_v8 = vsel %vm1201_vm6, %v6706_v50, %v6708_v33 }
 0x9d2   : > { %6763 = vmatpush.bf16.msra.mxu0 %v6724_v8 }
 0x9d3   : > { %8602 = vmatmul.msk.bf16.vlgmr.msra.gmra.mxu2 %vm2172_vm11, %v8601_v60 }
 0x9d5   : > { %6777 = vmatpush.bf16.msra.mxu1 %v6702_v14 }
 0x9d6   : > { %6764 = vmatpush.bf16.msra.mxu0 %v6722_v18  ;;  %v6900_v35 = vpop.permute.xlu0 %6899 }
 0x9d7   : > { %v6793_v53 = vpop.permute.xlu2 %6792 }
 0x9d8   : > { %v6902_v49 = vpop.permute.xlu1 %6901  ;;  %8600 = vmatmul.msk.bf16.vlgmr.msra.gmra.mxu1 %vm2172_vm11, %v8597_v46  ;;  %v6813_v42 = vsel %vm1371_vm7, %v6791_v4, %v6793_v53 }
 0x9d9   : > { %v6910_v21 = vsel %vm1541_vm8, %v6900_v35, %v6902_v49  ;;  %8599 = vmatmul.msk.bf16.vlgmr.msra.gmra.mxu0 %vm2172_vm11, %v8597_v46 }
 0x9da   : > { %6865 = vmatpush.bf16.msrb.mxu0 %v6811_v31  ;;  %6943 = vmatpush.bf16.msrb.mxu2 %v6910_v21  ;;  %v6345_v44 = vpop.f32.mrf.mxu0  ;;  %v6334_v31 = vpop.f32.mrf.mxu3 }
 0x9db   : > { %v6346_v16 = vadd.f32 %v6345_v44, %v6247_v41 }
 0x9de   : > { %v6805_v51 = vpop.permute.xlu0 %6804 }
 0x9df   : > { %6866 = vmatpush.bf16.msrb.mxu0 %v6805_v51  ;;  %v6817_v15 = vsel %vm1371_vm7, %v12632_v32, %v6805_v51  ;;  %v6886_v24 = vpop.permute.xlu2 %6885  ;;  %v6358_v37 = vpop.f32.mrf.mxu1 }
 0x9e0   : > { %v6894_v1 = vpop.permute.xlu1 %6893  ;;  %6853 = vmatpush.bf16.msra.mxu3 %v6817_v15  ;;  %v6905_v32 = vsel %vm1541_vm8, %v6886_v24, %v6888_v12  ;;  %v6359_v40 = vadd.f32 %v6358_v37, %v6260_v57 }
 0x9e1   : > { %v6908_v47 = vsel %vm1541_vm8, %v6894_v1, %v6896_v58 }
 0x9e2   : > { %6944 = vmatpush.bf16.msrb.mxu2 %v6908_v47  ;;  %v6347_v34 = vpop.f32.mrf.mxu0 }
 0x9e6   : > { %v6898_v52 = vpop.permute.xlu0 %6897 }
 0x9e7   : > { %v6909_v43 = vsel %vm1541_vm8, %v6898_v52, %v6900_v35  ;;  %v6987_v5 = vpop.permute.xlu2 %6986  ;;  %v6360_v14 = vpop.f32.mrf.mxu1 }
 0x9e8   : > { %v6799_v26 = vpop.permute.xlu1 %6798  ;;  %6930 = vmatpush.bf16.msrb.mxu1 %v6909_v43 }
 0x9e9   : > { %6867 = vmatpush.bf16.msrb.mxu0 %v6799_v26  ;;  %v6815_v36 = vsel %vm1371_vm7, %v6797_v59, %v6799_v26  ;;  %v6432_v59 = vpop.f32.mrf.mxu2 }
 0x9ea   : > { %6854 = vmatpush.bf16.msra.mxu3 %v6815_v36  ;;  %v6462_v55 = vadd.f32 %v6432_v59, %v6333_v48 }
 0x9ed   : > { %6868 = vmatpush.bf16.msrb.mxu0 %v6793_v53 }
 0x9ee   : > { %6855 = vmatpush.bf16.msra.mxu3 %v6813_v42  ;;  %v6890_v10 = vpop.permute.xlu0 %6889 }
 0x9ef   : > { %v6906_v3 = vsel %vm1541_vm8, %v6888_v12, %v6890_v10  ;;  %v6981_v22 = vpop.permute.xlu2 %6980 }
 0x9f0   : > { %v6892_v17 = vpop.permute.xlu1 %6891  ;;  %8604 = vmatmul.msk.bf16.vlgmr.msrb.gmra.mxu0 %vm2172_vm11, %v8601_v60  ;;  %6945 = vmatpush.bf16.msrb.mxu2 %v6906_v3 }
 0x9f1   : > { %v6907_v63 = vsel %vm1541_vm8, %v6892_v17, %v6894_v1  ;;  %8603 = vmatmul.msk.bf16.vlgmr.msra.gmra.mxu3 %vm2172_vm11, %v8601_v60  ;;  %v6434_v33 = vpop.f32.mrf.mxu2 }
 0x9f2   : > { %6956 = vmatpush.bf16.msrb.mxu3 %v6902_v49  ;;  %6931 = vmatpush.bf16.msrb.mxu1 %v6907_v63 }
 0x9f6   : > { %6957 = vmatpush.bf16.msrb.mxu3 %v6896_v58  ;;  %6932 = vmatpush.bf16.msrb.mxu1 %v6905_v32  ;;  %v6882_v20 = vpop.permute.xlu0 %6881 }
 0x9f7   : > { %v6975_v9 = vpop.permute.xlu2 %6974 }
 0x9f8   : > { %v6884_v62 = vpop.permute.xlu1 %6883 }
 0x9f9   : > { %v6904_v19 = vsel %vm1541_vm8, %v6882_v20, %v6884_v62 }
 0x9fa   : > { %6958 = vmatpush.bf16.msrb.mxu3 %v6890_v10  ;;  %6946 = vmatpush.bf16.msrb.mxu2 %v6904_v19 }
 0x9fd   : > { %8607 = vmatmul.msk.bf16.vlgmr.msrb.gmra.mxu2 %vm2172_vm11, %v8605_v23 }
 0x9fe   : > { %6959 = vmatpush.bf16.msrb.mxu3 %v6884_v62  ;;  %v6880_v25 = vpop.permute.xlu0 %6879 }
 0x9ff   : > { %v6903_v27 = vsel %vm1541_vm8, %v6880_v25, %v6882_v20  ;;  %v6973_v60 = vpop.permute.xlu2 %6972 }
 0xa00   : > { %v6993_v2 = vpop.permute.xlu1 %6992  ;;  %6933 = vmatpush.bf16.msrb.mxu1 %v6903_v27  ;;  %v6995_v26 = vsel %vm1711_vm9, %v6973_v60, %v6975_v9 }
 0xa01   : > { %8608 = vmatmul.msk.bf16.vlgmr.msrb.gmra.mxu3 %vm2172_vm11, %v8605_v23  ;;  %7047 = vmatpush.bf16.msra.mxu2 %v6993_v2 }
 0xa03   : > { %8606 = vmatmul.msk.bf16.vlgmr.msrb.gmra.mxu1 %vm2172_vm11, %v8605_v23  ;;  %v6535_v8 = vpop.f32.mrf.mxu1 }
 0xa04   : > { %v6565_v54 = vadd.f32 %v6535_v8, %v6462_v55 }
 0xa05   : > { %7048 = vmatpush.bf16.msra.mxu2 %v6987_v5 }
 0xa06   : > { %v6991_v50 = vpop.permute.xlu0 %6990 }
 0xa07   : > { %v7001_v7 = vsel %vm1711_vm9, %v6991_v50, %v6993_v2 }
 0xa08   : > { %v6989_v38 = vpop.permute.xlu1 %6988  ;;  %7034 = vmatpush.bf16.msra.mxu1 %v7001_v7  ;;  %v6445_v4 = vpop.f32.mrf.mxu3 }
 0xa09   : > { %v7000_v0 = vsel %vm1711_vm9, %v6989_v38, %v6991_v50  ;;  %7049 = vmatpush.bf16.msra.mxu2 %v6981_v22  ;;  %v6463_v58 = vadd.f32 %v6445_v4, %v6346_v16 }
 0xa0a   : > { %7021 = vmatpush.bf16.msra.mxu0 %v7000_v0 }
 0xa0b   : > { %v6537_v47 = vpop.f32.mrf.mxu1 }
 0xa0d   : > { %7050 = vmatpush.bf16.msra.mxu2 %v6975_v9 }
 0xa0e   : > { %v6985_v39 = vpop.permute.xlu0 %6984 }
 0xa0f   : > { %v6999_v46 = vsel %vm1711_vm9, %v6985_v39, %v6987_v5 }
 0xa10   : > { %v6983_v61 = vpop.permute.xlu1 %6982  ;;  %8612 = vmatmul.msk.bf16.vlgmr.msra.gmra.mxu2 %vm2172_vm11, %v8609_v29  ;;  %7035 = vmatpush.bf16.msra.mxu1 %v6999_v46  ;;  %v6447_v12 = vpop.f32.mrf.mxu3 }
 0xa11   : > { %v6998_v13 = vsel %vm1711_vm9, %v6983_v61, %v6985_v39  ;;  %v6548_v1 = vpop.f32.mrf.mxu2  ;;  %v7067_v12 = vld [vmem:[%s8955_s11 + $0x8] sm:$0x3] }
 0xa12   : > { %7022 = vmatpush.bf16.msra.mxu0 %v6998_v13  ;;  %v6566_v15 = vadd.f32 %v6548_v1, %v6463_v58  ;;  %v7068_v58 = vld [vmem:[%s8955_s11 + $0x10] sm:$0x3] }
 0xa14   : > { %v6675_v42 = vpop.f32.mrf.mxu1 }
 0xa15   : > { %v6693_v17 = vadd.f32 %v6675_v42, %v6566_v15 }
 0xa16   : > { %v6979_v49 = vpop.permute.xlu0 %6978 }
 0xa17   : > { %v6997_v21 = vsel %vm1711_vm9, %v6979_v49, %v6981_v22 }
 0xa18   : > { %v6977_v18 = vpop.permute.xlu1 %6976  ;;  %7036 = vmatpush.bf16.msra.mxu1 %v6997_v21 }
 0xa19   : > { %v6996_v35 = vsel %vm1711_vm9, %v6977_v18, %v6979_v49  ;;  %v6550_v36 = vpop.f32.mrf.mxu2 }
 0xa1a   : > { %7023 = vmatpush.bf16.msra.mxu0 %v6996_v35  ;;  %v6458_v51 = vpop.f32.mrf.mxu0 }
 0xa1b   : > { %v6464_v53 = vadd.f32 %v6458_v51, %v6359_v40 }
 0xa1c   : > { %7037 = vmatpush.bf16.msra.mxu1 %v6995_v26  ;;  %v6677_v32 = vpop.f32.mrf.mxu1 }
 0xa1e   : > { %v6971_v52 = vpop.permute.xlu0 %6970 }
 0xa1f   : > { %v6994_v43 = vsel %vm1711_vm9, %v6971_v52, %v6973_v60  ;;  %8611 = vmatmul.msk.bf16.vlgmr.msra.gmra.mxu1 %vm2172_vm11, %v8609_v29 }
 0xa20   : > { %7024 = vmatpush.bf16.msra.mxu0 %v6994_v43  ;;  %v7062_v13 = vpop.permute.xlu1 %7061 }
 0xa22   : > { %v6460_v24 = vpop.f32.mrf.mxu0  ;;  %v6688_v10 = vpop.f32.mrf.mxu2 }
 0xa23   : > { %8610 = vmatmul.msk.bf16.vlgmr.msra.gmra.mxu0 %vm2172_vm11, %v8609_v29 }
 0xa26   : > { %v6561_v63 = vpop.f32.mrf.mxu3 }
 0xa27   : > { %v6567_v41 = vadd.f32 %v6561_v63, %v6464_v53 }
 0xa29   : > { %v6694_v5 = vadd.f32 %v6688_v10, %v6567_v41 }
 0xa2a   : > { %v6662_v3 = vpop.f32.mrf.mxu0  ;;  %v6690_v62 = vpop.f32.mrf.mxu2 }
 0xa2b   : > { %v6692_v28 = vadd.f32 %v6662_v3, %v6565_v54  ;;  %v7069_v54 = vld [vmem:[%s8955_s11 + $0x18] sm:$0x3] }
 0xa2e   : > { %v6563_v20 = vpop.f32.mrf.mxu3 }
 0xa32   : > { %v6664_v19 = vpop.f32.mrf.mxu0 }
 0xa4e   : > { %v6753_v57 = vpop.f32.mrf.mxu3 }
 0xa4f   : > { %v6783_v23 = vadd.f32 %v6753_v57, %v6692_v28 }
 0xa55   : > { %v6779_v56 = vpop.f32.mrf.mxu1 }
 0xa56   : > { %v6785_v6 = vadd.f32 %v6779_v56, %v6694_v5  ;;  %v6766_v22 = vpop.f32.mrf.mxu0  ;;  %v6844_v25 = vpop.f32.mrf.mxu2 }
 0xa57   : > { %v6784_v2 = vadd.f32 %v6766_v22, %v6693_v17  ;;  %v6755_v27 = vpop.f32.mrf.mxu3  ;;  %v6874_v11 = vadd.f32 %v6844_v25, %v6783_v23 }
 0xa5d   : > { %v6781_v45 = vpop.f32.mrf.mxu1 }
 0xa5e   : > { %v6768_v48 = vpop.f32.mrf.mxu0  ;;  %v6846_v30 = vpop.f32.mrf.mxu2 }
 0xa6d   : > { %v6870_v37 = vpop.f32.mrf.mxu0 }
 0xa6e   : > { %v6876_v55 = vadd.f32 %v6870_v37, %v6785_v6 }
 0xa74   : > { %v6857_v40 = vpop.f32.mrf.mxu3 }
 0xa75   : > { %v6872_v44 = vpop.f32.mrf.mxu0  ;;  %v6875_v29 = vadd.f32 %v6857_v40, %v6784_v2 }
 0xa7c   : > { %v6859_v16 = vpop.f32.mrf.mxu3 }
 0xa80   : > { %v6948_v38 = vpop.f32.mrf.mxu2  ;;  %v6935_v50 = vpop.f32.mrf.mxu1 }
 0xa81   : > { %v6966_v39 = vadd.f32 %v6948_v38, %v6875_v29  ;;  %v6965_v8 = vadd.f32 %v6935_v50, %v6874_v11 }
 0xa84   : > { %v6961_v0 = vpop.f32.mrf.mxu3 }
 0xa85   : > { %v6967_v14 = vadd.f32 %v6961_v0, %v6876_v55 }
 0xa88   : > { %v6950_v7 = vpop.f32.mrf.mxu2  ;;  %v6937_v31 = vpop.f32.mrf.mxu1 }
 0xa8c   : > { %v6963_v59 = vpop.f32.mrf.mxu3 }
 0xa93   : > { %v7052_v9 = vpop.f32.mrf.mxu2 }
 0xa94   : > { %v7058_v61 = vadd.f32 %v7052_v9, %v6967_v14 }
 0xa96   : > { %v7066_v4 = vadd.f32 %v7062_v13, %v7058_v61 }
 0xa98   : > { %v7072_v21 = vadd.f32 %v7069_v54, %v7066_v4 }
 0xa9a   : > { %v7077_v53 = vrot.slane %v7072_v21, 4 }
 0xa9b   : > { %v7054_v34 = vpop.f32.mrf.mxu2 }
 0xa9c   : > { %v7039_v46 = vpop.f32.mrf.mxu1 }
 0xa9d   : > { %v7057_v33 = vadd.f32 %v7039_v46, %v6966_v39 }
 0xa9f   : > { %v7065_v60 = vadd.f32 %v7062_v13, %v7057_v33 }
 0xaa0   : > { %v7026_v18 = vpop.f32.mrf.mxu0 }
 0xaa1   : > { %v7071_v49 = vadd.f32 %v7068_v58, %v7065_v60  ;;  %v7056_v35 = vadd.f32 %v7026_v18, %v6965_v8 }
 0xaa3   : > { %v7064_v1 = vadd.f32 %v7062_v13, %v7056_v35  ;;  %v7076_v15 = vrot.slane %v7071_v49, 6 }
 0xaa4   : > { %v7041_v51 = vpop.f32.mrf.mxu1 }
 0xaa5   : > { %v7070_v47 = vadd.f32 %v7067_v12, %v7064_v1 }
 0xaa7   : > { %v7079_v26 = vsel %vm7078_vm12, %v7070_v47, %v7076_v15 }
 0xaa8   : > { %v7080_v52 = vsel %vm422_vm2, %v7079_v26, %v7077_v53  ;;  %v7028_v43 = vpop.f32.mrf.mxu0 }
 0xaa9   : > { %7086 = vst.msk [vmem:[%s8960_s14] sm:$0x3f] %vm7085_vm0, %v7080_v52 }
 0xaaa PF: > { %s18_s27 = sadd.s32 1, %s8875_s27  }
 0xaab   : > { %p15_p5 = scmp.ge.s32.totalorder %s18_s27, 4  }
 0xaad   :  { %17 = sbr.rel (!%p15_p5) target bundleno = 1 (0x1), region = 136 }

</bundles_post_ra>
